<compile_context>
chip_gen: v7x
topology: tpu7x:2x2x1
jax: 0.10.0
libtpu: 0.0.40
codegen_flags: <defaults>
</compile_context>

<pallas_src>
import functools

import jax
import jax.numpy as jnp
from jax.experimental import pallas as pl
from jax.experimental.pallas import tpu as pltpu


def _round_up(x, m):
    return (x + m - 1) // m * m


# ------------------------------------------------------------------
# Pallas kernel 1: single-shot matmul (K collapsed) + bias + optional ReLU.
# Used for every conv via im2col.  A/B are bf16, accumulation is f32.
# ------------------------------------------------------------------
def _matmul_bias_kernel(a_ref, b_ref, bias_ref, o_ref, *, relu):
    acc = jnp.dot(a_ref[...], b_ref[...], preferred_element_type=jnp.float32)
    acc = acc + bias_ref[...]
    if relu:
        acc = jnp.maximum(acc, 0.0)
    o_ref[...] = acc.astype(o_ref.dtype)


def matmul_bias(a, b, bias, relu=False, tm=512):
    # a: (M, K), b: (K, N), bias: (N,).  K and N stay un-padded (full-dim
    # blocks); ragged M is masked by Pallas on the boundary block.
    M, K = a.shape
    _, N = b.shape
    tm = min(tm, _round_up(M, 8))
    grid = (pl.cdiv(M, tm),)
    return pl.pallas_call(
        functools.partial(_matmul_bias_kernel, relu=relu),
        out_shape=jax.ShapeDtypeStruct((M, N), jnp.float32),
        grid_spec=pltpu.PrefetchScalarGridSpec(
            num_scalar_prefetch=0,
            grid=grid,
            in_specs=[pl.BlockSpec((tm, K), lambda i: (i, 0)),
                      pl.BlockSpec((K, N), lambda i: (0, 0)),
                      pl.BlockSpec((1, N), lambda i: (0, 0))],
            out_specs=pl.BlockSpec((tm, N), lambda i: (i, 0))),
        compiler_params=pltpu.CompilerParams(
            dimension_semantics=("parallel",)),
    )(a, b, bias.reshape(1, N).astype(jnp.float32))


# ------------------------------------------------------------------
# Pallas kernel 2: fused MaxPool2d(2,2) + ReLU, lane-dense slabs.
# The four 2x2 taps arrive as (B*Ho, Wo*C) slabs (free minor-dim reshapes of
# XLA strided slices); the kernel is a single whole-array grid step.
# ------------------------------------------------------------------
def _pool_relu_kernel(a_ref, b_ref, c_ref, d_ref, o_ref):
    m = jnp.maximum(jnp.maximum(a_ref[...], b_ref[...]),
                    jnp.maximum(c_ref[...], d_ref[...]))
    o_ref[...] = jnp.maximum(m, 0.0)


def maxpool2x2_relu(x):
    # MaxPool2d(2, stride=2) (floor mode) followed by ReLU. x: (B,H,W,C) NHWC.
    B, H, W, C = x.shape
    Ho, Wo = H // 2, W // 2
    taps = [x[:, di:2 * Ho:2, dj:2 * Wo:2, :].reshape(B * Ho, Wo * C)
            for di in (0, 1) for dj in (0, 1)]
    R, L = B * Ho, Wo * C
    out = pl.pallas_call(
        _pool_relu_kernel,
        out_shape=jax.ShapeDtypeStruct((R, L), jnp.float32),
        grid_spec=pltpu.PrefetchScalarGridSpec(
            num_scalar_prefetch=0,
            grid=(1,),
            in_specs=[pl.BlockSpec((R, L), lambda i: (0, 0))] * 4,
            out_specs=pl.BlockSpec((R, L), lambda i: (0, 0))),
        compiler_params=pltpu.CompilerParams(
            dimension_semantics=("arbitrary",)),
    )(*taps)
    return out.reshape(B, Ho, Wo, C)


# ------------------------------------------------------------------
# Pallas kernel 3: fused training-mode BatchNorm2d + ReLU in ONE pallas_call.
# grid = (2 passes, M tiles): pass 0 accumulates per-channel sum / sum-sq in
# VMEM scratch, pass 1 computes scale/shift once and normalizes + ReLUs.
# ------------------------------------------------------------------
def _bn_relu_kernel(x_ref, g_ref, b_ref, o_ref,
                    s_acc, q_acc, sc_ref, sh_ref, *, count, eps):
    p = pl.program_id(0)
    i = pl.program_id(1)

    @pl.when((p == 0) & (i == 0))
    def _():
        s_acc[...] = jnp.zeros_like(s_acc)
        q_acc[...] = jnp.zeros_like(q_acc)

    @pl.when(p == 0)
    def _():
        xv = x_ref[...]
        s_acc[...] += jnp.sum(xv, axis=0, keepdims=True)
        q_acc[...] += jnp.sum(xv * xv, axis=0, keepdims=True)

    @pl.when((p == 1) & (i == 0))
    def _():
        inv_n = 1.0 / count
        mean = s_acc[...] * inv_n
        # biased variance; clamp to >= 0 against f32 cancellation
        var = jnp.maximum(q_acc[...] * inv_n - mean * mean, 0.0)
        sc = g_ref[...] * jax.lax.rsqrt(var + eps)
        sc_ref[...] = sc
        sh_ref[...] = b_ref[...] - mean * sc

    @pl.when(p == 1)
    def _():
        o_ref[...] = jnp.maximum(x_ref[...] * sc_ref[...] + sh_ref[...], 0.0)


def batchnorm_relu(x, gamma, beta, eps=1e-5):
    B, H, W, C = x.shape
    xf = x.reshape(-1, C)
    M = xf.shape[0]
    tm = 512
    if M % tm:  # never hit for this net (M = 8192 / 2048); zero rows are
        # harmless for the sums because count below uses the true M.
        xf = jnp.pad(xf, ((0, _round_up(M, tm) - M), (0, 0)))
    Mp = xf.shape[0]
    out = pl.pallas_call(
        functools.partial(_bn_relu_kernel, count=float(M), eps=eps),
        out_shape=jax.ShapeDtypeStruct((Mp, C), jnp.float32),
        grid_spec=pltpu.PrefetchScalarGridSpec(
            num_scalar_prefetch=0,
            grid=(2, Mp // tm),
            in_specs=[pl.BlockSpec((tm, C), lambda p, i: (i, 0)),
                      pl.BlockSpec((1, C), lambda p, i: (0, 0)),
                      pl.BlockSpec((1, C), lambda p, i: (0, 0))],
            out_specs=pl.BlockSpec((tm, C), lambda p, i: (i, 0)),
            scratch_shapes=[pltpu.VMEM((1, C), jnp.float32)] * 4),
        compiler_params=pltpu.CompilerParams(
            dimension_semantics=("arbitrary", "arbitrary")),
    )(xf, gamma.reshape(1, C), beta.reshape(1, C))
    return out[:M].reshape(B, H, W, C)


# ------------------------------------------------------------------
# Conv2d = im2col (XLA slice/stack, bf16) + Pallas single-K-block matmul
# TODO(synk): fully fusing im2col into the matmul kernel (shifted in-VMEM taps)
#             needs a lane-dense small-C layout trick; kept in XLA for now.
# ------------------------------------------------------------------
def conv2d(x, w_hwio, bias, stride=1, padding=0, relu=False):
    # x: (B, H, W, Cin) NHWC, w: (kh, kw, Cin, Cout) HWIO
    B, H, W, Cin = x.shape
    kh, kw, _, Cout = w_hwio.shape
    xb = x.astype(jnp.bfloat16)
    if padding:
        xb = jnp.pad(xb, ((0, 0), (padding, padding), (padding, padding), (0, 0)))
    Hp, Wp = xb.shape[1], xb.shape[2]
    Ho = (Hp - kh) // stride + 1
    Wo = (Wp - kw) // stride + 1
    taps = [xb[:, di:di + stride * Ho:stride, dj:dj + stride * Wo:stride, :]
            for di in range(kh) for dj in range(kw)]
    patches = jnp.stack(taps, axis=3).reshape(B * Ho * Wo, kh * kw * Cin)
    wm = w_hwio.reshape(kh * kw * Cin, Cout).astype(jnp.bfloat16)
    out = matmul_bias(patches, wm, bias, relu=relu)     # (M, Cout) f32
    return out.reshape(B, Ho, Wo, Cout)


# ------------------------------------------------------------------
# affine_grid / grid_sample (align_corners=False, bilinear, zero padding)
# TODO(synk): grid_sample's data-dependent per-pixel gather has no clean
#             Pallas TPU equivalent; it is implemented in plain JAX here.
# ------------------------------------------------------------------
def affine_grid(theta, H, W):
    xs = (2.0 * jnp.arange(W, dtype=jnp.float32) + 1.0) / W - 1.0
    ys = (2.0 * jnp.arange(H, dtype=jnp.float32) + 1.0) / H - 1.0
    xg, yg = jnp.meshgrid(xs, ys)                             # (H, W) each
    base = jnp.stack([xg, yg, jnp.ones_like(xg)], axis=-1)    # (H, W, 3)
    return jnp.einsum('hwk,bjk->bhwj', base, theta)           # (B, H, W, 2)


def grid_sample_bilinear(x, grid):
    B, H, W, C = x.shape
    gx, gy = grid[..., 0], grid[..., 1]
    ix = ((gx + 1.0) * W - 1.0) * 0.5
    iy = ((gy + 1.0) * H - 1.0) * 0.5
    ix0 = jnp.floor(ix)
    iy0 = jnp.floor(iy)
    ix1, iy1 = ix0 + 1.0, iy0 + 1.0
    wx1 = ix - ix0
    wx0 = 1.0 - wx1
    wy1 = iy - iy0
    wy0 = 1.0 - wy1
    flat = x.reshape(B, H * W, C)

    def gather(iyc, ixc):
        valid = ((ixc >= 0) & (ixc <= W - 1) & (iyc >= 0) & (iyc <= H - 1))
        ixc_c = jnp.clip(ixc, 0, W - 1).astype(jnp.int32)
        iyc_c = jnp.clip(iyc, 0, H - 1).astype(jnp.int32)
        idx = (iyc_c * W + ixc_c).reshape(B, H * W, 1)
        vals = jnp.take_along_axis(flat, idx, axis=1).reshape(B, H, W, C)
        return vals * valid[..., None].astype(jnp.float32)

    out = (gather(iy0, ix0) * (wy0 * wx0)[..., None]
           + gather(iy0, ix1) * (wy0 * wx1)[..., None]
           + gather(iy1, ix0) * (wy1 * wx0)[..., None]
           + gather(iy1, ix1) * (wy1 * wx1)[..., None])
    return out


# ------------------------------------------------------------------
# Full network
# ------------------------------------------------------------------
def stn(x, p):
    B, H, W, _ = x.shape
    h = conv2d(x, p['loc_w1'], p['loc_b1'], stride=1, padding=0)   # (B,122,122,5)
    h = maxpool2x2_relu(h)                                         # (B, 61, 61,5)
    h = conv2d(h, p['loc_w2'], p['loc_b2'], stride=1, padding=0)   # (B, 57, 57,5)
    h = maxpool2x2_relu(h)                                         # (B, 28, 28,5)
    # flatten in PyTorch's C,H,W order
    xs = jnp.transpose(h, (0, 3, 1, 2)).reshape(B, -1)             # (B, 3920)
    # fc_loc: tiny matmuls (2x3920 @ 3920x140, 2x140 @ 140x6) -> plain jnp.dot;
    # a Pallas tile for a 2x6 result would be >99% padding + launch overhead.
    h1 = jnp.maximum(jnp.dot(xs, p['fc1_w'].T) + p['fc1_b'], 0.0)  # (B, 140)
    theta = (jnp.dot(h1, p['fc2_w'].T) + p['fc2_b']).reshape(B, 2, 3)
    grid = affine_grid(theta, H, W)
    return grid_sample_bilinear(x, grid)


def net_forward(x, p):
    x = stn(x, p)
    x = conv2d(x, p['w1'], p['b1'], stride=2, padding=1)             # (B,64,64,32)
    x = batchnorm_relu(x, p['bn1_gamma'], p['bn1_beta'])
    x = conv2d(x, p['w2'], p['b2'], stride=2, padding=1)             # (B,32,32,32)
    x = batchnorm_relu(x, p['bn2_gamma'], p['bn2_beta'])
    x = conv2d(x, p['w3'], p['b3'], stride=1, padding=1, relu=True)  # (B,32,32,1)
    return x  # NHWC, equivalent to PyTorch (B, 1, 32, 32)


def init_params(key):
    ks = jax.random.split(key, 8)

    def conv_w(k, cout, cin, kh, kw):
        w = jax.random.normal(k, (cout, cin, kh, kw), jnp.float32) * 0.05
        return jnp.transpose(w, (2, 3, 1, 0))  # OIHW -> HWIO

    p = {}
    p['loc_w1'] = conv_w(ks[0], 5, 3, 7, 7)
    p['loc_b1'] = jax.random.normal(ks[1], (5,), jnp.float32) * 0.05
    p['loc_w2'] = conv_w(ks[2], 5, 5, 5, 5)
    p['loc_b2'] = jax.random.normal(ks[3], (5,), jnp.float32) * 0.05
    p['fc1_w'] = jax.random.normal(ks[4], (5 * 28, 5 * 28 * 28), jnp.float32) * 0.01
    p['fc1_b'] = jnp.zeros((5 * 28,), jnp.float32)
    # fc_loc[2]: weight zeroed, bias = identity affine (as in __init__)
    p['fc2_w'] = jnp.zeros((6, 5 * 28), jnp.float32)
    p['fc2_b'] = jnp.array([1., 0., 0., 0., 1., 0.], jnp.float32)
    p['w1'] = conv_w(ks[5], 32, 3, 3, 3)
    p['b1'] = jnp.zeros((32,), jnp.float32)
    p['w2'] = conv_w(ks[6], 32, 32, 3, 3)
    p['b2'] = jnp.zeros((32,), jnp.float32)
    p['w3'] = conv_w(ks[7], 1, 32, 3, 3)
    p['b3'] = jnp.zeros((1,), jnp.float32)
    # BatchNorm2d default init: gamma=1, beta=0
    p['bn1_gamma'] = jnp.ones((32,), jnp.float32)
    p['bn1_beta'] = jnp.zeros((32,), jnp.float32)
    p['bn2_gamma'] = jnp.ones((32,), jnp.float32)
    p['bn2_beta'] = jnp.zeros((32,), jnp.float32)
    return p


if __name__ == "__main__":
    key = jax.random.PRNGKey(0)
    kx, kp = jax.random.split(key)
    # NHWC input; PyTorch equivalent is x of shape (2, 3, 128, 128) NCHW.
    x = jax.random.normal(kx, (2, 128, 128, 3), jnp.float32)
    params = init_params(kp)
    out = jax.jit(net_forward)(x, params)
    out = jax.block_until_ready(out)
    assert out.shape == (2, 32, 32, 1), out.shape
    assert jnp.all(jnp.isfinite(out))
    print("KERNEL_OK")
</pallas_src>

<mosaic_0001>
module attributes {stable_mosaic.version = 11 : i64} {
  func.func private @main(%arg0: i32) attributes {dimension_semantics = [#tpu.dimension_semantics<core_parallel>], iteration_bounds = array<i64: 2>, tpu.core_type = #tpu.core_type<sc_scalar_subcore>, window_params = []} {
    return
  }
}

module attributes {stable_mosaic.version = 11 : i64} {
  func.func private @main(%arg0: i32) attributes {dimension_semantics = [#tpu.dimension_semantics<core_parallel>], iteration_bounds = array<i64: 2>, tpu.core_type = #tpu.core_type<sc_scalar_subcore>, window_params = []} {
    return
  }
}

module attributes {stable_mosaic.version = 11 : i64} {
  func.func @_matmul_bias_kernel(%arg0: i32, %arg1: memref<512x147xbf16, #tpu.memory_space<vmem>>, %arg2: memref<147x5xbf16, #tpu.memory_space<vmem>>, %arg3: memref<1x5xf32, #tpu.memory_space<vmem>>, %arg4: memref<512x5xf32, #tpu.memory_space<vmem>>) attributes {dimension_semantics = [#tpu.dimension_semantics<parallel>], iteration_bounds = array<i64: 59>, scalar_prefetch = 0 : i64, scratch_operands = 0 : i64, tpu.core_type = #tpu.core_type<tc>, window_params = [{transform_indices = @transform_0, window_bounds = array<i64: 512, 147>}, {pipeline_mode = #tpu.pipeline_mode<synchronous>, transform_indices = @transform_1, window_bounds = array<i64: 147, 5>}, {pipeline_mode = #tpu.pipeline_mode<synchronous>, transform_indices = @transform_2, window_bounds = array<i64: 1, 5>}, {transform_indices = @transform_3, window_bounds = array<i64: 512, 5>}]} {
    %c0 = arith.constant 0 : index
    %c0_0 = arith.constant 0 : index
    %0 = vector.load %arg1[%c0, %c0_0] : memref<512x147xbf16, #tpu.memory_space<vmem>>, vector<512x147xbf16>
    %c0_1 = arith.constant 0 : index
    %c0_2 = arith.constant 0 : index
    %1 = vector.load %arg2[%c0_1, %c0_2] : memref<147x5xbf16, #tpu.memory_space<vmem>>, vector<147x5xbf16>
    %cst = arith.constant dense<0.000000e+00> : vector<512x5xf32>
    %2 = tpu.matmul %0, %1, %cst {dimension_numbers = #tpu.dot_dimension_numbers<[1], [0], [0], [1], [0, 0, 1, 1], [], []>} : vector<512x147xbf16>, vector<147x5xbf16>, vector<512x5xf32> -> vector<512x5xf32>
    %c0_3 = arith.constant 0 : index
    %c0_4 = arith.constant 0 : index
    %3 = vector.load %arg3[%c0_3, %c0_4] : memref<1x5xf32, #tpu.memory_space<vmem>>, vector<1x5xf32>
    %4 = vector.broadcast %3 : vector<1x5xf32> to vector<512x5xf32>
    %5 = arith.addf %2, %4 : vector<512x5xf32>
    %c0_5 = arith.constant 0 : index
    %c0_6 = arith.constant 0 : index
    %6 = vector.load %arg4[%c0_5, %c0_6] : memref<512x5xf32, #tpu.memory_space<vmem>>, vector<512x5xf32>
    tpu.vector_store %arg4[%c0_5, %c0_6], %5 {strides = array<i32>} : memref<512x5xf32, #tpu.memory_space<vmem>>, vector<512x5xf32>,
    return
  }
  func.func @transform_0(%arg0: i32) -> (i32, i32) {
    %c0_i32 = arith.constant 0 : i32
    %c0_i32_0 = arith.constant 0 : i32
    return %arg0, %c0_i32 : i32, i32
  }
  func.func @transform_1(%arg0: i32) -> (i32, i32) {
    %c0_i32 = arith.constant 0 : i32
    %c0_i32_0 = arith.constant 0 : i32
    %c0_i32_1 = arith.constant 0 : i32
    return %c0_i32, %c0_i32_0 : i32, i32
  }
  func.func @transform_2(%arg0: i32) -> (i32, i32) {
    %c0_i32 = arith.constant 0 : i32
    %c0_i32_0 = arith.constant 0 : i32
    %c0_i32_1 = arith.constant 0 : i32
    return %c0_i32, %c0_i32_0 : i32, i32
  }
  func.func @transform_3(%arg0: i32) -> (i32, i32) {
    %c0_i32 = arith.constant 0 : i32
    %c0_i32_0 = arith.constant 0 : i32
    return %arg0, %c0_i32 : i32, i32
  }
}

module attributes {stable_mosaic.version = 11 : i64} {
  func.func @_pool_relu_kernel(%arg0: i32, %arg1: memref<122x305xf32, #tpu.memory_space<vmem>>, %arg2: memref<122x305xf32, #tpu.memory_space<vmem>>, %arg3: memref<122x305xf32, #tpu.memory_space<vmem>>, %arg4: memref<122x305xf32, #tpu.memory_space<vmem>>, %arg5: memref<122x305xf32, #tpu.memory_space<vmem>>) attributes {dimension_semantics = [#tpu.dimension_semantics<arbitrary>], iteration_bounds = array<i64: 1>, scalar_prefetch = 0 : i64, scratch_operands = 0 : i64, tpu.core_type = #tpu.core_type<tc>, window_params = [{pipeline_mode = #tpu.pipeline_mode<synchronous>, transform_indices = @transform_0, window_bounds = array<i64: 122, 305>}, {pipeline_mode = #tpu.pipeline_mode<synchronous>, transform_indices = @transform_1, window_bounds = array<i64: 122, 305>}, {pipeline_mode = #tpu.pipeline_mode<synchronous>, transform_indices = @transform_2, window_bounds = array<i64: 122, 305>}, {pipeline_mode = #tpu.pipeline_mode<synchronous>, transform_indices = @transform_3, window_bounds = array<i64: 122, 305>}, {pipeline_mode = #tpu.pipeline_mode<synchronous>, transform_indices = @transform_4, window_bounds = array<i64: 122, 305>}]} {
    %c0 = arith.constant 0 : index
    %c0_0 = arith.constant 0 : index
    %0 = vector.load %arg1[%c0, %c0_0] : memref<122x305xf32, #tpu.memory_space<vmem>>, vector<122x305xf32>
    %c0_1 = arith.constant 0 : index
    %c0_2 = arith.constant 0 : index
    %1 = vector.load %arg2[%c0_1, %c0_2] : memref<122x305xf32, #tpu.memory_space<vmem>>, vector<122x305xf32>
    %2 = arith.maximumf %0, %1 : vector<122x305xf32>
    %c0_3 = arith.constant 0 : index
    %c0_4 = arith.constant 0 : index
    %3 = vector.load %arg3[%c0_3, %c0_4] : memref<122x305xf32, #tpu.memory_space<vmem>>, vector<122x305xf32>
    %c0_5 = arith.constant 0 : index
    %c0_6 = arith.constant 0 : index
    %4 = vector.load %arg4[%c0_5, %c0_6] : memref<122x305xf32, #tpu.memory_space<vmem>>, vector<122x305xf32>
    %5 = arith.maximumf %3, %4 : vector<122x305xf32>
    %6 = arith.maximumf %2, %5 : vector<122x305xf32>
    %cst = arith.constant 0.000000e+00 : f32
    %7 = vector.broadcast %cst : f32 to vector<122x305xf32>
    %8 = arith.maximumf %6, %7 : vector<122x305xf32>
    %c0_7 = arith.constant 0 : index
    %c0_8 = arith.constant 0 : index
    %9 = vector.load %arg5[%c0_7, %c0_8] : memref<122x305xf32, #tpu.memory_space<vmem>>, vector<122x305xf32>
    tpu.vector_store %arg5[%c0_7, %c0_8], %8 {strides = array<i32>} : memref<122x305xf32, #tpu.memory_space<vmem>>, vector<122x305xf32>,
    return
  }
  func.func @transform_0(%arg0: i32) -> (i32, i32) {
    %c0_i32 = arith.constant 0 : i32
    %c0_i32_0 = arith.constant 0 : i32
    %c0_i32_1 = arith.constant 0 : i32
    return %c0_i32, %c0_i32_0 : i32, i32
  }
  func.func @transform_1(%arg0: i32) -> (i32, i32) {
    %c0_i32 = arith.constant 0 : i32
    %c0_i32_0 = arith.constant 0 : i32
    %c0_i32_1 = arith.constant 0 : i32
    return %c0_i32, %c0_i32_0 : i32, i32
  }
  func.func @transform_2(%arg0: i32) -> (i32, i32) {
    %c0_i32 = arith.constant 0 : i32
    %c0_i32_0 = arith.constant 0 : i32
    %c0_i32_1 = arith.constant 0 : i32
    return %c0_i32, %c0_i32_0 : i32, i32
  }
  func.func @transform_3(%arg0: i32) -> (i32, i32) {
    %c0_i32 = arith.constant 0 : i32
    %c0_i32_0 = arith.constant 0 : i32
    %c0_i32_1 = arith.constant 0 : i32
    return %c0_i32, %c0_i32_0 : i32, i32
  }
  func.func @transform_4(%arg0: i32) -> (i32, i32) {
    %c0_i32 = arith.constant 0 : i32
    %c0_i32_0 = arith.constant 0 : i32
    %c0_i32_1 = arith.constant 0 : i32
    return %c0_i32, %c0_i32_0 : i32, i32
  }
}

module attributes {stable_mosaic.version = 11 : i64} {
  func.func @_matmul_bias_kernel(%arg0: i32, %arg1: memref<512x125xbf16, #tpu.memory_space<vmem>>, %arg2: memref<125x5xbf16, #tpu.memory_space<vmem>>, %arg3: memref<1x5xf32, #tpu.memory_space<vmem>>, %arg4: memref<512x5xf32, #tpu.memory_space<vmem>>) attributes {dimension_semantics = [#tpu.dimension_semantics<parallel>], iteration_bounds = array<i64: 13>, scalar_prefetch = 0 : i64, scratch_operands = 0 : i64, tpu.core_type = #tpu.core_type<tc>, window_params = [{transform_indices = @transform_0, window_bounds = array<i64: 512, 125>}, {pipeline_mode = #tpu.pipeline_mode<synchronous>, transform_indices = @transform_1, window_bounds = array<i64: 125, 5>}, {pipeline_mode = #tpu.pipeline_mode<synchronous>, transform_indices = @transform_2, window_bounds = array<i64: 1, 5>}, {transform_indices = @transform_3, window_bounds = array<i64: 512, 5>}]} {
    %c0 = arith.constant 0 : index
    %c0_0 = arith.constant 0 : index
    %0 = vector.load %arg1[%c0, %c0_0] : memref<512x125xbf16, #tpu.memory_space<vmem>>, vector<512x125xbf16>
    %c0_1 = arith.constant 0 : index
    %c0_2 = arith.constant 0 : index
    %1 = vector.load %arg2[%c0_1, %c0_2] : memref<125x5xbf16, #tpu.memory_space<vmem>>, vector<125x5xbf16>
    %cst = arith.constant dense<0.000000e+00> : vector<512x5xf32>
    %2 = tpu.matmul %0, %1, %cst {dimension_numbers = #tpu.dot_dimension_numbers<[1], [0], [0], [1], [0, 0, 1, 1], [], []>} : vector<512x125xbf16>, vector<125x5xbf16>, vector<512x5xf32> -> vector<512x5xf32>
    %c0_3 = arith.constant 0 : index
    %c0_4 = arith.constant 0 : index
    %3 = vector.load %arg3[%c0_3, %c0_4] : memref<1x5xf32, #tpu.memory_space<vmem>>, vector<1x5xf32>
    %4 = vector.broadcast %3 : vector<1x5xf32> to vector<512x5xf32>
    %5 = arith.addf %2, %4 : vector<512x5xf32>
    %c0_5 = arith.constant 0 : index
    %c0_6 = arith.constant 0 : index
    %6 = vector.load %arg4[%c0_5, %c0_6] : memref<512x5xf32, #tpu.memory_space<vmem>>, vector<512x5xf32>
    tpu.vector_store %arg4[%c0_5, %c0_6], %5 {strides = array<i32>} : memref<512x5xf32, #tpu.memory_space<vmem>>, vector<512x5xf32>,
    return
  }
  func.func @transform_0(%arg0: i32) -> (i32, i32) {
    %c0_i32 = arith.constant 0 : i32
    %c0_i32_0 = arith.constant 0 : i32
    return %arg0, %c0_i32 : i32, i32
  }
  func.func @transform_1(%arg0: i32) -> (i32, i32) {
    %c0_i32 = arith.constant 0 : i32
    %c0_i32_0 = arith.constant 0 : i32
    %c0_i32_1 = arith.constant 0 : i32
    return %c0_i32, %c0_i32_0 : i32, i32
  }
  func.func @transform_2(%arg0: i32) -> (i32, i32) {
    %c0_i32 = arith.constant 0 : i32
    %c0_i32_0 = arith.constant 0 : i32
    %c0_i32_1 = arith.constant 0 : i32
    return %c0_i32, %c0_i32_0 : i32, i32
  }
  func.func @transform_3(%arg0: i32) -> (i32, i32) {
    %c0_i32 = arith.constant 0 : i32
    %c0_i32_0 = arith.constant 0 : i32
    return %arg0, %c0_i32 : i32, i32
  }
}

module attributes {stable_mosaic.version = 11 : i64} {
  func.func @_pool_relu_kernel(%arg0: i32, %arg1: memref<56x140xf32, #tpu.memory_space<vmem>>, %arg2: memref<56x140xf32, #tpu.memory_space<vmem>>, %arg3: memref<56x140xf32, #tpu.memory_space<vmem>>, %arg4: memref<56x140xf32, #tpu.memory_space<vmem>>, %arg5: memref<56x140xf32, #tpu.memory_space<vmem>>) attributes {dimension_semantics = [#tpu.dimension_semantics<arbitrary>], iteration_bounds = array<i64: 1>, scalar_prefetch = 0 : i64, scratch_operands = 0 : i64, tpu.core_type = #tpu.core_type<tc>, window_params = [{pipeline_mode = #tpu.pipeline_mode<synchronous>, transform_indices = @transform_0, window_bounds = array<i64: 56, 140>}, {pipeline_mode = #tpu.pipeline_mode<synchronous>, transform_indices = @transform_1, window_bounds = array<i64: 56, 140>}, {pipeline_mode = #tpu.pipeline_mode<synchronous>, transform_indices = @transform_2, window_bounds = array<i64: 56, 140>}, {pipeline_mode = #tpu.pipeline_mode<synchronous>, transform_indices = @transform_3, window_bounds = array<i64: 56, 140>}, {pipeline_mode = #tpu.pipeline_mode<synchronous>, transform_indices = @transform_4, window_bounds = array<i64: 56, 140>}]} {
    %c0 = arith.constant 0 : index
    %c0_0 = arith.constant 0 : index
    %0 = vector.load %arg1[%c0, %c0_0] : memref<56x140xf32, #tpu.memory_space<vmem>>, vector<56x140xf32>
    %c0_1 = arith.constant 0 : index
    %c0_2 = arith.constant 0 : index
    %1 = vector.load %arg2[%c0_1, %c0_2] : memref<56x140xf32, #tpu.memory_space<vmem>>, vector<56x140xf32>
    %2 = arith.maximumf %0, %1 : vector<56x140xf32>
    %c0_3 = arith.constant 0 : index
    %c0_4 = arith.constant 0 : index
    %3 = vector.load %arg3[%c0_3, %c0_4] : memref<56x140xf32, #tpu.memory_space<vmem>>, vector<56x140xf32>
    %c0_5 = arith.constant 0 : index
    %c0_6 = arith.constant 0 : index
    %4 = vector.load %arg4[%c0_5, %c0_6] : memref<56x140xf32, #tpu.memory_space<vmem>>, vector<56x140xf32>
    %5 = arith.maximumf %3, %4 : vector<56x140xf32>
    %6 = arith.maximumf %2, %5 : vector<56x140xf32>
    %cst = arith.constant 0.000000e+00 : f32
    %7 = vector.broadcast %cst : f32 to vector<56x140xf32>
    %8 = arith.maximumf %6, %7 : vector<56x140xf32>
    %c0_7 = arith.constant 0 : index
    %c0_8 = arith.constant 0 : index
    %9 = vector.load %arg5[%c0_7, %c0_8] : memref<56x140xf32, #tpu.memory_space<vmem>>, vector<56x140xf32>
    tpu.vector_store %arg5[%c0_7, %c0_8], %8 {strides = array<i32>} : memref<56x140xf32, #tpu.memory_space<vmem>>, vector<56x140xf32>,
    return
  }
  func.func @transform_0(%arg0: i32) -> (i32, i32) {
    %c0_i32 = arith.constant 0 : i32
    %c0_i32_0 = arith.constant 0 : i32
    %c0_i32_1 = arith.constant 0 : i32
    return %c0_i32, %c0_i32_0 : i32, i32
  }
  func.func @transform_1(%arg0: i32) -> (i32, i32) {
    %c0_i32 = arith.constant 0 : i32
    %c0_i32_0 = arith.constant 0 : i32
    %c0_i32_1 = arith.constant 0 : i32
    return %c0_i32, %c0_i32_0 : i32, i32
  }
  func.func @transform_2(%arg0: i32) -> (i32, i32) {
    %c0_i32 = arith.constant 0 : i32
    %c0_i32_0 = arith.constant 0 : i32
    %c0_i32_1 = arith.constant 0 : i32
    return %c0_i32, %c0_i32_0 : i32, i32
  }
  func.func @transform_3(%arg0: i32) -> (i32, i32) {
    %c0_i32 = arith.constant 0 : i32
    %c0_i32_0 = arith.constant 0 : i32
    %c0_i32_1 = arith.constant 0 : i32
    return %c0_i32, %c0_i32_0 : i32, i32
  }
  func.func @transform_4(%arg0: i32) -> (i32, i32) {
    %c0_i32 = arith.constant 0 : i32
    %c0_i32_0 = arith.constant 0 : i32
    %c0_i32_1 = arith.constant 0 : i32
    return %c0_i32, %c0_i32_0 : i32, i32
  }
}

module attributes {stable_mosaic.version = 11 : i64} {
  func.func @_matmul_bias_kernel(%arg0: i32, %arg1: memref<512x27xbf16, #tpu.memory_space<vmem>>, %arg2: memref<27x32xbf16, #tpu.memory_space<vmem>>, %arg3: memref<1x32xf32, #tpu.memory_space<vmem>>, %arg4: memref<512x32xf32, #tpu.memory_space<vmem>>) attributes {dimension_semantics = [#tpu.dimension_semantics<parallel>], iteration_bounds = array<i64: 16>, scalar_prefetch = 0 : i64, scratch_operands = 0 : i64, tpu.core_type = #tpu.core_type<tc>, window_params = [{transform_indices = @transform_0, window_bounds = array<i64: 512, 27>}, {pipeline_mode = #tpu.pipeline_mode<synchronous>, transform_indices = @transform_1, window_bounds = array<i64: 27, 32>}, {pipeline_mode = #tpu.pipeline_mode<synchronous>, transform_indices = @transform_2, window_bounds = array<i64: 1, 32>}, {transform_indices = @transform_3, window_bounds = array<i64: 512, 32>}]} {
    %c0 = arith.constant 0 : index
    %c0_0 = arith.constant 0 : index
    %0 = vector.load %arg1[%c0, %c0_0] : memref<512x27xbf16, #tpu.memory_space<vmem>>, vector<512x27xbf16>
    %c0_1 = arith.constant 0 : index
    %c0_2 = arith.constant 0 : index
    %1 = vector.load %arg2[%c0_1, %c0_2] : memref<27x32xbf16, #tpu.memory_space<vmem>>, vector<27x32xbf16>
    %cst = arith.constant dense<0.000000e+00> : vector<512x32xf32>
    %2 = tpu.matmul %0, %1, %cst {dimension_numbers = #tpu.dot_dimension_numbers<[1], [0], [0], [1], [0, 0, 1, 1], [], []>} : vector<512x27xbf16>, vector<27x32xbf16>, vector<512x32xf32> -> vector<512x32xf32>
    %c0_3 = arith.constant 0 : index
    %c0_4 = arith.constant 0 : index
    %3 = vector.load %arg3[%c0_3, %c0_4] : memref<1x32xf32, #tpu.memory_space<vmem>>, vector<1x32xf32>
    %4 = vector.broadcast %3 : vector<1x32xf32> to vector<512x32xf32>
    %5 = arith.addf %2, %4 : vector<512x32xf32>
    %c0_5 = arith.constant 0 : index
    %c0_6 = arith.constant 0 : index
    %6 = vector.load %arg4[%c0_5, %c0_6] : memref<512x32xf32, #tpu.memory_space<vmem>>, vector<512x32xf32>
    tpu.vector_store %arg4[%c0_5, %c0_6], %5 {strides = array<i32>} : memref<512x32xf32, #tpu.memory_space<vmem>>, vector<512x32xf32>,
    return
  }
  func.func @transform_0(%arg0: i32) -> (i32, i32) {
    %c0_i32 = arith.constant 0 : i32
    %c0_i32_0 = arith.constant 0 : i32
    return %arg0, %c0_i32 : i32, i32
  }
  func.func @transform_1(%arg0: i32) -> (i32, i32) {
    %c0_i32 = arith.constant 0 : i32
    %c0_i32_0 = arith.constant 0 : i32
    %c0_i32_1 = arith.constant 0 : i32
    return %c0_i32, %c0_i32_0 : i32, i32
  }
  func.func @transform_2(%arg0: i32) -> (i32, i32) {
    %c0_i32 = arith.constant 0 : i32
    %c0_i32_0 = arith.constant 0 : i32
    %c0_i32_1 = arith.constant 0 : i32
    return %c0_i32, %c0_i32_0 : i32, i32
  }
  func.func @transform_3(%arg0: i32) -> (i32, i32) {
    %c0_i32 = arith.constant 0 : i32
    %c0_i32_0 = arith.constant 0 : i32
    return %arg0, %c0_i32 : i32, i32
  }
}

module attributes {stable_mosaic.version = 11 : i64} {
  func.func @_bn_relu_kernel(%arg0: i32, %arg1: i32, %arg2: memref<512x32xf32, #tpu.memory_space<vmem>>, %arg3: memref<1x32xf32, #tpu.memory_space<vmem>>, %arg4: memref<1x32xf32, #tpu.memory_space<vmem>>, %arg5: memref<512x32xf32, #tpu.memory_space<vmem>>, %arg6: memref<1x32xf32, #tpu.memory_space<vmem>>, %arg7: memref<1x32xf32, #tpu.memory_space<vmem>>, %arg8: memref<1x32xf32, #tpu.memory_space<vmem>>, %arg9: memref<1x32xf32, #tpu.memory_space<vmem>>) attributes {dimension_semantics = [#tpu.dimension_semantics<arbitrary>, #tpu.dimension_semantics<arbitrary>], iteration_bounds = array<i64: 2, 16>, scalar_prefetch = 0 : i64, scratch_operands = 4 : i64, tpu.core_type = #tpu.core_type<tc>, window_params = [{transform_indices = @transform_0, window_bounds = array<i64: 512, 32>}, {pipeline_mode = #tpu.pipeline_mode<synchronous>, transform_indices = @transform_1, window_bounds = array<i64: 1, 32>}, {pipeline_mode = #tpu.pipeline_mode<synchronous>, transform_indices = @transform_2, window_bounds = array<i64: 1, 32>}, {transform_indices = @transform_3, window_bounds = array<i64: 512, 32>}]} {
    %c0_i32 = arith.constant 0 : i32
    %0 = arith.cmpi eq, %arg0, %c0_i32 : i32
    %c0_i32_0 = arith.constant 0 : i32
    %1 = arith.cmpi eq, %arg1, %c0_i32_0 : i32
    %2 = arith.andi %0, %1 : i1
    %3 = arith.extui %2 : i1 to i32
    %c0_i32_1 = arith.constant 0 : i32
    %4 = arith.cmpi ne, %3, %c0_i32_1 : i32
    scf.if %4 {
      %cst = arith.constant 0.000000e+00 : f32
      %16 = vector.broadcast %cst : f32 to vector<1x32xf32>
      %c0 = arith.constant 0 : index
      %c0_8 = arith.constant 0 : index
      %17 = vector.load %arg6[%c0, %c0_8] : memref<1x32xf32, #tpu.memory_space<vmem>>, vector<1x32xf32>
      tpu.vector_store %arg6[%c0, %c0_8], %16 {strides = array<i32>} : memref<1x32xf32, #tpu.memory_space<vmem>>, vector<1x32xf32>,
      %cst_9 = arith.constant 0.000000e+00 : f32
      %18 = vector.broadcast %cst_9 : f32 to vector<1x32xf32>
      %c0_10 = arith.constant 0 : index
      %c0_11 = arith.constant 0 : index
      %19 = vector.load %arg7[%c0_10, %c0_11] : memref<1x32xf32, #tpu.memory_space<vmem>>, vector<1x32xf32>
      tpu.vector_store %arg7[%c0_10, %c0_11], %18 {strides = array<i32>} : memref<1x32xf32, #tpu.memory_space<vmem>>, vector<1x32xf32>,
    } else {
    }
    %c0_i32_2 = arith.constant 0 : i32
    %5 = arith.cmpi eq, %arg0, %c0_i32_2 : i32
    %6 = arith.extui %5 : i1 to i32
    %c0_i32_3 = arith.constant 0 : i32
    %7 = arith.cmpi ne, %6, %c0_i32_3 : i32
    scf.if %7 {
      %c0 = arith.constant 0 : index
      %c0_8 = arith.constant 0 : index
      %16 = vector.load %arg2[%c0, %c0_8] : memref<512x32xf32, #tpu.memory_space<vmem>>, vector<512x32xf32>
      %c0_9 = arith.constant 0 : index
      %c0_10 = arith.constant 0 : index
      %17 = vector.load %arg6[%c0_9, %c0_10] : memref<1x32xf32, #tpu.memory_space<vmem>>, vector<1x32xf32>
      %cst = arith.constant dense<0.000000e+00> : vector<32xf32>
      %18 = vector.multi_reduction <add>, %16, %cst [0] : vector<512x32xf32> to vector<32xf32>
      %19 = vector.shape_cast %18 : vector<32xf32> to vector<1x32xf32>
      %20 = arith.addf %17, %19 : vector<1x32xf32>
      %c0_11 = arith.constant 0 : index
      %c0_12 = arith.constant 0 : index
      %21 = vector.load %arg6[%c0_11, %c0_12] : memref<1x32xf32, #tpu.memory_space<vmem>>, vector<1x32xf32>
      tpu.vector_store %arg6[%c0_11, %c0_12], %20 {strides = array<i32>} : memref<1x32xf32, #tpu.memory_space<vmem>>, vector<1x32xf32>,
      %c0_13 = arith.constant 0 : index
      %c0_14 = arith.constant 0 : index
      %22 = vector.load %arg7[%c0_13, %c0_14] : memref<1x32xf32, #tpu.memory_space<vmem>>, vector<1x32xf32>
      %23 = arith.mulf %16, %16 : vector<512x32xf32>
      %cst_15 = arith.constant dense<0.000000e+00> : vector<32xf32>
      %24 = vector.multi_reduction <add>, %23, %cst_15 [0] : vector<512x32xf32> to vector<32xf32>
      %25 = vector.shape_cast %24 : vector<32xf32> to vector<1x32xf32>
      %26 = arith.addf %22, %25 : vector<1x32xf32>
      %c0_16 = arith.constant 0 : index
      %c0_17 = arith.constant 0 : index
      %27 = vector.load %arg7[%c0_16, %c0_17] : memref<1x32xf32, #tpu.memory_space<vmem>>, vector<1x32xf32>
      tpu.vector_store %arg7[%c0_16, %c0_17], %26 {strides = array<i32>} : memref<1x32xf32, #tpu.memory_space<vmem>>, vector<1x32xf32>,
    } else {
    }
    %c1_i32 = arith.constant 1 : i32
    %8 = arith.cmpi eq, %arg0, %c1_i32 : i32
    %c0_i32_4 = arith.constant 0 : i32
    %9 = arith.cmpi eq, %arg1, %c0_i32_4 : i32
    %10 = arith.andi %8, %9 : i1
    %11 = arith.extui %10 : i1 to i32
    %c0_i32_5 = arith.constant 0 : i32
    %12 = arith.cmpi ne, %11, %c0_i32_5 : i32
    scf.if %12 {
      %c0 = arith.constant 0 : index
      %c0_8 = arith.constant 0 : index
      %16 = vector.load %arg6[%c0, %c0_8] : memref<1x32xf32, #tpu.memory_space<vmem>>, vector<1x32xf32>
      %cst = arith.constant 1.22070313E-4 : f32
      %17 = vector.broadcast %cst : f32 to vector<1x32xf32>
      %18 = arith.mulf %16, %17 : vector<1x32xf32>
      %c0_9 = arith.constant 0 : index
      %c0_10 = arith.constant 0 : index
      %19 = vector.load %arg7[%c0_9, %c0_10] : memref<1x32xf32, #tpu.memory_space<vmem>>, vector<1x32xf32>
      %cst_11 = arith.constant 1.22070313E-4 : f32
      %20 = vector.broadcast %cst_11 : f32 to vector<1x32xf32>
      %21 = arith.mulf %19, %20 : vector<1x32xf32>
      %22 = arith.mulf %18, %18 : vector<1x32xf32>
      %23 = arith.subf %21, %22 : vector<1x32xf32>
      %cst_12 = arith.constant 0.000000e+00 : f32
      %24 = vector.broadcast %cst_12 : f32 to vector<1x32xf32>
      %25 = arith.maximumf %23, %24 : vector<1x32xf32>
      %c0_13 = arith.constant 0 : index
      %c0_14 = arith.constant 0 : index
      %26 = vector.load %arg3[%c0_13, %c0_14] : memref<1x32xf32, #tpu.memory_space<vmem>>, vector<1x32xf32>
      %cst_15 = arith.constant 9.99999974E-6 : f32
      %27 = vector.broadcast %cst_15 : f32 to vector<1x32xf32>
      %28 = arith.addf %25, %27 : vector<1x32xf32>
      %29 = math.rsqrt %28 : vector<1x32xf32>
      %30 = arith.mulf %26, %29 : vector<1x32xf32>
      %c0_16 = arith.constant 0 : index
      %c0_17 = arith.constant 0 : index
      %31 = vector.load %arg8[%c0_16, %c0_17] : memref<1x32xf32, #tpu.memory_space<vmem>>, vector<1x32xf32>
      tpu.vector_store %arg8[%c0_16, %c0_17], %30 {strides = array<i32>} : memref<1x32xf32, #tpu.memory_space<vmem>>, vector<1x32xf32>,
      %c0_18 = arith.constant 0 : index
      %c0_19 = arith.constant 0 : index
      %32 = vector.load %arg4[%c0_18, %c0_19] : memref<1x32xf32, #tpu.memory_space<vmem>>, vector<1x32xf32>
      %33 = arith.mulf %18, %30 : vector<1x32xf32>
      %34 = arith.subf %32, %33 : vector<1x32xf32>
      %c0_20 = arith.constant 0 : index
      %c0_21 = arith.constant 0 : index
      %35 = vector.load %arg9[%c0_20, %c0_21] : memref<1x32xf32, #tpu.memory_space<vmem>>, vector<1x32xf32>
      tpu.vector_store %arg9[%c0_20, %c0_21], %34 {strides = array<i32>} : memref<1x32xf32, #tpu.memory_space<vmem>>, vector<1x32xf32>,
    } else {
    }
    %c1_i32_6 = arith.constant 1 : i32
    %13 = arith.cmpi eq, %arg0, %c1_i32_6 : i32
    %14 = arith.extui %13 : i1 to i32
    %c0_i32_7 = arith.constant 0 : i32
    %15 = arith.cmpi ne, %14, %c0_i32_7 : i32
    scf.if %15 {
      %c0 = arith.constant 0 : index
      %c0_8 = arith.constant 0 : index
      %16 = vector.load %arg2[%c0, %c0_8] : memref<512x32xf32, #tpu.memory_space<vmem>>, vector<512x32xf32>
      %c0_9 = arith.constant 0 : index
      %c0_10 = arith.constant 0 : index
      %17 = vector.load %arg8[%c0_9, %c0_10] : memref<1x32xf32, #tpu.memory_space<vmem>>, vector<1x32xf32>
      %18 = vector.broadcast %17 : vector<1x32xf32> to vector<512x32xf32>
      %19 = arith.mulf %16, %18 : vector<512x32xf32>
      %c0_11 = arith.constant 0 : index
      %c0_12 = arith.constant 0 : index
      %20 = vector.load %arg9[%c0_11, %c0_12] : memref<1x32xf32, #tpu.memory_space<vmem>>, vector<1x32xf32>
      %21 = vector.broadcast %20 : vector<1x32xf32> to vector<512x32xf32>
      %22 = arith.addf %19, %21 : vector<512x32xf32>
      %cst = arith.constant 0.000000e+00 : f32
      %23 = vector.broadcast %cst : f32 to vector<512x32xf32>
      %24 = arith.maximumf %22, %23 : vector<512x32xf32>
      %c0_13 = arith.constant 0 : index
      %c0_14 = arith.constant 0 : index
      %25 = vector.load %arg5[%c0_13, %c0_14] : memref<512x32xf32, #tpu.memory_space<vmem>>, vector<512x32xf32>
      tpu.vector_store %arg5[%c0_13, %c0_14], %24 {strides = array<i32>} : memref<512x32xf32, #tpu.memory_space<vmem>>, vector<512x32xf32>,
    } else {
    }
    return
  }
  func.func @transform_0(%arg0: i32, %arg1: i32) -> (i32, i32) {
    %c0_i32 = arith.constant 0 : i32
    %c0_i32_0 = arith.constant 0 : i32
    return %arg1, %c0_i32 : i32, i32
  }
  func.func @transform_1(%arg0: i32, %arg1: i32) -> (i32, i32) {
    %c0_i32 = arith.constant 0 : i32
    %c0_i32_0 = arith.constant 0 : i32
    %c0_i32_1 = arith.constant 0 : i32
    return %c0_i32, %c0_i32_0 : i32, i32
  }
  func.func @transform_2(%arg0: i32, %arg1: i32) -> (i32, i32) {
    %c0_i32 = arith.constant 0 : i32
    %c0_i32_0 = arith.constant 0 : i32
    %c0_i32_1 = arith.constant 0 : i32
    return %c0_i32, %c0_i32_0 : i32, i32
  }
  func.func @transform_3(%arg0: i32, %arg1: i32) -> (i32, i32) {
    %c0_i32 = arith.constant 0 : i32
    %c0_i32_0 = arith.constant 0 : i32
    return %arg1, %c0_i32 : i32, i32
  }
}

module attributes {stable_mosaic.version = 11 : i64} {
  func.func @_matmul_bias_kernel(%arg0: i32, %arg1: memref<512x288xbf16, #tpu.memory_space<vmem>>, %arg2: memref<288x32xbf16, #tpu.memory_space<vmem>>, %arg3: memref<1x32xf32, #tpu.memory_space<vmem>>, %arg4: memref<512x32xf32, #tpu.memory_space<vmem>>) attributes {dimension_semantics = [#tpu.dimension_semantics<parallel>], iteration_bounds = array<i64: 4>, scalar_prefetch = 0 : i64, scratch_operands = 0 : i64, tpu.core_type = #tpu.core_type<tc>, window_params = [{transform_indices = @transform_0, window_bounds = array<i64: 512, 288>}, {pipeline_mode = #tpu.pipeline_mode<synchronous>, transform_indices = @transform_1, window_bounds = array<i64: 288, 32>}, {pipeline_mode = #tpu.pipeline_mode<synchronous>, transform_indices = @transform_2, window_bounds = array<i64: 1, 32>}, {transform_indices = @transform_3, window_bounds = array<i64: 512, 32>}]} {
    %c0 = arith.constant 0 : index
    %c0_0 = arith.constant 0 : index
    %0 = vector.load %arg1[%c0, %c0_0] : memref<512x288xbf16, #tpu.memory_space<vmem>>, vector<512x288xbf16>
    %c0_1 = arith.constant 0 : index
    %c0_2 = arith.constant 0 : index
    %1 = vector.load %arg2[%c0_1, %c0_2] : memref<288x32xbf16, #tpu.memory_space<vmem>>, vector<288x32xbf16>
    %cst = arith.constant dense<0.000000e+00> : vector<512x32xf32>
    %2 = tpu.matmul %0, %1, %cst {dimension_numbers = #tpu.dot_dimension_numbers<[1], [0], [0], [1], [0, 0, 1, 1], [], []>} : vector<512x288xbf16>, vector<288x32xbf16>, vector<512x32xf32> -> vector<512x32xf32>
    %c0_3 = arith.constant 0 : index
    %c0_4 = arith.constant 0 : index
    %3 = vector.load %arg3[%c0_3, %c0_4] : memref<1x32xf32, #tpu.memory_space<vmem>>, vector<1x32xf32>
    %4 = vector.broadcast %3 : vector<1x32xf32> to vector<512x32xf32>
    %5 = arith.addf %2, %4 : vector<512x32xf32>
    %c0_5 = arith.constant 0 : index
    %c0_6 = arith.constant 0 : index
    %6 = vector.load %arg4[%c0_5, %c0_6] : memref<512x32xf32, #tpu.memory_space<vmem>>, vector<512x32xf32>
    tpu.vector_store %arg4[%c0_5, %c0_6], %5 {strides = array<i32>} : memref<512x32xf32, #tpu.memory_space<vmem>>, vector<512x32xf32>,
    return
  }
  func.func @transform_0(%arg0: i32) -> (i32, i32) {
    %c0_i32 = arith.constant 0 : i32
    %c0_i32_0 = arith.constant 0 : i32
    return %arg0, %c0_i32 : i32, i32
  }
  func.func @transform_1(%arg0: i32) -> (i32, i32) {
    %c0_i32 = arith.constant 0 : i32
    %c0_i32_0 = arith.constant 0 : i32
    %c0_i32_1 = arith.constant 0 : i32
    return %c0_i32, %c0_i32_0 : i32, i32
  }
  func.func @transform_2(%arg0: i32) -> (i32, i32) {
    %c0_i32 = arith.constant 0 : i32
    %c0_i32_0 = arith.constant 0 : i32
    %c0_i32_1 = arith.constant 0 : i32
    return %c0_i32, %c0_i32_0 : i32, i32
  }
  func.func @transform_3(%arg0: i32) -> (i32, i32) {
    %c0_i32 = arith.constant 0 : i32
    %c0_i32_0 = arith.constant 0 : i32
    return %arg0, %c0_i32 : i32, i32
  }
}

module attributes {stable_mosaic.version = 11 : i64} {
  func.func @_bn_relu_kernel(%arg0: i32, %arg1: i32, %arg2: memref<512x32xf32, #tpu.memory_space<vmem>>, %arg3: memref<1x32xf32, #tpu.memory_space<vmem>>, %arg4: memref<1x32xf32, #tpu.memory_space<vmem>>, %arg5: memref<512x32xf32, #tpu.memory_space<vmem>>, %arg6: memref<1x32xf32, #tpu.memory_space<vmem>>, %arg7: memref<1x32xf32, #tpu.memory_space<vmem>>, %arg8: memref<1x32xf32, #tpu.memory_space<vmem>>, %arg9: memref<1x32xf32, #tpu.memory_space<vmem>>) attributes {dimension_semantics = [#tpu.dimension_semantics<arbitrary>, #tpu.dimension_semantics<arbitrary>], iteration_bounds = array<i64: 2, 4>, scalar_prefetch = 0 : i64, scratch_operands = 4 : i64, tpu.core_type = #tpu.core_type<tc>, window_params = [{transform_indices = @transform_0, window_bounds = array<i64: 512, 32>}, {pipeline_mode = #tpu.pipeline_mode<synchronous>, transform_indices = @transform_1, window_bounds = array<i64: 1, 32>}, {pipeline_mode = #tpu.pipeline_mode<synchronous>, transform_indices = @transform_2, window_bounds = array<i64: 1, 32>}, {transform_indices = @transform_3, window_bounds = array<i64: 512, 32>}]} {
    %c0_i32 = arith.constant 0 : i32
    %0 = arith.cmpi eq, %arg0, %c0_i32 : i32
    %c0_i32_0 = arith.constant 0 : i32
    %1 = arith.cmpi eq, %arg1, %c0_i32_0 : i32
    %2 = arith.andi %0, %1 : i1
    %3 = arith.extui %2 : i1 to i32
    %c0_i32_1 = arith.constant 0 : i32
    %4 = arith.cmpi ne, %3, %c0_i32_1 : i32
    scf.if %4 {
      %cst = arith.constant 0.000000e+00 : f32
      %16 = vector.broadcast %cst : f32 to vector<1x32xf32>
      %c0 = arith.constant 0 : index
      %c0_8 = arith.constant 0 : index
      %17 = vector.load %arg6[%c0, %c0_8] : memref<1x32xf32, #tpu.memory_space<vmem>>, vector<1x32xf32>
      tpu.vector_store %arg6[%c0, %c0_8], %16 {strides = array<i32>} : memref<1x32xf32, #tpu.memory_space<vmem>>, vector<1x32xf32>,
      %cst_9 = arith.constant 0.000000e+00 : f32
      %18 = vector.broadcast %cst_9 : f32 to vector<1x32xf32>
      %c0_10 = arith.constant 0 : index
      %c0_11 = arith.constant 0 : index
      %19 = vector.load %arg7[%c0_10, %c0_11] : memref<1x32xf32, #tpu.memory_space<vmem>>, vector<1x32xf32>
      tpu.vector_store %arg7[%c0_10, %c0_11], %18 {strides = array<i32>} : memref<1x32xf32, #tpu.memory_space<vmem>>, vector<1x32xf32>,
    } else {
    }
    %c0_i32_2 = arith.constant 0 : i32
    %5 = arith.cmpi eq, %arg0, %c0_i32_2 : i32
    %6 = arith.extui %5 : i1 to i32
    %c0_i32_3 = arith.constant 0 : i32
    %7 = arith.cmpi ne, %6, %c0_i32_3 : i32
    scf.if %7 {
      %c0 = arith.constant 0 : index
      %c0_8 = arith.constant 0 : index
      %16 = vector.load %arg2[%c0, %c0_8] : memref<512x32xf32, #tpu.memory_space<vmem>>, vector<512x32xf32>
      %c0_9 = arith.constant 0 : index
      %c0_10 = arith.constant 0 : index
      %17 = vector.load %arg6[%c0_9, %c0_10] : memref<1x32xf32, #tpu.memory_space<vmem>>, vector<1x32xf32>
      %cst = arith.constant dense<0.000000e+00> : vector<32xf32>
      %18 = vector.multi_reduction <add>, %16, %cst [0] : vector<512x32xf32> to vector<32xf32>
      %19 = vector.shape_cast %18 : vector<32xf32> to vector<1x32xf32>
      %20 = arith.addf %17, %19 : vector<1x32xf32>
      %c0_11 = arith.constant 0 : index
      %c0_12 = arith.constant 0 : index
      %21 = vector.load %arg6[%c0_11, %c0_12] : memref<1x32xf32, #tpu.memory_space<vmem>>, vector<1x32xf32>
      tpu.vector_store %arg6[%c0_11, %c0_12], %20 {strides = array<i32>} : memref<1x32xf32, #tpu.memory_space<vmem>>, vector<1x32xf32>,
      %c0_13 = arith.constant 0 : index
      %c0_14 = arith.constant 0 : index
      %22 = vector.load %arg7[%c0_13, %c0_14] : memref<1x32xf32, #tpu.memory_space<vmem>>, vector<1x32xf32>
      %23 = arith.mulf %16, %16 : vector<512x32xf32>
      %cst_15 = arith.constant dense<0.000000e+00> : vector<32xf32>
      %24 = vector.multi_reduction <add>, %23, %cst_15 [0] : vector<512x32xf32> to vector<32xf32>
      %25 = vector.shape_cast %24 : vector<32xf32> to vector<1x32xf32>
      %26 = arith.addf %22, %25 : vector<1x32xf32>
      %c0_16 = arith.constant 0 : index
      %c0_17 = arith.constant 0 : index
      %27 = vector.load %arg7[%c0_16, %c0_17] : memref<1x32xf32, #tpu.memory_space<vmem>>, vector<1x32xf32>
      tpu.vector_store %arg7[%c0_16, %c0_17], %26 {strides = array<i32>} : memref<1x32xf32, #tpu.memory_space<vmem>>, vector<1x32xf32>,
    } else {
    }
    %c1_i32 = arith.constant 1 : i32
    %8 = arith.cmpi eq, %arg0, %c1_i32 : i32
    %c0_i32_4 = arith.constant 0 : i32
    %9 = arith.cmpi eq, %arg1, %c0_i32_4 : i32
    %10 = arith.andi %8, %9 : i1
    %11 = arith.extui %10 : i1 to i32
    %c0_i32_5 = arith.constant 0 : i32
    %12 = arith.cmpi ne, %11, %c0_i32_5 : i32
    scf.if %12 {
      %c0 = arith.constant 0 : index
      %c0_8 = arith.constant 0 : index
      %16 = vector.load %arg6[%c0, %c0_8] : memref<1x32xf32, #tpu.memory_space<vmem>>, vector<1x32xf32>
      %cst = arith.constant 4.8828125E-4 : f32
      %17 = vector.broadcast %cst : f32 to vector<1x32xf32>
      %18 = arith.mulf %16, %17 : vector<1x32xf32>
      %c0_9 = arith.constant 0 : index
      %c0_10 = arith.constant 0 : index
      %19 = vector.load %arg7[%c0_9, %c0_10] : memref<1x32xf32, #tpu.memory_space<vmem>>, vector<1x32xf32>
      %cst_11 = arith.constant 4.8828125E-4 : f32
      %20 = vector.broadcast %cst_11 : f32 to vector<1x32xf32>
      %21 = arith.mulf %19, %20 : vector<1x32xf32>
      %22 = arith.mulf %18, %18 : vector<1x32xf32>
      %23 = arith.subf %21, %22 : vector<1x32xf32>
      %cst_12 = arith.constant 0.000000e+00 : f32
      %24 = vector.broadcast %cst_12 : f32 to vector<1x32xf32>
      %25 = arith.maximumf %23, %24 : vector<1x32xf32>
      %c0_13 = arith.constant 0 : index
      %c0_14 = arith.constant 0 : index
      %26 = vector.load %arg3[%c0_13, %c0_14] : memref<1x32xf32, #tpu.memory_space<vmem>>, vector<1x32xf32>
      %cst_15 = arith.constant 9.99999974E-6 : f32
      %27 = vector.broadcast %cst_15 : f32 to vector<1x32xf32>
      %28 = arith.addf %25, %27 : vector<1x32xf32>
      %29 = math.rsqrt %28 : vector<1x32xf32>
      %30 = arith.mulf %26, %29 : vector<1x32xf32>
      %c0_16 = arith.constant 0 : index
      %c0_17 = arith.constant 0 : index
      %31 = vector.load %arg8[%c0_16, %c0_17] : memref<1x32xf32, #tpu.memory_space<vmem>>, vector<1x32xf32>
      tpu.vector_store %arg8[%c0_16, %c0_17], %30 {strides = array<i32>} : memref<1x32xf32, #tpu.memory_space<vmem>>, vector<1x32xf32>,
      %c0_18 = arith.constant 0 : index
      %c0_19 = arith.constant 0 : index
      %32 = vector.load %arg4[%c0_18, %c0_19] : memref<1x32xf32, #tpu.memory_space<vmem>>, vector<1x32xf32>
      %33 = arith.mulf %18, %30 : vector<1x32xf32>
      %34 = arith.subf %32, %33 : vector<1x32xf32>
      %c0_20 = arith.constant 0 : index
      %c0_21 = arith.constant 0 : index
      %35 = vector.load %arg9[%c0_20, %c0_21] : memref<1x32xf32, #tpu.memory_space<vmem>>, vector<1x32xf32>
      tpu.vector_store %arg9[%c0_20, %c0_21], %34 {strides = array<i32>} : memref<1x32xf32, #tpu.memory_space<vmem>>, vector<1x32xf32>,
    } else {
    }
    %c1_i32_6 = arith.constant 1 : i32
    %13 = arith.cmpi eq, %arg0, %c1_i32_6 : i32
    %14 = arith.extui %13 : i1 to i32
    %c0_i32_7 = arith.constant 0 : i32
    %15 = arith.cmpi ne, %14, %c0_i32_7 : i32
    scf.if %15 {
      %c0 = arith.constant 0 : index
      %c0_8 = arith.constant 0 : index
      %16 = vector.load %arg2[%c0, %c0_8] : memref<512x32xf32, #tpu.memory_space<vmem>>, vector<512x32xf32>
      %c0_9 = arith.constant 0 : index
      %c0_10 = arith.constant 0 : index
      %17 = vector.load %arg8[%c0_9, %c0_10] : memref<1x32xf32, #tpu.memory_space<vmem>>, vector<1x32xf32>
      %18 = vector.broadcast %17 : vector<1x32xf32> to vector<512x32xf32>
      %19 = arith.mulf %16, %18 : vector<512x32xf32>
      %c0_11 = arith.constant 0 : index
      %c0_12 = arith.constant 0 : index
      %20 = vector.load %arg9[%c0_11, %c0_12] : memref<1x32xf32, #tpu.memory_space<vmem>>, vector<1x32xf32>
      %21 = vector.broadcast %20 : vector<1x32xf32> to vector<512x32xf32>
      %22 = arith.addf %19, %21 : vector<512x32xf32>
      %cst = arith.constant 0.000000e+00 : f32
      %23 = vector.broadcast %cst : f32 to vector<512x32xf32>
      %24 = arith.maximumf %22, %23 : vector<512x32xf32>
      %c0_13 = arith.constant 0 : index
      %c0_14 = arith.constant 0 : index
      %25 = vector.load %arg5[%c0_13, %c0_14] : memref<512x32xf32, #tpu.memory_space<vmem>>, vector<512x32xf32>
      tpu.vector_store %arg5[%c0_13, %c0_14], %24 {strides = array<i32>} : memref<512x32xf32, #tpu.memory_space<vmem>>, vector<512x32xf32>,
    } else {
    }
    return
  }
  func.func @transform_0(%arg0: i32, %arg1: i32) -> (i32, i32) {
    %c0_i32 = arith.constant 0 : i32
    %c0_i32_0 = arith.constant 0 : i32
    return %arg1, %c0_i32 : i32, i32
  }
  func.func @transform_1(%arg0: i32, %arg1: i32) -> (i32, i32) {
    %c0_i32 = arith.constant 0 : i32
    %c0_i32_0 = arith.constant 0 : i32
    %c0_i32_1 = arith.constant 0 : i32
    return %c0_i32, %c0_i32_0 : i32, i32
  }
  func.func @transform_2(%arg0: i32, %arg1: i32) -> (i32, i32) {
    %c0_i32 = arith.constant 0 : i32
    %c0_i32_0 = arith.constant 0 : i32
    %c0_i32_1 = arith.constant 0 : i32
    return %c0_i32, %c0_i32_0 : i32, i32
  }
  func.func @transform_3(%arg0: i32, %arg1: i32) -> (i32, i32) {
    %c0_i32 = arith.constant 0 : i32
    %c0_i32_0 = arith.constant 0 : i32
    return %arg1, %c0_i32 : i32, i32
  }
}

module attributes {stable_mosaic.version = 11 : i64} {
  func.func @_matmul_bias_kernel(%arg0: i32, %arg1: memref<512x288xbf16, #tpu.memory_space<vmem>>, %arg2: memref<288x1xbf16, #tpu.memory_space<vmem>>, %arg3: memref<1x1xf32, #tpu.memory_space<vmem>>, %arg4: memref<512x1xf32, #tpu.memory_space<vmem>>) attributes {dimension_semantics = [#tpu.dimension_semantics<parallel>], iteration_bounds = array<i64: 4>, scalar_prefetch = 0 : i64, scratch_operands = 0 : i64, tpu.core_type = #tpu.core_type<tc>, window_params = [{transform_indices = @transform_0, window_bounds = array<i64: 512, 288>}, {pipeline_mode = #tpu.pipeline_mode<synchronous>, transform_indices = @transform_1, window_bounds = array<i64: 288, 1>}, {pipeline_mode = #tpu.pipeline_mode<synchronous>, transform_indices = @transform_2, window_bounds = array<i64: 1, 1>}, {transform_indices = @transform_3, window_bounds = array<i64: 512, 1>}]} {
    %c0 = arith.constant 0 : index
    %c0_0 = arith.constant 0 : index
    %0 = vector.load %arg1[%c0, %c0_0] : memref<512x288xbf16, #tpu.memory_space<vmem>>, vector<512x288xbf16>
    %c0_1 = arith.constant 0 : index
    %c0_2 = arith.constant 0 : index
    %1 = vector.load %arg2[%c0_1, %c0_2] : memref<288x1xbf16, #tpu.memory_space<vmem>>, vector<288x1xbf16>
    %cst = arith.constant dense<0.000000e+00> : vector<512x1xf32>
    %2 = tpu.matmul %0, %1, %cst {dimension_numbers = #tpu.dot_dimension_numbers<[1], [0], [0], [1], [0, 0, 1, 1], [], []>} : vector<512x288xbf16>, vector<288x1xbf16>, vector<512x1xf32> -> vector<512x1xf32>
    %c0_3 = arith.constant 0 : index
    %c0_4 = arith.constant 0 : index
    %3 = vector.load %arg3[%c0_3, %c0_4] : memref<1x1xf32, #tpu.memory_space<vmem>>, vector<1x1xf32>
    %4 = vector.broadcast %3 : vector<1x1xf32> to vector<512x1xf32>
    %5 = arith.addf %2, %4 : vector<512x1xf32>
    %cst_5 = arith.constant 0.000000e+00 : f32
    %6 = vector.broadcast %cst_5 : f32 to vector<512x1xf32>
    %7 = arith.maximumf %5, %6 : vector<512x1xf32>
    %c0_6 = arith.constant 0 : index
    %c0_7 = arith.constant 0 : index
    %8 = vector.load %arg4[%c0_6, %c0_7] : memref<512x1xf32, #tpu.memory_space<vmem>>, vector<512x1xf32>
    tpu.vector_store %arg4[%c0_6, %c0_7], %7 {strides = array<i32>} : memref<512x1xf32, #tpu.memory_space<vmem>>, vector<512x1xf32>,
    return
  }
  func.func @transform_0(%arg0: i32) -> (i32, i32) {
    %c0_i32 = arith.constant 0 : i32
    %c0_i32_0 = arith.constant 0 : i32
    return %arg0, %c0_i32 : i32, i32
  }
  func.func @transform_1(%arg0: i32) -> (i32, i32) {
    %c0_i32 = arith.constant 0 : i32
    %c0_i32_0 = arith.constant 0 : i32
    %c0_i32_1 = arith.constant 0 : i32
    return %c0_i32, %c0_i32_0 : i32, i32
  }
  func.func @transform_2(%arg0: i32) -> (i32, i32) {
    %c0_i32 = arith.constant 0 : i32
    %c0_i32_0 = arith.constant 0 : i32
    %c0_i32_1 = arith.constant 0 : i32
    return %c0_i32, %c0_i32_0 : i32, i32
  }
  func.func @transform_3(%arg0: i32) -> (i32, i32) {
    %c0_i32 = arith.constant 0 : i32
    %c0_i32_0 = arith.constant 0 : i32
    return %arg0, %c0_i32 : i32, i32
  }
}

</mosaic_0001>

<bundles_post_ra>
// kernel: net_forward.9
= control target key start
LH: loop header
LB: loop body
LE: loop exit
PB: predicated region body
PF: predicated region fallthrough
CT: control target
= control target key end

     0   :  { %s2023_s12 = smov 0   ;;  %s2025_s13 = smov 0   ;;  %s2594_s0 = inlined_call_operand.vmem [shape: bf16[29768,147], index: 0, kind: input, shape index: {}]   ;;  %s2595_s1 = inlined_call_operand.vmem [shape: bf16[147,5], index: 1, kind: input, shape index: {}]   ;;  %s2596_s2 = inlined_call_operand.vmem [shape: f32[1,5], index: 2, kind: input, shape index: {}]   ;;  %s2597_s3 = inlined_call_operand.vmem [shape: f32[29768,5], index: 3, kind: output, shape index: {}]  }
   0x1   :  { %s2027_s14 = smov 0  }
   0x2 LB: > { %s2036_s15 = sadd.s32 4294967295, %s1967_s14   ;;  %s2038_s16 = sadd.s32 1, %s1967_s14   ;;  %s1967_s14 = sphi %s2027_s14, %s2606_s14   ;;  %s1963_s13 = sphi %s2025_s13, %s2605_s13   ;;  %s1959_s12 = sphi %s2023_s12, %s2604_s12  }
   0x3   : > { %s85_s17 = ssub.s32 %s1967_s14, %s2038_s16  ;;  %s88_s18 = sadd.s32 1, %s1963_s13 }
   0x4   : > { %p86_p0 = scmp.eq.s32.totalorder %s85_s17, 0  ;;  %p98_p1 = scmp.ne.s32.totalorder %s1963_s13, %s1959_s12 }
   0x5   : > { %p99_p2 = scmp.eq.s32.totalorder %s2036_s15, 58  ;;  %p1564_p3 = scmp.ge.s32.totalorder %s1967_s14, 1 }
   0x6   : > { %s2046_s19 = scalar_select %p86_p0, %s1963_s13, %s88_s18  }
   0x7   : > { %p2048_p4 = por %p99_p2, %p98_p1  ;;  %p149_p5 = scmp.lt.s32.totalorder %s1967_s14, 60 }
   0x9   : > { %p150_p6 = pnand %p1564_p3, %p149_p5 }
   0xa   : > { %v1807_v0 = vld [vmem:[%s2595_s1] sm:$0xff] (!%p150_p6)   ;;  %v2001_v1 = vmov (!%p150_p6), 0   ;;  %v1808_v2 = vld [vmem:[%s2595_s1 + $0x8] sm:$0xff] (!%p150_p6)   ;;  %v1809_v3 = vld [vmem:[%s2595_s1 + $0x10] sm:$0xff] (!%p150_p6)   ;;  %s2062_s27 = sshll.u32 (!%p150_p6), %s2036_s15, 6  ;;  %vm636_vm0 = vcmask (!%p150_p6), 154624  }
   0xb   : > { %153 = sbr.rel (%p150_p6) target bundleno = 460 (0x1cc), region = 32  ;;  %740 = vmatprep.subr.bf16.mxu0 (!%p150_p6), %v2001_v1  ;;  %1697 = vmatprep.subr.bf16.mxu1 (!%p150_p6), %v2001_v1  ;;  %p184_p7 = scmp.lt.s32.totalorder (!%p150_p6), %s2062_s27, 3720  ;;  %v1810_v4 = vld [vmem:[%s2595_s1 + $0x18] sm:$0xff] (!%p150_p6)   ;;  %v1811_v5 = vld [vmem:[%s2595_s1 + $0x20] sm:$0xff] (!%p150_p6)   ;;  %v1812_v8 = vld [vmem:[%s2595_s1 + $0x28] sm:$0xff] (!%p150_p6)   ;;  %vm733_vm1 = vcmask (!%p150_p6), 1040384  }
   0xc   : > { %741 = vmatpush1.bf16.msra.mxu0 (!%p150_p6), %v1807_v0  ;;  %1707 = vmatpush1.bf16.msra.mxu1 (!%p150_p6), %v1807_v0  ;;  %v1813_v9 = vld [vmem:[%s2595_s1 + $0x30] sm:$0xff] (!%p150_p6)   ;;  %v1814_v10 = vld [vmem:[%s2595_s1 + $0x38] sm:$0xff] (!%p150_p6)   ;;  %vm734_vm2 = vcmask (!%p150_p6), 1041408   ;;  %v2002_v11 = vmov (!%p150_p6), 65535   ;;  %v1815_v13 = vld [vmem:[%s2595_s1 + $0x40] sm:$0xff] (!%p150_p6)   ;;  %s175_s26 = sand.u32 (!%p150_p6), 1, %s1959_s12  }
   0xd   : > { %742 = vmatprep.subr.bf16.mxu0 (!%p150_p6), %v2001_v1  ;;  %1698 = vmatprep.subr.bf16.mxu1 (!%p150_p6), %v2001_v1  ;;  %v735_v12 = vsel (!%p150_p6), %vm733_vm1, 4294967295, %v2002_v11  ;;  %v1816_v14 = vld [vmem:[%s2595_s1 + $0x48] ss:$0 sps:$4 sm:$0x33] (!%p150_p6)   ;;  %vm1029_vm3 = vcmask (!%p150_p6), 39936  }
   0xe   : > { %v736_v15 = vsel (!%p150_p6), %vm734_vm2, %v735_v12, 0 }
   0xf   : > { %v738_v16 = vand.u32 (!%p150_p6), %v1816_v14, %v736_v15  ;;  %v2192_v15 = vld [vmem:[%s2596_s2] ss:$0 sm:$0xff] (!%p150_p6) }
  0x10   : > { %743 = vmatpush1.bf16.msra.mxu0 (!%p150_p6), %v1808_v2  ;;  %1708 = vmatpush1.bf16.msra.mxu1 (!%p150_p6), %v1808_v2 }
  0x11   : > { %744 = vmatprep.subr.bf16.mxu0 (!%p150_p6), %v2001_v1  ;;  %1699 = vmatprep.subr.bf16.mxu1 (!%p150_p6), %v2001_v1 }
  0x12   : > { %s185_s28 = scalar_select %p184_p7, %s2062_s27, 3720 }
  0x13   : > { %s1102_s12 = ssub.s32 (%p2048_p4), 3721, %s2062_s27  ;;  %s1694_s5 = sshll.u32 (%p2048_p4), %s2036_s15, 9 }
  0x14   : > { %745 = vmatpush1.bf16.msra.mxu0 %v1809_v3  ;;  %1709 = vmatpush1.bf16.msra.mxu1 %v1809_v3  ;;  %s1693_s4 = sshll.u32 %s185_s28, 3  ;;  %s1565_s28 = sshll.u32 %s175_s26, 9 }
  0x15   : > { %746 = vmatprep.subr.bf16.mxu0 %v2001_v1  ;;  %1700 = vmatprep.subr.bf16.mxu1 %v2001_v1  ;;  %s2072_s7 = scalar_lea.vmem %s2594_s0, %s1693_s4  ;;  %s2196_s4 = scalar_lea.vmem [#allocation2], %s1565_s28  }
  0x16   : > { %v1819_v6 = vld [vmem:[%s2072_s7 + $0x4] ss:$8 sps:$4 sm:$0xff]   ;;  %v1817_v17 = vld [vmem:[%s2072_s7] ss:$8 sps:$4 sm:$0xff]   ;;  %v1823_v19 = vld [vmem:[%s2072_s7 + $0x14] ss:$8 sps:$4 sm:$0xff]   ;;  %s2395_s8 = scalar_lea.vmem (%p2048_p4), %s2597_s3, %s1694_s5  }
  0x17   : > { %v1822_v7 = vld [vmem:[%s2072_s7 + $0x104] ss:$8 sps:$4 sm:$0xff]   ;;  %1644 = vmatprep.mubr.msk.bf16.mxu0 %vm636_vm0, %v1819_v6  ;;  %v1820_v18 = vld [vmem:[%s2072_s7 + $0x100] ss:$8 sps:$4 sm:$0xff]   ;;  %v1825_v20 = vld [vmem:[%s2072_s7 + $0x114] ss:$8 sps:$4 sm:$0xff]  }
  0x18   : > { %747 = vmatpush1.bf16.msra.mxu0 %v1810_v4  ;;  %1710 = vmatpush1.bf16.msra.mxu1 %v1810_v4  ;;  %v1827_v21 = vld [vmem:[%s2072_s7 + $0x10] ss:$8 sps:$4 sm:$0xff]   ;;  %v1829_v23 = vld [vmem:[%s2072_s7 + $0x24] ss:$8 sps:$4 sm:$0xff]   ;;  %v1833_v25 = vld [vmem:[%s2072_s7 + $0x20] ss:$8 sps:$4 sm:$0xff]  }
  0x19   : > { %748 = vmatprep.subr.bf16.mxu0 %v2001_v1  ;;  %1701 = vmatprep.subr.bf16.mxu1 %v2001_v1  ;;  %v1828_v22 = vld [vmem:[%s2072_s7 + $0x110] ss:$8 sps:$4 sm:$0xff]   ;;  %v1831_v24 = vld [vmem:[%s2072_s7 + $0x124] ss:$8 sps:$4 sm:$0xff]   ;;  %v1834_v26 = vld [vmem:[%s2072_s7 + $0x120] ss:$8 sps:$4 sm:$0xff]  }
  0x1a   : > { %1660 = vmatprep.mubr.msk.bf16.mxu1 %vm636_vm0, %v1822_v7  ;;  %v1835_v27 = vld [vmem:[%s2072_s7 + $0x34] ss:$8 sps:$4 sm:$0xff]   ;;  %v1839_v29 = vld [vmem:[%s2072_s7 + $0x30] ss:$8 sps:$4 sm:$0xff]   ;;  %v1841_v31 = vld [vmem:[%s2072_s7 + $0x44] ss:$8 sps:$4 sm:$0xff]  }
  0x1b   : > { %v1837_v28 = vld [vmem:[%s2072_s7 + $0x134] ss:$8 sps:$4 sm:$0xff]   ;;  %v1840_v30 = vld [vmem:[%s2072_s7 + $0x130] ss:$8 sps:$4 sm:$0xff]   ;;  %v1843_v32 = vld [vmem:[%s2072_s7 + $0x144] ss:$8 sps:$4 sm:$0xff]  }
  0x1c   : > { %749 = vmatpush1.bf16.msra.mxu0 %v1811_v5  ;;  %1711 = vmatpush1.bf16.msra.mxu1 %v1811_v5  ;;  %v1845_v33 = vld [vmem:[%s2072_s7 + $0x40] ss:$8 sps:$4 sm:$0xff]   ;;  %v1847_v35 = vld [vmem:[%s2072_s7 + $0x54] ss:$8 sps:$4 sm:$0xff]   ;;  %v1851_v37 = vld [vmem:[%s2072_s7 + $0x50] ss:$8 sps:$4 sm:$0xff]  }
  0x1d   : > { %750 = vmatprep.subr.bf16.mxu0 %v2001_v1  ;;  %1702 = vmatprep.subr.bf16.mxu1 %v2001_v1  ;;  %v1846_v34 = vld [vmem:[%s2072_s7 + $0x140] ss:$8 sps:$4 sm:$0xff]   ;;  %v1849_v36 = vld [vmem:[%s2072_s7 + $0x154] ss:$8 sps:$4 sm:$0xff]   ;;  %v1852_v38 = vld [vmem:[%s2072_s7 + $0x150] ss:$8 sps:$4 sm:$0xff]  }
  0x1e   : > { %v1853_v39 = vld [vmem:[%s2072_s7 + $0x64] ss:$8 sps:$4 sm:$0xff]   ;;  %v1857_v41 = vld [vmem:[%s2072_s7 + $0x60] ss:$8 sps:$4 sm:$0xff]   ;;  %v1859_v43 = vld [vmem:[%s2072_s7 + $0x74] ss:$8 sps:$4 sm:$0xff]  }
  0x1f   : > { %v1855_v40 = vld [vmem:[%s2072_s7 + $0x164] ss:$8 sps:$4 sm:$0xff]   ;;  %v1858_v42 = vld [vmem:[%s2072_s7 + $0x160] ss:$8 sps:$4 sm:$0xff]   ;;  %v1861_v44 = vld [vmem:[%s2072_s7 + $0x174] ss:$8 sps:$4 sm:$0xff]  }
  0x20   : > { %751 = vmatpush1.bf16.msra.mxu0 %v1812_v8  ;;  %1712 = vmatpush1.bf16.msra.mxu1 %v1812_v8  ;;  %v1863_v45 = vld [vmem:[%s2072_s7 + $0x70] ss:$8 sps:$4 sm:$0xff]   ;;  %v1865_v47 = vld [vmem:[%s2072_s7 + $0x84] ss:$8 sps:$4 sm:$0xff]   ;;  %v1869_v49 = vld [vmem:[%s2072_s7 + $0x80] ss:$8 sps:$4 sm:$0xff]  }
  0x21   : > { %752 = vmatprep.subr.bf16.mxu0 %v2001_v1  ;;  %1703 = vmatprep.subr.bf16.mxu1 %v2001_v1  ;;  %v1864_v46 = vld [vmem:[%s2072_s7 + $0x170] ss:$8 sps:$4 sm:$0xff]   ;;  %v1867_v48 = vld [vmem:[%s2072_s7 + $0x184] ss:$8 sps:$4 sm:$0xff]   ;;  %v1870_v50 = vld [vmem:[%s2072_s7 + $0x180] ss:$8 sps:$4 sm:$0xff]  }
  0x22   : > { %v1871_v51 = vld [vmem:[%s2072_s7 + $0x94] ss:$8 sps:$4 sm:$0xff]   ;;  %v1875_v53 = vld [vmem:[%s2072_s7 + $0x90] ss:$8 sps:$4 sm:$0xff]   ;;  %v1877_v55 = vld [vmem:[%s2072_s7 + $0xa4] ss:$8 sps:$4 sm:$0xff]  }
  0x23   : > { %v1873_v52 = vld [vmem:[%s2072_s7 + $0x194] ss:$8 sps:$4 sm:$0xff]   ;;  %v1876_v54 = vld [vmem:[%s2072_s7 + $0x190] ss:$8 sps:$4 sm:$0xff]   ;;  %v1879_v56 = vld [vmem:[%s2072_s7 + $0x1a4] ss:$8 sps:$4 sm:$0xff]  }
  0x24   : > { %753 = vmatpush1.bf16.msra.mxu0 %v1813_v9  ;;  %1713 = vmatpush1.bf16.msra.mxu1 %v1813_v9  ;;  %v1881_v57 = vld [vmem:[%s2072_s7 + $0xa0] ss:$8 sps:$4 sm:$0xff]   ;;  %v1883_v59 = vld [vmem:[%s2072_s7 + $0xb4] ss:$8 sps:$4 sm:$0xff]   ;;  %v1887_v61 = vld [vmem:[%s2072_s7 + $0xb0] ss:$8 sps:$4 sm:$0xff]  }
  0x25   : > { %754 = vmatprep.subr.bf16.mxu0 %v2001_v1  ;;  %1704 = vmatprep.subr.bf16.mxu1 %v2001_v1  ;;  %v1882_v58 = vld [vmem:[%s2072_s7 + $0x1a0] ss:$8 sps:$4 sm:$0xff]   ;;  %v1885_v60 = vld [vmem:[%s2072_s7 + $0x1b4] ss:$8 sps:$4 sm:$0xff]   ;;  %v1888_v62 = vld [vmem:[%s2072_s7 + $0x1b0] ss:$8 sps:$4 sm:$0xff]  }
  0x26   : > { %v1889_v63 = vld [vmem:[%s2072_s7 + $0xc4] ss:$8 sps:$4 sm:$0xff]   ;;  %v1894_v2 = vld [vmem:[%s2072_s7 + $0x1c0] ss:$8 sps:$4 sm:$0xff]   ;;  %v1895_v3 = vld [vmem:[%s2072_s7 + $0xd4] ss:$8 sps:$4 sm:$0xff]  }
  0x27   : > { %v1891_v0 = vld [vmem:[%s2072_s7 + $0x1c4] ss:$8 sps:$4 sm:$0xff]   ;;  %v1897_v4 = vld [vmem:[%s2072_s7 + $0x1d4] ss:$8 sps:$4 sm:$0xff]   ;;  %v1899_v5 = vld [vmem:[%s2072_s7 + $0xd0] ss:$8 sps:$4 sm:$0xff]  }
  0x28   : > { %755 = vmatpush1.bf16.msra.mxu0 %v1814_v10  ;;  %1714 = vmatpush1.bf16.msra.mxu1 %v1814_v10  ;;  %v1900_v6 = vld [vmem:[%s2072_s7 + $0x1d0] ss:$8 sps:$4 sm:$0xff]   ;;  %v1901_v7 = vld [vmem:[%s2072_s7 + $0xe4] ss:$8 sps:$4 sm:$0xff]   ;;  %v1905_v9 = vld [vmem:[%s2072_s7 + $0xe0] ss:$8 sps:$4 sm:$0xff]  }
  0x29   : > { %756 = vmatprep.subr.bf16.mxu0 %v2001_v1  ;;  %1705 = vmatprep.subr.bf16.mxu1 %v2001_v1  ;;  %v1903_v8 = vld [vmem:[%s2072_s7 + $0x1e4] ss:$8 sps:$4 sm:$0xff]   ;;  %v1906_v10 = vld [vmem:[%s2072_s7 + $0x1e0] ss:$8 sps:$4 sm:$0xff]   ;;  %v1907_v11 = vld [vmem:[%s2072_s7 + $0xf4] ss:$8 sps:$4 sm:$0xff]  }
  0x2a   : > { %v1909_v12 = vld [vmem:[%s2072_s7 + $0x1f4] ss:$8 sps:$4 sm:$0xff]   ;;  %v1912_v14 = vld [vmem:[%s2072_s7 + $0x1f0] ss:$8 sps:$4 sm:$0xff]   ;;  %p1103_p8 = scmp.lt.s32.totalorder (%p2048_p4), %s1102_s12, 64 }
  0x2c   : > { %757 = vmatpush1.bf16.msra.mxu0 %v1815_v13  ;;  %1715 = vmatpush1.bf16.msra.mxu1 %v1815_v13  ;;  %v1911_v13 = vld [vmem:[%s2072_s7 + $0xf0] ss:$8 sps:$4 sm:$0xff]  }
  0x2d   : > { %758 = vmatprep.subr.bf16.mxu0 %v2001_v1  ;;  %1706 = vmatprep.subr.bf16.mxu1 %v2001_v1  ;;  %v1893_v1 = vld [vmem:[%s2072_s7 + $0xc0] ss:$8 sps:$4 sm:$0xff]  }
  0x30   : > { %759 = vmatpush1.bf16.msra.mxu0 %v738_v16  ;;  %1716 = vmatpush1.bf16.msra.mxu1 %v738_v16 }
  0x33   : > { %773 = vmatmul.mubr.bf16.vlgmr.msra.gmra.mrb[0].mxu0 %v1817_v17  ;;  %901 = vmatmul.mubr.bf16.vlgmr.msra.gmra.mrb[0].mxu1 %v1820_v18 }
  0x34   : > { %1645 = vmatprep.mubr.msk.bf16.mxu0 %vm636_vm0, %v1823_v19  ;;  %1661 = vmatprep.mubr.msk.bf16.mxu1 %vm636_vm0, %v1825_v20 }
  0x3b   : > { %781 = vmatmul.mubr.bf16.gmra.mrb[4].mxu0 %v1827_v21  ;;  %909 = vmatmul.mubr.bf16.gmra.mrb[4].mxu1 %v1828_v22 }
  0x3c   : > { %1646 = vmatprep.mubr.msk.bf16.mxu0 %vm636_vm0, %v1829_v23  ;;  %1662 = vmatprep.mubr.msk.bf16.mxu1 %vm636_vm0, %v1831_v24 }
  0x43   : > { %789 = vmatmul.mubr.bf16.gmra.mrb[8].mxu0 %v1833_v25  ;;  %917 = vmatmul.mubr.bf16.gmra.mrb[8].mxu1 %v1834_v26 }
  0x44   : > { %1647 = vmatprep.mubr.msk.bf16.mxu0 %vm636_vm0, %v1835_v27  ;;  %1663 = vmatprep.mubr.msk.bf16.mxu1 %vm636_vm0, %v1837_v28 }
  0x4b   : > { %797 = vmatmul.mubr.bf16.gmra.mrb[12].mxu0 %v1839_v29  ;;  %925 = vmatmul.mubr.bf16.gmra.mrb[12].mxu1 %v1840_v30 }
  0x4c   : > { %1648 = vmatprep.mubr.msk.bf16.mxu0 %vm636_vm0, %v1841_v31  ;;  %1664 = vmatprep.mubr.msk.bf16.mxu1 %vm636_vm0, %v1843_v32 }
  0x53   : > { %805 = vmatmul.mubr.bf16.gmra.mrb[16].mxu0 %v1845_v33  ;;  %933 = vmatmul.mubr.bf16.gmra.mrb[16].mxu1 %v1846_v34 }
  0x54   : > { %1649 = vmatprep.mubr.msk.bf16.mxu0 %vm636_vm0, %v1847_v35  ;;  %1665 = vmatprep.mubr.msk.bf16.mxu1 %vm636_vm0, %v1849_v36 }
  0x5b   : > { %813 = vmatmul.mubr.bf16.gmra.mrb[20].mxu0 %v1851_v37  ;;  %941 = vmatmul.mubr.bf16.gmra.mrb[20].mxu1 %v1852_v38 }
  0x5c   : > { %1650 = vmatprep.mubr.msk.bf16.mxu0 %vm636_vm0, %v1853_v39  ;;  %1666 = vmatprep.mubr.msk.bf16.mxu1 %vm636_vm0, %v1855_v40 }
  0x63   : > { %821 = vmatmul.mubr.bf16.gmra.mrb[24].mxu0 %v1857_v41  ;;  %949 = vmatmul.mubr.bf16.gmra.mrb[24].mxu1 %v1858_v42 }
  0x64   : > { %1651 = vmatprep.mubr.msk.bf16.mxu0 %vm636_vm0, %v1859_v43  ;;  %1667 = vmatprep.mubr.msk.bf16.mxu1 %vm636_vm0, %v1861_v44 }
  0x6b   : > { %829 = vmatmul.mubr.bf16.gmra.mrb[28].mxu0 %v1863_v45  ;;  %957 = vmatmul.mubr.bf16.gmra.mrb[28].mxu1 %v1864_v46 }
  0x6c   : > { %1652 = vmatprep.mubr.msk.bf16.mxu0 %vm636_vm0, %v1865_v47  ;;  %1668 = vmatprep.mubr.msk.bf16.mxu1 %vm636_vm0, %v1867_v48 }
  0x73   : > { %837 = vmatmul.mubr.bf16.gmra.mrb[32].mxu0 %v1869_v49  ;;  %965 = vmatmul.mubr.bf16.gmra.mrb[32].mxu1 %v1870_v50 }
  0x74   : > { %1653 = vmatprep.mubr.msk.bf16.mxu0 %vm636_vm0, %v1871_v51  ;;  %1669 = vmatprep.mubr.msk.bf16.mxu1 %vm636_vm0, %v1873_v52 }
  0x7b   : > { %845 = vmatmul.mubr.bf16.gmra.mrb[36].mxu0 %v1875_v53  ;;  %973 = vmatmul.mubr.bf16.gmra.mrb[36].mxu1 %v1876_v54 }
  0x7c   : > { %1654 = vmatprep.mubr.msk.bf16.mxu0 %vm636_vm0, %v1877_v55  ;;  %1670 = vmatprep.mubr.msk.bf16.mxu1 %vm636_vm0, %v1879_v56 }
  0x83   : > { %853 = vmatmul.mubr.bf16.gmra.mrb[40].mxu0 %v1881_v57  ;;  %981 = vmatmul.mubr.bf16.gmra.mrb[40].mxu1 %v1882_v58 }
  0x84   : > { %1655 = vmatprep.mubr.msk.bf16.mxu0 %vm636_vm0, %v1883_v59  ;;  %1671 = vmatprep.mubr.msk.bf16.mxu1 %vm636_vm0, %v1885_v60 }
  0x8b   : > { %861 = vmatmul.mubr.bf16.gmra.mrb[44].mxu0 %v1887_v61  ;;  %989 = vmatmul.mubr.bf16.gmra.mrb[44].mxu1 %v1888_v62 }
  0x8c   : > { %1656 = vmatprep.mubr.msk.bf16.mxu0 %vm636_vm0, %v1889_v63  ;;  %1672 = vmatprep.mubr.msk.bf16.mxu1 %vm636_vm0, %v1891_v0 }
  0x93   : > { %869 = vmatmul.mubr.bf16.gmra.mrb[48].mxu0 %v1893_v1  ;;  %997 = vmatmul.mubr.bf16.gmra.mrb[48].mxu1 %v1894_v2 }
  0x94   : > { %1657 = vmatprep.mubr.msk.bf16.mxu0 %vm636_vm0, %v1895_v3  ;;  %1673 = vmatprep.mubr.msk.bf16.mxu1 %vm636_vm0, %v1897_v4 }
  0x9b   : > { %877 = vmatmul.mubr.bf16.gmra.mrb[52].mxu0 %v1899_v5  ;;  %1005 = vmatmul.mubr.bf16.gmra.mrb[52].mxu1 %v1900_v6 }
  0x9c   : > { %1658 = vmatprep.mubr.msk.bf16.mxu0 %vm636_vm0, %v1901_v7  ;;  %1674 = vmatprep.mubr.msk.bf16.mxu1 %vm636_vm0, %v1903_v8 }
  0xa3   : > { %885 = vmatmul.mubr.bf16.gmra.mrb[56].mxu0 %v1905_v9  ;;  %1013 = vmatmul.mubr.bf16.gmra.mrb[56].mxu1 %v1906_v10 }
  0xa4   : > { %1659 = vmatprep.mubr.msk.bf16.mxu0 %vm636_vm0, %v1907_v11  ;;  %1675 = vmatprep.mubr.msk.bf16.mxu1 %vm636_vm0, %v1909_v12 }
  0xab   : > { %893 = vmatmul.mubr.bf16.gmra.mrb[60].mxu0 %v1911_v13  ;;  %1021 = vmatmul.mubr.bf16.gmra.mrb[60].mxu1 %v1912_v14 }
 0x106   : > { %v774_v16 = vpop.f32.mrb[0].mxu0  ;;  %v902_v17 = vpop.f32.mrb[0].mxu1 }
 0x107   : > { %v775_v18 = vadd.f32 %v2192_v15, %v774_v16  ;;  %v903_v19 = vadd.f32 %v2192_v15, %v902_v17  ;;  %v776_v20 = vpop.f32.mrb[1].mxu0  ;;  %v904_v21 = vpop.f32.mrb[1].mxu1 }
 0x108   : > { %v777_v22 = vpop.f32.mrb[2].mxu0  ;;  %v905_v23 = vpop.f32.mrb[2].mxu1 }
 0x109   : > { %1030 = vst.msk [vmem:[%s2196_s4] sm:$0xff] %vm1029_vm3, %v775_v18  ;;  %1062 = vst.msk [vmem:[%s2196_s4 + $0x100] sm:$0xff] %vm1029_vm3, %v903_v19  ;;  %v778_v24 = vadd.f32 %v2192_v15, %v777_v22  ;;  %v906_v25 = vadd.f32 %v2192_v15, %v905_v23  ;;  %v779_v26 = vpop.f32.mrb[3].mxu0  ;;  %v907_v27 = vpop.f32.mrb[3].mxu1 }
 0x10b   : > { %1031 = vst.msk [vmem:[%s2196_s4 + $0x8] sm:$0xff] %vm1029_vm3, %v778_v24  ;;  %1063 = vst.msk [vmem:[%s2196_s4 + $0x108] sm:$0xff] %vm1029_vm3, %v906_v25 }
 0x10e   : > { %v782_v28 = vpop.f32.mrb[4].mxu0  ;;  %v910_v29 = vpop.f32.mrb[4].mxu1 }
 0x10f   : > { %v783_v30 = vadd.f32 %v2192_v15, %v782_v28  ;;  %v911_v31 = vadd.f32 %v2192_v15, %v910_v29  ;;  %v784_v32 = vpop.f32.mrb[5].mxu0  ;;  %v912_v33 = vpop.f32.mrb[5].mxu1 }
 0x110   : > { %v785_v34 = vpop.f32.mrb[6].mxu0  ;;  %v913_v35 = vpop.f32.mrb[6].mxu1 }
 0x111   : > { %1032 = vst.msk [vmem:[%s2196_s4 + $0x10] sm:$0xff] %vm1029_vm3, %v783_v30  ;;  %1064 = vst.msk [vmem:[%s2196_s4 + $0x110] sm:$0xff] %vm1029_vm3, %v911_v31  ;;  %v786_v36 = vadd.f32 %v2192_v15, %v785_v34  ;;  %v914_v37 = vadd.f32 %v2192_v15, %v913_v35  ;;  %v787_v38 = vpop.f32.mrb[7].mxu0  ;;  %v915_v39 = vpop.f32.mrb[7].mxu1 }
 0x113   : > { %1033 = vst.msk [vmem:[%s2196_s4 + $0x18] sm:$0xff] %vm1029_vm3, %v786_v36  ;;  %1065 = vst.msk [vmem:[%s2196_s4 + $0x118] sm:$0xff] %vm1029_vm3, %v914_v37 }
 0x116   : > { %v790_v40 = vpop.f32.mrb[8].mxu0  ;;  %v918_v41 = vpop.f32.mrb[8].mxu1 }
 0x117   : > { %v791_v42 = vadd.f32 %v2192_v15, %v790_v40  ;;  %v919_v43 = vadd.f32 %v2192_v15, %v918_v41  ;;  %v792_v44 = vpop.f32.mrb[9].mxu0  ;;  %v920_v45 = vpop.f32.mrb[9].mxu1 }
 0x118   : > { %v793_v46 = vpop.f32.mrb[10].mxu0  ;;  %v921_v47 = vpop.f32.mrb[10].mxu1 }
 0x119   : > { %1034 = vst.msk [vmem:[%s2196_s4 + $0x20] sm:$0xff] %vm1029_vm3, %v791_v42  ;;  %1066 = vst.msk [vmem:[%s2196_s4 + $0x120] sm:$0xff] %vm1029_vm3, %v919_v43  ;;  %v794_v48 = vadd.f32 %v2192_v15, %v793_v46  ;;  %v922_v49 = vadd.f32 %v2192_v15, %v921_v47  ;;  %v795_v50 = vpop.f32.mrb[11].mxu0  ;;  %v923_v51 = vpop.f32.mrb[11].mxu1 }
 0x11b   : > { %1035 = vst.msk [vmem:[%s2196_s4 + $0x28] sm:$0xff] %vm1029_vm3, %v794_v48  ;;  %1067 = vst.msk [vmem:[%s2196_s4 + $0x128] sm:$0xff] %vm1029_vm3, %v922_v49 }
 0x11e   : > { %v798_v52 = vpop.f32.mrb[12].mxu0  ;;  %v926_v53 = vpop.f32.mrb[12].mxu1 }
 0x11f   : > { %v799_v54 = vadd.f32 %v2192_v15, %v798_v52  ;;  %v927_v55 = vadd.f32 %v2192_v15, %v926_v53  ;;  %v800_v56 = vpop.f32.mrb[13].mxu0  ;;  %v928_v57 = vpop.f32.mrb[13].mxu1 }
 0x120   : > { %v801_v58 = vpop.f32.mrb[14].mxu0  ;;  %v929_v59 = vpop.f32.mrb[14].mxu1 }
 0x121   : > { %1036 = vst.msk [vmem:[%s2196_s4 + $0x30] sm:$0xff] %vm1029_vm3, %v799_v54  ;;  %1068 = vst.msk [vmem:[%s2196_s4 + $0x130] sm:$0xff] %vm1029_vm3, %v927_v55  ;;  %v802_v60 = vadd.f32 %v2192_v15, %v801_v58  ;;  %v930_v61 = vadd.f32 %v2192_v15, %v929_v59  ;;  %v803_v62 = vpop.f32.mrb[15].mxu0  ;;  %v931_v63 = vpop.f32.mrb[15].mxu1 }
 0x123   : > { %1037 = vst.msk [vmem:[%s2196_s4 + $0x38] sm:$0xff] %vm1029_vm3, %v802_v60  ;;  %1069 = vst.msk [vmem:[%s2196_s4 + $0x138] sm:$0xff] %vm1029_vm3, %v930_v61 }
 0x126   : > { %v806_v0 = vpop.f32.mrb[16].mxu0  ;;  %v934_v1 = vpop.f32.mrb[16].mxu1 }
 0x127   : > { %v807_v2 = vadd.f32 %v2192_v15, %v806_v0  ;;  %v935_v3 = vadd.f32 %v2192_v15, %v934_v1  ;;  %v808_v4 = vpop.f32.mrb[17].mxu0  ;;  %v936_v5 = vpop.f32.mrb[17].mxu1 }
 0x128   : > { %v809_v6 = vpop.f32.mrb[18].mxu0  ;;  %v937_v7 = vpop.f32.mrb[18].mxu1 }
 0x129   : > { %1038 = vst.msk [vmem:[%s2196_s4 + $0x40] sm:$0xff] %vm1029_vm3, %v807_v2  ;;  %1070 = vst.msk [vmem:[%s2196_s4 + $0x140] sm:$0xff] %vm1029_vm3, %v935_v3  ;;  %v810_v8 = vadd.f32 %v2192_v15, %v809_v6  ;;  %v938_v9 = vadd.f32 %v2192_v15, %v937_v7  ;;  %v811_v10 = vpop.f32.mrb[19].mxu0  ;;  %v939_v11 = vpop.f32.mrb[19].mxu1 }
 0x12b   : > { %1039 = vst.msk [vmem:[%s2196_s4 + $0x48] sm:$0xff] %vm1029_vm3, %v810_v8  ;;  %1071 = vst.msk [vmem:[%s2196_s4 + $0x148] sm:$0xff] %vm1029_vm3, %v938_v9 }
 0x12e   : > { %v814_v12 = vpop.f32.mrb[20].mxu0  ;;  %v942_v13 = vpop.f32.mrb[20].mxu1 }
 0x12f   : > { %v815_v14 = vadd.f32 %v2192_v15, %v814_v12  ;;  %v943_v16 = vadd.f32 %v2192_v15, %v942_v13  ;;  %v816_v17 = vpop.f32.mrb[21].mxu0  ;;  %v944_v18 = vpop.f32.mrb[21].mxu1 }
 0x130   : > { %v817_v19 = vpop.f32.mrb[22].mxu0  ;;  %v945_v20 = vpop.f32.mrb[22].mxu1 }
 0x131   : > { %1040 = vst.msk [vmem:[%s2196_s4 + $0x50] sm:$0xff] %vm1029_vm3, %v815_v14  ;;  %1072 = vst.msk [vmem:[%s2196_s4 + $0x150] sm:$0xff] %vm1029_vm3, %v943_v16  ;;  %v818_v21 = vadd.f32 %v2192_v15, %v817_v19  ;;  %v946_v22 = vadd.f32 %v2192_v15, %v945_v20  ;;  %v819_v23 = vpop.f32.mrb[23].mxu0  ;;  %v947_v24 = vpop.f32.mrb[23].mxu1 }
 0x133   : > { %1041 = vst.msk [vmem:[%s2196_s4 + $0x58] sm:$0xff] %vm1029_vm3, %v818_v21  ;;  %1073 = vst.msk [vmem:[%s2196_s4 + $0x158] sm:$0xff] %vm1029_vm3, %v946_v22 }
 0x136   : > { %v822_v25 = vpop.f32.mrb[24].mxu0  ;;  %v950_v26 = vpop.f32.mrb[24].mxu1 }
 0x137   : > { %v823_v27 = vadd.f32 %v2192_v15, %v822_v25  ;;  %v951_v28 = vadd.f32 %v2192_v15, %v950_v26  ;;  %v824_v29 = vpop.f32.mrb[25].mxu0  ;;  %v952_v30 = vpop.f32.mrb[25].mxu1 }
 0x138   : > { %v825_v31 = vpop.f32.mrb[26].mxu0  ;;  %v953_v32 = vpop.f32.mrb[26].mxu1 }
 0x139   : > { %1042 = vst.msk [vmem:[%s2196_s4 + $0x60] sm:$0xff] %vm1029_vm3, %v823_v27  ;;  %1074 = vst.msk [vmem:[%s2196_s4 + $0x160] sm:$0xff] %vm1029_vm3, %v951_v28  ;;  %v826_v33 = vadd.f32 %v2192_v15, %v825_v31  ;;  %v954_v34 = vadd.f32 %v2192_v15, %v953_v32  ;;  %v827_v35 = vpop.f32.mrb[27].mxu0  ;;  %v955_v36 = vpop.f32.mrb[27].mxu1 }
 0x13b   : > { %1043 = vst.msk [vmem:[%s2196_s4 + $0x68] sm:$0xff] %vm1029_vm3, %v826_v33  ;;  %1075 = vst.msk [vmem:[%s2196_s4 + $0x168] sm:$0xff] %vm1029_vm3, %v954_v34 }
 0x13e   : > { %v830_v37 = vpop.f32.mrb[28].mxu0  ;;  %v958_v38 = vpop.f32.mrb[28].mxu1 }
 0x13f   : > { %v831_v39 = vadd.f32 %v2192_v15, %v830_v37  ;;  %v959_v40 = vadd.f32 %v2192_v15, %v958_v38  ;;  %v832_v41 = vpop.f32.mrb[29].mxu0  ;;  %v960_v42 = vpop.f32.mrb[29].mxu1 }
 0x140   : > { %v833_v43 = vpop.f32.mrb[30].mxu0  ;;  %v961_v44 = vpop.f32.mrb[30].mxu1 }
 0x141   : > { %1044 = vst.msk [vmem:[%s2196_s4 + $0x70] sm:$0xff] %vm1029_vm3, %v831_v39  ;;  %1076 = vst.msk [vmem:[%s2196_s4 + $0x170] sm:$0xff] %vm1029_vm3, %v959_v40  ;;  %v834_v45 = vadd.f32 %v2192_v15, %v833_v43  ;;  %v962_v46 = vadd.f32 %v2192_v15, %v961_v44  ;;  %v835_v47 = vpop.f32.mrb[31].mxu0  ;;  %v963_v48 = vpop.f32.mrb[31].mxu1 }
 0x143   : > { %1045 = vst.msk [vmem:[%s2196_s4 + $0x78] sm:$0xff] %vm1029_vm3, %v834_v45  ;;  %1077 = vst.msk [vmem:[%s2196_s4 + $0x178] sm:$0xff] %vm1029_vm3, %v962_v46 }
 0x146   : > { %v838_v49 = vpop.f32.mrb[32].mxu0  ;;  %v966_v50 = vpop.f32.mrb[32].mxu1 }
 0x147   : > { %v839_v51 = vadd.f32 %v2192_v15, %v838_v49  ;;  %v967_v52 = vadd.f32 %v2192_v15, %v966_v50  ;;  %v840_v53 = vpop.f32.mrb[33].mxu0  ;;  %v968_v54 = vpop.f32.mrb[33].mxu1 }
 0x148   : > { %v841_v55 = vpop.f32.mrb[34].mxu0  ;;  %v969_v56 = vpop.f32.mrb[34].mxu1 }
 0x149   : > { %1046 = vst.msk [vmem:[%s2196_s4 + $0x80] sm:$0xff] %vm1029_vm3, %v839_v51  ;;  %1078 = vst.msk [vmem:[%s2196_s4 + $0x180] sm:$0xff] %vm1029_vm3, %v967_v52  ;;  %v842_v57 = vadd.f32 %v2192_v15, %v841_v55  ;;  %v970_v58 = vadd.f32 %v2192_v15, %v969_v56  ;;  %v843_v59 = vpop.f32.mrb[35].mxu0  ;;  %v971_v60 = vpop.f32.mrb[35].mxu1 }
 0x14b   : > { %1047 = vst.msk [vmem:[%s2196_s4 + $0x88] sm:$0xff] %vm1029_vm3, %v842_v57  ;;  %1079 = vst.msk [vmem:[%s2196_s4 + $0x188] sm:$0xff] %vm1029_vm3, %v970_v58 }
 0x14e   : > { %v846_v61 = vpop.f32.mrb[36].mxu0  ;;  %v974_v62 = vpop.f32.mrb[36].mxu1 }
 0x14f   : > { %v847_v63 = vadd.f32 %v2192_v15, %v846_v61  ;;  %v975_v0 = vadd.f32 %v2192_v15, %v974_v62  ;;  %v848_v1 = vpop.f32.mrb[37].mxu0  ;;  %v976_v2 = vpop.f32.mrb[37].mxu1 }
 0x150   : > { %v849_v3 = vpop.f32.mrb[38].mxu0  ;;  %v977_v4 = vpop.f32.mrb[38].mxu1 }
 0x151   : > { %1048 = vst.msk [vmem:[%s2196_s4 + $0x90] sm:$0xff] %vm1029_vm3, %v847_v63  ;;  %1080 = vst.msk [vmem:[%s2196_s4 + $0x190] sm:$0xff] %vm1029_vm3, %v975_v0  ;;  %v850_v5 = vadd.f32 %v2192_v15, %v849_v3  ;;  %v978_v6 = vadd.f32 %v2192_v15, %v977_v4  ;;  %v851_v7 = vpop.f32.mrb[39].mxu0  ;;  %v979_v8 = vpop.f32.mrb[39].mxu1 }
 0x153   : > { %1049 = vst.msk [vmem:[%s2196_s4 + $0x98] sm:$0xff] %vm1029_vm3, %v850_v5  ;;  %1081 = vst.msk [vmem:[%s2196_s4 + $0x198] sm:$0xff] %vm1029_vm3, %v978_v6 }
 0x156   : > { %v854_v9 = vpop.f32.mrb[40].mxu0  ;;  %v982_v10 = vpop.f32.mrb[40].mxu1 }
 0x157   : > { %v855_v11 = vadd.f32 %v2192_v15, %v854_v9  ;;  %v983_v12 = vadd.f32 %v2192_v15, %v982_v10  ;;  %v856_v13 = vpop.f32.mrb[41].mxu0  ;;  %v984_v14 = vpop.f32.mrb[41].mxu1 }
 0x158   : > { %v857_v16 = vpop.f32.mrb[42].mxu0  ;;  %v985_v17 = vpop.f32.mrb[42].mxu1 }
 0x159   : > { %1050 = vst.msk [vmem:[%s2196_s4 + $0xa0] sm:$0xff] %vm1029_vm3, %v855_v11  ;;  %1082 = vst.msk [vmem:[%s2196_s4 + $0x1a0] sm:$0xff] %vm1029_vm3, %v983_v12  ;;  %v858_v18 = vadd.f32 %v2192_v15, %v857_v16  ;;  %v986_v19 = vadd.f32 %v2192_v15, %v985_v17  ;;  %v859_v20 = vpop.f32.mrb[43].mxu0  ;;  %v987_v21 = vpop.f32.mrb[43].mxu1 }
 0x15b   : > { %1051 = vst.msk [vmem:[%s2196_s4 + $0xa8] sm:$0xff] %vm1029_vm3, %v858_v18  ;;  %1083 = vst.msk [vmem:[%s2196_s4 + $0x1a8] sm:$0xff] %vm1029_vm3, %v986_v19 }
 0x15e   : > { %v862_v22 = vpop.f32.mrb[44].mxu0  ;;  %v990_v23 = vpop.f32.mrb[44].mxu1 }
 0x15f   : > { %v863_v24 = vadd.f32 %v2192_v15, %v862_v22  ;;  %v991_v25 = vadd.f32 %v2192_v15, %v990_v23  ;;  %v864_v26 = vpop.f32.mrb[45].mxu0  ;;  %v992_v27 = vpop.f32.mrb[45].mxu1 }
 0x160   : > { %v865_v28 = vpop.f32.mrb[46].mxu0  ;;  %v993_v29 = vpop.f32.mrb[46].mxu1 }
 0x161   : > { %1052 = vst.msk [vmem:[%s2196_s4 + $0xb0] sm:$0xff] %vm1029_vm3, %v863_v24  ;;  %1084 = vst.msk [vmem:[%s2196_s4 + $0x1b0] sm:$0xff] %vm1029_vm3, %v991_v25  ;;  %v866_v30 = vadd.f32 %v2192_v15, %v865_v28  ;;  %v994_v31 = vadd.f32 %v2192_v15, %v993_v29  ;;  %v867_v32 = vpop.f32.mrb[47].mxu0  ;;  %v995_v33 = vpop.f32.mrb[47].mxu1 }
 0x163   : > { %1053 = vst.msk [vmem:[%s2196_s4 + $0xb8] sm:$0xff] %vm1029_vm3, %v866_v30  ;;  %1085 = vst.msk [vmem:[%s2196_s4 + $0x1b8] sm:$0xff] %vm1029_vm3, %v994_v31 }
 0x166   : > { %v870_v34 = vpop.f32.mrb[48].mxu0  ;;  %v998_v35 = vpop.f32.mrb[48].mxu1 }
 0x167   : > { %v871_v36 = vadd.f32 %v2192_v15, %v870_v34  ;;  %v999_v37 = vadd.f32 %v2192_v15, %v998_v35  ;;  %v872_v38 = vpop.f32.mrb[49].mxu0  ;;  %v1000_v39 = vpop.f32.mrb[49].mxu1 }
 0x168   : > { %v873_v40 = vpop.f32.mrb[50].mxu0  ;;  %v1001_v41 = vpop.f32.mrb[50].mxu1 }
 0x169   : > { %1054 = vst.msk [vmem:[%s2196_s4 + $0xc0] sm:$0xff] %vm1029_vm3, %v871_v36  ;;  %1086 = vst.msk [vmem:[%s2196_s4 + $0x1c0] sm:$0xff] %vm1029_vm3, %v999_v37  ;;  %v874_v42 = vadd.f32 %v2192_v15, %v873_v40  ;;  %v1002_v43 = vadd.f32 %v2192_v15, %v1001_v41  ;;  %v875_v44 = vpop.f32.mrb[51].mxu0  ;;  %v1003_v45 = vpop.f32.mrb[51].mxu1 }
 0x16b   : > { %1055 = vst.msk [vmem:[%s2196_s4 + $0xc8] sm:$0xff] %vm1029_vm3, %v874_v42  ;;  %1087 = vst.msk [vmem:[%s2196_s4 + $0x1c8] sm:$0xff] %vm1029_vm3, %v1002_v43 }
 0x16e   : > { %v878_v46 = vpop.f32.mrb[52].mxu0  ;;  %v1006_v47 = vpop.f32.mrb[52].mxu1 }
 0x16f   : > { %v879_v48 = vadd.f32 %v2192_v15, %v878_v46  ;;  %v1007_v49 = vadd.f32 %v2192_v15, %v1006_v47  ;;  %v880_v50 = vpop.f32.mrb[53].mxu0  ;;  %v1008_v51 = vpop.f32.mrb[53].mxu1 }
 0x170   : > { %v881_v52 = vpop.f32.mrb[54].mxu0  ;;  %v1009_v53 = vpop.f32.mrb[54].mxu1 }
 0x171   : > { %1056 = vst.msk [vmem:[%s2196_s4 + $0xd0] sm:$0xff] %vm1029_vm3, %v879_v48  ;;  %1088 = vst.msk [vmem:[%s2196_s4 + $0x1d0] sm:$0xff] %vm1029_vm3, %v1007_v49  ;;  %v882_v54 = vadd.f32 %v2192_v15, %v881_v52  ;;  %v1010_v55 = vadd.f32 %v2192_v15, %v1009_v53  ;;  %v883_v56 = vpop.f32.mrb[55].mxu0  ;;  %v1011_v57 = vpop.f32.mrb[55].mxu1 }
 0x173   : > { %1057 = vst.msk [vmem:[%s2196_s4 + $0xd8] sm:$0xff] %vm1029_vm3, %v882_v54  ;;  %1089 = vst.msk [vmem:[%s2196_s4 + $0x1d8] sm:$0xff] %vm1029_vm3, %v1010_v55 }
 0x176   : > { %v886_v58 = vpop.f32.mrb[56].mxu0  ;;  %v1014_v59 = vpop.f32.mrb[56].mxu1 }
 0x177   : > { %v887_v60 = vadd.f32 %v2192_v15, %v886_v58  ;;  %v1015_v61 = vadd.f32 %v2192_v15, %v1014_v59  ;;  %v888_v62 = vpop.f32.mrb[57].mxu0  ;;  %v1016_v63 = vpop.f32.mrb[57].mxu1 }
 0x178   : > { %v889_v0 = vpop.f32.mrb[58].mxu0  ;;  %v1017_v1 = vpop.f32.mrb[58].mxu1 }
 0x179   : > { %1058 = vst.msk [vmem:[%s2196_s4 + $0xe0] sm:$0xff] %vm1029_vm3, %v887_v60  ;;  %1090 = vst.msk [vmem:[%s2196_s4 + $0x1e0] sm:$0xff] %vm1029_vm3, %v1015_v61  ;;  %v890_v2 = vadd.f32 %v2192_v15, %v889_v0  ;;  %v1018_v3 = vadd.f32 %v2192_v15, %v1017_v1  ;;  %v891_v4 = vpop.f32.mrb[59].mxu0  ;;  %v1019_v5 = vpop.f32.mrb[59].mxu1 }
 0x17b   : > { %1059 = vst.msk [vmem:[%s2196_s4 + $0xe8] sm:$0xff] %vm1029_vm3, %v890_v2  ;;  %1091 = vst.msk [vmem:[%s2196_s4 + $0x1e8] sm:$0xff] %vm1029_vm3, %v1018_v3 }
 0x17d   : > { %1100 = sbr.rel (!%p2048_p4) target bundleno = 460 (0x1cc), region = 36 }
 0x17e   : > { %v894_v6 = vpop.f32.mrb[60].mxu0  ;;  %v1022_v7 = vpop.f32.mrb[60].mxu1 }
 0x17f   : > { %v895_v8 = vadd.f32 %v2192_v15, %v894_v6  ;;  %v1023_v9 = vadd.f32 %v2192_v15, %v1022_v7  ;;  %v896_v10 = vpop.f32.mrb[61].mxu0  ;;  %v1024_v11 = vpop.f32.mrb[61].mxu1 }
 0x180   : > { %v897_v12 = vpop.f32.mrb[62].mxu0  ;;  %v1025_v13 = vpop.f32.mrb[62].mxu1 }
 0x181   : > { %1060 = vst.msk [vmem:[%s2196_s4 + $0xf0] sm:$0xff] %vm1029_vm3, %v895_v8  ;;  %1092 = vst.msk [vmem:[%s2196_s4 + $0x1f0] sm:$0xff] %vm1029_vm3, %v1023_v9  ;;  %v898_v14 = vadd.f32 %v2192_v15, %v897_v12  ;;  %v1026_v16 = vadd.f32 %v2192_v15, %v1025_v13  ;;  %v899_v17 = vpop.f32.mrb[63].mxu0  ;;  %v1027_v18 = vpop.f32.mrb[63].mxu1 }
 0x183   : > { %1061 = vst.msk [vmem:[%s2196_s4 + $0xf8] sm:$0xff] %vm1029_vm3, %v898_v14  ;;  %1093 = vst.msk [vmem:[%s2196_s4 + $0x1f8] sm:$0xff] %vm1029_vm3, %v1026_v16 }
 0x184   : > { %s2608_s12 = smov (!%p1103_p8, %s1102_s12), 64 }
 0x185   : > { %s1678_s9 = sshll.u32 %s2608_s12, 7 }
 0x186   : > { %p1681_p9 = scmp.eq.s32.totalorder %s1678_s9, 0 }
 0x187   : > { %s2401_s10 = sshrl.u32 (!%p1681_p9), %s2608_s12, 6 }
 0x188   : > { %1111 = sbr.rel (%p1681_p9) target bundleno = 460 (0x1cc), region = 40  ;;  %p1682_p10 = scmp.le.s32.totalorder (!%p1681_p9), %s2401_s10, 0 }
 0x18f   : > { %1517 = sbr.rel (%p1682_p10) target bundleno = 439 (0x1b7), region = 116  ;;  %s2599_s15 = smov (!%p1682_p10), %s2395_s8 }
 0x190   : > { %s2600_s20 = smov (!%p1682_p10), %s2196_s4  ;;  %s2410_s27 = smov (!%p1682_p10), 0  }
 0x191   : > { %s2412_s11 = smov (!%p1682_p10), 0  }
 0x196 LB: >> { %v1299_v15 = vld [vmem:[%s1975_s20] sm:$0xff]  ;;  %v1301_v19 = vld [vmem:[%s1975_s20 + $0x8] sm:$0xff]  ;;  %v1303_v20 = vld [vmem:[%s1975_s20 + $0x10] sm:$0xff]  ;;  %s1427_s14 = sadd.s32 1, %s1979_s27  ;;  %s1293_s11 = sadd.s32 1, %s1983_s11   ;;  %s1983_s11 = sphi %s2412_s11, %s1293_s11   ;;  %s1979_s27 = sphi %s2410_s27, %s2603_s27   ;;  %s1975_s20 = sphi %s2600_s20, %s2602_s20   ;;  %s1971_s15 = sphi %s2599_s15, %s2601_s15  }
 0x197   : >> { %1300 = vst [vmem:[%s1971_s15] sm:$0xff] %v1299_v15  ;;  %1302 = vst [vmem:[%s1971_s15 + $0x8] sm:$0xff] %v1301_v19  ;;  %v1305_v21 = vld [vmem:[%s1975_s20 + $0x18] sm:$0xff]  ;;  %v1307_v22 = vld [vmem:[%s1975_s20 + $0x20] sm:$0xff]  ;;  %p1428_p11 = scmp.ge.s32.totalorder %s1427_s14, %s2401_s10  ;;  %p1292_p12 = scmp.ge.s32.totalorder %s1293_s11, %s2401_s10 }
 0x198   : >> { %1304 = vst [vmem:[%s1971_s15 + $0x10] sm:$0xff] %v1303_v20  ;;  %v1309_v23 = vld [vmem:[%s1975_s20 + $0x28] sm:$0xff]  ;;  %1306 = vst [vmem:[%s1971_s15 + $0x18] sm:$0xff] %v1305_v21  ;;  %v1311_v24 = vld [vmem:[%s1975_s20 + $0x30] sm:$0xff] }
 0x199   : >> { %1308 = vst [vmem:[%s1971_s15 + $0x20] sm:$0xff] %v1307_v22  ;;  %1310 = vst [vmem:[%s1971_s15 + $0x28] sm:$0xff] %v1309_v23  ;;  %v1313_v25 = vld [vmem:[%s1975_s20 + $0x38] sm:$0xff]  ;;  %v1315_v26 = vld [vmem:[%s1975_s20 + $0x40] sm:$0xff]  ;;  %s2610_s14 = smov (%p1428_p11, %s1427_s14), 0 }
 0x19a   : >> { %1312 = vst [vmem:[%s1971_s15 + $0x30] sm:$0xff] %v1311_v24  ;;  %1314 = vst [vmem:[%s1971_s15 + $0x38] sm:$0xff] %v1313_v25  ;;  %v1317_v27 = vld [vmem:[%s1975_s20 + $0x48] sm:$0xff]  ;;  %v1319_v28 = vld [vmem:[%s1975_s20 + $0x50] sm:$0xff]  ;;  %s1683_s17 = sshll.u32 %s2610_s14, 9  ;;  %s2603_s27 = smov %s2610_s14 }
 0x19b   : >> { %1316 = vst [vmem:[%s1971_s15 + $0x40] sm:$0xff] %v1315_v26  ;;  %v1321_v29 = vld [vmem:[%s1975_s20 + $0x58] sm:$0xff]  ;;  %1318 = vst [vmem:[%s1971_s15 + $0x48] sm:$0xff] %v1317_v27  ;;  %v1323_v30 = vld [vmem:[%s1975_s20 + $0x60] sm:$0xff]  ;;  %s2468_s18 = scalar_lea.vmem %s2196_s4, %s1683_s17 [#allocation2]   ;;  %s2471_s21 = scalar_lea.vmem %s2395_s8, %s1683_s17  }
 0x19c   : >> { %1320 = vst [vmem:[%s1971_s15 + $0x50] sm:$0xff] %v1319_v28  ;;  %1322 = vst [vmem:[%s1971_s15 + $0x58] sm:$0xff] %v1321_v29  ;;  %v1325_v31 = vld [vmem:[%s1975_s20 + $0x68] sm:$0xff]  ;;  %v1327_v32 = vld [vmem:[%s1975_s20 + $0x70] sm:$0xff] }
 0x19d   : >> { %1324 = vst [vmem:[%s1971_s15 + $0x60] sm:$0xff] %v1323_v30  ;;  %1326 = vst [vmem:[%s1971_s15 + $0x68] sm:$0xff] %v1325_v31  ;;  %v1329_v33 = vld [vmem:[%s1975_s20 + $0x78] sm:$0xff]  ;;  %v1331_v34 = vld [vmem:[%s1975_s20 + $0x80] sm:$0xff] }
 0x19e   : >> { %1328 = vst [vmem:[%s1971_s15 + $0x70] sm:$0xff] %v1327_v32  ;;  %v1333_v35 = vld [vmem:[%s1975_s20 + $0x88] sm:$0xff]  ;;  %1330 = vst [vmem:[%s1971_s15 + $0x78] sm:$0xff] %v1329_v33  ;;  %v1335_v36 = vld [vmem:[%s1975_s20 + $0x90] sm:$0xff] }
 0x19f   : >> { %1332 = vst [vmem:[%s1971_s15 + $0x80] sm:$0xff] %v1331_v34  ;;  %1334 = vst [vmem:[%s1971_s15 + $0x88] sm:$0xff] %v1333_v35  ;;  %v1337_v37 = vld [vmem:[%s1975_s20 + $0x98] sm:$0xff]  ;;  %v1339_v38 = vld [vmem:[%s1975_s20 + $0xa0] sm:$0xff] }
 0x1a0   : >> { %1336 = vst [vmem:[%s1971_s15 + $0x90] sm:$0xff] %v1335_v36  ;;  %1338 = vst [vmem:[%s1971_s15 + $0x98] sm:$0xff] %v1337_v37  ;;  %v1341_v39 = vld [vmem:[%s1975_s20 + $0xa8] sm:$0xff]  ;;  %v1343_v40 = vld [vmem:[%s1975_s20 + $0xb0] sm:$0xff] }
 0x1a1   : >> { %1340 = vst [vmem:[%s1971_s15 + $0xa0] sm:$0xff] %v1339_v38  ;;  %v1345_v41 = vld [vmem:[%s1975_s20 + $0xb8] sm:$0xff]  ;;  %1342 = vst [vmem:[%s1971_s15 + $0xa8] sm:$0xff] %v1341_v39  ;;  %v1347_v42 = vld [vmem:[%s1975_s20 + $0xc0] sm:$0xff] }
 0x1a2   : >> { %1344 = vst [vmem:[%s1971_s15 + $0xb0] sm:$0xff] %v1343_v40  ;;  %1346 = vst [vmem:[%s1971_s15 + $0xb8] sm:$0xff] %v1345_v41  ;;  %v1349_v43 = vld [vmem:[%s1975_s20 + $0xc8] sm:$0xff]  ;;  %v1351_v44 = vld [vmem:[%s1975_s20 + $0xd0] sm:$0xff] }
 0x1a3   : >> { %1348 = vst [vmem:[%s1971_s15 + $0xc0] sm:$0xff] %v1347_v42  ;;  %1350 = vst [vmem:[%s1971_s15 + $0xc8] sm:$0xff] %v1349_v43  ;;  %v1353_v45 = vld [vmem:[%s1975_s20 + $0xd8] sm:$0xff]  ;;  %v1355_v46 = vld [vmem:[%s1975_s20 + $0xe0] sm:$0xff] }
 0x1a4   : >> { %1352 = vst [vmem:[%s1971_s15 + $0xd0] sm:$0xff] %v1351_v44  ;;  %v1357_v47 = vld [vmem:[%s1975_s20 + $0xe8] sm:$0xff]  ;;  %1354 = vst [vmem:[%s1971_s15 + $0xd8] sm:$0xff] %v1353_v45  ;;  %v1359_v48 = vld [vmem:[%s1975_s20 + $0xf0] sm:$0xff] }
 0x1a5   : >> { %1356 = vst [vmem:[%s1971_s15 + $0xe0] sm:$0xff] %v1355_v46  ;;  %1358 = vst [vmem:[%s1971_s15 + $0xe8] sm:$0xff] %v1357_v47  ;;  %v1361_v49 = vld [vmem:[%s1975_s20 + $0xf8] sm:$0xff]  ;;  %v1363_v50 = vld [vmem:[%s1975_s20 + $0x100] sm:$0xff] }
 0x1a6   : >> { %1360 = vst [vmem:[%s1971_s15 + $0xf0] sm:$0xff] %v1359_v48  ;;  %1362 = vst [vmem:[%s1971_s15 + $0xf8] sm:$0xff] %v1361_v49  ;;  %v1365_v51 = vld [vmem:[%s1975_s20 + $0x108] sm:$0xff]  ;;  %v1367_v52 = vld [vmem:[%s1975_s20 + $0x110] sm:$0xff] }
 0x1a7   : >> { %1364 = vst [vmem:[%s1971_s15 + $0x100] sm:$0xff] %v1363_v50  ;;  %v1369_v53 = vld [vmem:[%s1975_s20 + $0x118] sm:$0xff]  ;;  %1366 = vst [vmem:[%s1971_s15 + $0x108] sm:$0xff] %v1365_v51  ;;  %v1371_v54 = vld [vmem:[%s1975_s20 + $0x120] sm:$0xff] }
 0x1a8   : >> { %1368 = vst [vmem:[%s1971_s15 + $0x110] sm:$0xff] %v1367_v52  ;;  %1370 = vst [vmem:[%s1971_s15 + $0x118] sm:$0xff] %v1369_v53  ;;  %v1373_v55 = vld [vmem:[%s1975_s20 + $0x128] sm:$0xff]  ;;  %v1375_v56 = vld [vmem:[%s1975_s20 + $0x130] sm:$0xff] }
 0x1a9   : >> { %1372 = vst [vmem:[%s1971_s15 + $0x120] sm:$0xff] %v1371_v54  ;;  %1374 = vst [vmem:[%s1971_s15 + $0x128] sm:$0xff] %v1373_v55  ;;  %v1377_v57 = vld [vmem:[%s1975_s20 + $0x138] sm:$0xff]  ;;  %v1379_v58 = vld [vmem:[%s1975_s20 + $0x140] sm:$0xff] }
 0x1aa   : >> { %1376 = vst [vmem:[%s1971_s15 + $0x130] sm:$0xff] %v1375_v56  ;;  %v1381_v59 = vld [vmem:[%s1975_s20 + $0x148] sm:$0xff]  ;;  %1378 = vst [vmem:[%s1971_s15 + $0x138] sm:$0xff] %v1377_v57  ;;  %v1383_v60 = vld [vmem:[%s1975_s20 + $0x150] sm:$0xff] }
 0x1ab   : >> { %1380 = vst [vmem:[%s1971_s15 + $0x140] sm:$0xff] %v1379_v58  ;;  %1382 = vst [vmem:[%s1971_s15 + $0x148] sm:$0xff] %v1381_v59  ;;  %v1385_v61 = vld [vmem:[%s1975_s20 + $0x158] sm:$0xff]  ;;  %v1387_v62 = vld [vmem:[%s1975_s20 + $0x160] sm:$0xff] }
 0x1ac   : >> { %1384 = vst [vmem:[%s1971_s15 + $0x150] sm:$0xff] %v1383_v60  ;;  %1386 = vst [vmem:[%s1971_s15 + $0x158] sm:$0xff] %v1385_v61  ;;  %v1389_v63 = vld [vmem:[%s1975_s20 + $0x168] sm:$0xff]  ;;  %v1391_v0 = vld [vmem:[%s1975_s20 + $0x170] sm:$0xff] }
 0x1ad   : >> { %1388 = vst [vmem:[%s1971_s15 + $0x160] sm:$0xff] %v1387_v62  ;;  %v1393_v1 = vld [vmem:[%s1975_s20 + $0x178] sm:$0xff]  ;;  %1390 = vst [vmem:[%s1971_s15 + $0x168] sm:$0xff] %v1389_v63  ;;  %v1395_v2 = vld [vmem:[%s1975_s20 + $0x180] sm:$0xff] }
 0x1ae   : >> { %1392 = vst [vmem:[%s1971_s15 + $0x170] sm:$0xff] %v1391_v0  ;;  %1394 = vst [vmem:[%s1971_s15 + $0x178] sm:$0xff] %v1393_v1  ;;  %v1397_v3 = vld [vmem:[%s1975_s20 + $0x188] sm:$0xff]  ;;  %v1399_v4 = vld [vmem:[%s1975_s20 + $0x190] sm:$0xff] }
 0x1af   : >> { %1396 = vst [vmem:[%s1971_s15 + $0x180] sm:$0xff] %v1395_v2  ;;  %1398 = vst [vmem:[%s1971_s15 + $0x188] sm:$0xff] %v1397_v3  ;;  %v1401_v5 = vld [vmem:[%s1975_s20 + $0x198] sm:$0xff]  ;;  %v1403_v6 = vld [vmem:[%s1975_s20 + $0x1a0] sm:$0xff] }
 0x1b0   : >> { %1400 = vst [vmem:[%s1971_s15 + $0x190] sm:$0xff] %v1399_v4  ;;  %v1405_v7 = vld [vmem:[%s1975_s20 + $0x1a8] sm:$0xff]  ;;  %1402 = vst [vmem:[%s1971_s15 + $0x198] sm:$0xff] %v1401_v5  ;;  %v1407_v8 = vld [vmem:[%s1975_s20 + $0x1b0] sm:$0xff]  ;;  %1295 = sbr.rel (!%p1292_p12) target bundleno = 406 (0x196), region = 122 }
 0x1b1   : >> { %1404 = vst [vmem:[%s1971_s15 + $0x1a0] sm:$0xff] %v1403_v6  ;;  %1406 = vst [vmem:[%s1971_s15 + $0x1a8] sm:$0xff] %v1405_v7  ;;  %v1409_v9 = vld [vmem:[%s1975_s20 + $0x1b8] sm:$0xff]  ;;  %v1411_v10 = vld [vmem:[%s1975_s20 + $0x1c0] sm:$0xff] }
 0x1b2   : >> { %1408 = vst [vmem:[%s1971_s15 + $0x1b0] sm:$0xff] %v1407_v8  ;;  %1410 = vst [vmem:[%s1971_s15 + $0x1b8] sm:$0xff] %v1409_v9  ;;  %v1413_v11 = vld [vmem:[%s1975_s20 + $0x1c8] sm:$0xff]  ;;  %v1415_v12 = vld [vmem:[%s1975_s20 + $0x1d0] sm:$0xff] }
 0x1b3   : >> { %1412 = vst [vmem:[%s1971_s15 + $0x1c0] sm:$0xff] %v1411_v10  ;;  %v1417_v13 = vld [vmem:[%s1975_s20 + $0x1d8] sm:$0xff]  ;;  %1414 = vst [vmem:[%s1971_s15 + $0x1c8] sm:$0xff] %v1413_v11  ;;  %v1419_v14 = vld [vmem:[%s1975_s20 + $0x1e0] sm:$0xff] }
 0x1b4   : >> { %1416 = vst [vmem:[%s1971_s15 + $0x1d0] sm:$0xff] %v1415_v12  ;;  %1418 = vst [vmem:[%s1971_s15 + $0x1d8] sm:$0xff] %v1417_v13  ;;  %v1421_v16 = vld [vmem:[%s1975_s20 + $0x1e8] sm:$0xff]  ;;  %v1423_v17 = vld [vmem:[%s1975_s20 + $0x1f0] sm:$0xff] }
 0x1b5   : >> { %1420 = vst [vmem:[%s1971_s15 + $0x1e0] sm:$0xff] %v1419_v14  ;;  %1422 = vst [vmem:[%s1971_s15 + $0x1e8] sm:$0xff] %v1421_v16  ;;  %v1425_v18 = vld [vmem:[%s1975_s20 + $0x1f8] sm:$0xff]  ;;  %s2602_s20 = smov %s2468_s18 }
 0x1b6   : >> { %1424 = vst [vmem:[%s1971_s15 + $0x1f0] sm:$0xff] %v1423_v17  ;;  %1426 = vst [vmem:[%s1971_s15 + $0x1f8] sm:$0xff] %v1425_v18  ;;  %s2601_s15 = smov %s2471_s21 }
 0x1b7 PF: > { %s2576_s22 = sand.u32 63, %s2608_s12   ;;  %s1695_s23 = sshll.u32 %s2401_s10, 9 }
 0x1b8   : > { %s1438_s24 = scalar_lea.vmem %s2196_s4, %s1695_s23 [#allocation2]   ;;  %s1440_s25 = scalar_lea.vmem %s2395_s8, %s1695_s23  }
 0x1b9   : > { %p1688_p13 = scmp.le.s32.totalorder %s2576_s22, 0 }
 0x1ba   : > { %s1985_s26 = smov (!%p1688_p13), %s1440_s25   ;;  %s1989_s28 = smov (!%p1688_p13), %s1438_s24  }
 0x1bb   : > { %1531 = sbr.rel (%p1688_p13) target bundleno = 460 (0x1cc), region = 127  ;;  %s1993_s29 = smov (!%p1688_p13), 0  }
 0x1bc   : > { %s1997_s30 = smov (!%p1688_p13), 0  }
 0x1c2 LB: >> { %v1450_v15 = vld [vmem:[%s1991_s28] sm:$0xff]  ;;  %s1452_s12 = sadd.s32 1, %s1995_s29  ;;  %s1444_s30 = sadd.s32 1, %s1999_s30   ;;  %s1999_s30 = sphi %s1997_s30, %s1444_s30   ;;  %s1995_s29 = sphi %s1993_s29, %s1994_s29   ;;  %s1991_s28 = sphi %s1989_s28, %s1457_s28   ;;  %s1987_s26 = sphi %s1985_s26, %s1458_s26  }
 0x1c3   : >> { %1451 = vst [vmem:[%s1987_s26] sm:$0xff] %v1450_v15  ;;  %p1453_p0 = scmp.ge.s32.totalorder %s1452_s12, %s2576_s22  ;;  %p1443_p1 = scmp.ge.s32.totalorder %s1444_s30, %s2576_s22 }
 0x1c5   : >> { %s2612_s12 = smov (%p1453_p0, %s1452_s12), 0  ;;  %1446 = sbr.rel (!%p1443_p1) target bundleno = 450 (0x1c2), region = 133 }
 0x1c6   : >> { %s1689_s4 = sshll.u32 %s2612_s12, 3  ;;  %s1994_s29 = smov %s2612_s12  }
 0x1c7   : >> { %s1457_s28 = scalar_lea.vmem %s1438_s24, %s1689_s4 [#allocation2]   ;;  %s1458_s26 = scalar_lea.vmem %s1440_s25, %s1689_s4  }
 0x1cc PF: > { %p10_p2 = scmp.ge.s32.totalorder %s2038_s16, 61   ;;  %s2604_s12 = smov %s1963_s13 }
 0x1cd   : > { %s2605_s13 = smov %s2046_s19  ;;  %s2606_s14 = smov %s2038_s16 }
 0x1ce   :  { %12 = sbr.rel (!%p10_p2) target bundleno = 2 (0x2), region = 144 }

// kernel: net_forward.10
= control target key start
LH: loop header
LB: loop body
LE: loop exit
PB: predicated region body
PF: predicated region fallthrough
CT: control target
= control target key end

     0   :  { %vm403_vm0 = vcmask 400384   ;;  %vm449_vm1 = vcmask 394240   ;;  %s1215_s0 = inlined_call_operand.vmem [shape: f32[122,305], index: 0, kind: input, shape index: {}]   ;;  %s1216_s1 = inlined_call_operand.vmem [shape: f32[122,305], index: 1, kind: input, shape index: {}]   ;;  %s1217_s2 = inlined_call_operand.vmem [shape: f32[122,305], index: 2, kind: input, shape index: {}]   ;;  %s1218_s3 = inlined_call_operand.vmem [shape: f32[122,305], index: 3, kind: input, shape index: {}]   ;;  %s1219_s4 = inlined_call_operand.vmem [shape: f32[122,305], index: 4, kind: output, shape index: {}]  }
   0x1   :  { %v17_v0 = vld [vmem:[%s1215_s0] sm:$0xff]  ;;  %v18_v5 = vld [vmem:[%s1215_s0 + $0x8] sm:$0xff]  ;;  %v19_v11 = vld [vmem:[%s1215_s0 + $0x10] sm:$0xff] }
   0x2   :  { %v65_v1 = vld [vmem:[%s1216_s1] sm:$0xff]  ;;  %v66_v6 = vld [vmem:[%s1216_s1 + $0x8] sm:$0xff]  ;;  %v67_v13 = vld [vmem:[%s1216_s1 + $0x10] sm:$0xff] }
   0x3   :  { %v161_v2 = vld [vmem:[%s1217_s2] sm:$0xff]  ;;  %v113_v3 = vmax.f32 %v17_v0, %v65_v1  ;;  %v114_v8 = vmax.f32 %v18_v5, %v66_v6  ;;  %v162_v9 = vld [vmem:[%s1217_s2 + $0x8] sm:$0xff]  ;;  %v163_v14 = vld [vmem:[%s1217_s2 + $0x10] sm:$0xff]  ;;  %v115_v17 = vmax.f32 %v19_v11, %v67_v13 }
   0x4   :  { %v209_v4 = vld [vmem:[%s1218_s3] sm:$0xff]  ;;  %v210_v10 = vld [vmem:[%s1218_s3 + $0x8] sm:$0xff]  ;;  %v211_v15 = vld [vmem:[%s1218_s3 + $0x10] sm:$0xff] }
   0x5   :  { %v257_v7 = vmax.f32 %v161_v2, %v209_v4  ;;  %v258_v12 = vmax.f32 %v162_v9, %v210_v10  ;;  %v259_v18 = vmax.f32 %v163_v14, %v211_v15  ;;  %v20_v19 = vld [vmem:[%s1215_s0 + $0x18] sm:$0xff]  ;;  %v21_v25 = vld [vmem:[%s1215_s0 + $0x20] sm:$0xff]  ;;  %v22_v33 = vld [vmem:[%s1215_s0 + $0x28] sm:$0xff] }
   0x6   :  { %v68_v20 = vld [vmem:[%s1216_s1 + $0x18] sm:$0xff]  ;;  %v69_v26 = vld [vmem:[%s1216_s1 + $0x20] sm:$0xff]  ;;  %v70_v36 = vld [vmem:[%s1216_s1 + $0x28] sm:$0xff] }
   0x7   :  { %v305_v16 = vmax.f32 %v113_v3, %v257_v7  ;;  %v164_v21 = vld [vmem:[%s1217_s2 + $0x18] sm:$0xff]  ;;  %v306_v22 = vmax.f32 %v114_v8, %v258_v12  ;;  %v116_v23 = vmax.f32 %v20_v19, %v68_v20  ;;  %v307_v28 = vmax.f32 %v115_v17, %v259_v18  ;;  %v165_v31 = vld [vmem:[%s1217_s2 + $0x20] sm:$0xff]  ;;  %v166_v37 = vld [vmem:[%s1217_s2 + $0x28] sm:$0xff] }
   0x8   :  { %v212_v24 = vld [vmem:[%s1218_s3 + $0x18] sm:$0xff]  ;;  %v117_v30 = vmax.f32 %v21_v25, %v69_v26  ;;  %v213_v32 = vld [vmem:[%s1218_s3 + $0x20] sm:$0xff]  ;;  %v214_v38 = vld [vmem:[%s1218_s3 + $0x28] sm:$0xff]  ;;  %v118_v41 = vmax.f32 %v22_v33, %v70_v36 }
   0x9   :  { %v353_v27 = vmax.f32 %v305_v16, 0.0  ;;  %v260_v29 = vmax.f32 %v164_v21, %v212_v24  ;;  %v354_v34 = vmax.f32 %v306_v22, 0.0  ;;  %v261_v35 = vmax.f32 %v165_v31, %v213_v32  ;;  %v23_v43 = vld [vmem:[%s1215_s0 + $0x30] sm:$0xff]  ;;  %v24_v49 = vld [vmem:[%s1215_s0 + $0x38] sm:$0xff]  ;;  %v25_v57 = vld [vmem:[%s1215_s0 + $0x40] sm:$0xff] }
   0xa   :  { %v355_v39 = vmax.f32 %v307_v28, 0.0  ;;  %v262_v42 = vmax.f32 %v166_v37, %v214_v38  ;;  %v71_v44 = vld [vmem:[%s1216_s1 + $0x30] sm:$0xff]  ;;  %v72_v50 = vld [vmem:[%s1216_s1 + $0x38] sm:$0xff]  ;;  %v73_v60 = vld [vmem:[%s1216_s1 + $0x40] sm:$0xff] }
   0xb   :  { %401 = vst [vmem:[%s1219_s4] sm:$0xff] %v353_v27  ;;  %v308_v40 = vmax.f32 %v116_v23, %v260_v29  ;;  %v167_v45 = vld [vmem:[%s1217_s2 + $0x30] sm:$0xff]  ;;  %402 = vst [vmem:[%s1219_s4 + $0x8] sm:$0xff] %v354_v34  ;;  %v309_v46 = vmax.f32 %v117_v30, %v261_v35  ;;  %v119_v47 = vmax.f32 %v23_v43, %v71_v44  ;;  %v168_v55 = vld [vmem:[%s1217_s2 + $0x38] sm:$0xff] }
   0xc   :  { %v215_v48 = vld [vmem:[%s1218_s3 + $0x30] sm:$0xff]  ;;  %404 = vst.msk [vmem:[%s1219_s4 + $0x10] sm:$0xff] %vm403_vm0, %v355_v39  ;;  %v310_v52 = vmax.f32 %v118_v41, %v262_v42  ;;  %v120_v54 = vmax.f32 %v24_v49, %v72_v50  ;;  %v216_v56 = vld [vmem:[%s1218_s3 + $0x38] sm:$0xff]  ;;  %v169_v61 = vld [vmem:[%s1217_s2 + $0x40] sm:$0xff]  ;;  %v121_v1 = vmax.f32 %v25_v57, %v73_v60 }
   0xd   :  { %v356_v51 = vmax.f32 %v308_v40, 0.0  ;;  %v263_v53 = vmax.f32 %v167_v45, %v215_v48  ;;  %v357_v58 = vmax.f32 %v309_v46, 0.0  ;;  %v264_v59 = vmax.f32 %v168_v55, %v216_v56  ;;  %v217_v62 = vld [vmem:[%s1218_s3 + $0x40] sm:$0xff]  ;;  %v26_v3 = vld [vmem:[%s1215_s0 + $0x48] sm:$0xff]  ;;  %v27_v9 = vld [vmem:[%s1215_s0 + $0x50] sm:$0xff] }
   0xe   :  { %v358_v63 = vmax.f32 %v310_v52, 0.0  ;;  %v265_v2 = vmax.f32 %v169_v61, %v217_v62  ;;  %v74_v4 = vld [vmem:[%s1216_s1 + $0x48] sm:$0xff]  ;;  %v75_v10 = vld [vmem:[%s1216_s1 + $0x50] sm:$0xff]  ;;  %v28_v17 = vld [vmem:[%s1215_s0 + $0x58] sm:$0xff] }
   0xf   :  { %405 = vst [vmem:[%s1219_s4 + $0x18] sm:$0xff] %v356_v51  ;;  %v311_v0 = vmax.f32 %v119_v47, %v263_v53  ;;  %v170_v5 = vld [vmem:[%s1217_s2 + $0x48] sm:$0xff]  ;;  %406 = vst [vmem:[%s1219_s4 + $0x20] sm:$0xff] %v357_v58  ;;  %v312_v6 = vmax.f32 %v120_v54, %v264_v59  ;;  %v122_v7 = vmax.f32 %v26_v3, %v74_v4  ;;  %v171_v15 = vld [vmem:[%s1217_s2 + $0x50] sm:$0xff] }
  0x10   :  { %v218_v8 = vld [vmem:[%s1218_s3 + $0x48] sm:$0xff]  ;;  %407 = vst.msk [vmem:[%s1219_s4 + $0x28] sm:$0xff] %vm403_vm0, %v358_v63  ;;  %v313_v12 = vmax.f32 %v121_v1, %v265_v2  ;;  %v123_v14 = vmax.f32 %v27_v9, %v75_v10  ;;  %v219_v16 = vld [vmem:[%s1218_s3 + $0x50] sm:$0xff]  ;;  %v76_v20 = vld [vmem:[%s1216_s1 + $0x58] sm:$0xff] }
  0x11   :  { %v359_v11 = vmax.f32 %v311_v0, 0.0  ;;  %v266_v13 = vmax.f32 %v170_v5, %v218_v8  ;;  %v360_v18 = vmax.f32 %v312_v6, 0.0  ;;  %v267_v19 = vmax.f32 %v171_v15, %v219_v16  ;;  %v172_v21 = vld [vmem:[%s1217_s2 + $0x58] sm:$0xff]  ;;  %v29_v27 = vld [vmem:[%s1215_s0 + $0x60] sm:$0xff]  ;;  %v30_v33 = vld [vmem:[%s1215_s0 + $0x68] sm:$0xff] }
  0x12   :  { %v220_v22 = vld [vmem:[%s1218_s3 + $0x58] sm:$0xff]  ;;  %v361_v23 = vmax.f32 %v313_v12, 0.0  ;;  %v124_v25 = vmax.f32 %v28_v17, %v76_v20  ;;  %v77_v28 = vld [vmem:[%s1216_s1 + $0x60] sm:$0xff]  ;;  %v78_v34 = vld [vmem:[%s1216_s1 + $0x68] sm:$0xff] }
  0x13   :  { %408 = vst [vmem:[%s1219_s4 + $0x30] sm:$0xff] %v359_v11  ;;  %v314_v24 = vmax.f32 %v122_v7, %v266_v13  ;;  %v268_v26 = vmax.f32 %v172_v21, %v220_v22  ;;  %v173_v29 = vld [vmem:[%s1217_s2 + $0x60] sm:$0xff]  ;;  %409 = vst [vmem:[%s1219_s4 + $0x38] sm:$0xff] %v360_v18  ;;  %v315_v30 = vmax.f32 %v123_v14, %v267_v19  ;;  %v174_v39 = vld [vmem:[%s1217_s2 + $0x68] sm:$0xff] }
  0x14   :  { %v125_v31 = vmax.f32 %v29_v27, %v77_v28  ;;  %v221_v32 = vld [vmem:[%s1218_s3 + $0x60] sm:$0xff]  ;;  %410 = vst.msk [vmem:[%s1219_s4 + $0x40] sm:$0xff] %vm403_vm0, %v361_v23  ;;  %v126_v38 = vmax.f32 %v30_v33, %v78_v34  ;;  %v222_v40 = vld [vmem:[%s1218_s3 + $0x68] sm:$0xff]  ;;  %v31_v41 = vld [vmem:[%s1215_s0 + $0x70] sm:$0xff] }
  0x15   :  { %v362_v35 = vmax.f32 %v314_v24, 0.0  ;;  %v316_v36 = vmax.f32 %v124_v25, %v268_v26  ;;  %v269_v37 = vmax.f32 %v173_v29, %v221_v32  ;;  %v363_v42 = vmax.f32 %v315_v30, 0.0  ;;  %v79_v44 = vld [vmem:[%s1216_s1 + $0x70] sm:$0xff]  ;;  %v32_v51 = vld [vmem:[%s1215_s0 + $0x78] sm:$0xff]  ;;  %v33_v57 = vld [vmem:[%s1215_s0 + $0x80] sm:$0xff] }
  0x16   :  { %v270_v43 = vmax.f32 %v174_v39, %v222_v40  ;;  %v175_v45 = vld [vmem:[%s1217_s2 + $0x70] sm:$0xff]  ;;  %v127_v49 = vmax.f32 %v31_v41, %v79_v44  ;;  %v80_v52 = vld [vmem:[%s1216_s1 + $0x78] sm:$0xff]  ;;  %v81_v58 = vld [vmem:[%s1216_s1 + $0x80] sm:$0xff] }
  0x17   :  { %v223_v46 = vld [vmem:[%s1218_s3 + $0x70] sm:$0xff]  ;;  %411 = vst [vmem:[%s1219_s4 + $0x48] sm:$0xff] %v362_v35  ;;  %v364_v47 = vmax.f32 %v316_v36, 0.0  ;;  %v317_v48 = vmax.f32 %v125_v31, %v269_v37  ;;  %v176_v53 = vld [vmem:[%s1217_s2 + $0x78] sm:$0xff]  ;;  %412 = vst [vmem:[%s1219_s4 + $0x50] sm:$0xff] %v363_v42  ;;  %v128_v55 = vmax.f32 %v32_v51, %v80_v52  ;;  %v129_v62 = vmax.f32 %v33_v57, %v81_v58 }
  0x18   :  { %v271_v50 = vmax.f32 %v175_v45, %v223_v46  ;;  %v318_v54 = vmax.f32 %v126_v38, %v270_v43  ;;  %v224_v56 = vld [vmem:[%s1218_s3 + $0x78] sm:$0xff]  ;;  %v177_v63 = vld [vmem:[%s1217_s2 + $0x80] sm:$0xff]  ;;  %v34_v1 = vld [vmem:[%s1215_s0 + $0x88] sm:$0xff] }
  0x19   :  { %413 = vst.msk [vmem:[%s1219_s4 + $0x58] sm:$0xff] %vm403_vm0, %v364_v47  ;;  %v365_v59 = vmax.f32 %v317_v48, 0.0  ;;  %v272_v61 = vmax.f32 %v176_v53, %v224_v56  ;;  %v225_v0 = vld [vmem:[%s1218_s3 + $0x80] sm:$0xff]  ;;  %v82_v4 = vld [vmem:[%s1216_s1 + $0x88] sm:$0xff]  ;;  %v35_v11 = vld [vmem:[%s1215_s0 + $0x90] sm:$0xff] }
  0x1a   :  { %v319_v60 = vmax.f32 %v127_v49, %v271_v50  ;;  %v366_v2 = vmax.f32 %v318_v54, 0.0  ;;  %v273_v3 = vmax.f32 %v177_v63, %v225_v0  ;;  %v178_v5 = vld [vmem:[%s1217_s2 + $0x88] sm:$0xff]  ;;  %v130_v9 = vmax.f32 %v34_v1, %v82_v4  ;;  %v83_v12 = vld [vmem:[%s1216_s1 + $0x90] sm:$0xff]  ;;  %v36_v17 = vld [vmem:[%s1215_s0 + $0x98] sm:$0xff] }
  0x1b   :  { %v226_v6 = vld [vmem:[%s1218_s3 + $0x88] sm:$0xff]  ;;  %414 = vst [vmem:[%s1219_s4 + $0x60] sm:$0xff] %v365_v59  ;;  %v320_v8 = vmax.f32 %v128_v55, %v272_v61  ;;  %v179_v13 = vld [vmem:[%s1217_s2 + $0x90] sm:$0xff]  ;;  %v131_v15 = vmax.f32 %v35_v11, %v83_v12  ;;  %v84_v18 = vld [vmem:[%s1216_s1 + $0x98] sm:$0xff] }
  0x1c   :  { %v367_v7 = vmax.f32 %v319_v60, 0.0  ;;  %v274_v10 = vmax.f32 %v178_v5, %v226_v6  ;;  %415 = vst [vmem:[%s1219_s4 + $0x68] sm:$0xff] %v366_v2  ;;  %v321_v14 = vmax.f32 %v129_v62, %v273_v3  ;;  %v227_v16 = vld [vmem:[%s1218_s3 + $0x90] sm:$0xff]  ;;  %v132_v22 = vmax.f32 %v36_v17, %v84_v18  ;;  %v180_v23 = vld [vmem:[%s1217_s2 + $0x98] sm:$0xff]  ;;  %v37_v25 = vld [vmem:[%s1215_s0 + $0xa0] sm:$0xff] }
  0x1d   :  { %v368_v19 = vmax.f32 %v320_v8, 0.0  ;;  %v275_v21 = vmax.f32 %v179_v13, %v227_v16  ;;  %v228_v24 = vld [vmem:[%s1218_s3 + $0x98] sm:$0xff]  ;;  %v85_v28 = vld [vmem:[%s1216_s1 + $0xa0] sm:$0xff]  ;;  %v38_v35 = vld [vmem:[%s1215_s0 + $0xa8] sm:$0xff] }
  0x1e   :  { %416 = vst.msk [vmem:[%s1219_s4 + $0x70] sm:$0xff] %vm403_vm0, %v367_v7  ;;  %v322_v20 = vmax.f32 %v130_v9, %v274_v10  ;;  %v369_v26 = vmax.f32 %v321_v14, 0.0  ;;  %v276_v27 = vmax.f32 %v180_v23, %v228_v24  ;;  %v181_v29 = vld [vmem:[%s1217_s2 + $0xa0] sm:$0xff]  ;;  %v133_v33 = vmax.f32 %v37_v25, %v85_v28  ;;  %v86_v36 = vld [vmem:[%s1216_s1 + $0xa8] sm:$0xff]  ;;  %v39_v41 = vld [vmem:[%s1215_s0 + $0xb0] sm:$0xff] }
  0x1f   :  { %v229_v30 = vld [vmem:[%s1218_s3 + $0xa0] sm:$0xff]  ;;  %417 = vst [vmem:[%s1219_s4 + $0x78] sm:$0xff] %v368_v19  ;;  %v323_v32 = vmax.f32 %v131_v15, %v275_v21  ;;  %v182_v37 = vld [vmem:[%s1217_s2 + $0xa8] sm:$0xff]  ;;  %v134_v39 = vmax.f32 %v38_v35, %v86_v36  ;;  %v87_v42 = vld [vmem:[%s1216_s1 + $0xb0] sm:$0xff] }
  0x20   :  { %v370_v31 = vmax.f32 %v322_v20, 0.0  ;;  %v277_v34 = vmax.f32 %v181_v29, %v229_v30  ;;  %418 = vst [vmem:[%s1219_s4 + $0x80] sm:$0xff] %v369_v26  ;;  %v324_v38 = vmax.f32 %v132_v22, %v276_v27  ;;  %v230_v40 = vld [vmem:[%s1218_s3 + $0xa8] sm:$0xff]  ;;  %v135_v46 = vmax.f32 %v39_v41, %v87_v42  ;;  %v183_v47 = vld [vmem:[%s1217_s2 + $0xb0] sm:$0xff]  ;;  %v40_v49 = vld [vmem:[%s1215_s0 + $0xb8] sm:$0xff] }
  0x21   :  { %v371_v43 = vmax.f32 %v323_v32, 0.0  ;;  %v278_v45 = vmax.f32 %v182_v37, %v230_v40  ;;  %v231_v48 = vld [vmem:[%s1218_s3 + $0xb0] sm:$0xff]  ;;  %v88_v52 = vld [vmem:[%s1216_s1 + $0xb8] sm:$0xff]  ;;  %v41_v59 = vld [vmem:[%s1215_s0 + $0xc0] sm:$0xff] }
  0x22   :  { %419 = vst.msk [vmem:[%s1219_s4 + $0x88] sm:$0xff] %vm403_vm0, %v370_v31  ;;  %v325_v44 = vmax.f32 %v133_v33, %v277_v34  ;;  %v372_v50 = vmax.f32 %v324_v38, 0.0  ;;  %v279_v51 = vmax.f32 %v183_v47, %v231_v48  ;;  %v184_v53 = vld [vmem:[%s1217_s2 + $0xb8] sm:$0xff]  ;;  %v136_v57 = vmax.f32 %v40_v49, %v88_v52  ;;  %v89_v60 = vld [vmem:[%s1216_s1 + $0xc0] sm:$0xff]  ;;  %v42_v1 = vld [vmem:[%s1215_s0 + $0xc8] sm:$0xff] }
  0x23   :  { %v232_v54 = vld [vmem:[%s1218_s3 + $0xb8] sm:$0xff]  ;;  %420 = vst [vmem:[%s1219_s4 + $0x90] sm:$0xff] %v371_v43  ;;  %v326_v56 = vmax.f32 %v134_v39, %v278_v45  ;;  %v185_v61 = vld [vmem:[%s1217_s2 + $0xc0] sm:$0xff]  ;;  %v137_v63 = vmax.f32 %v41_v59, %v89_v60  ;;  %v90_v2 = vld [vmem:[%s1216_s1 + $0xc8] sm:$0xff] }
  0x24   :  { %v373_v55 = vmax.f32 %v325_v44, 0.0  ;;  %v280_v58 = vmax.f32 %v184_v53, %v232_v54  ;;  %421 = vst [vmem:[%s1219_s4 + $0x98] sm:$0xff] %v372_v50  ;;  %v327_v62 = vmax.f32 %v135_v46, %v279_v51  ;;  %v233_v0 = vld [vmem:[%s1218_s3 + $0xc0] sm:$0xff]  ;;  %v138_v6 = vmax.f32 %v42_v1, %v90_v2  ;;  %v186_v7 = vld [vmem:[%s1217_s2 + $0xc8] sm:$0xff]  ;;  %v43_v9 = vld [vmem:[%s1215_s0 + $0xd0] sm:$0xff] }
  0x25   :  { %v374_v3 = vmax.f32 %v326_v56, 0.0  ;;  %v281_v5 = vmax.f32 %v185_v61, %v233_v0  ;;  %v234_v8 = vld [vmem:[%s1218_s3 + $0xc8] sm:$0xff]  ;;  %v91_v12 = vld [vmem:[%s1216_s1 + $0xd0] sm:$0xff]  ;;  %v44_v19 = vld [vmem:[%s1215_s0 + $0xd8] sm:$0xff] }
  0x26   :  { %422 = vst.msk [vmem:[%s1219_s4 + $0xa0] sm:$0xff] %vm403_vm0, %v373_v55  ;;  %v328_v4 = vmax.f32 %v136_v57, %v280_v58  ;;  %v375_v10 = vmax.f32 %v327_v62, 0.0  ;;  %v282_v11 = vmax.f32 %v186_v7, %v234_v8  ;;  %v187_v13 = vld [vmem:[%s1217_s2 + $0xd0] sm:$0xff]  ;;  %v139_v17 = vmax.f32 %v43_v9, %v91_v12  ;;  %v92_v20 = vld [vmem:[%s1216_s1 + $0xd8] sm:$0xff]  ;;  %v45_v25 = vld [vmem:[%s1215_s0 + $0xe0] sm:$0xff] }
  0x27   :  { %v235_v14 = vld [vmem:[%s1218_s3 + $0xd0] sm:$0xff]  ;;  %423 = vst [vmem:[%s1219_s4 + $0xa8] sm:$0xff] %v374_v3  ;;  %v329_v16 = vmax.f32 %v137_v63, %v281_v5  ;;  %v188_v21 = vld [vmem:[%s1217_s2 + $0xd8] sm:$0xff]  ;;  %v140_v23 = vmax.f32 %v44_v19, %v92_v20  ;;  %v93_v26 = vld [vmem:[%s1216_s1 + $0xe0] sm:$0xff] }
  0x28   :  { %v376_v15 = vmax.f32 %v328_v4, 0.0  ;;  %v283_v18 = vmax.f32 %v187_v13, %v235_v14  ;;  %424 = vst [vmem:[%s1219_s4 + $0xb0] sm:$0xff] %v375_v10  ;;  %v330_v22 = vmax.f32 %v138_v6, %v282_v11  ;;  %v236_v24 = vld [vmem:[%s1218_s3 + $0xd8] sm:$0xff]  ;;  %v141_v30 = vmax.f32 %v45_v25, %v93_v26  ;;  %v189_v31 = vld [vmem:[%s1217_s2 + $0xe0] sm:$0xff]  ;;  %v46_v33 = vld [vmem:[%s1215_s0 + $0xe8] sm:$0xff] }
  0x29   :  { %v377_v27 = vmax.f32 %v329_v16, 0.0  ;;  %v284_v29 = vmax.f32 %v188_v21, %v236_v24  ;;  %v237_v32 = vld [vmem:[%s1218_s3 + $0xe0] sm:$0xff]  ;;  %v94_v36 = vld [vmem:[%s1216_s1 + $0xe8] sm:$0xff]  ;;  %v47_v43 = vld [vmem:[%s1215_s0 + $0xf0] sm:$0xff] }
  0x2a   :  { %425 = vst.msk [vmem:[%s1219_s4 + $0xb8] sm:$0xff] %vm403_vm0, %v376_v15  ;;  %v331_v28 = vmax.f32 %v139_v17, %v283_v18  ;;  %v378_v34 = vmax.f32 %v330_v22, 0.0  ;;  %v285_v35 = vmax.f32 %v189_v31, %v237_v32  ;;  %v190_v37 = vld [vmem:[%s1217_s2 + $0xe8] sm:$0xff]  ;;  %v142_v41 = vmax.f32 %v46_v33, %v94_v36  ;;  %v95_v44 = vld [vmem:[%s1216_s1 + $0xf0] sm:$0xff]  ;;  %v48_v49 = vld [vmem:[%s1215_s0 + $0xf8] sm:$0xff] }
  0x2b   :  { %v238_v38 = vld [vmem:[%s1218_s3 + $0xe8] sm:$0xff]  ;;  %426 = vst [vmem:[%s1219_s4 + $0xc0] sm:$0xff] %v377_v27  ;;  %v332_v40 = vmax.f32 %v140_v23, %v284_v29  ;;  %v191_v45 = vld [vmem:[%s1217_s2 + $0xf0] sm:$0xff]  ;;  %v143_v47 = vmax.f32 %v47_v43, %v95_v44  ;;  %v96_v50 = vld [vmem:[%s1216_s1 + $0xf8] sm:$0xff] }
  0x2c   :  { %v379_v39 = vmax.f32 %v331_v28, 0.0  ;;  %v286_v42 = vmax.f32 %v190_v37, %v238_v38  ;;  %427 = vst [vmem:[%s1219_s4 + $0xc8] sm:$0xff] %v378_v34  ;;  %v333_v46 = vmax.f32 %v141_v30, %v285_v35  ;;  %v239_v48 = vld [vmem:[%s1218_s3 + $0xf0] sm:$0xff]  ;;  %v144_v54 = vmax.f32 %v48_v49, %v96_v50  ;;  %v192_v55 = vld [vmem:[%s1217_s2 + $0xf8] sm:$0xff]  ;;  %v49_v57 = vld [vmem:[%s1215_s0 + $0x100] sm:$0xff] }
  0x2d   :  { %v380_v51 = vmax.f32 %v332_v40, 0.0  ;;  %v287_v53 = vmax.f32 %v191_v45, %v239_v48  ;;  %v240_v56 = vld [vmem:[%s1218_s3 + $0xf8] sm:$0xff]  ;;  %v97_v60 = vld [vmem:[%s1216_s1 + $0x100] sm:$0xff]  ;;  %v50_v3 = vld [vmem:[%s1215_s0 + $0x108] sm:$0xff] }
  0x2e   :  { %428 = vst.msk [vmem:[%s1219_s4 + $0xd0] sm:$0xff] %vm403_vm0, %v379_v39  ;;  %v334_v52 = vmax.f32 %v142_v41, %v286_v42  ;;  %v381_v58 = vmax.f32 %v333_v46, 0.0  ;;  %v288_v59 = vmax.f32 %v192_v55, %v240_v56  ;;  %v193_v61 = vld [vmem:[%s1217_s2 + $0x100] sm:$0xff]  ;;  %v145_v1 = vmax.f32 %v49_v57, %v97_v60  ;;  %v98_v4 = vld [vmem:[%s1216_s1 + $0x108] sm:$0xff]  ;;  %v51_v9 = vld [vmem:[%s1215_s0 + $0x110] sm:$0xff] }
  0x2f   :  { %v241_v62 = vld [vmem:[%s1218_s3 + $0x100] sm:$0xff]  ;;  %429 = vst [vmem:[%s1219_s4 + $0xd8] sm:$0xff] %v380_v51  ;;  %v335_v0 = vmax.f32 %v143_v47, %v287_v53  ;;  %v194_v5 = vld [vmem:[%s1217_s2 + $0x108] sm:$0xff]  ;;  %v146_v7 = vmax.f32 %v50_v3, %v98_v4  ;;  %v99_v10 = vld [vmem:[%s1216_s1 + $0x110] sm:$0xff] }
  0x30   :  { %v382_v63 = vmax.f32 %v334_v52, 0.0  ;;  %v289_v2 = vmax.f32 %v193_v61, %v241_v62  ;;  %430 = vst [vmem:[%s1219_s4 + $0xe0] sm:$0xff] %v381_v58  ;;  %v336_v6 = vmax.f32 %v144_v54, %v288_v59  ;;  %v242_v8 = vld [vmem:[%s1218_s3 + $0x108] sm:$0xff]  ;;  %v147_v14 = vmax.f32 %v51_v9, %v99_v10  ;;  %v195_v15 = vld [vmem:[%s1217_s2 + $0x110] sm:$0xff]  ;;  %v52_v17 = vld [vmem:[%s1215_s0 + $0x118] sm:$0xff] }
  0x31   :  { %v383_v11 = vmax.f32 %v335_v0, 0.0  ;;  %v290_v13 = vmax.f32 %v194_v5, %v242_v8  ;;  %v243_v16 = vld [vmem:[%s1218_s3 + $0x110] sm:$0xff]  ;;  %v100_v20 = vld [vmem:[%s1216_s1 + $0x118] sm:$0xff]  ;;  %v53_v27 = vld [vmem:[%s1215_s0 + $0x120] sm:$0xff] }
  0x32   :  { %431 = vst.msk [vmem:[%s1219_s4 + $0xe8] sm:$0xff] %vm403_vm0, %v382_v63  ;;  %v337_v12 = vmax.f32 %v145_v1, %v289_v2  ;;  %v384_v18 = vmax.f32 %v336_v6, 0.0  ;;  %v291_v19 = vmax.f32 %v195_v15, %v243_v16  ;;  %v196_v21 = vld [vmem:[%s1217_s2 + $0x118] sm:$0xff]  ;;  %v148_v25 = vmax.f32 %v52_v17, %v100_v20  ;;  %v101_v28 = vld [vmem:[%s1216_s1 + $0x120] sm:$0xff]  ;;  %v54_v33 = vld [vmem:[%s1215_s0 + $0x128] sm:$0xff] }
  0x33   :  { %v244_v22 = vld [vmem:[%s1218_s3 + $0x118] sm:$0xff]  ;;  %432 = vst [vmem:[%s1219_s4 + $0xf0] sm:$0xff] %v383_v11  ;;  %v338_v24 = vmax.f32 %v146_v7, %v290_v13  ;;  %v197_v29 = vld [vmem:[%s1217_s2 + $0x120] sm:$0xff]  ;;  %v149_v31 = vmax.f32 %v53_v27, %v101_v28  ;;  %v102_v34 = vld [vmem:[%s1216_s1 + $0x128] sm:$0xff] }
  0x34   :  { %v385_v23 = vmax.f32 %v337_v12, 0.0  ;;  %v292_v26 = vmax.f32 %v196_v21, %v244_v22  ;;  %433 = vst [vmem:[%s1219_s4 + $0xf8] sm:$0xff] %v384_v18  ;;  %v339_v30 = vmax.f32 %v147_v14, %v291_v19  ;;  %v245_v32 = vld [vmem:[%s1218_s3 + $0x120] sm:$0xff]  ;;  %v150_v38 = vmax.f32 %v54_v33, %v102_v34  ;;  %v198_v39 = vld [vmem:[%s1217_s2 + $0x128] sm:$0xff]  ;;  %v55_v41 = vld [vmem:[%s1215_s0 + $0x130] sm:$0xff] }
  0x35   :  { %v386_v35 = vmax.f32 %v338_v24, 0.0  ;;  %v293_v37 = vmax.f32 %v197_v29, %v245_v32  ;;  %v246_v40 = vld [vmem:[%s1218_s3 + $0x128] sm:$0xff]  ;;  %v103_v44 = vld [vmem:[%s1216_s1 + $0x130] sm:$0xff]  ;;  %v56_v51 = vld [vmem:[%s1215_s0 + $0x138] sm:$0xff] }
  0x36   :  { %434 = vst.msk [vmem:[%s1219_s4 + $0x100] sm:$0xff] %vm403_vm0, %v385_v23  ;;  %v340_v36 = vmax.f32 %v148_v25, %v292_v26  ;;  %v387_v42 = vmax.f32 %v339_v30, 0.0  ;;  %v294_v43 = vmax.f32 %v198_v39, %v246_v40  ;;  %v199_v45 = vld [vmem:[%s1217_s2 + $0x130] sm:$0xff]  ;;  %v151_v49 = vmax.f32 %v55_v41, %v103_v44  ;;  %v104_v52 = vld [vmem:[%s1216_s1 + $0x138] sm:$0xff]  ;;  %v57_v57 = vld [vmem:[%s1215_s0 + $0x140] sm:$0xff] }
  0x37   :  { %v247_v46 = vld [vmem:[%s1218_s3 + $0x130] sm:$0xff]  ;;  %435 = vst [vmem:[%s1219_s4 + $0x108] sm:$0xff] %v386_v35  ;;  %v341_v48 = vmax.f32 %v149_v31, %v293_v37  ;;  %v200_v53 = vld [vmem:[%s1217_s2 + $0x138] sm:$0xff]  ;;  %v152_v55 = vmax.f32 %v56_v51, %v104_v52  ;;  %v105_v58 = vld [vmem:[%s1216_s1 + $0x140] sm:$0xff] }
  0x38   :  { %v388_v47 = vmax.f32 %v340_v36, 0.0  ;;  %v295_v50 = vmax.f32 %v199_v45, %v247_v46  ;;  %436 = vst [vmem:[%s1219_s4 + $0x110] sm:$0xff] %v387_v42  ;;  %v342_v54 = vmax.f32 %v150_v38, %v294_v43  ;;  %v248_v56 = vld [vmem:[%s1218_s3 + $0x138] sm:$0xff]  ;;  %v153_v62 = vmax.f32 %v57_v57, %v105_v58  ;;  %v201_v63 = vld [vmem:[%s1217_s2 + $0x140] sm:$0xff]  ;;  %v58_v1 = vld [vmem:[%s1215_s0 + $0x148] sm:$0xff] }
  0x39   :  { %v389_v59 = vmax.f32 %v341_v48, 0.0  ;;  %v296_v61 = vmax.f32 %v200_v53, %v248_v56  ;;  %v249_v0 = vld [vmem:[%s1218_s3 + $0x140] sm:$0xff]  ;;  %v106_v4 = vld [vmem:[%s1216_s1 + $0x148] sm:$0xff]  ;;  %v59_v11 = vld [vmem:[%s1215_s0 + $0x150] sm:$0xff] }
  0x3a   :  { %437 = vst.msk [vmem:[%s1219_s4 + $0x118] sm:$0xff] %vm403_vm0, %v388_v47  ;;  %v343_v60 = vmax.f32 %v151_v49, %v295_v50  ;;  %v390_v2 = vmax.f32 %v342_v54, 0.0  ;;  %v297_v3 = vmax.f32 %v201_v63, %v249_v0  ;;  %v202_v5 = vld [vmem:[%s1217_s2 + $0x148] sm:$0xff]  ;;  %v154_v9 = vmax.f32 %v58_v1, %v106_v4  ;;  %v107_v12 = vld [vmem:[%s1216_s1 + $0x150] sm:$0xff]  ;;  %v60_v17 = vld [vmem:[%s1215_s0 + $0x158] sm:$0xff] }
  0x3b   :  { %v250_v6 = vld [vmem:[%s1218_s3 + $0x148] sm:$0xff]  ;;  %438 = vst [vmem:[%s1219_s4 + $0x120] sm:$0xff] %v389_v59  ;;  %v344_v8 = vmax.f32 %v152_v55, %v296_v61  ;;  %v203_v13 = vld [vmem:[%s1217_s2 + $0x150] sm:$0xff]  ;;  %v155_v15 = vmax.f32 %v59_v11, %v107_v12  ;;  %v108_v18 = vld [vmem:[%s1216_s1 + $0x158] sm:$0xff] }
  0x3c   :  { %v391_v7 = vmax.f32 %v343_v60, 0.0  ;;  %v298_v10 = vmax.f32 %v202_v5, %v250_v6  ;;  %439 = vst [vmem:[%s1219_s4 + $0x128] sm:$0xff] %v390_v2  ;;  %v345_v14 = vmax.f32 %v153_v62, %v297_v3  ;;  %v251_v16 = vld [vmem:[%s1218_s3 + $0x150] sm:$0xff]  ;;  %v156_v22 = vmax.f32 %v60_v17, %v108_v18  ;;  %v204_v23 = vld [vmem:[%s1217_s2 + $0x158] sm:$0xff]  ;;  %v61_v25 = vld [vmem:[%s1215_s0 + $0x160] sm:$0xff] }
  0x3d   :  { %v392_v19 = vmax.f32 %v344_v8, 0.0  ;;  %v299_v21 = vmax.f32 %v203_v13, %v251_v16  ;;  %v252_v24 = vld [vmem:[%s1218_s3 + $0x158] sm:$0xff]  ;;  %v109_v28 = vld [vmem:[%s1216_s1 + $0x160] sm:$0xff]  ;;  %v62_v35 = vld [vmem:[%s1215_s0 + $0x168] sm:$0x3] }
  0x3e   :  { %440 = vst.msk [vmem:[%s1219_s4 + $0x130] sm:$0xff] %vm403_vm0, %v391_v7  ;;  %v346_v20 = vmax.f32 %v154_v9, %v298_v10  ;;  %v393_v26 = vmax.f32 %v345_v14, 0.0  ;;  %v300_v27 = vmax.f32 %v204_v23, %v252_v24  ;;  %v205_v29 = vld [vmem:[%s1217_s2 + $0x160] sm:$0xff]  ;;  %v157_v33 = vmax.f32 %v61_v25, %v109_v28  ;;  %v110_v36 = vld [vmem:[%s1216_s1 + $0x168] sm:$0x3] }
  0x3f   :  { %v253_v30 = vld [vmem:[%s1218_s3 + $0x160] sm:$0xff]  ;;  %441 = vst [vmem:[%s1219_s4 + $0x138] sm:$0xff] %v392_v19  ;;  %v347_v32 = vmax.f32 %v155_v15, %v299_v21  ;;  %v158_v38 = vmax.f32 %v62_v35, %v110_v36  ;;  %v206_v39 = vld [vmem:[%s1217_s2 + $0x168] sm:$0x3]  ;;  %v63_v41 = vld [vmem:[%s1215_s0 + $0x170] sm:$0x3] }
  0x40   :  { %v394_v31 = vmax.f32 %v346_v20, 0.0  ;;  %v301_v34 = vmax.f32 %v205_v29, %v253_v30  ;;  %442 = vst [vmem:[%s1219_s4 + $0x140] sm:$0xff] %v393_v26  ;;  %v348_v37 = vmax.f32 %v156_v22, %v300_v27  ;;  %v254_v40 = vld [vmem:[%s1218_s3 + $0x168] sm:$0x3]  ;;  %v111_v45 = vld [vmem:[%s1216_s1 + $0x170] sm:$0x3] }
  0x41   :  { %v395_v42 = vmax.f32 %v347_v32, 0.0  ;;  %v302_v44 = vmax.f32 %v206_v39, %v254_v40  ;;  %v207_v46 = vld [vmem:[%s1217_s2 + $0x170] sm:$0x3]  ;;  %v159_v48 = vmax.f32 %v63_v41, %v111_v45  ;;  %v64_v50 = vld [vmem:[%s1215_s0 + $0x178] sm:$0x3] }
  0x42   :  { %443 = vst.msk [vmem:[%s1219_s4 + $0x148] sm:$0xff] %vm403_vm0, %v394_v31  ;;  %v349_v43 = vmax.f32 %v157_v33, %v301_v34  ;;  %v396_v47 = vmax.f32 %v348_v37, 0.0  ;;  %v255_v49 = vld [vmem:[%s1218_s3 + $0x170] sm:$0x3]  ;;  %v112_v54 = vld [vmem:[%s1216_s1 + $0x178] sm:$0x3] }
  0x43   :  { %444 = vst [vmem:[%s1219_s4 + $0x150] sm:$0xff] %v395_v42  ;;  %v350_v52 = vmax.f32 %v158_v38, %v302_v44  ;;  %v303_v53 = vmax.f32 %v207_v46, %v255_v49  ;;  %v208_v55 = vld [vmem:[%s1217_s2 + $0x178] sm:$0x3]  ;;  %v160_v56 = vmax.f32 %v64_v50, %v112_v54 }
  0x44   :  { %v397_v51 = vmax.f32 %v349_v43, 0.0  ;;  %445 = vst [vmem:[%s1219_s4 + $0x158] sm:$0xff] %v396_v47  ;;  %v256_v57 = vld [vmem:[%s1218_s3 + $0x178] sm:$0x3] }
  0x45   :  { %v398_v58 = vmax.f32 %v350_v52, 0.0  ;;  %v351_v59 = vmax.f32 %v159_v48, %v303_v53  ;;  %v304_v60 = vmax.f32 %v208_v55, %v256_v57 }
  0x46   :  { %446 = vst.msk [vmem:[%s1219_s4 + $0x160] sm:$0xff] %vm403_vm0, %v397_v51 }
  0x47   :  { %447 = vst [vmem:[%s1219_s4 + $0x168] sm:$0x3] %v398_v58  ;;  %v399_v61 = vmax.f32 %v351_v59, 0.0  ;;  %v352_v62 = vmax.f32 %v160_v56, %v304_v60 }
  0x49   :  { %448 = vst [vmem:[%s1219_s4 + $0x170] sm:$0x3] %v399_v61  ;;  %v400_v63 = vmax.f32 %v352_v62, 0.0 }
  0x4b   :  { %450 = vst.msk [vmem:[%s1219_s4 + $0x178] sm:$0x3] %vm449_vm1, %v400_v63 }

// kernel: net_forward.11
= control target key start
LH: loop header
LB: loop body
LE: loop exit
PB: predicated region body
PF: predicated region fallthrough
CT: control target
= control target key end

     0   :  { %s1886_s12 = smov 0   ;;  %s1888_s13 = smov 0   ;;  %s2419_s0 = inlined_call_operand.vmem [shape: bf16[6498,125], index: 0, kind: input, shape index: {}]   ;;  %s2420_s1 = inlined_call_operand.vmem [shape: bf16[125,5], index: 1, kind: input, shape index: {}]   ;;  %s2421_s2 = inlined_call_operand.vmem [shape: f32[1,5], index: 2, kind: input, shape index: {}]   ;;  %s2422_s3 = inlined_call_operand.vmem [shape: f32[6498,5], index: 3, kind: output, shape index: {}]  }
   0x1   :  { %s1890_s14 = smov 0  }
   0x2 LB: > { %s1899_s15 = sadd.s32 4294967295, %s1831_s14   ;;  %s1901_s16 = sadd.s32 1, %s1831_s14   ;;  %s1831_s14 = sphi %s1890_s14, %s2431_s14   ;;  %s1827_s13 = sphi %s1888_s13, %s2430_s13   ;;  %s1823_s12 = sphi %s1886_s12, %s2429_s12  }
   0x3   : > { %s85_s17 = ssub.s32 %s1831_s14, %s1901_s16  ;;  %s88_s18 = sadd.s32 1, %s1827_s13 }
   0x4   : > { %p86_p0 = scmp.eq.s32.totalorder %s85_s17, 0  ;;  %p98_p1 = scmp.ne.s32.totalorder %s1827_s13, %s1823_s12 }
   0x5   : > { %p99_p2 = scmp.eq.s32.totalorder %s1899_s15, 12  ;;  %p1415_p3 = scmp.ge.s32.totalorder %s1831_s14, 1 }
   0x6   : > { %s1909_s19 = scalar_select %p86_p0, %s1827_s13, %s88_s18  }
   0x7   : > { %p1911_p4 = por %p99_p2, %p98_p1  ;;  %p146_p5 = scmp.lt.s32.totalorder %s1831_s14, 14 }
   0x9   : > { %p147_p6 = pnand %p1415_p3, %p146_p5 }
   0xa   : > { %v1737_v0 = vld [vmem:[%s2420_s1] sm:$0xff] (!%p147_p6)   ;;  %v1738_v1 = vld [vmem:[%s2420_s1 + $0x8] sm:$0xff] (!%p147_p6)   ;;  %v1739_v2 = vld [vmem:[%s2420_s1 + $0x10] sm:$0xff] (!%p147_p6)   ;;  %s1925_s27 = sshll.u32 (!%p147_p6), %s1899_s15, 6  ;;  %vm487_vm0 = vcmask (!%p147_p6), 1022976   ;;  %vm584_vm1 = vcmask (!%p147_p6), 1045504  }
   0xb   : > { %150 = sbr.rel (%p147_p6) target bundleno = 389 (0x185), region = 32  ;;  %1552 = vmatprep.subr.bf16.mxu0 (!%p147_p6), %v1737_v0  ;;  %1632 = vmatprep.subr.bf16.mxu1 (!%p147_p6), %v1737_v0  ;;  %p178_p7 = scmp.lt.s32.totalorder (!%p147_p6), %s1925_s27, 812  ;;  %v1740_v3 = vld [vmem:[%s2420_s1 + $0x18] sm:$0xff] (!%p147_p6)   ;;  %v1741_v4 = vld [vmem:[%s2420_s1 + $0x20] sm:$0xff] (!%p147_p6)   ;;  %v1742_v7 = vld [vmem:[%s2420_s1 + $0x28] sm:$0xff] (!%p147_p6)   ;;  %vm585_vm2 = vcmask (!%p147_p6), 1046528  }
   0xc   : > { %1553 = vmatpush3.bf16.msra.mxu0 (!%p147_p6), %v1737_v0  ;;  %1640 = vmatpush3.bf16.msra.mxu1 (!%p147_p6), %v1737_v0  ;;  %v1865_v8 = vmov (!%p147_p6), 65535   ;;  %v1743_v10 = vld [vmem:[%s2420_s1 + $0x30] sm:$0xff] (!%p147_p6)   ;;  %v1744_v11 = vld [vmem:[%s2420_s1 + $0x38] sm:$0x7f] (!%p147_p6)   ;;  %s170_s22 = sand.u32 (!%p147_p6), 1, %s1823_s12   ;;  %vm880_vm3 = vcmask (!%p147_p6), 39936  }
   0xd   : > { %1554 = vmatprep.subr.bf16.mxu0 (!%p147_p6), %v1738_v1  ;;  %1633 = vmatprep.subr.bf16.mxu1 (!%p147_p6), %v1738_v1  ;;  %v586_v9 = vsel (!%p147_p6), %vm584_vm1, 4294967295, %v1865_v8  ;;  %s1416_s23 = sshll.u32 (!%p147_p6), %s170_s22, 9  ;;  %v2017_v44 = vld [vmem:[%s2421_s2] ss:$0 sm:$0xff] (!%p147_p6) }
   0xe   : > { %v587_v12 = vsel (!%p147_p6), %vm585_vm2, %v586_v9, 0  ;;  %s2023_s12 = scalar_lea.vmem (!%p147_p6), [#allocation2], %s1416_s23  }
   0xf   : > { %v589_v13 = vand.u32 (!%p147_p6), %v1744_v11, %v587_v12 }
  0x10   : > { %1555 = vmatpush3.bf16.msra.mxu0 (!%p147_p6), %v1738_v1  ;;  %1641 = vmatpush3.bf16.msra.mxu1 (!%p147_p6), %v1738_v1 }
  0x11   : > { %1556 = vmatprep.subr.bf16.mxu0 (!%p147_p6), %v1739_v2  ;;  %1634 = vmatprep.subr.bf16.mxu1 (!%p147_p6), %v1739_v2 }
  0x12   : > { %s179_s30 = scalar_select %p178_p7, %s1925_s27, 812 }
  0x13   : > { %s953_s26 = ssub.s32 (%p1911_p4), 813, %s1925_s27  ;;  %s1509_s28 = sshll.u32 (%p1911_p4), %s1899_s15, 9 }
  0x14   : > { %s1418_s4 = sshll.u32 %s179_s30, 2  ;;  %1557 = vmatpush3.bf16.msra.mxu0 %v1739_v2  ;;  %1642 = vmatpush3.bf16.msra.mxu1 %v1739_v2  ;;  %p954_p8 = scmp.lt.s32.totalorder (%p1911_p4), %s953_s26, 64 }
  0x15   : > { %s1938_s9 = scalar_lea.vmem %s2419_s0, %s1418_s4  ;;  %1558 = vmatprep.subr.bf16.mxu0 %v1740_v3  ;;  %1635 = vmatprep.subr.bf16.mxu1 %v1740_v3  ;;  %s2220_s4 = scalar_lea.vmem (%p1911_p4), %s2422_s3, %s1509_s28  }
  0x16   : > { %v1745_v5 = vld [vmem:[%s1938_s9] sm:$0xff]   ;;  %v1747_v14 = vld [vmem:[%s1938_s9 + $0x8] sm:$0xff]   ;;  %v1749_v16 = vld [vmem:[%s1938_s9 + $0x10] sm:$0xff]  }
  0x17   : > { %v1746_v6 = vld [vmem:[%s1938_s9 + $0x80] sm:$0xff]   ;;  %1568 = vmatprep.mubr.msk.bf16.mxu0 %vm487_vm0, %v1745_v5  ;;  %v1748_v15 = vld [vmem:[%s1938_s9 + $0x88] sm:$0xff]   ;;  %v1750_v17 = vld [vmem:[%s1938_s9 + $0x90] sm:$0xff]  }
  0x18   : > { %1559 = vmatpush3.bf16.msra.mxu0 %v1740_v3  ;;  %1643 = vmatpush3.bf16.msra.mxu1 %v1740_v3  ;;  %v1751_v18 = vld [vmem:[%s1938_s9 + $0x18] sm:$0xff]   ;;  %v1753_v20 = vld [vmem:[%s1938_s9 + $0x20] sm:$0xff]   ;;  %v1755_v22 = vld [vmem:[%s1938_s9 + $0x28] sm:$0xff]  }
  0x19   : > { %1560 = vmatprep.subr.bf16.mxu0 %v1741_v4  ;;  %1636 = vmatprep.subr.bf16.mxu1 %v1741_v4  ;;  %v1752_v19 = vld [vmem:[%s1938_s9 + $0x98] sm:$0xff]   ;;  %v1754_v21 = vld [vmem:[%s1938_s9 + $0xa0] sm:$0xff]   ;;  %v1756_v23 = vld [vmem:[%s1938_s9 + $0xa8] sm:$0xff]  }
  0x1a   : > { %1600 = vmatprep.mubr.msk.bf16.mxu1 %vm487_vm0, %v1746_v6  ;;  %v1757_v24 = vld [vmem:[%s1938_s9 + $0x30] sm:$0xff]   ;;  %v1759_v26 = vld [vmem:[%s1938_s9 + $0x38] sm:$0xff]   ;;  %v1761_v28 = vld [vmem:[%s1938_s9 + $0x40] sm:$0xff]  }
  0x1b   : > { %v1758_v25 = vld [vmem:[%s1938_s9 + $0xb0] sm:$0xff]   ;;  %v1760_v27 = vld [vmem:[%s1938_s9 + $0xb8] sm:$0xff]   ;;  %v1762_v29 = vld [vmem:[%s1938_s9 + $0xc0] sm:$0xff]  }
  0x1c   : > { %1561 = vmatpush3.bf16.msra.mxu0 %v1741_v4  ;;  %1644 = vmatpush3.bf16.msra.mxu1 %v1741_v4  ;;  %v1763_v30 = vld [vmem:[%s1938_s9 + $0x48] sm:$0xff]   ;;  %v1765_v32 = vld [vmem:[%s1938_s9 + $0x50] sm:$0xff]   ;;  %v1767_v34 = vld [vmem:[%s1938_s9 + $0x58] sm:$0xff]  }
  0x1d   : > { %1562 = vmatprep.subr.bf16.mxu0 %v1742_v7  ;;  %1637 = vmatprep.subr.bf16.mxu1 %v1742_v7  ;;  %v1764_v31 = vld [vmem:[%s1938_s9 + $0xc8] sm:$0xff]   ;;  %v1766_v33 = vld [vmem:[%s1938_s9 + $0xd0] sm:$0xff]   ;;  %v1768_v35 = vld [vmem:[%s1938_s9 + $0xd8] sm:$0xff]  }
  0x1e   : > { %v1769_v36 = vld [vmem:[%s1938_s9 + $0x60] sm:$0xff]   ;;  %v1771_v38 = vld [vmem:[%s1938_s9 + $0x68] sm:$0xff]   ;;  %v1773_v40 = vld [vmem:[%s1938_s9 + $0x70] sm:$0xff]  }
  0x1f   : > { %v1770_v37 = vld [vmem:[%s1938_s9 + $0xe0] sm:$0xff]   ;;  %v1772_v39 = vld [vmem:[%s1938_s9 + $0xe8] sm:$0xff]   ;;  %v1774_v41 = vld [vmem:[%s1938_s9 + $0xf0] sm:$0xff]  }
  0x20   : > { %1563 = vmatpush3.bf16.msra.mxu0 %v1742_v7  ;;  %1645 = vmatpush3.bf16.msra.mxu1 %v1742_v7  ;;  %v1775_v42 = vld [vmem:[%s1938_s9 + $0x78] sm:$0xff]  }
  0x21   : > { %1564 = vmatprep.subr.bf16.mxu0 %v1743_v10  ;;  %1638 = vmatprep.subr.bf16.mxu1 %v1743_v10  ;;  %v1776_v43 = vld [vmem:[%s1938_s9 + $0xf8] sm:$0xff]  }
  0x24   : > { %1565 = vmatpush3.bf16.msra.mxu0 %v1743_v10  ;;  %1646 = vmatpush3.bf16.msra.mxu1 %v1743_v10 }
  0x25   : > { %1566 = vmatprep.subr.bf16.mxu0 %v589_v13  ;;  %1639 = vmatprep.subr.bf16.mxu1 %v589_v13 }
  0x28   : > { %1567 = vmatpush3.bf16.msra.mxu0 %v589_v13  ;;  %1647 = vmatpush3.bf16.msra.mxu1 %v589_v13 }
  0x2b   : > { %1569 = vmatmul.mubr.msk.bf16.vlgmr.msra.gmra.mrb[0].mxu0 %vm487_vm0, %v1747_v14  ;;  %1601 = vmatmul.mubr.msk.bf16.vlgmr.msra.gmra.mrb[0].mxu1 %vm487_vm0, %v1748_v15 }
  0x2c   : > { %1572 = vmatprep.mubr.msk.bf16.mxu0 %vm487_vm0, %v1749_v16  ;;  %1604 = vmatprep.mubr.msk.bf16.mxu1 %vm487_vm0, %v1750_v17 }
  0x33   : > { %1573 = vmatmul.mubr.msk.bf16.gmra.mrb[4].mxu0 %vm487_vm0, %v1751_v18  ;;  %1605 = vmatmul.mubr.msk.bf16.gmra.mrb[4].mxu1 %vm487_vm0, %v1752_v19 }
  0x34   : > { %1576 = vmatprep.mubr.msk.bf16.mxu0 %vm487_vm0, %v1753_v20  ;;  %1608 = vmatprep.mubr.msk.bf16.mxu1 %vm487_vm0, %v1754_v21 }
  0x3b   : > { %1577 = vmatmul.mubr.msk.bf16.gmra.mrb[8].mxu0 %vm487_vm0, %v1755_v22  ;;  %1609 = vmatmul.mubr.msk.bf16.gmra.mrb[8].mxu1 %vm487_vm0, %v1756_v23 }
  0x3c   : > { %1580 = vmatprep.mubr.msk.bf16.mxu0 %vm487_vm0, %v1757_v24  ;;  %1612 = vmatprep.mubr.msk.bf16.mxu1 %vm487_vm0, %v1758_v25 }
  0x43   : > { %1581 = vmatmul.mubr.msk.bf16.gmra.mrb[12].mxu0 %vm487_vm0, %v1759_v26  ;;  %1613 = vmatmul.mubr.msk.bf16.gmra.mrb[12].mxu1 %vm487_vm0, %v1760_v27 }
  0x44   : > { %1584 = vmatprep.mubr.msk.bf16.mxu0 %vm487_vm0, %v1761_v28  ;;  %1616 = vmatprep.mubr.msk.bf16.mxu1 %vm487_vm0, %v1762_v29 }
  0x4b   : > { %1585 = vmatmul.mubr.msk.bf16.gmra.mrb[16].mxu0 %vm487_vm0, %v1763_v30  ;;  %1617 = vmatmul.mubr.msk.bf16.gmra.mrb[16].mxu1 %vm487_vm0, %v1764_v31 }
  0x4c   : > { %1588 = vmatprep.mubr.msk.bf16.mxu0 %vm487_vm0, %v1765_v32  ;;  %1620 = vmatprep.mubr.msk.bf16.mxu1 %vm487_vm0, %v1766_v33 }
  0x53   : > { %1589 = vmatmul.mubr.msk.bf16.gmra.mrb[20].mxu0 %vm487_vm0, %v1767_v34  ;;  %1621 = vmatmul.mubr.msk.bf16.gmra.mrb[20].mxu1 %vm487_vm0, %v1768_v35 }
  0x54   : > { %1592 = vmatprep.mubr.msk.bf16.mxu0 %vm487_vm0, %v1769_v36  ;;  %1624 = vmatprep.mubr.msk.bf16.mxu1 %vm487_vm0, %v1770_v37 }
  0x5b   : > { %1593 = vmatmul.mubr.msk.bf16.gmra.mrb[24].mxu0 %vm487_vm0, %v1771_v38  ;;  %1625 = vmatmul.mubr.msk.bf16.gmra.mrb[24].mxu1 %vm487_vm0, %v1772_v39 }
  0x5c   : > { %1596 = vmatprep.mubr.msk.bf16.mxu0 %vm487_vm0, %v1773_v40  ;;  %1628 = vmatprep.mubr.msk.bf16.mxu1 %vm487_vm0, %v1774_v41 }
  0x63   : > { %1597 = vmatmul.mubr.msk.bf16.gmra.mrb[28].mxu0 %vm487_vm0, %v1775_v42  ;;  %1629 = vmatmul.mubr.msk.bf16.gmra.mrb[28].mxu1 %vm487_vm0, %v1776_v43 }
  0xfe   : > { %v1570_v45 = vpop.f32.mrb[0].mxu0  ;;  %v1602_v46 = vpop.f32.mrb[0].mxu1 }
  0xff   : > { %v634_v47 = vadd.f32 %v1570_v45, %v2017_v44  ;;  %v762_v48 = vadd.f32 %v1602_v46, %v2017_v44  ;;  %v625_v49 = vpop.f32.mrb[1].mxu0  ;;  %v753_v50 = vpop.f32.mrb[1].mxu1 }
 0x100   : > { %v626_v51 = vadd.f32 %v2017_v44, %v625_v49  ;;  %v754_v52 = vadd.f32 %v2017_v44, %v753_v50  ;;  %v1571_v53 = vpop.f32.mrb[2].mxu0  ;;  %v1603_v54 = vpop.f32.mrb[2].mxu1 }
 0x101   : > { %883 = vst.msk [vmem:[%s2023_s12 + $0x10] sm:$0xff] %vm880_vm3, %v634_v47  ;;  %915 = vst.msk [vmem:[%s2023_s12 + $0x110] sm:$0xff] %vm880_vm3, %v762_v48  ;;  %v637_v55 = vadd.f32 %v1571_v53, %v2017_v44  ;;  %v765_v56 = vadd.f32 %v1603_v54, %v2017_v44  ;;  %v628_v57 = vpop.f32.mrb[3].mxu0  ;;  %v756_v58 = vpop.f32.mrb[3].mxu1 }
 0x102   : > { %881 = vst.msk [vmem:[%s2023_s12] sm:$0xff] %vm880_vm3, %v626_v51  ;;  %913 = vst.msk [vmem:[%s2023_s12 + $0x100] sm:$0xff] %vm880_vm3, %v754_v52  ;;  %v629_v59 = vadd.f32 %v2017_v44, %v628_v57  ;;  %v757_v60 = vadd.f32 %v2017_v44, %v756_v58 }
 0x103   : > { %884 = vst.msk [vmem:[%s2023_s12 + $0x18] sm:$0xff] %vm880_vm3, %v637_v55  ;;  %916 = vst.msk [vmem:[%s2023_s12 + $0x118] sm:$0xff] %vm880_vm3, %v765_v56 }
 0x104   : > { %882 = vst.msk [vmem:[%s2023_s12 + $0x8] sm:$0xff] %vm880_vm3, %v629_v59  ;;  %914 = vst.msk [vmem:[%s2023_s12 + $0x108] sm:$0xff] %vm880_vm3, %v757_v60 }
 0x106   : > { %v1574_v61 = vpop.f32.mrb[4].mxu0  ;;  %v1606_v62 = vpop.f32.mrb[4].mxu1 }
 0x107   : > { %v650_v63 = vadd.f32 %v1574_v61, %v2017_v44  ;;  %v778_v0 = vadd.f32 %v1606_v62, %v2017_v44  ;;  %v641_v1 = vpop.f32.mrb[5].mxu0  ;;  %v769_v2 = vpop.f32.mrb[5].mxu1 }
 0x108   : > { %v642_v3 = vadd.f32 %v2017_v44, %v641_v1  ;;  %v770_v4 = vadd.f32 %v2017_v44, %v769_v2  ;;  %v1575_v5 = vpop.f32.mrb[6].mxu0  ;;  %v1607_v6 = vpop.f32.mrb[6].mxu1 }
 0x109   : > { %887 = vst.msk [vmem:[%s2023_s12 + $0x30] sm:$0xff] %vm880_vm3, %v650_v63  ;;  %919 = vst.msk [vmem:[%s2023_s12 + $0x130] sm:$0xff] %vm880_vm3, %v778_v0  ;;  %v653_v7 = vadd.f32 %v1575_v5, %v2017_v44  ;;  %v781_v8 = vadd.f32 %v1607_v6, %v2017_v44  ;;  %v644_v9 = vpop.f32.mrb[7].mxu0  ;;  %v772_v10 = vpop.f32.mrb[7].mxu1 }
 0x10a   : > { %885 = vst.msk [vmem:[%s2023_s12 + $0x20] sm:$0xff] %vm880_vm3, %v642_v3  ;;  %917 = vst.msk [vmem:[%s2023_s12 + $0x120] sm:$0xff] %vm880_vm3, %v770_v4  ;;  %v645_v11 = vadd.f32 %v2017_v44, %v644_v9  ;;  %v773_v12 = vadd.f32 %v2017_v44, %v772_v10 }
 0x10b   : > { %888 = vst.msk [vmem:[%s2023_s12 + $0x38] sm:$0xff] %vm880_vm3, %v653_v7  ;;  %920 = vst.msk [vmem:[%s2023_s12 + $0x138] sm:$0xff] %vm880_vm3, %v781_v8 }
 0x10c   : > { %886 = vst.msk [vmem:[%s2023_s12 + $0x28] sm:$0xff] %vm880_vm3, %v645_v11  ;;  %918 = vst.msk [vmem:[%s2023_s12 + $0x128] sm:$0xff] %vm880_vm3, %v773_v12 }
 0x10e   : > { %v1578_v13 = vpop.f32.mrb[8].mxu0  ;;  %v1610_v14 = vpop.f32.mrb[8].mxu1 }
 0x10f   : > { %v666_v15 = vadd.f32 %v1578_v13, %v2017_v44  ;;  %v794_v16 = vadd.f32 %v1610_v14, %v2017_v44  ;;  %v657_v17 = vpop.f32.mrb[9].mxu0  ;;  %v785_v18 = vpop.f32.mrb[9].mxu1 }
 0x110   : > { %v658_v19 = vadd.f32 %v2017_v44, %v657_v17  ;;  %v786_v20 = vadd.f32 %v2017_v44, %v785_v18  ;;  %v1579_v21 = vpop.f32.mrb[10].mxu0  ;;  %v1611_v22 = vpop.f32.mrb[10].mxu1 }
 0x111   : > { %891 = vst.msk [vmem:[%s2023_s12 + $0x50] sm:$0xff] %vm880_vm3, %v666_v15  ;;  %923 = vst.msk [vmem:[%s2023_s12 + $0x150] sm:$0xff] %vm880_vm3, %v794_v16  ;;  %v669_v23 = vadd.f32 %v1579_v21, %v2017_v44  ;;  %v797_v24 = vadd.f32 %v1611_v22, %v2017_v44  ;;  %v660_v25 = vpop.f32.mrb[11].mxu0  ;;  %v788_v26 = vpop.f32.mrb[11].mxu1 }
 0x112   : > { %889 = vst.msk [vmem:[%s2023_s12 + $0x40] sm:$0xff] %vm880_vm3, %v658_v19  ;;  %921 = vst.msk [vmem:[%s2023_s12 + $0x140] sm:$0xff] %vm880_vm3, %v786_v20  ;;  %v661_v27 = vadd.f32 %v2017_v44, %v660_v25  ;;  %v789_v28 = vadd.f32 %v2017_v44, %v788_v26 }
 0x113   : > { %892 = vst.msk [vmem:[%s2023_s12 + $0x58] sm:$0xff] %vm880_vm3, %v669_v23  ;;  %924 = vst.msk [vmem:[%s2023_s12 + $0x158] sm:$0xff] %vm880_vm3, %v797_v24 }
 0x114   : > { %890 = vst.msk [vmem:[%s2023_s12 + $0x48] sm:$0xff] %vm880_vm3, %v661_v27  ;;  %922 = vst.msk [vmem:[%s2023_s12 + $0x148] sm:$0xff] %vm880_vm3, %v789_v28 }
 0x116   : > { %v1582_v29 = vpop.f32.mrb[12].mxu0  ;;  %v1614_v30 = vpop.f32.mrb[12].mxu1 }
 0x117   : > { %v682_v31 = vadd.f32 %v1582_v29, %v2017_v44  ;;  %v810_v32 = vadd.f32 %v1614_v30, %v2017_v44  ;;  %v673_v33 = vpop.f32.mrb[13].mxu0  ;;  %v801_v34 = vpop.f32.mrb[13].mxu1 }
 0x118   : > { %v674_v35 = vadd.f32 %v2017_v44, %v673_v33  ;;  %v802_v36 = vadd.f32 %v2017_v44, %v801_v34  ;;  %v1583_v37 = vpop.f32.mrb[14].mxu0  ;;  %v1615_v38 = vpop.f32.mrb[14].mxu1 }
 0x119   : > { %895 = vst.msk [vmem:[%s2023_s12 + $0x70] sm:$0xff] %vm880_vm3, %v682_v31  ;;  %927 = vst.msk [vmem:[%s2023_s12 + $0x170] sm:$0xff] %vm880_vm3, %v810_v32  ;;  %v685_v39 = vadd.f32 %v1583_v37, %v2017_v44  ;;  %v813_v40 = vadd.f32 %v1615_v38, %v2017_v44  ;;  %v676_v41 = vpop.f32.mrb[15].mxu0  ;;  %v804_v42 = vpop.f32.mrb[15].mxu1 }
 0x11a   : > { %893 = vst.msk [vmem:[%s2023_s12 + $0x60] sm:$0xff] %vm880_vm3, %v674_v35  ;;  %925 = vst.msk [vmem:[%s2023_s12 + $0x160] sm:$0xff] %vm880_vm3, %v802_v36  ;;  %v677_v43 = vadd.f32 %v2017_v44, %v676_v41  ;;  %v805_v45 = vadd.f32 %v2017_v44, %v804_v42 }
 0x11b   : > { %896 = vst.msk [vmem:[%s2023_s12 + $0x78] sm:$0xff] %vm880_vm3, %v685_v39  ;;  %928 = vst.msk [vmem:[%s2023_s12 + $0x178] sm:$0xff] %vm880_vm3, %v813_v40 }
 0x11c   : > { %894 = vst.msk [vmem:[%s2023_s12 + $0x68] sm:$0xff] %vm880_vm3, %v677_v43  ;;  %926 = vst.msk [vmem:[%s2023_s12 + $0x168] sm:$0xff] %vm880_vm3, %v805_v45 }
 0x11e   : > { %v1586_v46 = vpop.f32.mrb[16].mxu0  ;;  %v1618_v47 = vpop.f32.mrb[16].mxu1 }
 0x11f   : > { %v698_v48 = vadd.f32 %v1586_v46, %v2017_v44  ;;  %v826_v49 = vadd.f32 %v1618_v47, %v2017_v44  ;;  %v689_v50 = vpop.f32.mrb[17].mxu0  ;;  %v817_v51 = vpop.f32.mrb[17].mxu1 }
 0x120   : > { %v690_v52 = vadd.f32 %v2017_v44, %v689_v50  ;;  %v818_v53 = vadd.f32 %v2017_v44, %v817_v51  ;;  %v1587_v54 = vpop.f32.mrb[18].mxu0  ;;  %v1619_v55 = vpop.f32.mrb[18].mxu1 }
 0x121   : > { %899 = vst.msk [vmem:[%s2023_s12 + $0x90] sm:$0xff] %vm880_vm3, %v698_v48  ;;  %931 = vst.msk [vmem:[%s2023_s12 + $0x190] sm:$0xff] %vm880_vm3, %v826_v49  ;;  %v701_v56 = vadd.f32 %v1587_v54, %v2017_v44  ;;  %v829_v57 = vadd.f32 %v1619_v55, %v2017_v44  ;;  %v692_v58 = vpop.f32.mrb[19].mxu0  ;;  %v820_v59 = vpop.f32.mrb[19].mxu1 }
 0x122   : > { %897 = vst.msk [vmem:[%s2023_s12 + $0x80] sm:$0xff] %vm880_vm3, %v690_v52  ;;  %929 = vst.msk [vmem:[%s2023_s12 + $0x180] sm:$0xff] %vm880_vm3, %v818_v53  ;;  %v693_v60 = vadd.f32 %v2017_v44, %v692_v58  ;;  %v821_v61 = vadd.f32 %v2017_v44, %v820_v59 }
 0x123   : > { %900 = vst.msk [vmem:[%s2023_s12 + $0x98] sm:$0xff] %vm880_vm3, %v701_v56  ;;  %932 = vst.msk [vmem:[%s2023_s12 + $0x198] sm:$0xff] %vm880_vm3, %v829_v57 }
 0x124   : > { %898 = vst.msk [vmem:[%s2023_s12 + $0x88] sm:$0xff] %vm880_vm3, %v693_v60  ;;  %930 = vst.msk [vmem:[%s2023_s12 + $0x188] sm:$0xff] %vm880_vm3, %v821_v61 }
 0x126   : > { %v1590_v62 = vpop.f32.mrb[20].mxu0  ;;  %v1622_v63 = vpop.f32.mrb[20].mxu1 }
 0x127   : > { %v714_v0 = vadd.f32 %v1590_v62, %v2017_v44  ;;  %v842_v1 = vadd.f32 %v1622_v63, %v2017_v44  ;;  %v705_v2 = vpop.f32.mrb[21].mxu0  ;;  %v833_v3 = vpop.f32.mrb[21].mxu1 }
 0x128   : > { %v706_v4 = vadd.f32 %v2017_v44, %v705_v2  ;;  %v834_v5 = vadd.f32 %v2017_v44, %v833_v3  ;;  %v1591_v6 = vpop.f32.mrb[22].mxu0  ;;  %v1623_v7 = vpop.f32.mrb[22].mxu1 }
 0x129   : > { %903 = vst.msk [vmem:[%s2023_s12 + $0xb0] sm:$0xff] %vm880_vm3, %v714_v0  ;;  %935 = vst.msk [vmem:[%s2023_s12 + $0x1b0] sm:$0xff] %vm880_vm3, %v842_v1  ;;  %v717_v8 = vadd.f32 %v1591_v6, %v2017_v44  ;;  %v845_v9 = vadd.f32 %v1623_v7, %v2017_v44  ;;  %v708_v10 = vpop.f32.mrb[23].mxu0  ;;  %v836_v11 = vpop.f32.mrb[23].mxu1 }
 0x12a   : > { %901 = vst.msk [vmem:[%s2023_s12 + $0xa0] sm:$0xff] %vm880_vm3, %v706_v4  ;;  %933 = vst.msk [vmem:[%s2023_s12 + $0x1a0] sm:$0xff] %vm880_vm3, %v834_v5  ;;  %v709_v12 = vadd.f32 %v2017_v44, %v708_v10  ;;  %v837_v13 = vadd.f32 %v2017_v44, %v836_v11 }
 0x12b   : > { %904 = vst.msk [vmem:[%s2023_s12 + $0xb8] sm:$0xff] %vm880_vm3, %v717_v8  ;;  %936 = vst.msk [vmem:[%s2023_s12 + $0x1b8] sm:$0xff] %vm880_vm3, %v845_v9 }
 0x12c   : > { %902 = vst.msk [vmem:[%s2023_s12 + $0xa8] sm:$0xff] %vm880_vm3, %v709_v12  ;;  %934 = vst.msk [vmem:[%s2023_s12 + $0x1a8] sm:$0xff] %vm880_vm3, %v837_v13 }
 0x12e   : > { %v1594_v14 = vpop.f32.mrb[24].mxu0  ;;  %v1626_v15 = vpop.f32.mrb[24].mxu1 }
 0x12f   : > { %v730_v16 = vadd.f32 %v1594_v14, %v2017_v44  ;;  %v858_v17 = vadd.f32 %v1626_v15, %v2017_v44  ;;  %v721_v18 = vpop.f32.mrb[25].mxu0  ;;  %v849_v19 = vpop.f32.mrb[25].mxu1 }
 0x130   : > { %v722_v20 = vadd.f32 %v2017_v44, %v721_v18  ;;  %v850_v21 = vadd.f32 %v2017_v44, %v849_v19  ;;  %v1595_v22 = vpop.f32.mrb[26].mxu0  ;;  %v1627_v23 = vpop.f32.mrb[26].mxu1 }
 0x131   : > { %907 = vst.msk [vmem:[%s2023_s12 + $0xd0] sm:$0xff] %vm880_vm3, %v730_v16  ;;  %939 = vst.msk [vmem:[%s2023_s12 + $0x1d0] sm:$0xff] %vm880_vm3, %v858_v17  ;;  %v733_v24 = vadd.f32 %v1595_v22, %v2017_v44  ;;  %v861_v25 = vadd.f32 %v1627_v23, %v2017_v44  ;;  %v724_v26 = vpop.f32.mrb[27].mxu0  ;;  %v852_v27 = vpop.f32.mrb[27].mxu1 }
 0x132   : > { %905 = vst.msk [vmem:[%s2023_s12 + $0xc0] sm:$0xff] %vm880_vm3, %v722_v20  ;;  %937 = vst.msk [vmem:[%s2023_s12 + $0x1c0] sm:$0xff] %vm880_vm3, %v850_v21  ;;  %v725_v28 = vadd.f32 %v2017_v44, %v724_v26  ;;  %v853_v29 = vadd.f32 %v2017_v44, %v852_v27 }
 0x133   : > { %908 = vst.msk [vmem:[%s2023_s12 + $0xd8] sm:$0xff] %vm880_vm3, %v733_v24  ;;  %940 = vst.msk [vmem:[%s2023_s12 + $0x1d8] sm:$0xff] %vm880_vm3, %v861_v25 }
 0x134   : > { %906 = vst.msk [vmem:[%s2023_s12 + $0xc8] sm:$0xff] %vm880_vm3, %v725_v28  ;;  %938 = vst.msk [vmem:[%s2023_s12 + $0x1c8] sm:$0xff] %vm880_vm3, %v853_v29 }
 0x136   : > { %v1598_v30 = vpop.f32.mrb[28].mxu0  ;;  %v1630_v31 = vpop.f32.mrb[28].mxu1  ;;  %951 = sbr.rel (!%p1911_p4) target bundleno = 389 (0x185), region = 36 }
 0x137   : > { %v746_v32 = vadd.f32 %v1598_v30, %v2017_v44  ;;  %v874_v33 = vadd.f32 %v1630_v31, %v2017_v44  ;;  %v737_v34 = vpop.f32.mrb[29].mxu0  ;;  %v865_v35 = vpop.f32.mrb[29].mxu1 }
 0x138   : > { %v738_v36 = vadd.f32 %v2017_v44, %v737_v34  ;;  %v866_v37 = vadd.f32 %v2017_v44, %v865_v35  ;;  %v1599_v38 = vpop.f32.mrb[30].mxu0  ;;  %v1631_v39 = vpop.f32.mrb[30].mxu1 }
 0x139   : > { %911 = vst.msk [vmem:[%s2023_s12 + $0xf0] sm:$0xff] %vm880_vm3, %v746_v32  ;;  %943 = vst.msk [vmem:[%s2023_s12 + $0x1f0] sm:$0xff] %vm880_vm3, %v874_v33  ;;  %v749_v40 = vadd.f32 %v1599_v38, %v2017_v44  ;;  %v877_v41 = vadd.f32 %v1631_v39, %v2017_v44  ;;  %v740_v42 = vpop.f32.mrb[31].mxu0  ;;  %v868_v43 = vpop.f32.mrb[31].mxu1 }
 0x13a   : > { %909 = vst.msk [vmem:[%s2023_s12 + $0xe0] sm:$0xff] %vm880_vm3, %v738_v36  ;;  %941 = vst.msk [vmem:[%s2023_s12 + $0x1e0] sm:$0xff] %vm880_vm3, %v866_v37  ;;  %v741_v45 = vadd.f32 %v2017_v44, %v740_v42  ;;  %v869_v46 = vadd.f32 %v2017_v44, %v868_v43 }
 0x13b   : > { %912 = vst.msk [vmem:[%s2023_s12 + $0xf8] sm:$0xff] %vm880_vm3, %v749_v40  ;;  %944 = vst.msk [vmem:[%s2023_s12 + $0x1f8] sm:$0xff] %vm880_vm3, %v877_v41 }
 0x13c   : > { %910 = vst.msk [vmem:[%s2023_s12 + $0xe8] sm:$0xff] %vm880_vm3, %v741_v45  ;;  %942 = vst.msk [vmem:[%s2023_s12 + $0x1e8] sm:$0xff] %vm880_vm3, %v869_v46 }
 0x13d   : > { %s2433_s26 = smov (!%p954_p8, %s953_s26), 64 }
 0x13e   : > { %s1494_s5 = sshll.u32 %s2433_s26, 7 }
 0x13f   : > { %p1497_p9 = scmp.eq.s32.totalorder %s1494_s5, 0 }
 0x140   : > { %s2226_s6 = sshrl.u32 (!%p1497_p9), %s2433_s26, 6 }
 0x141   : > { %962 = sbr.rel (%p1497_p9) target bundleno = 389 (0x185), region = 40  ;;  %p1498_p10 = scmp.le.s32.totalorder (!%p1497_p9), %s2226_s6, 0 }
 0x148   : > { %1368 = sbr.rel (%p1498_p10) target bundleno = 368 (0x170), region = 116  ;;  %s2424_s15 = smov (!%p1498_p10), %s2220_s4 }
 0x149   : > { %s2425_s20 = smov (!%p1498_p10), %s2023_s12  ;;  %s2235_s27 = smov (!%p1498_p10), 0  }
 0x14a   : > { %s2237_s7 = smov (!%p1498_p10), 0  }
 0x14f LB: >> { %v1150_v44 = vld [vmem:[%s1839_s20] sm:$0xff]  ;;  %v1152_v47 = vld [vmem:[%s1839_s20 + $0x8] sm:$0xff]  ;;  %v1154_v48 = vld [vmem:[%s1839_s20 + $0x10] sm:$0xff]  ;;  %s1278_s8 = sadd.s32 1, %s1843_s27  ;;  %s1144_s7 = sadd.s32 1, %s1847_s7   ;;  %s1847_s7 = sphi %s2237_s7, %s1144_s7   ;;  %s1843_s27 = sphi %s2235_s27, %s2428_s27   ;;  %s1839_s20 = sphi %s2425_s20, %s2427_s20   ;;  %s1835_s15 = sphi %s2424_s15, %s2426_s15  }
 0x150   : >> { %1151 = vst [vmem:[%s1835_s15] sm:$0xff] %v1150_v44  ;;  %1153 = vst [vmem:[%s1835_s15 + $0x8] sm:$0xff] %v1152_v47  ;;  %v1156_v49 = vld [vmem:[%s1839_s20 + $0x18] sm:$0xff]  ;;  %v1158_v50 = vld [vmem:[%s1839_s20 + $0x20] sm:$0xff]  ;;  %p1279_p11 = scmp.ge.s32.totalorder %s1278_s8, %s2226_s6  ;;  %p1143_p12 = scmp.ge.s32.totalorder %s1144_s7, %s2226_s6 }
 0x151   : >> { %1155 = vst [vmem:[%s1835_s15 + $0x10] sm:$0xff] %v1154_v48  ;;  %v1160_v51 = vld [vmem:[%s1839_s20 + $0x28] sm:$0xff]  ;;  %1157 = vst [vmem:[%s1835_s15 + $0x18] sm:$0xff] %v1156_v49  ;;  %v1162_v52 = vld [vmem:[%s1839_s20 + $0x30] sm:$0xff] }
 0x152   : >> { %1159 = vst [vmem:[%s1835_s15 + $0x20] sm:$0xff] %v1158_v50  ;;  %1161 = vst [vmem:[%s1835_s15 + $0x28] sm:$0xff] %v1160_v51  ;;  %v1164_v53 = vld [vmem:[%s1839_s20 + $0x38] sm:$0xff]  ;;  %v1166_v54 = vld [vmem:[%s1839_s20 + $0x40] sm:$0xff]  ;;  %s2435_s8 = smov (%p1279_p11, %s1278_s8), 0 }
 0x153   : >> { %1163 = vst [vmem:[%s1835_s15 + $0x30] sm:$0xff] %v1162_v52  ;;  %1165 = vst [vmem:[%s1835_s15 + $0x38] sm:$0xff] %v1164_v53  ;;  %v1168_v55 = vld [vmem:[%s1839_s20 + $0x48] sm:$0xff]  ;;  %v1170_v56 = vld [vmem:[%s1839_s20 + $0x50] sm:$0xff]  ;;  %s1499_s9 = sshll.u32 %s2435_s8, 9  ;;  %s2428_s27 = smov %s2435_s8 }
 0x154   : >> { %1167 = vst [vmem:[%s1835_s15 + $0x40] sm:$0xff] %v1166_v54  ;;  %v1172_v57 = vld [vmem:[%s1839_s20 + $0x58] sm:$0xff]  ;;  %1169 = vst [vmem:[%s1835_s15 + $0x48] sm:$0xff] %v1168_v55  ;;  %v1174_v58 = vld [vmem:[%s1839_s20 + $0x60] sm:$0xff]  ;;  %s2293_s10 = scalar_lea.vmem %s2023_s12, %s1499_s9 [#allocation2]   ;;  %s2296_s11 = scalar_lea.vmem %s2220_s4, %s1499_s9  }
 0x155   : >> { %1171 = vst [vmem:[%s1835_s15 + $0x50] sm:$0xff] %v1170_v56  ;;  %1173 = vst [vmem:[%s1835_s15 + $0x58] sm:$0xff] %v1172_v57  ;;  %v1176_v59 = vld [vmem:[%s1839_s20 + $0x68] sm:$0xff]  ;;  %v1178_v60 = vld [vmem:[%s1839_s20 + $0x70] sm:$0xff] }
 0x156   : >> { %1175 = vst [vmem:[%s1835_s15 + $0x60] sm:$0xff] %v1174_v58  ;;  %1177 = vst [vmem:[%s1835_s15 + $0x68] sm:$0xff] %v1176_v59  ;;  %v1180_v61 = vld [vmem:[%s1839_s20 + $0x78] sm:$0xff]  ;;  %v1182_v62 = vld [vmem:[%s1839_s20 + $0x80] sm:$0xff] }
 0x157   : >> { %1179 = vst [vmem:[%s1835_s15 + $0x70] sm:$0xff] %v1178_v60  ;;  %v1184_v63 = vld [vmem:[%s1839_s20 + $0x88] sm:$0xff]  ;;  %1181 = vst [vmem:[%s1835_s15 + $0x78] sm:$0xff] %v1180_v61  ;;  %v1186_v0 = vld [vmem:[%s1839_s20 + $0x90] sm:$0xff] }
 0x158   : >> { %1183 = vst [vmem:[%s1835_s15 + $0x80] sm:$0xff] %v1182_v62  ;;  %1185 = vst [vmem:[%s1835_s15 + $0x88] sm:$0xff] %v1184_v63  ;;  %v1188_v1 = vld [vmem:[%s1839_s20 + $0x98] sm:$0xff]  ;;  %v1190_v2 = vld [vmem:[%s1839_s20 + $0xa0] sm:$0xff] }
 0x159   : >> { %1187 = vst [vmem:[%s1835_s15 + $0x90] sm:$0xff] %v1186_v0  ;;  %1189 = vst [vmem:[%s1835_s15 + $0x98] sm:$0xff] %v1188_v1  ;;  %v1192_v3 = vld [vmem:[%s1839_s20 + $0xa8] sm:$0xff]  ;;  %v1194_v4 = vld [vmem:[%s1839_s20 + $0xb0] sm:$0xff] }
 0x15a   : >> { %1191 = vst [vmem:[%s1835_s15 + $0xa0] sm:$0xff] %v1190_v2  ;;  %v1196_v5 = vld [vmem:[%s1839_s20 + $0xb8] sm:$0xff]  ;;  %1193 = vst [vmem:[%s1835_s15 + $0xa8] sm:$0xff] %v1192_v3  ;;  %v1198_v6 = vld [vmem:[%s1839_s20 + $0xc0] sm:$0xff] }
 0x15b   : >> { %1195 = vst [vmem:[%s1835_s15 + $0xb0] sm:$0xff] %v1194_v4  ;;  %1197 = vst [vmem:[%s1835_s15 + $0xb8] sm:$0xff] %v1196_v5  ;;  %v1200_v7 = vld [vmem:[%s1839_s20 + $0xc8] sm:$0xff]  ;;  %v1202_v8 = vld [vmem:[%s1839_s20 + $0xd0] sm:$0xff] }
 0x15c   : >> { %1199 = vst [vmem:[%s1835_s15 + $0xc0] sm:$0xff] %v1198_v6  ;;  %1201 = vst [vmem:[%s1835_s15 + $0xc8] sm:$0xff] %v1200_v7  ;;  %v1204_v9 = vld [vmem:[%s1839_s20 + $0xd8] sm:$0xff]  ;;  %v1206_v10 = vld [vmem:[%s1839_s20 + $0xe0] sm:$0xff] }
 0x15d   : >> { %1203 = vst [vmem:[%s1835_s15 + $0xd0] sm:$0xff] %v1202_v8  ;;  %v1208_v11 = vld [vmem:[%s1839_s20 + $0xe8] sm:$0xff]  ;;  %1205 = vst [vmem:[%s1835_s15 + $0xd8] sm:$0xff] %v1204_v9  ;;  %v1210_v12 = vld [vmem:[%s1839_s20 + $0xf0] sm:$0xff] }
 0x15e   : >> { %1207 = vst [vmem:[%s1835_s15 + $0xe0] sm:$0xff] %v1206_v10  ;;  %1209 = vst [vmem:[%s1835_s15 + $0xe8] sm:$0xff] %v1208_v11  ;;  %v1212_v13 = vld [vmem:[%s1839_s20 + $0xf8] sm:$0xff]  ;;  %v1214_v14 = vld [vmem:[%s1839_s20 + $0x100] sm:$0xff] }
 0x15f   : >> { %1211 = vst [vmem:[%s1835_s15 + $0xf0] sm:$0xff] %v1210_v12  ;;  %1213 = vst [vmem:[%s1835_s15 + $0xf8] sm:$0xff] %v1212_v13  ;;  %v1216_v15 = vld [vmem:[%s1839_s20 + $0x108] sm:$0xff]  ;;  %v1218_v16 = vld [vmem:[%s1839_s20 + $0x110] sm:$0xff] }
 0x160   : >> { %1215 = vst [vmem:[%s1835_s15 + $0x100] sm:$0xff] %v1214_v14  ;;  %v1220_v17 = vld [vmem:[%s1839_s20 + $0x118] sm:$0xff]  ;;  %1217 = vst [vmem:[%s1835_s15 + $0x108] sm:$0xff] %v1216_v15  ;;  %v1222_v18 = vld [vmem:[%s1839_s20 + $0x120] sm:$0xff] }
 0x161   : >> { %1219 = vst [vmem:[%s1835_s15 + $0x110] sm:$0xff] %v1218_v16  ;;  %1221 = vst [vmem:[%s1835_s15 + $0x118] sm:$0xff] %v1220_v17  ;;  %v1224_v19 = vld [vmem:[%s1839_s20 + $0x128] sm:$0xff]  ;;  %v1226_v20 = vld [vmem:[%s1839_s20 + $0x130] sm:$0xff] }
 0x162   : >> { %1223 = vst [vmem:[%s1835_s15 + $0x120] sm:$0xff] %v1222_v18  ;;  %1225 = vst [vmem:[%s1835_s15 + $0x128] sm:$0xff] %v1224_v19  ;;  %v1228_v21 = vld [vmem:[%s1839_s20 + $0x138] sm:$0xff]  ;;  %v1230_v22 = vld [vmem:[%s1839_s20 + $0x140] sm:$0xff] }
 0x163   : >> { %1227 = vst [vmem:[%s1835_s15 + $0x130] sm:$0xff] %v1226_v20  ;;  %v1232_v23 = vld [vmem:[%s1839_s20 + $0x148] sm:$0xff]  ;;  %1229 = vst [vmem:[%s1835_s15 + $0x138] sm:$0xff] %v1228_v21  ;;  %v1234_v24 = vld [vmem:[%s1839_s20 + $0x150] sm:$0xff] }
 0x164   : >> { %1231 = vst [vmem:[%s1835_s15 + $0x140] sm:$0xff] %v1230_v22  ;;  %1233 = vst [vmem:[%s1835_s15 + $0x148] sm:$0xff] %v1232_v23  ;;  %v1236_v25 = vld [vmem:[%s1839_s20 + $0x158] sm:$0xff]  ;;  %v1238_v26 = vld [vmem:[%s1839_s20 + $0x160] sm:$0xff] }
 0x165   : >> { %1235 = vst [vmem:[%s1835_s15 + $0x150] sm:$0xff] %v1234_v24  ;;  %1237 = vst [vmem:[%s1835_s15 + $0x158] sm:$0xff] %v1236_v25  ;;  %v1240_v27 = vld [vmem:[%s1839_s20 + $0x168] sm:$0xff]  ;;  %v1242_v28 = vld [vmem:[%s1839_s20 + $0x170] sm:$0xff] }
 0x166   : >> { %1239 = vst [vmem:[%s1835_s15 + $0x160] sm:$0xff] %v1238_v26  ;;  %v1244_v29 = vld [vmem:[%s1839_s20 + $0x178] sm:$0xff]  ;;  %1241 = vst [vmem:[%s1835_s15 + $0x168] sm:$0xff] %v1240_v27  ;;  %v1246_v30 = vld [vmem:[%s1839_s20 + $0x180] sm:$0xff] }
 0x167   : >> { %1243 = vst [vmem:[%s1835_s15 + $0x170] sm:$0xff] %v1242_v28  ;;  %1245 = vst [vmem:[%s1835_s15 + $0x178] sm:$0xff] %v1244_v29  ;;  %v1248_v31 = vld [vmem:[%s1839_s20 + $0x188] sm:$0xff]  ;;  %v1250_v32 = vld [vmem:[%s1839_s20 + $0x190] sm:$0xff] }
 0x168   : >> { %1247 = vst [vmem:[%s1835_s15 + $0x180] sm:$0xff] %v1246_v30  ;;  %1249 = vst [vmem:[%s1835_s15 + $0x188] sm:$0xff] %v1248_v31  ;;  %v1252_v33 = vld [vmem:[%s1839_s20 + $0x198] sm:$0xff]  ;;  %v1254_v34 = vld [vmem:[%s1839_s20 + $0x1a0] sm:$0xff] }
 0x169   : >> { %1251 = vst [vmem:[%s1835_s15 + $0x190] sm:$0xff] %v1250_v32  ;;  %v1256_v35 = vld [vmem:[%s1839_s20 + $0x1a8] sm:$0xff]  ;;  %1253 = vst [vmem:[%s1835_s15 + $0x198] sm:$0xff] %v1252_v33  ;;  %v1258_v36 = vld [vmem:[%s1839_s20 + $0x1b0] sm:$0xff]  ;;  %1146 = sbr.rel (!%p1143_p12) target bundleno = 335 (0x14f), region = 122 }
 0x16a   : >> { %1255 = vst [vmem:[%s1835_s15 + $0x1a0] sm:$0xff] %v1254_v34  ;;  %1257 = vst [vmem:[%s1835_s15 + $0x1a8] sm:$0xff] %v1256_v35  ;;  %v1260_v37 = vld [vmem:[%s1839_s20 + $0x1b8] sm:$0xff]  ;;  %v1262_v38 = vld [vmem:[%s1839_s20 + $0x1c0] sm:$0xff] }
 0x16b   : >> { %1259 = vst [vmem:[%s1835_s15 + $0x1b0] sm:$0xff] %v1258_v36  ;;  %1261 = vst [vmem:[%s1835_s15 + $0x1b8] sm:$0xff] %v1260_v37  ;;  %v1264_v39 = vld [vmem:[%s1839_s20 + $0x1c8] sm:$0xff]  ;;  %v1266_v40 = vld [vmem:[%s1839_s20 + $0x1d0] sm:$0xff] }
 0x16c   : >> { %1263 = vst [vmem:[%s1835_s15 + $0x1c0] sm:$0xff] %v1262_v38  ;;  %v1268_v41 = vld [vmem:[%s1839_s20 + $0x1d8] sm:$0xff]  ;;  %1265 = vst [vmem:[%s1835_s15 + $0x1c8] sm:$0xff] %v1264_v39  ;;  %v1270_v42 = vld [vmem:[%s1839_s20 + $0x1e0] sm:$0xff] }
 0x16d   : >> { %1267 = vst [vmem:[%s1835_s15 + $0x1d0] sm:$0xff] %v1266_v40  ;;  %1269 = vst [vmem:[%s1835_s15 + $0x1d8] sm:$0xff] %v1268_v41  ;;  %v1272_v43 = vld [vmem:[%s1839_s20 + $0x1e8] sm:$0xff]  ;;  %v1274_v45 = vld [vmem:[%s1839_s20 + $0x1f0] sm:$0xff] }
 0x16e   : >> { %1271 = vst [vmem:[%s1835_s15 + $0x1e0] sm:$0xff] %v1270_v42  ;;  %1273 = vst [vmem:[%s1835_s15 + $0x1e8] sm:$0xff] %v1272_v43  ;;  %v1276_v46 = vld [vmem:[%s1839_s20 + $0x1f8] sm:$0xff]  ;;  %s2427_s20 = smov %s2293_s10 }
 0x16f   : >> { %1275 = vst [vmem:[%s1835_s15 + $0x1f0] sm:$0xff] %v1274_v45  ;;  %1277 = vst [vmem:[%s1835_s15 + $0x1f8] sm:$0xff] %v1276_v46  ;;  %s2426_s15 = smov %s2296_s11 }
 0x170 PF: > { %s2401_s14 = sand.u32 63, %s2433_s26   ;;  %s1510_s17 = sshll.u32 %s2226_s6, 9 }
 0x171   : > { %s1289_s18 = scalar_lea.vmem %s2023_s12, %s1510_s17 [#allocation2]   ;;  %s1291_s21 = scalar_lea.vmem %s2220_s4, %s1510_s17  }
 0x172   : > { %p1504_p13 = scmp.le.s32.totalorder %s2401_s14, 0 }
 0x173   : > { %s1849_s22 = smov (!%p1504_p13), %s1291_s21   ;;  %s1853_s23 = smov (!%p1504_p13), %s1289_s18  }
 0x174   : > { %1382 = sbr.rel (%p1504_p13) target bundleno = 389 (0x185), region = 127  ;;  %s1857_s24 = smov (!%p1504_p13), 0  }
 0x175   : > { %s1861_s25 = smov (!%p1504_p13), 0  }
 0x17b LB: >> { %v1301_v44 = vld [vmem:[%s1855_s23] sm:$0xff]  ;;  %s1303_s26 = sadd.s32 1, %s1859_s24  ;;  %s1295_s25 = sadd.s32 1, %s1863_s25   ;;  %s1863_s25 = sphi %s1861_s25, %s1295_s25   ;;  %s1859_s24 = sphi %s1857_s24, %s1858_s24   ;;  %s1855_s23 = sphi %s1853_s23, %s1308_s23   ;;  %s1851_s22 = sphi %s1849_s22, %s1309_s22  }
 0x17c   : >> { %1302 = vst [vmem:[%s1851_s22] sm:$0xff] %v1301_v44  ;;  %p1304_p0 = scmp.ge.s32.totalorder %s1303_s26, %s2401_s14  ;;  %p1294_p1 = scmp.ge.s32.totalorder %s1295_s25, %s2401_s14 }
 0x17e   : >> { %s2437_s26 = smov (%p1304_p0, %s1303_s26), 0  ;;  %1297 = sbr.rel (!%p1294_p1) target bundleno = 379 (0x17b), region = 133 }
 0x17f   : >> { %s1505_s12 = sshll.u32 %s2437_s26, 3  ;;  %s1858_s24 = smov %s2437_s26  }
 0x180   : >> { %s1308_s23 = scalar_lea.vmem %s1289_s18, %s1505_s12 [#allocation2]   ;;  %s1309_s22 = scalar_lea.vmem %s1291_s21, %s1505_s12  }
 0x185 PF: > { %p10_p2 = scmp.ge.s32.totalorder %s1901_s16, 15   ;;  %s2429_s12 = smov %s1827_s13 }
 0x186   : > { %s2430_s13 = smov %s1909_s19  ;;  %s2431_s14 = smov %s1901_s16 }
 0x187   :  { %12 = sbr.rel (!%p10_p2) target bundleno = 2 (0x2), region = 144 }

// kernel: net_forward.12
= control target key start
LH: loop header
LB: loop body
LE: loop exit
PB: predicated region body
PF: predicated region fallthrough
CT: control target
= control target key end

     0   :  { %vm130_vm0 = vcmask 97280   ;;  %s390_s0 = inlined_call_operand.vmem [shape: f32[56,140], index: 0, kind: input, shape index: {}]   ;;  %s391_s1 = inlined_call_operand.vmem [shape: f32[56,140], index: 1, kind: input, shape index: {}]   ;;  %s392_s2 = inlined_call_operand.vmem [shape: f32[56,140], index: 2, kind: input, shape index: {}]   ;;  %s393_s3 = inlined_call_operand.vmem [shape: f32[56,140], index: 3, kind: input, shape index: {}]   ;;  %s394_s4 = inlined_call_operand.vmem [shape: f32[56,140], index: 4, kind: output, shape index: {}]  }
   0x1   :  { %v17_v0 = vld [vmem:[%s390_s0] sm:$0xff]  ;;  %v18_v5 = vld [vmem:[%s390_s0 + $0x8] sm:$0xff]  ;;  %v19_v11 = vld [vmem:[%s390_s0 + $0x10] sm:$0xff] }
   0x2   :  { %v31_v1 = vld [vmem:[%s391_s1] sm:$0xff]  ;;  %v32_v6 = vld [vmem:[%s391_s1 + $0x8] sm:$0xff]  ;;  %v33_v13 = vld [vmem:[%s391_s1 + $0x10] sm:$0xff] }
   0x3   :  { %v59_v2 = vld [vmem:[%s392_s2] sm:$0xff]  ;;  %v45_v3 = vmax.f32 %v17_v0, %v31_v1  ;;  %v46_v8 = vmax.f32 %v18_v5, %v32_v6  ;;  %v60_v9 = vld [vmem:[%s392_s2 + $0x8] sm:$0xff]  ;;  %v61_v14 = vld [vmem:[%s392_s2 + $0x10] sm:$0xff]  ;;  %v47_v17 = vmax.f32 %v19_v11, %v33_v13 }
   0x4   :  { %v73_v4 = vld [vmem:[%s393_s3] sm:$0xff]  ;;  %v74_v10 = vld [vmem:[%s393_s3 + $0x8] sm:$0xff]  ;;  %v75_v15 = vld [vmem:[%s393_s3 + $0x10] sm:$0xff] }
   0x5   :  { %v87_v7 = vmax.f32 %v59_v2, %v73_v4  ;;  %v88_v12 = vmax.f32 %v60_v9, %v74_v10  ;;  %v89_v18 = vmax.f32 %v61_v14, %v75_v15  ;;  %v20_v19 = vld [vmem:[%s390_s0 + $0x18] sm:$0xff]  ;;  %v21_v25 = vld [vmem:[%s390_s0 + $0x20] sm:$0xff]  ;;  %v22_v33 = vld [vmem:[%s390_s0 + $0x28] sm:$0xff] }
   0x6   :  { %v34_v20 = vld [vmem:[%s391_s1 + $0x18] sm:$0xff]  ;;  %v35_v26 = vld [vmem:[%s391_s1 + $0x20] sm:$0xff]  ;;  %v36_v36 = vld [vmem:[%s391_s1 + $0x28] sm:$0xff] }
   0x7   :  { %v101_v16 = vmax.f32 %v45_v3, %v87_v7  ;;  %v62_v21 = vld [vmem:[%s392_s2 + $0x18] sm:$0xff]  ;;  %v102_v22 = vmax.f32 %v46_v8, %v88_v12  ;;  %v48_v23 = vmax.f32 %v20_v19, %v34_v20  ;;  %v103_v28 = vmax.f32 %v47_v17, %v89_v18  ;;  %v63_v31 = vld [vmem:[%s392_s2 + $0x20] sm:$0xff]  ;;  %v64_v37 = vld [vmem:[%s392_s2 + $0x28] sm:$0xff] }
   0x8   :  { %v76_v24 = vld [vmem:[%s393_s3 + $0x18] sm:$0xff]  ;;  %v49_v30 = vmax.f32 %v21_v25, %v35_v26  ;;  %v77_v32 = vld [vmem:[%s393_s3 + $0x20] sm:$0xff]  ;;  %v78_v38 = vld [vmem:[%s393_s3 + $0x28] sm:$0xff]  ;;  %v50_v41 = vmax.f32 %v22_v33, %v36_v36 }
   0x9   :  { %v115_v27 = vmax.f32 %v101_v16, 0.0  ;;  %v90_v29 = vmax.f32 %v62_v21, %v76_v24  ;;  %v116_v34 = vmax.f32 %v102_v22, 0.0  ;;  %v91_v35 = vmax.f32 %v63_v31, %v77_v32  ;;  %v23_v43 = vld [vmem:[%s390_s0 + $0x30] sm:$0xff]  ;;  %v24_v49 = vld [vmem:[%s390_s0 + $0x38] sm:$0xff]  ;;  %v25_v57 = vld [vmem:[%s390_s0 + $0x40] sm:$0xff] }
   0xa   :  { %v117_v39 = vmax.f32 %v103_v28, 0.0  ;;  %v92_v42 = vmax.f32 %v64_v37, %v78_v38  ;;  %v37_v44 = vld [vmem:[%s391_s1 + $0x30] sm:$0xff]  ;;  %v38_v50 = vld [vmem:[%s391_s1 + $0x38] sm:$0xff]  ;;  %v39_v60 = vld [vmem:[%s391_s1 + $0x40] sm:$0xff] }
   0xb   :  { %129 = vst [vmem:[%s394_s4] sm:$0xff] %v115_v27  ;;  %v104_v40 = vmax.f32 %v48_v23, %v90_v29  ;;  %v65_v45 = vld [vmem:[%s392_s2 + $0x30] sm:$0xff]  ;;  %131 = vst.msk [vmem:[%s394_s4 + $0x8] sm:$0xff] %vm130_vm0, %v116_v34  ;;  %v105_v46 = vmax.f32 %v49_v30, %v91_v35  ;;  %v51_v47 = vmax.f32 %v23_v43, %v37_v44  ;;  %v66_v55 = vld [vmem:[%s392_s2 + $0x38] sm:$0xff] }
   0xc   :  { %v79_v48 = vld [vmem:[%s393_s3 + $0x30] sm:$0xff]  ;;  %132 = vst [vmem:[%s394_s4 + $0x10] sm:$0xff] %v117_v39  ;;  %v106_v52 = vmax.f32 %v50_v41, %v92_v42  ;;  %v52_v54 = vmax.f32 %v24_v49, %v38_v50  ;;  %v80_v56 = vld [vmem:[%s393_s3 + $0x38] sm:$0xff]  ;;  %v67_v61 = vld [vmem:[%s392_s2 + $0x40] sm:$0xff]  ;;  %v53_v1 = vmax.f32 %v25_v57, %v39_v60 }
   0xd   :  { %v118_v51 = vmax.f32 %v104_v40, 0.0  ;;  %v93_v53 = vmax.f32 %v65_v45, %v79_v48  ;;  %v119_v58 = vmax.f32 %v105_v46, 0.0  ;;  %v94_v59 = vmax.f32 %v66_v55, %v80_v56  ;;  %v81_v62 = vld [vmem:[%s393_s3 + $0x40] sm:$0xff]  ;;  %v26_v3 = vld [vmem:[%s390_s0 + $0x48] sm:$0xff]  ;;  %v27_v9 = vld [vmem:[%s390_s0 + $0x50] sm:$0xff] }
   0xe   :  { %v120_v63 = vmax.f32 %v106_v52, 0.0  ;;  %v95_v2 = vmax.f32 %v67_v61, %v81_v62  ;;  %v40_v4 = vld [vmem:[%s391_s1 + $0x48] sm:$0xff]  ;;  %v41_v10 = vld [vmem:[%s391_s1 + $0x50] sm:$0xff]  ;;  %v28_v17 = vld [vmem:[%s390_s0 + $0x58] sm:$0xff] }
   0xf   :  { %133 = vst.msk [vmem:[%s394_s4 + $0x18] sm:$0xff] %vm130_vm0, %v118_v51  ;;  %v107_v0 = vmax.f32 %v51_v47, %v93_v53  ;;  %v68_v5 = vld [vmem:[%s392_s2 + $0x48] sm:$0xff]  ;;  %134 = vst [vmem:[%s394_s4 + $0x20] sm:$0xff] %v119_v58  ;;  %v108_v6 = vmax.f32 %v52_v54, %v94_v59  ;;  %v54_v7 = vmax.f32 %v26_v3, %v40_v4  ;;  %v69_v15 = vld [vmem:[%s392_s2 + $0x50] sm:$0xff] }
  0x10   :  { %v82_v8 = vld [vmem:[%s393_s3 + $0x48] sm:$0xff]  ;;  %135 = vst.msk [vmem:[%s394_s4 + $0x28] sm:$0xff] %vm130_vm0, %v120_v63  ;;  %v109_v12 = vmax.f32 %v53_v1, %v95_v2  ;;  %v55_v14 = vmax.f32 %v27_v9, %v41_v10  ;;  %v83_v16 = vld [vmem:[%s393_s3 + $0x50] sm:$0xff]  ;;  %v42_v20 = vld [vmem:[%s391_s1 + $0x58] sm:$0xff] }
  0x11   :  { %v121_v11 = vmax.f32 %v107_v0, 0.0  ;;  %v96_v13 = vmax.f32 %v68_v5, %v82_v8  ;;  %v122_v18 = vmax.f32 %v108_v6, 0.0  ;;  %v97_v19 = vmax.f32 %v69_v15, %v83_v16  ;;  %v70_v21 = vld [vmem:[%s392_s2 + $0x58] sm:$0xff]  ;;  %v29_v27 = vld [vmem:[%s390_s0 + $0x60] sm:$0xff]  ;;  %v30_v33 = vld [vmem:[%s390_s0 + $0x68] sm:$0xff] }
  0x12   :  { %v84_v22 = vld [vmem:[%s393_s3 + $0x58] sm:$0xff]  ;;  %v123_v23 = vmax.f32 %v109_v12, 0.0  ;;  %v56_v25 = vmax.f32 %v28_v17, %v42_v20  ;;  %v43_v28 = vld [vmem:[%s391_s1 + $0x60] sm:$0xff]  ;;  %v44_v34 = vld [vmem:[%s391_s1 + $0x68] sm:$0xff] }
  0x13   :  { %136 = vst [vmem:[%s394_s4 + $0x30] sm:$0xff] %v121_v11  ;;  %v110_v24 = vmax.f32 %v54_v7, %v96_v13  ;;  %v98_v26 = vmax.f32 %v70_v21, %v84_v22  ;;  %v71_v29 = vld [vmem:[%s392_s2 + $0x60] sm:$0xff]  ;;  %137 = vst.msk [vmem:[%s394_s4 + $0x38] sm:$0xff] %vm130_vm0, %v122_v18  ;;  %v111_v30 = vmax.f32 %v55_v14, %v97_v19  ;;  %v72_v39 = vld [vmem:[%s392_s2 + $0x68] sm:$0xff] }
  0x14   :  { %v57_v31 = vmax.f32 %v29_v27, %v43_v28  ;;  %v85_v32 = vld [vmem:[%s393_s3 + $0x60] sm:$0xff]  ;;  %138 = vst [vmem:[%s394_s4 + $0x40] sm:$0xff] %v123_v23  ;;  %v58_v38 = vmax.f32 %v30_v33, %v44_v34  ;;  %v86_v40 = vld [vmem:[%s393_s3 + $0x68] sm:$0xff] }
  0x15   :  { %v124_v35 = vmax.f32 %v110_v24, 0.0  ;;  %v112_v36 = vmax.f32 %v56_v25, %v98_v26  ;;  %v99_v37 = vmax.f32 %v71_v29, %v85_v32  ;;  %v125_v41 = vmax.f32 %v111_v30, 0.0 }
  0x16   :  { %v100_v42 = vmax.f32 %v72_v39, %v86_v40 }
  0x17   :  { %139 = vst.msk [vmem:[%s394_s4 + $0x48] sm:$0xff] %vm130_vm0, %v124_v35  ;;  %v126_v43 = vmax.f32 %v112_v36, 0.0  ;;  %v113_v44 = vmax.f32 %v57_v31, %v99_v37  ;;  %140 = vst [vmem:[%s394_s4 + $0x50] sm:$0xff] %v125_v41 }
  0x18   :  { %v114_v45 = vmax.f32 %v58_v38, %v100_v42 }
  0x19   :  { %141 = vst.msk [vmem:[%s394_s4 + $0x58] sm:$0xff] %vm130_vm0, %v126_v43  ;;  %v127_v46 = vmax.f32 %v113_v44, 0.0 }
  0x1a   :  { %v128_v47 = vmax.f32 %v114_v45, 0.0 }
  0x1b   :  { %142 = vst [vmem:[%s394_s4 + $0x60] sm:$0xff] %v127_v46 }
  0x1c   :  { %143 = vst.msk [vmem:[%s394_s4 + $0x68] sm:$0xff] %vm130_vm0, %v128_v47 }

// kernel: net_forward.13
= control target key start
LH: loop header
LB: loop body
LE: loop exit
PB: predicated region body
PF: predicated region fallthrough
CT: control target
= control target key end

     0   :  { %s1191_s12 = smov 0   ;;  %s1483_s0 = inlined_call_operand.vmem [shape: bf16[8192,27], index: 0, kind: input, shape index: {}]   ;;  %s1484_s1 = inlined_call_operand.vmem [shape: bf16[27,32], index: 1, kind: input, shape index: {}]   ;;  %s1485_s2 = inlined_call_operand.vmem [shape: f32[1,32], index: 2, kind: input, shape index: {}]   ;;  %s1486_s3 = inlined_call_operand.vmem [shape: f32[8192,32], index: 3, kind: output, shape index: {}]  }
   0x1 LB: > { %s935_s13 = sadd.s32 4294967295, %s1168_s12   ;;  %p939_p0 = scmp.ge.s32.totalorder %s1168_s12, 1  ;;  %s1168_s12 = sphi %s1191_s12, %s13_s12  }
   0x2   : > { %p138_p1 = scmp.lt.s32.totalorder %s1168_s12, 17 }
   0x4   : > { %p139_p2 = pnand %p939_p0, %p138_p1 }
   0x5   : > { %v1128_v0 = vld [vmem:[%s1484_s1] sm:$0xff] (!%p139_p2)   ;;  %vm518_vm0 = vcmask (!%p139_p2), 1044480   ;;  %v1129_v1 = vld [vmem:[%s1484_s1 + $0x8] sm:$0x3f] (!%p139_p2)   ;;  %vm519_vm1 = vcmask (!%p139_p2), 1045504   ;;  %s940_s18 = sshll.u32 (!%p139_p2), %s935_s13, 6 }
   0x6   : > { %142 = sbr.rel (%p139_p2) target bundleno = 293 (0x125), region = 32  ;;  %1047 = vmatprep.subr.bf16.mxu0 (!%p139_p2), %v1128_v0  ;;  %1115 = vmatprep.subr.bf16.mxu1 (!%p139_p2), %v1128_v0  ;;  %v1170_v2 = vmov (!%p139_p2), 65535   ;;  %p163_p3 = scmp.lt.s32.totalorder (!%p139_p2), %s940_s18, 1023  ;;  %vm421_vm2 = vcmask (!%p139_p2), 220160   ;;  %v1281_v38 = vld [vmem:[%s1485_s2] ss:$0 sm:$0xff] (!%p139_p2) }
   0x7   : > { %1048 = vmatpush3.bf16.msra.mxu0 (!%p139_p2), %v1128_v0  ;;  %1117 = vmatpush3.bf16.msra.mxu1 (!%p139_p2), %v1128_v0  ;;  %v520_v3 = vsel (!%p139_p2), %vm518_vm0, 4294967295, %v1170_v2  ;;  %vm814_vm3 = vcmask (!%p139_p2), 261120  }
   0x8   : > { %v521_v4 = vsel (!%p139_p2), %vm519_vm1, %v520_v3, 0 }
   0x9   : > { %v523_v5 = vand.u32 (!%p139_p2), %v1129_v1, %v521_v4 }
   0xb   : > { %1049 = vmatprep.subr.bf16.mxu0 (!%p139_p2), %v523_v5  ;;  %1116 = vmatprep.subr.bf16.mxu1 (!%p139_p2), %v523_v5 }
   0xc   : > { %1050 = vmatpush3.bf16.msra.mxu0 (!%p139_p2), %v523_v5  ;;  %1118 = vmatpush3.bf16.msra.mxu1 (!%p139_p2), %v523_v5 }
   0xd   : > { %s1488_s18 = smov (!%p163_p3, %s940_s18), 1023 }
   0xe   : > { %s941_s19 = sshll.u32 %s1488_s18, 2  ;;  %s943_s23 = sshll.u32 %s1488_s18, 3 }
   0xf   : > { %s1211_s22 = scalar_lea.vmem %s1483_s0, %s941_s19  ;;  %s1286_s28 = scalar_lea.vmem %s1486_s3, %s943_s23 }
  0x10   : > { %v1130_v6 = vld [vmem:[%s1211_s22] sm:$0xff]   ;;  %v1132_v8 = vld [vmem:[%s1211_s22 + $0x8] sm:$0xff]   ;;  %v1134_v10 = vld [vmem:[%s1211_s22 + $0x10] sm:$0xff]  }
  0x11   : > { %v1131_v7 = vld [vmem:[%s1211_s22 + $0x80] sm:$0xff]   ;;  %1051 = vmatprep.mubr.msk.bf16.mxu0 %vm421_vm2, %v1130_v6  ;;  %v1133_v9 = vld [vmem:[%s1211_s22 + $0x88] sm:$0xff]   ;;  %v1135_v11 = vld [vmem:[%s1211_s22 + $0x90] sm:$0xff]  }
  0x12   : > { %1083 = vmatprep.mubr.msk.bf16.mxu1 %vm421_vm2, %v1131_v7  ;;  %1052 = vmatmul.mubr.msk.bf16.vlgmr.msra.gmra.mrb[0].mxu0 %vm421_vm2, %v1132_v8  ;;  %v1136_v12 = vld [vmem:[%s1211_s22 + $0x18] sm:$0xff]   ;;  %v1138_v14 = vld [vmem:[%s1211_s22 + $0x20] sm:$0xff]   ;;  %v1140_v16 = vld [vmem:[%s1211_s22 + $0x28] sm:$0xff]  }
  0x13   : > { %1084 = vmatmul.mubr.msk.bf16.vlgmr.msra.gmra.mrb[0].mxu1 %vm421_vm2, %v1133_v9  ;;  %1055 = vmatprep.mubr.msk.bf16.mxu0 %vm421_vm2, %v1134_v10  ;;  %v1137_v13 = vld [vmem:[%s1211_s22 + $0x98] sm:$0xff]   ;;  %v1139_v15 = vld [vmem:[%s1211_s22 + $0xa0] sm:$0xff]   ;;  %v1141_v17 = vld [vmem:[%s1211_s22 + $0xa8] sm:$0xff]  }
  0x14   : > { %1087 = vmatprep.mubr.msk.bf16.mxu1 %vm421_vm2, %v1135_v11  ;;  %v1142_v18 = vld [vmem:[%s1211_s22 + $0x30] sm:$0xff]   ;;  %v1144_v20 = vld [vmem:[%s1211_s22 + $0x38] sm:$0xff]   ;;  %v1146_v22 = vld [vmem:[%s1211_s22 + $0x40] sm:$0xff]  }
  0x15   : > { %v1143_v19 = vld [vmem:[%s1211_s22 + $0xb0] sm:$0xff]   ;;  %v1145_v21 = vld [vmem:[%s1211_s22 + $0xb8] sm:$0xff]   ;;  %v1147_v23 = vld [vmem:[%s1211_s22 + $0xc0] sm:$0xff]  }
  0x16   : > { %v1148_v24 = vld [vmem:[%s1211_s22 + $0x48] sm:$0xff]   ;;  %v1150_v26 = vld [vmem:[%s1211_s22 + $0x50] sm:$0xff]   ;;  %v1152_v28 = vld [vmem:[%s1211_s22 + $0x58] sm:$0xff]  }
  0x17   : > { %v1149_v25 = vld [vmem:[%s1211_s22 + $0xc8] sm:$0xff]   ;;  %v1151_v27 = vld [vmem:[%s1211_s22 + $0xd0] sm:$0xff]   ;;  %v1153_v29 = vld [vmem:[%s1211_s22 + $0xd8] sm:$0xff]  }
  0x18   : > { %v1154_v30 = vld [vmem:[%s1211_s22 + $0x60] sm:$0xff]   ;;  %v1156_v32 = vld [vmem:[%s1211_s22 + $0x68] sm:$0xff]   ;;  %v1158_v34 = vld [vmem:[%s1211_s22 + $0x70] sm:$0xff]  }
  0x19   : > { %v1155_v31 = vld [vmem:[%s1211_s22 + $0xe0] sm:$0xff]   ;;  %v1157_v33 = vld [vmem:[%s1211_s22 + $0xe8] sm:$0xff]   ;;  %v1159_v35 = vld [vmem:[%s1211_s22 + $0xf0] sm:$0xff]  }
  0x1a   : > { %1056 = vmatmul.mubr.msk.bf16.gmra.mrb[4].mxu0 %vm421_vm2, %v1136_v12  ;;  %v1160_v36 = vld [vmem:[%s1211_s22 + $0x78] sm:$0xff]  }
  0x1b   : > { %1088 = vmatmul.mubr.msk.bf16.gmra.mrb[4].mxu1 %vm421_vm2, %v1137_v13  ;;  %1059 = vmatprep.mubr.msk.bf16.mxu0 %vm421_vm2, %v1138_v14  ;;  %v1161_v37 = vld [vmem:[%s1211_s22 + $0xf8] sm:$0xff]  }
  0x1c   : > { %1091 = vmatprep.mubr.msk.bf16.mxu1 %vm421_vm2, %v1139_v15 }
  0x22   : > { %1060 = vmatmul.mubr.msk.bf16.gmra.mrb[8].mxu0 %vm421_vm2, %v1140_v16 }
  0x23   : > { %1092 = vmatmul.mubr.msk.bf16.gmra.mrb[8].mxu1 %vm421_vm2, %v1141_v17  ;;  %1063 = vmatprep.mubr.msk.bf16.mxu0 %vm421_vm2, %v1142_v18 }
  0x24   : > { %1095 = vmatprep.mubr.msk.bf16.mxu1 %vm421_vm2, %v1143_v19 }
  0x2a   : > { %1064 = vmatmul.mubr.msk.bf16.gmra.mrb[12].mxu0 %vm421_vm2, %v1144_v20 }
  0x2b   : > { %1096 = vmatmul.mubr.msk.bf16.gmra.mrb[12].mxu1 %vm421_vm2, %v1145_v21  ;;  %1067 = vmatprep.mubr.msk.bf16.mxu0 %vm421_vm2, %v1146_v22 }
  0x2c   : > { %1099 = vmatprep.mubr.msk.bf16.mxu1 %vm421_vm2, %v1147_v23 }
  0x32   : > { %1068 = vmatmul.mubr.msk.bf16.gmra.mrb[16].mxu0 %vm421_vm2, %v1148_v24 }
  0x33   : > { %1100 = vmatmul.mubr.msk.bf16.gmra.mrb[16].mxu1 %vm421_vm2, %v1149_v25  ;;  %1071 = vmatprep.mubr.msk.bf16.mxu0 %vm421_vm2, %v1150_v26 }
  0x34   : > { %1103 = vmatprep.mubr.msk.bf16.mxu1 %vm421_vm2, %v1151_v27 }
  0x3a   : > { %1072 = vmatmul.mubr.msk.bf16.gmra.mrb[20].mxu0 %vm421_vm2, %v1152_v28 }
  0x3b   : > { %1104 = vmatmul.mubr.msk.bf16.gmra.mrb[20].mxu1 %vm421_vm2, %v1153_v29  ;;  %1075 = vmatprep.mubr.msk.bf16.mxu0 %vm421_vm2, %v1154_v30 }
  0x3c   : > { %1107 = vmatprep.mubr.msk.bf16.mxu1 %vm421_vm2, %v1155_v31 }
  0x42   : > { %1076 = vmatmul.mubr.msk.bf16.gmra.mrb[24].mxu0 %vm421_vm2, %v1156_v32 }
  0x43   : > { %1108 = vmatmul.mubr.msk.bf16.gmra.mrb[24].mxu1 %vm421_vm2, %v1157_v33  ;;  %1079 = vmatprep.mubr.msk.bf16.mxu0 %vm421_vm2, %v1158_v34 }
  0x44   : > { %1111 = vmatprep.mubr.msk.bf16.mxu1 %vm421_vm2, %v1159_v35 }
  0x4a   : > { %1080 = vmatmul.mubr.msk.bf16.gmra.mrb[28].mxu0 %vm421_vm2, %v1160_v36 }
  0x4b   : > { %1112 = vmatmul.mubr.msk.bf16.gmra.mrb[28].mxu1 %vm421_vm2, %v1161_v37 }
  0xe5   : > { %v1053_v39 = vpop.f32.mrb[0].mxu0 }
  0xe6   : > { %v568_v40 = vadd.f32 %v1053_v39, %v1281_v38  ;;  %v1085_v41 = vpop.f32.mrb[0].mxu1  ;;  %v559_v42 = vpop.f32.mrb[1].mxu0 }
  0xe7   : > { %v696_v43 = vadd.f32 %v1085_v41, %v1281_v38  ;;  %v560_v44 = vadd.f32 %v1281_v38, %v559_v42  ;;  %v687_v45 = vpop.f32.mrb[1].mxu1  ;;  %v1054_v46 = vpop.f32.mrb[2].mxu0 }
  0xe8   : > { %817 = vst.msk [vmem:[%s1286_s28 + $0x10] sm:$0xff] %vm814_vm3, %v568_v40  ;;  %v688_v47 = vadd.f32 %v1281_v38, %v687_v45  ;;  %v571_v48 = vadd.f32 %v1054_v46, %v1281_v38  ;;  %v1086_v49 = vpop.f32.mrb[2].mxu1  ;;  %v562_v50 = vpop.f32.mrb[3].mxu0 }
  0xe9   : > { %849 = vst.msk [vmem:[%s1286_s28 + $0x110] sm:$0xff] %vm814_vm3, %v696_v43  ;;  %815 = vst.msk [vmem:[%s1286_s28] sm:$0xff] %vm814_vm3, %v560_v44  ;;  %v699_v51 = vadd.f32 %v1086_v49, %v1281_v38  ;;  %v563_v52 = vadd.f32 %v1281_v38, %v562_v50  ;;  %v690_v53 = vpop.f32.mrb[3].mxu1 }
  0xea   : > { %847 = vst.msk [vmem:[%s1286_s28 + $0x100] sm:$0xff] %vm814_vm3, %v688_v47  ;;  %818 = vst.msk [vmem:[%s1286_s28 + $0x18] sm:$0xff] %vm814_vm3, %v571_v48  ;;  %v691_v54 = vadd.f32 %v1281_v38, %v690_v53 }
  0xeb   : > { %850 = vst.msk [vmem:[%s1286_s28 + $0x118] sm:$0xff] %vm814_vm3, %v699_v51  ;;  %816 = vst.msk [vmem:[%s1286_s28 + $0x8] sm:$0xff] %vm814_vm3, %v563_v52 }
  0xec   : > { %848 = vst.msk [vmem:[%s1286_s28 + $0x108] sm:$0xff] %vm814_vm3, %v691_v54 }
  0xed   : > { %v1057_v55 = vpop.f32.mrb[4].mxu0 }
  0xee   : > { %v584_v56 = vadd.f32 %v1057_v55, %v1281_v38  ;;  %v1089_v57 = vpop.f32.mrb[4].mxu1  ;;  %v575_v58 = vpop.f32.mrb[5].mxu0 }
  0xef   : > { %v712_v59 = vadd.f32 %v1089_v57, %v1281_v38  ;;  %v576_v60 = vadd.f32 %v1281_v38, %v575_v58  ;;  %v703_v61 = vpop.f32.mrb[5].mxu1  ;;  %v1058_v62 = vpop.f32.mrb[6].mxu0 }
  0xf0   : > { %821 = vst.msk [vmem:[%s1286_s28 + $0x30] sm:$0xff] %vm814_vm3, %v584_v56  ;;  %v704_v63 = vadd.f32 %v1281_v38, %v703_v61  ;;  %v587_v0 = vadd.f32 %v1058_v62, %v1281_v38  ;;  %v1090_v1 = vpop.f32.mrb[6].mxu1  ;;  %v578_v2 = vpop.f32.mrb[7].mxu0 }
  0xf1   : > { %853 = vst.msk [vmem:[%s1286_s28 + $0x130] sm:$0xff] %vm814_vm3, %v712_v59  ;;  %819 = vst.msk [vmem:[%s1286_s28 + $0x20] sm:$0xff] %vm814_vm3, %v576_v60  ;;  %v715_v3 = vadd.f32 %v1090_v1, %v1281_v38  ;;  %v579_v4 = vadd.f32 %v1281_v38, %v578_v2  ;;  %v706_v5 = vpop.f32.mrb[7].mxu1 }
  0xf2   : > { %851 = vst.msk [vmem:[%s1286_s28 + $0x120] sm:$0xff] %vm814_vm3, %v704_v63  ;;  %822 = vst.msk [vmem:[%s1286_s28 + $0x38] sm:$0xff] %vm814_vm3, %v587_v0  ;;  %v707_v6 = vadd.f32 %v1281_v38, %v706_v5 }
  0xf3   : > { %854 = vst.msk [vmem:[%s1286_s28 + $0x138] sm:$0xff] %vm814_vm3, %v715_v3  ;;  %820 = vst.msk [vmem:[%s1286_s28 + $0x28] sm:$0xff] %vm814_vm3, %v579_v4 }
  0xf4   : > { %852 = vst.msk [vmem:[%s1286_s28 + $0x128] sm:$0xff] %vm814_vm3, %v707_v6 }
  0xf5   : > { %v1061_v7 = vpop.f32.mrb[8].mxu0 }
  0xf6   : > { %v600_v8 = vadd.f32 %v1061_v7, %v1281_v38  ;;  %v1093_v9 = vpop.f32.mrb[8].mxu1  ;;  %v591_v10 = vpop.f32.mrb[9].mxu0 }
  0xf7   : > { %v728_v11 = vadd.f32 %v1093_v9, %v1281_v38  ;;  %v592_v12 = vadd.f32 %v1281_v38, %v591_v10  ;;  %v719_v13 = vpop.f32.mrb[9].mxu1  ;;  %v1062_v14 = vpop.f32.mrb[10].mxu0 }
  0xf8   : > { %825 = vst.msk [vmem:[%s1286_s28 + $0x50] sm:$0xff] %vm814_vm3, %v600_v8  ;;  %v720_v15 = vadd.f32 %v1281_v38, %v719_v13  ;;  %v603_v16 = vadd.f32 %v1062_v14, %v1281_v38  ;;  %v1094_v17 = vpop.f32.mrb[10].mxu1  ;;  %v594_v18 = vpop.f32.mrb[11].mxu0 }
  0xf9   : > { %857 = vst.msk [vmem:[%s1286_s28 + $0x150] sm:$0xff] %vm814_vm3, %v728_v11  ;;  %823 = vst.msk [vmem:[%s1286_s28 + $0x40] sm:$0xff] %vm814_vm3, %v592_v12  ;;  %v731_v19 = vadd.f32 %v1094_v17, %v1281_v38  ;;  %v595_v20 = vadd.f32 %v1281_v38, %v594_v18  ;;  %v722_v21 = vpop.f32.mrb[11].mxu1 }
  0xfa   : > { %855 = vst.msk [vmem:[%s1286_s28 + $0x140] sm:$0xff] %vm814_vm3, %v720_v15  ;;  %826 = vst.msk [vmem:[%s1286_s28 + $0x58] sm:$0xff] %vm814_vm3, %v603_v16  ;;  %v723_v22 = vadd.f32 %v1281_v38, %v722_v21 }
  0xfb   : > { %858 = vst.msk [vmem:[%s1286_s28 + $0x158] sm:$0xff] %vm814_vm3, %v731_v19  ;;  %824 = vst.msk [vmem:[%s1286_s28 + $0x48] sm:$0xff] %vm814_vm3, %v595_v20 }
  0xfc   : > { %856 = vst.msk [vmem:[%s1286_s28 + $0x148] sm:$0xff] %vm814_vm3, %v723_v22 }
  0xfd   : > { %v1065_v23 = vpop.f32.mrb[12].mxu0 }
  0xfe   : > { %v616_v24 = vadd.f32 %v1065_v23, %v1281_v38  ;;  %v1097_v25 = vpop.f32.mrb[12].mxu1  ;;  %v607_v26 = vpop.f32.mrb[13].mxu0 }
  0xff   : > { %v744_v27 = vadd.f32 %v1097_v25, %v1281_v38  ;;  %v608_v28 = vadd.f32 %v1281_v38, %v607_v26  ;;  %v735_v29 = vpop.f32.mrb[13].mxu1  ;;  %v1066_v30 = vpop.f32.mrb[14].mxu0 }
 0x100   : > { %829 = vst.msk [vmem:[%s1286_s28 + $0x70] sm:$0xff] %vm814_vm3, %v616_v24  ;;  %v736_v31 = vadd.f32 %v1281_v38, %v735_v29  ;;  %v619_v32 = vadd.f32 %v1066_v30, %v1281_v38  ;;  %v1098_v33 = vpop.f32.mrb[14].mxu1  ;;  %v610_v34 = vpop.f32.mrb[15].mxu0 }
 0x101   : > { %861 = vst.msk [vmem:[%s1286_s28 + $0x170] sm:$0xff] %vm814_vm3, %v744_v27  ;;  %827 = vst.msk [vmem:[%s1286_s28 + $0x60] sm:$0xff] %vm814_vm3, %v608_v28  ;;  %v747_v35 = vadd.f32 %v1098_v33, %v1281_v38  ;;  %v611_v36 = vadd.f32 %v1281_v38, %v610_v34  ;;  %v738_v37 = vpop.f32.mrb[15].mxu1 }
 0x102   : > { %859 = vst.msk [vmem:[%s1286_s28 + $0x160] sm:$0xff] %vm814_vm3, %v736_v31  ;;  %830 = vst.msk [vmem:[%s1286_s28 + $0x78] sm:$0xff] %vm814_vm3, %v619_v32  ;;  %v739_v39 = vadd.f32 %v1281_v38, %v738_v37 }
 0x103   : > { %862 = vst.msk [vmem:[%s1286_s28 + $0x178] sm:$0xff] %vm814_vm3, %v747_v35  ;;  %828 = vst.msk [vmem:[%s1286_s28 + $0x68] sm:$0xff] %vm814_vm3, %v611_v36 }
 0x104   : > { %860 = vst.msk [vmem:[%s1286_s28 + $0x168] sm:$0xff] %vm814_vm3, %v739_v39 }
 0x105   : > { %v1069_v40 = vpop.f32.mrb[16].mxu0 }
 0x106   : > { %v632_v41 = vadd.f32 %v1069_v40, %v1281_v38  ;;  %v1101_v42 = vpop.f32.mrb[16].mxu1  ;;  %v623_v43 = vpop.f32.mrb[17].mxu0 }
 0x107   : > { %v760_v44 = vadd.f32 %v1101_v42, %v1281_v38  ;;  %v624_v45 = vadd.f32 %v1281_v38, %v623_v43  ;;  %v751_v46 = vpop.f32.mrb[17].mxu1  ;;  %v1070_v47 = vpop.f32.mrb[18].mxu0 }
 0x108   : > { %833 = vst.msk [vmem:[%s1286_s28 + $0x90] sm:$0xff] %vm814_vm3, %v632_v41  ;;  %v752_v48 = vadd.f32 %v1281_v38, %v751_v46  ;;  %v635_v49 = vadd.f32 %v1070_v47, %v1281_v38  ;;  %v1102_v50 = vpop.f32.mrb[18].mxu1  ;;  %v626_v51 = vpop.f32.mrb[19].mxu0 }
 0x109   : > { %865 = vst.msk [vmem:[%s1286_s28 + $0x190] sm:$0xff] %vm814_vm3, %v760_v44  ;;  %831 = vst.msk [vmem:[%s1286_s28 + $0x80] sm:$0xff] %vm814_vm3, %v624_v45  ;;  %v763_v52 = vadd.f32 %v1102_v50, %v1281_v38  ;;  %v627_v53 = vadd.f32 %v1281_v38, %v626_v51  ;;  %v754_v54 = vpop.f32.mrb[19].mxu1 }
 0x10a   : > { %863 = vst.msk [vmem:[%s1286_s28 + $0x180] sm:$0xff] %vm814_vm3, %v752_v48  ;;  %834 = vst.msk [vmem:[%s1286_s28 + $0x98] sm:$0xff] %vm814_vm3, %v635_v49  ;;  %v755_v55 = vadd.f32 %v1281_v38, %v754_v54 }
 0x10b   : > { %866 = vst.msk [vmem:[%s1286_s28 + $0x198] sm:$0xff] %vm814_vm3, %v763_v52  ;;  %832 = vst.msk [vmem:[%s1286_s28 + $0x88] sm:$0xff] %vm814_vm3, %v627_v53 }
 0x10c   : > { %864 = vst.msk [vmem:[%s1286_s28 + $0x188] sm:$0xff] %vm814_vm3, %v755_v55 }
 0x10d   : > { %v1073_v56 = vpop.f32.mrb[20].mxu0 }
 0x10e   : > { %v648_v57 = vadd.f32 %v1073_v56, %v1281_v38  ;;  %v1105_v58 = vpop.f32.mrb[20].mxu1  ;;  %v639_v59 = vpop.f32.mrb[21].mxu0 }
 0x10f   : > { %v776_v60 = vadd.f32 %v1105_v58, %v1281_v38  ;;  %v640_v61 = vadd.f32 %v1281_v38, %v639_v59  ;;  %v767_v62 = vpop.f32.mrb[21].mxu1  ;;  %v1074_v63 = vpop.f32.mrb[22].mxu0 }
 0x110   : > { %837 = vst.msk [vmem:[%s1286_s28 + $0xb0] sm:$0xff] %vm814_vm3, %v648_v57  ;;  %v768_v0 = vadd.f32 %v1281_v38, %v767_v62  ;;  %v651_v1 = vadd.f32 %v1074_v63, %v1281_v38  ;;  %v1106_v2 = vpop.f32.mrb[22].mxu1  ;;  %v642_v3 = vpop.f32.mrb[23].mxu0 }
 0x111   : > { %869 = vst.msk [vmem:[%s1286_s28 + $0x1b0] sm:$0xff] %vm814_vm3, %v776_v60  ;;  %835 = vst.msk [vmem:[%s1286_s28 + $0xa0] sm:$0xff] %vm814_vm3, %v640_v61  ;;  %v779_v4 = vadd.f32 %v1106_v2, %v1281_v38  ;;  %v643_v5 = vadd.f32 %v1281_v38, %v642_v3  ;;  %v770_v6 = vpop.f32.mrb[23].mxu1 }
 0x112   : > { %867 = vst.msk [vmem:[%s1286_s28 + $0x1a0] sm:$0xff] %vm814_vm3, %v768_v0  ;;  %838 = vst.msk [vmem:[%s1286_s28 + $0xb8] sm:$0xff] %vm814_vm3, %v651_v1  ;;  %v771_v7 = vadd.f32 %v1281_v38, %v770_v6 }
 0x113   : > { %870 = vst.msk [vmem:[%s1286_s28 + $0x1b8] sm:$0xff] %vm814_vm3, %v779_v4  ;;  %836 = vst.msk [vmem:[%s1286_s28 + $0xa8] sm:$0xff] %vm814_vm3, %v643_v5 }
 0x114   : > { %868 = vst.msk [vmem:[%s1286_s28 + $0x1a8] sm:$0xff] %vm814_vm3, %v771_v7 }
 0x115   : > { %v1077_v8 = vpop.f32.mrb[24].mxu0 }
 0x116   : > { %v664_v9 = vadd.f32 %v1077_v8, %v1281_v38  ;;  %v1109_v10 = vpop.f32.mrb[24].mxu1  ;;  %v655_v11 = vpop.f32.mrb[25].mxu0 }
 0x117   : > { %v792_v12 = vadd.f32 %v1109_v10, %v1281_v38  ;;  %v656_v13 = vadd.f32 %v1281_v38, %v655_v11  ;;  %v783_v14 = vpop.f32.mrb[25].mxu1  ;;  %v1078_v15 = vpop.f32.mrb[26].mxu0 }
 0x118   : > { %841 = vst.msk [vmem:[%s1286_s28 + $0xd0] sm:$0xff] %vm814_vm3, %v664_v9  ;;  %v784_v16 = vadd.f32 %v1281_v38, %v783_v14  ;;  %v667_v17 = vadd.f32 %v1078_v15, %v1281_v38  ;;  %v1110_v18 = vpop.f32.mrb[26].mxu1  ;;  %v658_v19 = vpop.f32.mrb[27].mxu0 }
 0x119   : > { %873 = vst.msk [vmem:[%s1286_s28 + $0x1d0] sm:$0xff] %vm814_vm3, %v792_v12  ;;  %839 = vst.msk [vmem:[%s1286_s28 + $0xc0] sm:$0xff] %vm814_vm3, %v656_v13  ;;  %v795_v20 = vadd.f32 %v1110_v18, %v1281_v38  ;;  %v659_v21 = vadd.f32 %v1281_v38, %v658_v19  ;;  %v786_v22 = vpop.f32.mrb[27].mxu1 }
 0x11a   : > { %871 = vst.msk [vmem:[%s1286_s28 + $0x1c0] sm:$0xff] %vm814_vm3, %v784_v16  ;;  %842 = vst.msk [vmem:[%s1286_s28 + $0xd8] sm:$0xff] %vm814_vm3, %v667_v17  ;;  %v787_v23 = vadd.f32 %v1281_v38, %v786_v22 }
 0x11b   : > { %874 = vst.msk [vmem:[%s1286_s28 + $0x1d8] sm:$0xff] %vm814_vm3, %v795_v20  ;;  %840 = vst.msk [vmem:[%s1286_s28 + $0xc8] sm:$0xff] %vm814_vm3, %v659_v21 }
 0x11c   : > { %872 = vst.msk [vmem:[%s1286_s28 + $0x1c8] sm:$0xff] %vm814_vm3, %v787_v23 }
 0x11d   : > { %v1081_v24 = vpop.f32.mrb[28].mxu0 }
 0x11e   : > { %v680_v25 = vadd.f32 %v1081_v24, %v1281_v38  ;;  %v1113_v26 = vpop.f32.mrb[28].mxu1  ;;  %v671_v27 = vpop.f32.mrb[29].mxu0 }
 0x11f   : > { %v808_v28 = vadd.f32 %v1113_v26, %v1281_v38  ;;  %v672_v29 = vadd.f32 %v1281_v38, %v671_v27  ;;  %v799_v30 = vpop.f32.mrb[29].mxu1  ;;  %v1082_v31 = vpop.f32.mrb[30].mxu0 }
 0x120   : > { %845 = vst.msk [vmem:[%s1286_s28 + $0xf0] sm:$0xff] %vm814_vm3, %v680_v25  ;;  %v800_v32 = vadd.f32 %v1281_v38, %v799_v30  ;;  %v683_v33 = vadd.f32 %v1082_v31, %v1281_v38  ;;  %v1114_v34 = vpop.f32.mrb[30].mxu1  ;;  %v674_v35 = vpop.f32.mrb[31].mxu0 }
 0x121   : > { %877 = vst.msk [vmem:[%s1286_s28 + $0x1f0] sm:$0xff] %vm814_vm3, %v808_v28  ;;  %843 = vst.msk [vmem:[%s1286_s28 + $0xe0] sm:$0xff] %vm814_vm3, %v672_v29  ;;  %v811_v36 = vadd.f32 %v1114_v34, %v1281_v38  ;;  %v675_v37 = vadd.f32 %v1281_v38, %v674_v35  ;;  %v802_v39 = vpop.f32.mrb[31].mxu1 }
 0x122   : > { %875 = vst.msk [vmem:[%s1286_s28 + $0x1e0] sm:$0xff] %vm814_vm3, %v800_v32  ;;  %846 = vst.msk [vmem:[%s1286_s28 + $0xf8] sm:$0xff] %vm814_vm3, %v683_v33  ;;  %v803_v40 = vadd.f32 %v1281_v38, %v802_v39 }
 0x123   : > { %878 = vst.msk [vmem:[%s1286_s28 + $0x1f8] sm:$0xff] %vm814_vm3, %v811_v36  ;;  %844 = vst.msk [vmem:[%s1286_s28 + $0xe8] sm:$0xff] %vm814_vm3, %v675_v37 }
 0x124   : > { %876 = vst.msk [vmem:[%s1286_s28 + $0x1e8] sm:$0xff] %vm814_vm3, %v803_v40 }
 0x125 PF: > { %s13_s12 = sadd.s32 1, %s1168_s12  }
 0x126   : > { %p10_p4 = scmp.ge.s32.totalorder %s13_s12, 18  }
 0x128   :  { %12 = sbr.rel (!%p10_p4) target bundleno = 1 (0x1), region = 62 }

// kernel: net_forward.14
= control target key start
LH: loop header
LB: loop body
LE: loop exit
PB: predicated region body
PF: predicated region fallthrough
CT: control target
= control target key end

     0   :  { %s1147_s12 = smov 0   ;;  %s1149_s13 = smov 0   ;;  %s2030_s0 = inlined_call_operand.vmem [shape: f32[8192,32], index: 0, kind: input, shape index: {}]   ;;  %s2031_s1 = inlined_call_operand.vmem [shape: f32[1,32], index: 1, kind: input, shape index: {}]   ;;  %s2032_s2 = inlined_call_operand.vmem [shape: f32[1,32], index: 2, kind: input, shape index: {}]   ;;  %s2033_s3 = inlined_call_operand.vmem [shape: f32[8192,32], index: 3, kind: output, shape index: {}]  }
   0x1   :  { %s1151_s14 = smov 0   ;;  %s1153_s15 = smov 0  }
   0x2   :  { %s1155_s16 = smov 0  }
   0x3 LB: > { %s22_s17 = sadd.s32 1, %s1116_s14  ;;  %s25_s18 = sadd.s32 1, %s1120_s15  ;;  %s1124_s16 = sphi %s1155_s16, %s13_s16   ;;  %s1120_s15 = sphi %s1153_s15, %s2037_s15   ;;  %s1116_s14 = sphi %s1151_s14, %s2036_s14   ;;  %s1112_s13 = sphi %s1149_s13, %s2035_s13   ;;  %s1108_s12 = sphi %s1147_s12, %s2034_s12  }
   0x4   : > { %p23_p0 = scmp.ge.s32.totalorder %s22_s17, 16  ;;  %p1032_p1 = scmp.ge.s32.totalorder %s1124_s16, 1 }
   0x5   : > { %p150_p2 = scmp.lt.s32.totalorder %s1124_s16, 33 }
   0x6   : > { %s2039_s17 = smov (%p23_p0, %s22_s17), 0  ;;  %s2041_s18 = smov (!%p23_p0, %s25_s18), %s1120_s15 }
   0x7   : > { %p151_p3 = pnand %p1032_p1, %p150_p2  ;;  %p27_p4 = scmp.ge.s32.totalorder %s2041_s18, 2 }
   0x8   : > { %s1033_s19 = sshll.u32 (!%p151_p3), %s1108_s12, 6  ;;  %p186_p5 = scmp.eq.s32.totalorder (!%p151_p3), %s1112_s13, 0 }
   0x9   : > { %s2043_s18 = smov (%p27_p4, %s2041_s18), 0  ;;  %154 = sbr.rel (%p151_p3) target bundleno = 279 (0x117), region = 32 }
   0xa   : > { %p175_p6 = scmp.lt.s32.totalorder (!%p151_p3), %s1033_s19, 1023  ;;  %p187_p7 = scmp.eq.s32.totalorder (!%p151_p3), %s1108_s12, 0 }
   0xc   : > { %p188_p8 = pnand (!%p151_p3), %p187_p7, %p186_p5 }
  0x10   : > { %s2045_s19 = smov (!%p175_p6, %s1033_s19), 1023  ;;  %191 = sbr.rel (%p188_p8) target bundleno = 23 (0x17), region = 36 }
  0x11   : > { %s1034_s20 = sshll.u32 %s2045_s19, 3  ;;  %vm192_vm0 = vcmask (!%p188_p8), 253952   ;;  %v1126_v0 = vmov (!%p188_p8), 0.0  }
  0x12   : > { %s1189_s23 = scalar_lea.vmem %s2030_s0, %s1034_s20  ;;  %s1194_s26 = scalar_lea.vmem %s2033_s3, %s1034_s20  ;;  %193 = vst.msk [vmem:[#allocation2] sm:$0x1] (!%p188_p8), %vm192_vm0, %v1126_v0  ;;  %194 = vst.msk [vmem:[#allocation3] sm:$0x1] (!%p188_p8), %vm192_vm0, %v1126_v0 }
  0x17 PF: > { %p1037_p9 = scmp.ne.s32.totalorder %s1112_s13, 0 }
  0x18   : > { %v198_v1 = vld [vmem:[%s1189_s23] sm:$0xff] (!%p1037_p9)  ;;  %v199_v2 = vld [vmem:[%s1189_s23 + $0x8] sm:$0xff] (!%p1037_p9)  ;;  %v200_v3 = vld [vmem:[%s1189_s23 + $0x10] sm:$0xff] (!%p1037_p9)  ;;  %vm263_vm1 = vcmask (!%p1037_p9), 261120   ;;  %vm398_vm2 = vcmask (!%p1037_p9), 253952  }
  0x19   : > { %197 = sbr.rel (%p1037_p9) target bundleno = 188 (0xbc), region = 40  ;;  %v264_v4 = vsel (!%p1037_p9), %vm263_vm1, %v198_v1, 0.0  ;;  %v265_v5 = vsel (!%p1037_p9), %vm263_vm1, %v199_v2, 0.0  ;;  %v267_v6 = vsel (!%p1037_p9), %vm263_vm1, %v200_v3, 0.0  ;;  %v201_v7 = vld [vmem:[%s1189_s23 + $0x18] sm:$0xff] (!%p1037_p9)  ;;  %v202_v10 = vld [vmem:[%s1189_s23 + $0x20] sm:$0xff] (!%p1037_p9)  ;;  %v401_v55 = vmul.f32 (!%p1037_p9), %v198_v1, %v198_v1 }
  0x1a   : > { %v266_v8 = vadd.f32 (!%p1037_p9), %v265_v5, %v264_v4  ;;  %v269_v9 = vsel (!%p1037_p9), %vm263_vm1, %v201_v7, 0.0  ;;  %v271_v12 = vsel (!%p1037_p9), %vm263_vm1, %v202_v10, 0.0  ;;  %v203_v13 = vld [vmem:[%s1189_s23 + $0x28] sm:$0xff] (!%p1037_p9)  ;;  %v1210_v16 = vld [vmem:[%s1189_s23 + $0x30] sm:$0xff] (!%p1037_p9)  ;;  %v1215_v19 = vld [vmem:[%s1189_s23 + $0x38] sm:$0xff] (!%p1037_p9)  ;;  %v402_v58 = vmul.f32 (!%p1037_p9), %v199_v2, %v199_v2 }
  0x1b   : > { %v273_v15 = vsel (!%p1037_p9), %vm263_vm1, %v203_v13, 0.0  ;;  %v275_v18 = vsel (!%p1037_p9), %vm263_vm1, %v1210_v16, 0.0  ;;  %v277_v21 = vsel (!%p1037_p9), %vm263_vm1, %v1215_v19, 0.0  ;;  %v1220_v22 = vld [vmem:[%s1189_s23 + $0x40] sm:$0xff] (!%p1037_p9)  ;;  %v1225_v25 = vld [vmem:[%s1189_s23 + $0x48] sm:$0xff] (!%p1037_p9)  ;;  %v1230_v28 = vld [vmem:[%s1189_s23 + $0x50] sm:$0xff] (!%p1037_p9)  ;;  %v403_v59 = vmul.f32 (!%p1037_p9), %v200_v3, %v200_v3 }
  0x1c   : > { %v268_v11 = vadd.f32 (!%p1037_p9), %v267_v6, %v266_v8  ;;  %v279_v24 = vsel (!%p1037_p9), %vm263_vm1, %v1220_v22, 0.0  ;;  %v281_v27 = vsel (!%p1037_p9), %vm263_vm1, %v1225_v25, 0.0  ;;  %v283_v30 = vsel (!%p1037_p9), %vm263_vm1, %v1230_v28, 0.0  ;;  %v1235_v31 = vld [vmem:[%s1189_s23 + $0x58] sm:$0xff] (!%p1037_p9)  ;;  %v1240_v34 = vld [vmem:[%s1189_s23 + $0x60] sm:$0xff] (!%p1037_p9)  ;;  %v1245_v37 = vld [vmem:[%s1189_s23 + $0x68] sm:$0xff] (!%p1037_p9) }
  0x1d   : > { %v285_v33 = vsel (!%p1037_p9), %vm263_vm1, %v1235_v31, 0.0  ;;  %v287_v36 = vsel (!%p1037_p9), %vm263_vm1, %v1240_v34, 0.0  ;;  %v289_v39 = vsel (!%p1037_p9), %vm263_vm1, %v1245_v37, 0.0  ;;  %v1250_v40 = vld [vmem:[%s1189_s23 + $0x70] sm:$0xff] (!%p1037_p9)  ;;  %v1255_v43 = vld [vmem:[%s1189_s23 + $0x78] sm:$0xff] (!%p1037_p9)  ;;  %v1260_v46 = vld [vmem:[%s1189_s23 + $0x80] sm:$0xff] (!%p1037_p9)  ;;  %v404_v63 = vmul.f32 (!%p1037_p9), %v201_v7, %v201_v7 }
  0x1e   : > { %v270_v14 = vadd.f32 (!%p1037_p9), %v269_v9, %v268_v11  ;;  %v291_v42 = vsel (!%p1037_p9), %vm263_vm1, %v1250_v40, 0.0  ;;  %v293_v45 = vsel (!%p1037_p9), %vm263_vm1, %v1255_v43, 0.0  ;;  %v295_v48 = vsel (!%p1037_p9), %vm263_vm1, %v1260_v46, 0.0  ;;  %v1265_v49 = vld [vmem:[%s1189_s23 + $0x88] sm:$0xff] (!%p1037_p9)  ;;  %v1270_v52 = vld [vmem:[%s1189_s23 + $0x90] sm:$0xff] (!%p1037_p9)  ;;  %v1275_v56 = vld [vmem:[%s1189_s23 + $0x98] sm:$0xff] (!%p1037_p9) }
  0x1f   : > { %v297_v51 = vsel (!%p1037_p9), %vm263_vm1, %v1265_v49, 0.0  ;;  %v299_v54 = vsel (!%p1037_p9), %vm263_vm1, %v1270_v52, 0.0  ;;  %v301_v60 = vsel (!%p1037_p9), %vm263_vm1, %v1275_v56, 0.0  ;;  %v1280_v61 = vld [vmem:[%s1189_s23 + $0xa0] sm:$0xff] (!%p1037_p9)  ;;  %v465_v4 = vsel (!%p1037_p9), %vm263_vm1, %v401_v55, 0.0  ;;  %v1286_v1 = vld [vmem:[%s1189_s23 + $0xa8] sm:$0xff] (!%p1037_p9) }
  0x20   : > { %v272_v17 = vadd.f32 %v271_v12, %v270_v14  ;;  %v303_v0 = vsel %vm263_vm1, %v1280_v61, 0.0  ;;  %v405_v6 = vmul.f32 %v202_v10, %v202_v10  ;;  %v466_v2 = vsel %vm263_vm1, %v402_v58, 0.0  ;;  %v1293_v7 = vld [vmem:[%s1189_s23 + $0xb0] sm:$0xff] }
  0x21   : > { %v468_v3 = vsel %vm263_vm1, %v403_v59, 0.0  ;;  %v305_v8 = vsel %vm263_vm1, %v1286_v1, 0.0  ;;  %v467_v9 = vadd.f32 %v466_v2, %v465_v4  ;;  %v406_v12 = vmul.f32 %v203_v13, %v203_v13 }
  0x22   : > { %v274_v20 = vadd.f32 %v273_v15, %v272_v17  ;;  %v470_v14 = vsel %vm263_vm1, %v404_v63, 0.0  ;;  %v307_v15 = vsel %vm263_vm1, %v1293_v7, 0.0  ;;  %v1299_v17 = vld [vmem:[%s1189_s23 + $0xb8] sm:$0xff]  ;;  %v413_v63 = vmul.f32 %v1240_v34, %v1240_v34 }
  0x23   : > { %v469_v10 = vadd.f32 %v468_v3, %v467_v9  ;;  %v414_v2 = vmul.f32 %v1245_v37, %v1245_v37  ;;  %v1363_v9 = vld [vmem:[%s1189_s23 + $0xf8] sm:$0xff] }
  0x24   : > { %v276_v23 = vadd.f32 %v275_v18, %v274_v20  ;;  %v407_v20 = vmul.f32 %v1210_v16, %v1210_v16 }
  0x25   : > { %v471_v13 = vadd.f32 %v470_v14, %v469_v10  ;;  %v488_v14 = vsel %vm263_vm1, %v413_v63, 0.0  ;;  %v1371_v10 = vld [vmem:[%s1189_s23 + $0x100] sm:$0xff]  ;;  %v422_v63 = vmul.f32 %v1286_v1, %v1286_v1 }
  0x26   : > { %v278_v26 = vadd.f32 %v277_v21, %v276_v23  ;;  %v472_v21 = vsel %vm263_vm1, %v405_v6, 0.0  ;;  %v309_v23 = vsel %vm263_vm1, %v1299_v17, 0.0 }
  0x27   : > { %v473_v16 = vadd.f32 %v472_v21, %v471_v13  ;;  %v490_v21 = vsel %vm263_vm1, %v414_v2, 0.0  ;;  %v1379_v13 = vld [vmem:[%s1189_s23 + $0x108] sm:$0xff]  ;;  %v423_v2 = vmul.f32 %v1293_v7, %v1293_v7 }
  0x28   : > { %v280_v29 = vadd.f32 %v279_v24, %v278_v26  ;;  %v1307_v24 = vld [vmem:[%s1189_s23 + $0xc0] sm:$0xff] }
  0x2a   : > { %v282_v32 = vadd.f32 %v281_v27, %v280_v29  ;;  %v408_v27 = vmul.f32 %v1215_v19, %v1215_v19  ;;  %v474_v29 = vsel %vm263_vm1, %v406_v12, 0.0  ;;  %v415_v12 = vmul.f32 %v1250_v40, %v1250_v40 }
  0x2b   : > { %v475_v19 = vadd.f32 %v474_v29, %v473_v16  ;;  %v1387_v16 = vld [vmem:[%s1189_s23 + $0x110] sm:$0xff] }
  0x2c   : > { %v284_v35 = vadd.f32 %v283_v30, %v282_v32  ;;  %v311_v30 = vsel %vm263_vm1, %v1307_v24, 0.0  ;;  %v1315_v32 = vld [vmem:[%s1189_s23 + $0xc8] sm:$0xff]  ;;  %v492_v29 = vsel %vm263_vm1, %v415_v12, 0.0  ;;  %v424_v12 = vmul.f32 %v1299_v17, %v1299_v17 }
  0x2e   : > { %v286_v38 = vadd.f32 %v285_v33, %v284_v35  ;;  %v409_v35 = vmul.f32 %v1220_v22, %v1220_v22 }
  0x30   : > { %v288_v41 = vadd.f32 %v287_v36, %v286_v38  ;;  %v476_v36 = vsel %vm263_vm1, %v407_v20, 0.0  ;;  %v313_v38 = vsel %vm263_vm1, %v1315_v32, 0.0  ;;  %v416_v20 = vmul.f32 %v1255_v43, %v1255_v43 }
  0x31   : > { %v477_v22 = vadd.f32 %v476_v36, %v475_v19  ;;  %v1395_v19 = vld [vmem:[%s1189_s23 + $0x118] sm:$0xff] }
  0x32   : > { %v290_v44 = vadd.f32 %v289_v39, %v288_v41  ;;  %v1323_v39 = vld [vmem:[%s1189_s23 + $0xd0] sm:$0xff]  ;;  %v494_v36 = vsel %vm263_vm1, %v416_v20, 0.0  ;;  %v425_v20 = vmul.f32 %v1307_v24, %v1307_v24 }
  0x34   : > { %v292_v47 = vadd.f32 %v291_v42, %v290_v44  ;;  %v410_v42 = vmul.f32 %v1225_v25, %v1225_v25  ;;  %v478_v44 = vsel %vm263_vm1, %v408_v27, 0.0  ;;  %v417_v27 = vmul.f32 %v1260_v46, %v1260_v46 }
  0x35   : > { %v479_v25 = vadd.f32 %v478_v44, %v477_v22  ;;  %v1403_v22 = vld [vmem:[%s1189_s23 + $0x120] sm:$0xff] }
  0x36   : > { %v294_v50 = vadd.f32 %v293_v45, %v292_v47  ;;  %v315_v45 = vsel %vm263_vm1, %v1323_v39, 0.0  ;;  %v1331_v47 = vld [vmem:[%s1189_s23 + $0xd8] sm:$0xff]  ;;  %v482_v58 = vsel %vm263_vm1, %v410_v42, 0.0  ;;  %v419_v42 = vmul.f32 %v1270_v52, %v1270_v52 }
  0x37   : > { %v496_v44 = vsel %vm263_vm1, %v417_v27, 0.0  ;;  %v426_v27 = vmul.f32 %v1315_v32, %v1315_v32 }
  0x38   : > { %v296_v53 = vadd.f32 %v295_v48, %v294_v50  ;;  %v411_v50 = vmul.f32 %v1230_v28, %v1230_v28 }
  0x3a   : > { %v298_v57 = vadd.f32 %v297_v51, %v296_v53  ;;  %v480_v51 = vsel %vm263_vm1, %v409_v35, 0.0  ;;  %v317_v53 = vsel %vm263_vm1, %v1331_v47, 0.0  ;;  %v418_v35 = vmul.f32 %v1265_v49, %v1265_v49 }
  0x3b   : > { %v481_v28 = vadd.f32 %v480_v51, %v479_v25  ;;  %v1411_v25 = vld [vmem:[%s1189_s23 + $0x128] sm:$0xff] }
  0x3c   : > { %v300_v62 = vadd.f32 %v299_v54, %v298_v57  ;;  %v1339_v54 = vld [vmem:[%s1189_s23 + $0xe0] sm:$0xff]  ;;  %v412_v57 = vmul.f32 %v1235_v31, %v1235_v31  ;;  %v498_v51 = vsel %vm263_vm1, %v418_v35, 0.0  ;;  %v427_v35 = vmul.f32 %v1323_v39, %v1323_v39 }
  0x3d   : > { %v319_v59 = vsel %vm263_vm1, %v1339_v54, 0.0  ;;  %v483_v31 = vadd.f32 %v482_v58, %v481_v28  ;;  %v500_v58 = vsel %vm263_vm1, %v419_v42, 0.0  ;;  %v1419_v28 = vld [vmem:[%s1189_s23 + $0x130] sm:$0xff]  ;;  %v428_v42 = vmul.f32 %v1331_v47, %v1331_v47 }
  0x3e   : > { %v302_v5 = vadd.f32 %v301_v60, %v300_v62  ;;  %v1347_v60 = vld [vmem:[%s1189_s23 + $0xe8] sm:$0xff]  ;;  %v486_v3 = vsel %vm263_vm1, %v412_v57, 0.0  ;;  %v421_v57 = vmul.f32 %v1280_v61, %v1280_v61 }
  0x3f   : > { %v321_v4 = vsel %vm263_vm1, %v1347_v60, 0.0 }
  0x40   : > { %v304_v11 = vadd.f32 %v303_v0, %v302_v5  ;;  %v484_v0 = vsel %vm263_vm1, %v411_v50, 0.0  ;;  %v1355_v5 = vld [vmem:[%s1189_s23 + $0xf0] sm:$0xff]  ;;  %v420_v50 = vmul.f32 %v1275_v56, %v1275_v56 }
  0x41   : > { %v485_v34 = vadd.f32 %v484_v0, %v483_v31  ;;  %v1427_v31 = vld [vmem:[%s1189_s23 + $0x138] sm:$0xff] }
  0x42   : > { %v306_v18 = vadd.f32 %v305_v8, %v304_v11  ;;  %v323_v8 = vsel %vm263_vm1, %v1355_v5, 0.0  ;;  %v502_v0 = vsel %vm263_vm1, %v420_v50, 0.0  ;;  %v429_v50 = vmul.f32 %v1339_v54, %v1339_v54 }
  0x43   : > { %v487_v37 = vadd.f32 %v486_v3, %v485_v34  ;;  %v504_v3 = vsel %vm263_vm1, %v421_v57, 0.0  ;;  %v1435_v34 = vld [vmem:[%s1189_s23 + $0x140] sm:$0xff]  ;;  %v430_v57 = vmul.f32 %v1347_v60, %v1347_v60 }
  0x44   : > { %v308_v26 = vadd.f32 %v307_v15, %v306_v18  ;;  %v325_v15 = vsel %vm263_vm1, %v1363_v9, 0.0 }
  0x45   : > { %v489_v40 = vadd.f32 %v488_v14, %v487_v37  ;;  %v506_v14 = vsel %vm263_vm1, %v422_v63, 0.0  ;;  %v1443_v37 = vld [vmem:[%s1189_s23 + $0x148] sm:$0xff]  ;;  %v431_v63 = vmul.f32 %v1355_v5, %v1355_v5 }
  0x46   : > { %v310_v33 = vadd.f32 %v309_v23, %v308_v26  ;;  %v327_v23 = vsel %vm263_vm1, %v1371_v10, 0.0 }
  0x47   : > { %v491_v43 = vadd.f32 %v490_v21, %v489_v40  ;;  %v508_v21 = vsel %vm263_vm1, %v423_v2, 0.0  ;;  %v1451_v40 = vld [vmem:[%s1189_s23 + $0x150] sm:$0xff]  ;;  %v432_v2 = vmul.f32 %v1363_v9, %v1363_v9 }
  0x48   : > { %v312_v41 = vadd.f32 %v311_v30, %v310_v33  ;;  %v329_v30 = vsel %vm263_vm1, %v1379_v13, 0.0 }
  0x49   : > { %v493_v46 = vadd.f32 %v492_v29, %v491_v43  ;;  %v510_v29 = vsel %vm263_vm1, %v424_v12, 0.0  ;;  %v1459_v43 = vld [vmem:[%s1189_s23 + $0x158] sm:$0xff]  ;;  %v433_v12 = vmul.f32 %v1371_v10, %v1371_v10 }
  0x4a   : > { %v314_v48 = vadd.f32 %v313_v38, %v312_v41  ;;  %v331_v38 = vsel %vm263_vm1, %v1387_v16, 0.0 }
  0x4b   : > { %v495_v49 = vadd.f32 %v494_v36, %v493_v46  ;;  %v512_v36 = vsel %vm263_vm1, %v425_v20, 0.0  ;;  %v1467_v46 = vld [vmem:[%s1189_s23 + $0x160] sm:$0xff]  ;;  %v434_v20 = vmul.f32 %v1379_v13, %v1379_v13 }
  0x4c   : > { %v316_v55 = vadd.f32 %v315_v45, %v314_v48  ;;  %v333_v45 = vsel %vm263_vm1, %v1395_v19, 0.0 }
  0x4d   : > { %v497_v52 = vadd.f32 %v496_v44, %v495_v49  ;;  %v514_v44 = vsel %vm263_vm1, %v426_v27, 0.0  ;;  %v1475_v49 = vld [vmem:[%s1189_s23 + $0x168] sm:$0xff]  ;;  %v435_v27 = vmul.f32 %v1387_v16, %v1387_v16 }
  0x4e   : > { %v318_v62 = vadd.f32 %v317_v53, %v316_v55  ;;  %v335_v53 = vsel %vm263_vm1, %v1403_v22, 0.0 }
  0x4f   : > { %v499_v56 = vadd.f32 %v498_v51, %v497_v52  ;;  %v516_v51 = vsel %vm263_vm1, %v427_v35, 0.0  ;;  %v1483_v52 = vld [vmem:[%s1189_s23 + $0x170] sm:$0xff]  ;;  %v436_v35 = vmul.f32 %v1395_v19, %v1395_v19 }
  0x50   : > { %v320_v6 = vadd.f32 %v319_v59, %v318_v62  ;;  %v337_v59 = vsel %vm263_vm1, %v1411_v25, 0.0 }
  0x51   : > { %v501_v61 = vadd.f32 %v500_v58, %v499_v56  ;;  %v518_v58 = vsel %vm263_vm1, %v428_v42, 0.0  ;;  %v1491_v56 = vld [vmem:[%s1189_s23 + $0x178] sm:$0xff]  ;;  %v437_v42 = vmul.f32 %v1403_v22, %v1403_v22 }
  0x52   : > { %v322_v11 = vadd.f32 %v321_v4, %v320_v6  ;;  %v339_v4 = vsel %vm263_vm1, %v1419_v28, 0.0 }
  0x53   : > { %v503_v1 = vadd.f32 %v502_v0, %v501_v61  ;;  %v520_v0 = vsel %vm263_vm1, %v429_v50, 0.0  ;;  %v1499_v61 = vld [vmem:[%s1189_s23 + $0x180] sm:$0xff]  ;;  %v438_v50 = vmul.f32 %v1411_v25, %v1411_v25 }
  0x54   : > { %v324_v18 = vadd.f32 %v323_v8, %v322_v11  ;;  %v341_v8 = vsel %vm263_vm1, %v1427_v31, 0.0 }
  0x55   : > { %v505_v7 = vadd.f32 %v504_v3, %v503_v1  ;;  %v522_v3 = vsel %vm263_vm1, %v430_v57, 0.0  ;;  %v1507_v1 = vld [vmem:[%s1189_s23 + $0x188] sm:$0xff]  ;;  %v439_v57 = vmul.f32 %v1419_v28, %v1419_v28 }
  0x56   : > { %v326_v26 = vadd.f32 %v325_v15, %v324_v18  ;;  %v343_v15 = vsel %vm263_vm1, %v1435_v34, 0.0 }
  0x57   : > { %v507_v17 = vadd.f32 %v506_v14, %v505_v7  ;;  %v524_v14 = vsel %vm263_vm1, %v431_v63, 0.0  ;;  %v1515_v7 = vld [vmem:[%s1189_s23 + $0x190] sm:$0xff]  ;;  %v440_v63 = vmul.f32 %v1427_v31, %v1427_v31 }
  0x58   : > { %v328_v33 = vadd.f32 %v327_v23, %v326_v26  ;;  %v345_v23 = vsel %vm263_vm1, %v1443_v37, 0.0 }
  0x59   : > { %v509_v24 = vadd.f32 %v508_v21, %v507_v17  ;;  %v526_v21 = vsel %vm263_vm1, %v432_v2, 0.0  ;;  %v1523_v17 = vld [vmem:[%s1189_s23 + $0x198] sm:$0xff]  ;;  %v441_v2 = vmul.f32 %v1435_v34, %v1435_v34 }
  0x5a   : > { %v330_v41 = vadd.f32 %v329_v30, %v328_v33  ;;  %v347_v30 = vsel %vm263_vm1, %v1451_v40, 0.0 }
  0x5b   : > { %v511_v32 = vadd.f32 %v510_v29, %v509_v24  ;;  %v528_v29 = vsel %vm263_vm1, %v433_v12, 0.0  ;;  %v1531_v24 = vld [vmem:[%s1189_s23 + $0x1a0] sm:$0xff]  ;;  %v442_v12 = vmul.f32 %v1443_v37, %v1443_v37 }
  0x5c   : > { %v332_v48 = vadd.f32 %v331_v38, %v330_v41  ;;  %v349_v38 = vsel %vm263_vm1, %v1459_v43, 0.0 }
  0x5d   : > { %v513_v39 = vadd.f32 %v512_v36, %v511_v32  ;;  %v530_v36 = vsel %vm263_vm1, %v434_v20, 0.0  ;;  %v1539_v32 = vld [vmem:[%s1189_s23 + $0x1a8] sm:$0xff]  ;;  %v443_v20 = vmul.f32 %v1451_v40, %v1451_v40 }
  0x5e   : > { %v334_v55 = vadd.f32 %v333_v45, %v332_v48  ;;  %v351_v45 = vsel %vm263_vm1, %v1467_v46, 0.0 }
  0x5f   : > { %v515_v47 = vadd.f32 %v514_v44, %v513_v39  ;;  %v532_v44 = vsel %vm263_vm1, %v435_v27, 0.0  ;;  %v1547_v39 = vld [vmem:[%s1189_s23 + $0x1b0] sm:$0xff]  ;;  %v444_v27 = vmul.f32 %v1459_v43, %v1459_v43 }
  0x60   : > { %v336_v62 = vadd.f32 %v335_v53, %v334_v55  ;;  %v353_v53 = vsel %vm263_vm1, %v1475_v49, 0.0  ;;  %v1611_v43 = vld [vmem:[%s1189_s23 + $0x1f0] sm:$0xff] }
  0x61   : > { %v517_v54 = vadd.f32 %v516_v51, %v515_v47  ;;  %v534_v51 = vsel %vm263_vm1, %v436_v35, 0.0  ;;  %v1555_v47 = vld [vmem:[%s1189_s23 + $0x1b8] sm:$0xff]  ;;  %v445_v35 = vmul.f32 %v1467_v46, %v1467_v46 }
  0x62   : > { %v338_v6 = vadd.f32 %v337_v59, %v336_v62  ;;  %v355_v59 = vsel %vm263_vm1, %v1483_v52, 0.0 }
  0x63   : > { %v519_v60 = vadd.f32 %v518_v58, %v517_v54  ;;  %v536_v58 = vsel %vm263_vm1, %v437_v42, 0.0  ;;  %v1563_v54 = vld [vmem:[%s1189_s23 + $0x1c0] sm:$0xff]  ;;  %v446_v42 = vmul.f32 %v1475_v49, %v1475_v49  ;;  %v448_v49 = vmul.f32 %v1491_v56, %v1491_v56 }
  0x64   : > { %v340_v11 = vadd.f32 %v339_v4, %v338_v6  ;;  %v357_v4 = vsel %vm263_vm1, %v1491_v56, 0.0  ;;  %v451_v56 = vmul.f32 %v1515_v7, %v1515_v7 }
  0x65   : > { %v521_v5 = vadd.f32 %v520_v0, %v519_v60  ;;  %v538_v0 = vsel %vm263_vm1, %v438_v50, 0.0  ;;  %v1571_v60 = vld [vmem:[%s1189_s23 + $0x1c8] sm:$0xff]  ;;  %v447_v50 = vmul.f32 %v1483_v52, %v1483_v52 }
  0x66   : > { %v342_v18 = vadd.f32 %v341_v8, %v340_v11  ;;  %v359_v8 = vsel %vm263_vm1, %v1499_v61, 0.0 }
  0x67   : > { %v523_v9 = vadd.f32 %v522_v3, %v521_v5  ;;  %v540_v3 = vsel %vm263_vm1, %v439_v57, 0.0  ;;  %v1579_v5 = vld [vmem:[%s1189_s23 + $0x1d0] sm:$0xff]  ;;  %v554_v57 = vsel %vm263_vm1, %v446_v42, 0.0 }
  0x68   : > { %v344_v26 = vadd.f32 %v343_v15, %v342_v18  ;;  %v361_v15 = vsel %vm263_vm1, %v1507_v1, 0.0 }
  0x69   : > { %v525_v10 = vadd.f32 %v524_v14, %v523_v9  ;;  %v542_v14 = vsel %vm263_vm1, %v440_v63, 0.0  ;;  %v1587_v9 = vld [vmem:[%s1189_s23 + $0x1d8] sm:$0xff] }
  0x6a   : > { %v346_v33 = vadd.f32 %v345_v23, %v344_v26  ;;  %v363_v23 = vsel %vm263_vm1, %v1515_v7, 0.0  ;;  %v454_v7 = vmul.f32 %v1539_v32, %v1539_v32 }
  0x6b   : > { %v527_v13 = vadd.f32 %v526_v21, %v525_v10  ;;  %v544_v21 = vsel %vm263_vm1, %v441_v2, 0.0  ;;  %v1595_v10 = vld [vmem:[%s1189_s23 + $0x1e0] sm:$0xff] }
  0x6c   : > { %v348_v41 = vadd.f32 %v347_v30, %v346_v33  ;;  %v365_v30 = vsel %vm263_vm1, %v1523_v17, 0.0 }
  0x6d   : > { %v529_v16 = vadd.f32 %v528_v29, %v527_v13  ;;  %v546_v29 = vsel %vm263_vm1, %v442_v12, 0.0  ;;  %v1603_v13 = vld [vmem:[%s1189_s23 + $0x1e8] sm:$0xff] }
  0x6e   : > { %v350_v48 = vadd.f32 %v349_v38, %v348_v41  ;;  %v367_v38 = vsel %vm263_vm1, %v1531_v24, 0.0 }
  0x6f   : > { %v531_v19 = vadd.f32 %v530_v36, %v529_v16  ;;  %v548_v36 = vsel %vm263_vm1, %v443_v20, 0.0  ;;  %v262_v20 = vld [vmem:[#allocation2] sm:$0x1] }
  0x70   : > { %v352_v55 = vadd.f32 %v351_v45, %v350_v48  ;;  %v369_v45 = vsel %vm263_vm1, %v1539_v32, 0.0  ;;  %v457_v32 = vmul.f32 %v1563_v54, %v1563_v54 }
  0x71   : > { %v533_v22 = vadd.f32 %v532_v44, %v531_v19  ;;  %v550_v44 = vsel %vm263_vm1, %v444_v27, 0.0  ;;  %v456_v27 = vmul.f32 %v1555_v47, %v1555_v47 }
  0x72   : > { %v354_v62 = vadd.f32 %v353_v53, %v352_v55  ;;  %v371_v53 = vsel %vm263_vm1, %v1547_v39, 0.0 }
  0x73   : > { %v535_v25 = vadd.f32 %v534_v51, %v533_v22  ;;  %v552_v51 = vsel %vm263_vm1, %v445_v35, 0.0  ;;  %v574_v35 = vsel %vm263_vm1, %v456_v27, 0.0 }
  0x74   : > { %v356_v6 = vadd.f32 %v355_v59, %v354_v62  ;;  %v373_v59 = vsel %vm263_vm1, %v1555_v47, 0.0  ;;  %v459_v47 = vmul.f32 %v1579_v5, %v1579_v5 }
  0x75   : > { %v537_v28 = vadd.f32 %v536_v58, %v535_v25  ;;  %v449_v25 = vmul.f32 %v1499_v61, %v1499_v61  ;;  %v452_v61 = vmul.f32 %v1523_v17, %v1523_v17  ;;  %v455_v17 = vmul.f32 %v1547_v39, %v1547_v39 }
  0x76   : > { %v358_v11 = vadd.f32 %v357_v4, %v356_v6  ;;  %v375_v4 = vsel %vm263_vm1, %v1563_v54, 0.0  ;;  %v458_v39 = vmul.f32 %v1571_v60, %v1571_v60 }
  0x77   : > { %v539_v31 = vadd.f32 %v538_v0, %v537_v28  ;;  %v450_v0 = vmul.f32 %v1507_v1, %v1507_v1  ;;  %v560_v2 = vsel %vm263_vm1, %v449_v25, 0.0  ;;  %v453_v1 = vmul.f32 %v1531_v24, %v1531_v24 }
  0x78   : > { %v360_v18 = vadd.f32 %v359_v8, %v358_v11  ;;  %v377_v8 = vsel %vm263_vm1, %v1571_v60, 0.0  ;;  %v578_v54 = vsel %vm263_vm1, %v458_v39, 0.0  ;;  %v580_v60 = vsel %vm263_vm1, %v459_v47, 0.0 }
  0x79   : > { %v541_v34 = vadd.f32 %v540_v3, %v539_v31  ;;  %v562_v31 = vsel %vm263_vm1, %v450_v0, 0.0 }
  0x7a   : > { %v362_v26 = vadd.f32 %v361_v15, %v360_v18  ;;  %v379_v15 = vsel %vm263_vm1, %v1579_v5, 0.0 }
  0x7b   : > { %v543_v37 = vadd.f32 %v542_v14, %v541_v34  ;;  %v564_v14 = vsel %vm263_vm1, %v451_v56, 0.0 }
  0x7c   : > { %v364_v33 = vadd.f32 %v363_v23, %v362_v26  ;;  %v381_v23 = vsel %vm263_vm1, %v1587_v9, 0.0 }
  0x7d   : > { %v545_v40 = vadd.f32 %v544_v21, %v543_v37  ;;  %v568_v37 = vsel %vm263_vm1, %v453_v1, 0.0 }
  0x7e   : > { %v366_v41 = vadd.f32 %v365_v30, %v364_v33  ;;  %v383_v30 = vsel %vm263_vm1, %v1595_v10, 0.0 }
  0x7f   : > { %v547_v16 = vadd.f32 %v546_v29, %v545_v40  ;;  %v570_v29 = vsel %vm263_vm1, %v454_v7, 0.0  ;;  %v572_v40 = vsel %vm263_vm1, %v455_v17, 0.0 }
  0x80   : > { %v368_v48 = vadd.f32 %v367_v38, %v366_v41  ;;  %v385_v38 = vsel %vm263_vm1, %v1603_v13, 0.0 }
  0x81   : > { %v549_v19 = vadd.f32 %v548_v36, %v547_v16 }
  0x82   : > { %v370_v55 = vadd.f32 %v369_v45, %v368_v48  ;;  %v387_v45 = vsel %vm263_vm1, %v1611_v43, 0.0  ;;  %v1619_v48 = vld [vmem:[%s1189_s23 + $0x1f8] sm:$0xff] }
  0x83   : > { %v551_v22 = vadd.f32 %v550_v44, %v549_v19  ;;  %v461_v44 = vmul.f32 %v1595_v10, %v1595_v10  ;;  %v462_v19 = vmul.f32 %v1603_v13, %v1603_v13 }
  0x84   : > { %v372_v62 = vadd.f32 %v371_v53, %v370_v55  ;;  %v389_v53 = vsel %vm263_vm1, %v1619_v48, 0.0 }
  0x85   : > { %v553_v58 = vadd.f32 %v552_v51, %v551_v22  ;;  %v586_v10 = vsel %vm263_vm1, %v462_v19, 0.0 }
  0x86   : > { %v374_v6 = vadd.f32 %v373_v59, %v372_v62  ;;  %v556_v62 = vsel %vm263_vm1, %v447_v50, 0.0  ;;  %v463_v50 = vmul.f32 %v1611_v43, %v1611_v43 }
  0x87   : > { %v555_v52 = vadd.f32 %v554_v57, %v553_v58 }
  0x88   : > { %v376_v11 = vadd.f32 %v375_v4, %v374_v6  ;;  %v558_v4 = vsel %vm263_vm1, %v448_v49, 0.0 }
  0x89   : > { %v557_v28 = vadd.f32 %v556_v62, %v555_v52 }
  0x8a   : > { %v378_v18 = vadd.f32 %v377_v8, %v376_v11 }
  0x8b   : > { %v559_v3 = vadd.f32 %v558_v4, %v557_v28 }
  0x8c   : > { %v380_v26 = vadd.f32 %v379_v15, %v378_v18  ;;  %v566_v18 = vsel %vm263_vm1, %v452_v61, 0.0 }
  0x8d   : > { %v561_v11 = vadd.f32 %v560_v2, %v559_v3 }
  0x8e   : > { %v382_v33 = vadd.f32 %v381_v23, %v380_v26 }
  0x8f   : > { %v563_v15 = vadd.f32 %v562_v31, %v561_v11 }
  0x90   : > { %v384_v41 = vadd.f32 %v383_v30, %v382_v33 }
  0x91   : > { %v565_v21 = vadd.f32 %v564_v14, %v563_v15 }
  0x92   : > { %v386_v46 = vadd.f32 %v385_v38, %v384_v41  ;;  %v576_v38 = vsel %vm263_vm1, %v457_v32, 0.0  ;;  %v460_v41 = vmul.f32 %v1587_v9, %v1587_v9  ;;  %v584_v9 = vsel %vm263_vm1, %v461_v44, 0.0 }
  0x93   : > { %v567_v26 = vadd.f32 %v566_v18, %v565_v21 }
  0x94   : > { %v388_v55 = vadd.f32 %v387_v45, %v386_v46  ;;  %v582_v5 = vsel %vm263_vm1, %v460_v41, 0.0 }
  0x95   : > { %v569_v30 = vadd.f32 %v568_v37, %v567_v26 }
  0x96   : > { %v390_v59 = vadd.f32 %v389_v53, %v388_v55  ;;  %v464_v53 = vmul.f32 %v1619_v48, %v1619_v48  ;;  %v588_v55 = vsel %vm263_vm1, %v463_v50, 0.0 }
  0x97   : > { %v571_v33 = vadd.f32 %v570_v29, %v569_v30 }
  0x98   : > { %v391_v63 = vrot.slane %v390_v59, 4  ;;  %v590_v13 = vsel %vm263_vm1, %v464_v53, 0.0 }
  0x99   : > { %v573_v36 = vadd.f32 %v572_v40, %v571_v33 }
  0x9a   : > { %v392_v6 = vadd.f32 %v391_v63, %v390_v59  ;;  %v400_v63 = vld [vmem:[#allocation3] sm:$0x1] }
  0x9b   : > { %v575_v16 = vadd.f32 %v574_v35, %v573_v36 }
  0x9c   : > { %v393_v8 = vrot.slane %v392_v6, 2 }
  0x9d   : > { %v577_v42 = vadd.f32 %v576_v38, %v575_v16 }
  0x9e   : > { %v394_v12 = vadd.f32 %v393_v8, %v392_v6 }
  0x9f   : > { %v579_v45 = vadd.f32 %v578_v54, %v577_v42 }
  0xa0   : > { %v395_v34 = vrot.slane %v394_v12, 1 }
  0xa1   : > { %v581_v46 = vadd.f32 %v580_v60, %v579_v45 }
  0xa2   : > { %v396_v23 = vadd.f32 %v395_v34, %v394_v12 }
  0xa3   : > { %v583_v51 = vadd.f32 %v582_v5, %v581_v46 }
  0xa4   : > { %v397_v24 = vadd.f32 %v396_v23, %v262_v20 }
  0xa5   : > { %v585_v22 = vadd.f32 %v584_v9, %v583_v51 }
  0xa6   : > { %399 = vst.msk [vmem:[#allocation2] sm:$0x1] %vm398_vm2, %v397_v24 }
  0xa7   : > { %v587_v49 = vadd.f32 %v586_v10, %v585_v22 }
  0xa9   : > { %v589_v57 = vadd.f32 %v588_v55, %v587_v49 }
  0xab   : > { %v591_v58 = vadd.f32 %v590_v13, %v589_v57 }
  0xad   : > { %v592_v59 = vrot.slane %v591_v58, 4 }
  0xaf   : > { %v593_v25 = vadd.f32 %v592_v59, %v591_v58 }
  0xb1   : > { %v594_v62 = vrot.slane %v593_v25, 2 }
  0xb3   : > { %v595_v43 = vadd.f32 %v594_v62, %v593_v25 }
  0xb5   : > { %v596_v52 = vrot.slane %v595_v43, 1 }
  0xb7   : > { %v597_v0 = vadd.f32 %v596_v52, %v595_v43 }
  0xb9   : > { %v598_v4 = vadd.f32 %v597_v0, %v400_v63 }
  0xbb   : > { %599 = vst.msk [vmem:[#allocation3] sm:$0x1] %vm398_vm2, %v598_v4 }
  0xbc PF: > { %p600_p10 = scmp.eq.s32.totalorder %s1112_s13, 1 }
  0xbe   : > { %p601_p11 = pnand %p600_p10, %p187_p7 }
  0xbf   : > { %v605_v48 = vld [vmem:[#allocation2] sm:$0x1] (!%p601_p11)  ;;  %vm616_vm3 = vcmask (!%p601_p11), 253952  }
  0xc0   : > { %604 = sbr.rel (%p601_p11) target bundleno = 221 (0xdd), region = 44  ;;  %v606_v6 = vmul.f32 (!%p601_p11), 0.00012207031, %v605_v48  ;;  %v612_v31 = vld [vmem:[%s2031_s1] sm:$0x1] (!%p601_p11) }
  0xc1   : > { %v618_v1 = vld [vmem:[%s2032_s2] sm:$0x1] (!%p601_p11) }
  0xc2   : > { %v607_v28 = vld [vmem:[#allocation3] sm:$0x1] (!%p601_p11)  ;;  %v609_v2 = vmul.f32 (!%p601_p11), %v606_v6, %v606_v6 }
  0xc3   : > { %v608_v56 = vmul.f32 (!%p601_p11), 0.00012207031, %v607_v28 }
  0xc5   : > { %v610_v3 = vsub.f32 (!%p601_p11), %v608_v56, %v609_v2 }
  0xc7   : > { %v611_v8 = vmax.f32 %v610_v3, 0.0 }
  0xc9   : > { %v613_v61 = vadd.f32 1e-05, %v611_v8 }
  0xcb   : > { %1084 = vrsqrt.f32 %v613_v61 }
  0xd5   : > { %v1085_v11 = vpop.eup %1084 }
  0xd6   : > { %v615_v12 = vmul.f32 %v1085_v11, %v612_v31 }
  0xd8   : > { %617 = vst.msk [vmem:[#allocation4] sm:$0x1] %vm616_vm3, %v615_v12  ;;  %v619_v14 = vmul.f32 %v615_v12, %v606_v6 }
  0xda   : > { %v620_v15 = vsub.f32 %v618_v1, %v619_v14 }
  0xdc   : > { %621 = vst.msk [vmem:[#allocation5] sm:$0x1] %vm616_vm3, %v620_v15 }
  0xdd PF: > { %p1038_p12 = scmp.ne.s32.totalorder %s1112_s13, 1 }
  0xde   : > { %v625_v34 = vld [vmem:[%s1189_s23] sm:$0xff] (!%p1038_p12)  ;;  %v626_v21 = vld [vmem:[%s1189_s23 + $0x8] sm:$0xff] (!%p1038_p12)  ;;  %v627_v23 = vld [vmem:[%s1189_s23 + $0x10] sm:$0xff] (!%p1038_p12)  ;;  %vm895_vm4 = vcmask (!%p1038_p12), 261120  }
  0xdf   : > { %624 = sbr.rel (%p1038_p12) target bundleno = 279 (0x117), region = 48  ;;  %v1692_v7 = vld [vmem:[#allocation4] ss:$0 sm:$0xff] (!%p1038_p12)  ;;  %v628_v17 = vld [vmem:[%s1189_s23 + $0x18] sm:$0xff] (!%p1038_p12)  ;;  %v630_v29 = vld [vmem:[%s1189_s23 + $0x28] sm:$0xff] (!%p1038_p12) }
  0xe0   : > { %v696_v20 = vmul.f32 (!%p1038_p12), %v1692_v7, %v625_v34  ;;  %v697_v37 = vmul.f32 (!%p1038_p12), %v1692_v7, %v626_v21  ;;  %v698_v26 = vmul.f32 (!%p1038_p12), %v1692_v7, %v627_v23  ;;  %v699_v24 = vmul.f32 (!%p1038_p12), %v1692_v7, %v628_v17  ;;  %v629_v27 = vld [vmem:[%s1189_s23 + $0x20] sm:$0xff] (!%p1038_p12)  ;;  %v631_v30 = vld [vmem:[%s1189_s23 + $0x30] sm:$0xff] (!%p1038_p12)  ;;  %v632_v35 = vld [vmem:[%s1189_s23 + $0x38] sm:$0xff] (!%p1038_p12) }
  0xe1   : > { %v700_v40 = vmul.f32 (!%p1038_p12), %v1692_v7, %v629_v27  ;;  %v701_v33 = vmul.f32 (!%p1038_p12), %v1692_v7, %v630_v29  ;;  %v702_v39 = vmul.f32 (!%p1038_p12), %v1692_v7, %v631_v30  ;;  %v703_v16 = vmul.f32 (!%p1038_p12), %v1692_v7, %v632_v35  ;;  %v633_v41 = vld [vmem:[%s1189_s23 + $0x40] sm:$0xff] (!%p1038_p12)  ;;  %v634_v45 = vld [vmem:[%s1189_s23 + $0x48] sm:$0xff] (!%p1038_p12)  ;;  %v635_v19 = vld [vmem:[%s1189_s23 + $0x50] sm:$0xff] (!%p1038_p12) }
  0xe2   : > { %v636_v5 = vld [vmem:[%s1189_s23 + $0x58] sm:$0xff] (!%p1038_p12)  ;;  %v637_v53 = vld [vmem:[%s1189_s23 + $0x60] sm:$0xff] (!%p1038_p12)  ;;  %v638_v10 = vld [vmem:[%s1189_s23 + $0x68] sm:$0xff] (!%p1038_p12)  ;;  %v704_v57 = vmul.f32 (!%p1038_p12), %v1692_v7, %v633_v41  ;;  %v705_v25 = vmul.f32 (!%p1038_p12), %v1692_v7, %v634_v45  ;;  %v706_v62 = vmul.f32 (!%p1038_p12), %v1692_v7, %v635_v19 }
  0xe3   : > { %v1694_v18 = vld [vmem:[#allocation5] ss:$0 sm:$0xff] (!%p1038_p12)  ;;  %v639_v22 = vld [vmem:[%s1189_s23 + $0x70] sm:$0xff] (!%p1038_p12)  ;;  %v640_v58 = vld [vmem:[%s1189_s23 + $0x78] sm:$0xff] (!%p1038_p12)  ;;  %v707_v43 = vmul.f32 (!%p1038_p12), %v1692_v7, %v636_v5  ;;  %v708_v63 = vmul.f32 (!%p1038_p12), %v1692_v7, %v637_v53  ;;  %v709_v0 = vmul.f32 (!%p1038_p12), %v1692_v7, %v638_v10 }
  0xe4   : > { %v767_v32 = vadd.f32 (!%p1038_p12), %v1694_v18, %v696_v20  ;;  %v768_v36 = vadd.f32 (!%p1038_p12), %v1694_v18, %v697_v37  ;;  %v769_v47 = vadd.f32 (!%p1038_p12), %v1694_v18, %v698_v26  ;;  %v770_v38 = vadd.f32 (!%p1038_p12), %v1694_v18, %v699_v24  ;;  %v641_v2 = vld [vmem:[%s1189_s23 + $0x80] sm:$0xff] (!%p1038_p12)  ;;  %v642_v11 = vld [vmem:[%s1189_s23 + $0x88] sm:$0xff] (!%p1038_p12)  ;;  %v643_v12 = vld [vmem:[%s1189_s23 + $0x90] sm:$0xff] (!%p1038_p12) }
  0xe5   : > { %v771_v42 = vadd.f32 (!%p1038_p12), %v1694_v18, %v700_v40  ;;  %v772_v44 = vadd.f32 (!%p1038_p12), %v1694_v18, %v701_v33  ;;  %v773_v60 = vadd.f32 (!%p1038_p12), %v1694_v18, %v702_v39  ;;  %v774_v51 = vadd.f32 (!%p1038_p12), %v1694_v18, %v703_v16  ;;  %v644_v1 = vld [vmem:[%s1189_s23 + $0x98] sm:$0xff] (!%p1038_p12)  ;;  %v645_v21 = vld [vmem:[%s1189_s23 + $0xa0] sm:$0xff] (!%p1038_p12)  ;;  %v646_v23 = vld [vmem:[%s1189_s23 + $0xa8] sm:$0xff] (!%p1038_p12) }
  0xe6   : > { %v831_v54 = vmax.f32 %v767_v32, 0.0  ;;  %v832_v46 = vmax.f32 %v768_v36, 0.0  ;;  %v833_v50 = vmax.f32 %v769_v47, 0.0  ;;  %v834_v9 = vmax.f32 %v770_v38, 0.0  ;;  %v647_v17 = vld [vmem:[%s1189_s23 + $0xb0] sm:$0xff]  ;;  %v648_v29 = vld [vmem:[%s1189_s23 + $0xb8] sm:$0xff] }
  0xe7   : > { %v835_v55 = vmax.f32 %v771_v42, 0.0  ;;  %v836_v49 = vmax.f32 %v772_v44, 0.0  ;;  %v837_v13 = vmax.f32 %v773_v60, 0.0  ;;  %v838_v59 = vmax.f32 %v774_v51, 0.0  ;;  %v649_v42 = vld [vmem:[%s1189_s23 + $0xc0] sm:$0xff]  ;;  %v650_v5 = vld [vmem:[%s1189_s23 + $0xc8] sm:$0xff] }
  0xe8   : > { %896 = vst.msk [vmem:[%s1194_s26] sm:$0xff] %vm895_vm4, %v831_v54  ;;  %897 = vst.msk [vmem:[%s1194_s26 + $0x8] sm:$0xff] %vm895_vm4, %v832_v46  ;;  %v775_v52 = vadd.f32 %v1694_v18, %v704_v57  ;;  %v710_v4 = vmul.f32 %v1692_v7, %v639_v22  ;;  %v776_v48 = vadd.f32 %v1694_v18, %v705_v25  ;;  %v651_v46 = vld [vmem:[%s1189_s23 + $0xd0] sm:$0xff]  ;;  %v653_v22 = vld [vmem:[%s1189_s23 + $0xe0] sm:$0xff] }
  0xe9   : > { %898 = vst.msk [vmem:[%s1194_s26 + $0x10] sm:$0xff] %vm895_vm4, %v833_v50  ;;  %899 = vst.msk [vmem:[%s1194_s26 + $0x18] sm:$0xff] %vm895_vm4, %v834_v9  ;;  %v777_v28 = vadd.f32 %v1694_v18, %v706_v62  ;;  %v778_v6 = vadd.f32 %v1694_v18, %v707_v43  ;;  %v711_v56 = vmul.f32 %v1692_v7, %v640_v58  ;;  %v652_v50 = vld [vmem:[%s1189_s23 + $0xd8] sm:$0xff] }
  0xea   : > { %900 = vst.msk [vmem:[%s1194_s26 + $0x20] sm:$0xff] %vm895_vm4, %v835_v55  ;;  %901 = vst.msk [vmem:[%s1194_s26 + $0x28] sm:$0xff] %vm895_vm4, %v836_v49  ;;  %v839_v3 = vmax.f32 %v775_v52, 0.0  ;;  %v779_v8 = vadd.f32 %v1694_v18, %v708_v63  ;;  %v780_v61 = vadd.f32 %v1694_v18, %v709_v0  ;;  %v781_v31 = vadd.f32 %v1694_v18, %v710_v4  ;;  %v654_v55 = vld [vmem:[%s1189_s23 + $0xe8] sm:$0xff]  ;;  %v655_v49 = vld [vmem:[%s1189_s23 + $0xf0] sm:$0xff] }
  0xeb   : > { %902 = vst.msk [vmem:[%s1194_s26 + $0x30] sm:$0xff] %vm895_vm4, %v837_v13  ;;  %903 = vst.msk [vmem:[%s1194_s26 + $0x38] sm:$0xff] %vm895_vm4, %v838_v59  ;;  %v840_v14 = vmax.f32 %v776_v48, 0.0  ;;  %v841_v15 = vmax.f32 %v777_v28, 0.0  ;;  %v842_v34 = vmax.f32 %v778_v6, 0.0  ;;  %v782_v20 = vadd.f32 %v1694_v18, %v711_v56  ;;  %v656_v25 = vld [vmem:[%s1189_s23 + $0xf8] sm:$0xff] }
  0xec   : > { %904 = vst.msk [vmem:[%s1194_s26 + $0x40] sm:$0xff] %vm895_vm4, %v839_v3  ;;  %v843_v37 = vmax.f32 %v779_v8, 0.0  ;;  %v844_v26 = vmax.f32 %v780_v61, 0.0  ;;  %v845_v24 = vmax.f32 %v781_v31, 0.0  ;;  %v712_v27 = vmul.f32 %v1692_v7, %v641_v2  ;;  %v657_v8 = vld [vmem:[%s1189_s23 + $0x100] sm:$0xff] }
  0xed   : > { %905 = vst.msk [vmem:[%s1194_s26 + $0x48] sm:$0xff] %vm895_vm4, %v840_v14  ;;  %906 = vst.msk [vmem:[%s1194_s26 + $0x50] sm:$0xff] %vm895_vm4, %v841_v15  ;;  %v846_v30 = vmax.f32 %v782_v20, 0.0  ;;  %v713_v32 = vmul.f32 %v1692_v7, %v642_v11  ;;  %v714_v40 = vmul.f32 %v1692_v7, %v643_v12  ;;  %v715_v33 = vmul.f32 %v1692_v7, %v644_v1  ;;  %v658_v1 = vld [vmem:[%s1189_s23 + $0x108] sm:$0xff]  ;;  %v659_v14 = vld [vmem:[%s1189_s23 + $0x110] sm:$0xff] }
  0xee   : > { %907 = vst.msk [vmem:[%s1194_s26 + $0x58] sm:$0xff] %vm895_vm4, %v842_v34  ;;  %908 = vst.msk [vmem:[%s1194_s26 + $0x60] sm:$0xff] %vm895_vm4, %v843_v37  ;;  %v783_v39 = vadd.f32 %v1694_v18, %v712_v27  ;;  %v716_v35 = vmul.f32 %v1692_v7, %v645_v21  ;;  %v717_v36 = vmul.f32 %v1692_v7, %v646_v23  ;;  %v660_v15 = vld [vmem:[%s1189_s23 + $0x118] sm:$0xff]  ;;  %v662_v37 = vld [vmem:[%s1189_s23 + $0x128] sm:$0xff] }
  0xef   : > { %909 = vst.msk [vmem:[%s1194_s26 + $0x68] sm:$0xff] %vm895_vm4, %v844_v26  ;;  %910 = vst.msk [vmem:[%s1194_s26 + $0x70] sm:$0xff] %vm895_vm4, %v845_v24  ;;  %v718_v47 = vmul.f32 %v1692_v7, %v647_v17  ;;  %v784_v38 = vadd.f32 %v1694_v18, %v713_v32  ;;  %v785_v16 = vadd.f32 %v1694_v18, %v714_v40  ;;  %v661_v17 = vld [vmem:[%s1189_s23 + $0x120] sm:$0xff]  ;;  %v663_v26 = vld [vmem:[%s1189_s23 + $0x130] sm:$0xff] }
  0xf0   : > { %911 = vst.msk [vmem:[%s1194_s26 + $0x78] sm:$0xff] %vm895_vm4, %v846_v30  ;;  %v786_v41 = vadd.f32 %v1694_v18, %v715_v33  ;;  %v719_v54 = vmul.f32 %v1692_v7, %v648_v29  ;;  %v847_v44 = vmax.f32 %v783_v39, 0.0  ;;  %v787_v60 = vadd.f32 %v1694_v18, %v716_v35  ;;  %v664_v32 = vld [vmem:[%s1189_s23 + $0x138] sm:$0xff] }
  0xf1   : > { %v788_v45 = vadd.f32 %v1694_v18, %v717_v36  ;;  %v789_v19 = vadd.f32 %v1694_v18, %v718_v47  ;;  %v848_v9 = vmax.f32 %v784_v38, 0.0  ;;  %v849_v51 = vmax.f32 %v785_v16, 0.0 }
  0xf2   : > { %v850_v53 = vmax.f32 %v786_v41, 0.0  ;;  %v790_v10 = vadd.f32 %v1694_v18, %v719_v54  ;;  %912 = vst.msk [vmem:[%s1194_s26 + $0x80] sm:$0xff] %vm895_vm4, %v847_v44  ;;  %v851_v13 = vmax.f32 %v787_v60, 0.0  ;;  %v720_v59 = vmul.f32 %v1692_v7, %v649_v42  ;;  %v665_v60 = vld [vmem:[%s1189_s23 + $0x140] sm:$0xff] }
  0xf3   : > { %v852_v57 = vmax.f32 %v788_v45, 0.0  ;;  %v853_v58 = vmax.f32 %v789_v19, 0.0  ;;  %913 = vst.msk [vmem:[%s1194_s26 + $0x88] sm:$0xff] %vm895_vm4, %v848_v9  ;;  %914 = vst.msk [vmem:[%s1194_s26 + $0x90] sm:$0xff] %vm895_vm4, %v849_v51  ;;  %v721_v43 = vmul.f32 %v1692_v7, %v650_v5  ;;  %v722_v52 = vmul.f32 %v1692_v7, %v651_v46  ;;  %v667_v9 = vld [vmem:[%s1189_s23 + $0x150] sm:$0xff]  ;;  %v668_v51 = vld [vmem:[%s1189_s23 + $0x158] sm:$0xff] }
  0xf4   : > { %915 = vst.msk [vmem:[%s1194_s26 + $0x98] sm:$0xff] %vm895_vm4, %v850_v53  ;;  %v854_v62 = vmax.f32 %v790_v10, 0.0  ;;  %v723_v63 = vmul.f32 %v1692_v7, %v652_v50  ;;  %916 = vst.msk [vmem:[%s1194_s26 + $0xa0] sm:$0xff] %vm895_vm4, %v851_v13  ;;  %v791_v0 = vadd.f32 %v1694_v18, %v720_v59  ;;  %v724_v4 = vmul.f32 %v1692_v7, %v653_v22  ;;  %v666_v50 = vld [vmem:[%s1189_s23 + $0x148] sm:$0xff] }
  0xf5   : > { %917 = vst.msk [vmem:[%s1194_s26 + $0xa8] sm:$0xff] %vm895_vm4, %v852_v57  ;;  %918 = vst.msk [vmem:[%s1194_s26 + $0xb0] sm:$0xff] %vm895_vm4, %v853_v58  ;;  %v725_v48 = vmul.f32 %v1692_v7, %v654_v55  ;;  %v726_v28 = vmul.f32 %v1692_v7, %v655_v49  ;;  %v792_v6 = vadd.f32 %v1694_v18, %v721_v43  ;;  %v669_v49 = vld [vmem:[%s1189_s23 + $0x160] sm:$0xff]  ;;  %v670_v13 = vld [vmem:[%s1189_s23 + $0x168] sm:$0xff] }
  0xf6   : > { %919 = vst.msk [vmem:[%s1194_s26 + $0xb8] sm:$0xff] %vm895_vm4, %v854_v62  ;;  %v793_v56 = vadd.f32 %v1694_v18, %v722_v52  ;;  %v794_v2 = vadd.f32 %v1694_v18, %v723_v63  ;;  %v727_v3 = vmul.f32 %v1692_v7, %v656_v25  ;;  %v855_v61 = vmax.f32 %v791_v0, 0.0  ;;  %v671_v57 = vld [vmem:[%s1189_s23 + $0x170] sm:$0xff]  ;;  %v672_v43 = vld [vmem:[%s1189_s23 + $0x178] sm:$0xff] }
  0xf7   : > { %v795_v31 = vadd.f32 %v1694_v18, %v724_v4  ;;  %v796_v11 = vadd.f32 %v1694_v18, %v725_v48  ;;  %v797_v12 = vadd.f32 %v1694_v18, %v726_v28  ;;  %v856_v34 = vmax.f32 %v792_v6, 0.0 }
  0xf8   : > { %v857_v20 = vmax.f32 %v793_v56, 0.0  ;;  %v858_v21 = vmax.f32 %v794_v2, 0.0  ;;  %v798_v23 = vadd.f32 %v1694_v18, %v727_v3  ;;  %920 = vst.msk [vmem:[%s1194_s26 + $0xc0] sm:$0xff] %vm895_vm4, %v855_v61  ;;  %v728_v30 = vmul.f32 %v1692_v7, %v657_v8 }
  0xf9   : > { %v859_v24 = vmax.f32 %v795_v31, 0.0  ;;  %v860_v27 = vmax.f32 %v796_v11, 0.0  ;;  %v861_v29 = vmax.f32 %v797_v12, 0.0  ;;  %921 = vst.msk [vmem:[%s1194_s26 + $0xc8] sm:$0xff] %vm895_vm4, %v856_v34  ;;  %v729_v33 = vmul.f32 %v1692_v7, %v658_v1  ;;  %v673_v31 = vld [vmem:[%s1189_s23 + $0x180] sm:$0xff]  ;;  %v675_v34 = vld [vmem:[%s1189_s23 + $0x190] sm:$0xff] }
  0xfa   : > { %922 = vst.msk [vmem:[%s1194_s26 + $0xd0] sm:$0xff] %vm895_vm4, %v857_v20  ;;  %923 = vst.msk [vmem:[%s1194_s26 + $0xd8] sm:$0xff] %vm895_vm4, %v858_v21  ;;  %v862_v40 = vmax.f32 %v798_v23, 0.0  ;;  %v730_v39 = vmul.f32 %v1692_v7, %v659_v14  ;;  %v731_v35 = vmul.f32 %v1692_v7, %v660_v15  ;;  %v799_v36 = vadd.f32 %v1694_v18, %v728_v30  ;;  %v674_v15 = vld [vmem:[%s1189_s23 + $0x188] sm:$0xff]  ;;  %v676_v20 = vld [vmem:[%s1189_s23 + $0x198] sm:$0xff] }
  0xfb   : > { %924 = vst.msk [vmem:[%s1194_s26 + $0xe0] sm:$0xff] %vm895_vm4, %v859_v24  ;;  %925 = vst.msk [vmem:[%s1194_s26 + $0xe8] sm:$0xff] %vm895_vm4, %v860_v27  ;;  %v732_v47 = vmul.f32 %v1692_v7, %v661_v17  ;;  %v733_v38 = vmul.f32 %v1692_v7, %v662_v37  ;;  %v734_v16 = vmul.f32 %v1692_v7, %v663_v26  ;;  %v677_v26 = vld [vmem:[%s1189_s23 + $0x1a0] sm:$0xff]  ;;  %v678_v24 = vld [vmem:[%s1189_s23 + $0x1a8] sm:$0xff] }
  0xfc   : > { %926 = vst.msk [vmem:[%s1194_s26 + $0xf0] sm:$0xff] %vm895_vm4, %v861_v29  ;;  %927 = vst.msk [vmem:[%s1194_s26 + $0xf8] sm:$0xff] %vm895_vm4, %v862_v40  ;;  %v800_v41 = vadd.f32 %v1694_v18, %v729_v33  ;;  %v801_v54 = vadd.f32 %v1694_v18, %v730_v39  ;;  %v802_v42 = vadd.f32 %v1694_v18, %v731_v35  ;;  %v863_v45 = vmax.f32 %v799_v36, 0.0  ;;  %v679_v27 = vld [vmem:[%s1189_s23 + $0x1b0] sm:$0xff]  ;;  %v680_v33 = vld [vmem:[%s1189_s23 + $0x1b8] sm:$0xff] }
  0xfd   : > { %v735_v44 = vmul.f32 %v1692_v7, %v664_v32  ;;  %v803_v19 = vadd.f32 %v1694_v18, %v732_v47  ;;  %v804_v5 = vadd.f32 %v1694_v18, %v733_v38  ;;  %v805_v46 = vadd.f32 %v1694_v18, %v734_v16 }
  0xfe   : > { %v864_v53 = vmax.f32 %v800_v41, 0.0  ;;  %v865_v10 = vmax.f32 %v801_v54, 0.0  ;;  %v866_v22 = vmax.f32 %v802_v42, 0.0  ;;  %928 = vst.msk [vmem:[%s1194_s26 + $0x100] sm:$0xff] %vm895_vm4, %v863_v45  ;;  %v736_v62 = vmul.f32 %v1692_v7, %v665_v60 }
  0xff   : > { %v806_v55 = vadd.f32 %v1694_v18, %v735_v44  ;;  %v867_v58 = vmax.f32 %v803_v19, 0.0  ;;  %v868_v59 = vmax.f32 %v804_v5, 0.0  ;;  %v869_v25 = vmax.f32 %v805_v46, 0.0  ;;  %v681_v19 = vld [vmem:[%s1189_s23 + $0x1c0] sm:$0xff] }
 0x100   : > { %929 = vst.msk [vmem:[%s1194_s26 + $0x108] sm:$0xff] %vm895_vm4, %v864_v53  ;;  %930 = vst.msk [vmem:[%s1194_s26 + $0x110] sm:$0xff] %vm895_vm4, %v865_v10  ;;  %v737_v63 = vmul.f32 %v1692_v7, %v666_v50  ;;  %v738_v0 = vmul.f32 %v1692_v7, %v667_v9  ;;  %v739_v4 = vmul.f32 %v1692_v7, %v668_v51  ;;  %v682_v51 = vld [vmem:[%s1189_s23 + $0x1c8] sm:$0xff]  ;;  %v683_v53 = vld [vmem:[%s1189_s23 + $0x1d0] sm:$0xff] }
 0x101   : > { %931 = vst.msk [vmem:[%s1194_s26 + $0x118] sm:$0xff] %vm895_vm4, %v866_v22  ;;  %v870_v52 = vmax.f32 %v806_v55, 0.0  ;;  %932 = vst.msk [vmem:[%s1194_s26 + $0x120] sm:$0xff] %vm895_vm4, %v867_v58  ;;  %v807_v48 = vadd.f32 %v1694_v18, %v736_v62  ;;  %v740_v28 = vmul.f32 %v1692_v7, %v669_v49  ;;  %v741_v6 = vmul.f32 %v1692_v7, %v670_v13  ;;  %v684_v10 = vld [vmem:[%s1189_s23 + $0x1d8] sm:$0xff]  ;;  %v686_v58 = vld [vmem:[%s1189_s23 + $0x1e8] sm:$0xff] }
 0x102   : > { %933 = vst.msk [vmem:[%s1194_s26 + $0x128] sm:$0xff] %vm895_vm4, %v868_v59  ;;  %934 = vst.msk [vmem:[%s1194_s26 + $0x130] sm:$0xff] %vm895_vm4, %v869_v25  ;;  %v742_v56 = vmul.f32 %v1692_v7, %v671_v57  ;;  %v808_v2 = vadd.f32 %v1694_v18, %v737_v63  ;;  %v809_v3 = vadd.f32 %v1694_v18, %v738_v0  ;;  %v685_v57 = vld [vmem:[%s1189_s23 + $0x1e0] sm:$0xff]  ;;  %v687_v59 = vld [vmem:[%s1189_s23 + $0x1f0] sm:$0xff] }
 0x103   : > { %935 = vst.msk [vmem:[%s1194_s26 + $0x138] sm:$0xff] %vm895_vm4, %v870_v52  ;;  %v810_v8 = vadd.f32 %v1694_v18, %v739_v4  ;;  %v743_v61 = vmul.f32 %v1692_v7, %v672_v43  ;;  %v871_v11 = vmax.f32 %v807_v48, 0.0  ;;  %v811_v12 = vadd.f32 %v1694_v18, %v740_v28  ;;  %v688_v63 = vld [vmem:[%s1189_s23 + $0x1f8] sm:$0xff] }
 0x104   : > { %v812_v1 = vadd.f32 %v1694_v18, %v741_v6  ;;  %v813_v14 = vadd.f32 %v1694_v18, %v742_v56  ;;  %v872_v21 = vmax.f32 %v808_v2, 0.0  ;;  %v873_v23 = vmax.f32 %v809_v3, 0.0 }
 0x105   : > { %v874_v17 = vmax.f32 %v810_v8, 0.0  ;;  %v814_v37 = vadd.f32 %v1694_v18, %v743_v61  ;;  %936 = vst.msk [vmem:[%s1194_s26 + $0x140] sm:$0xff] %vm895_vm4, %v871_v11  ;;  %v875_v29 = vmax.f32 %v811_v12, 0.0  ;;  %v744_v40 = vmul.f32 %v1692_v7, %v673_v31 }
 0x106   : > { %v876_v30 = vmax.f32 %v812_v1, 0.0  ;;  %v877_v32 = vmax.f32 %v813_v14, 0.0  ;;  %937 = vst.msk [vmem:[%s1194_s26 + $0x148] sm:$0xff] %vm895_vm4, %v872_v21  ;;  %938 = vst.msk [vmem:[%s1194_s26 + $0x150] sm:$0xff] %vm895_vm4, %v873_v23  ;;  %v745_v35 = vmul.f32 %v1692_v7, %v674_v15  ;;  %v746_v36 = vmul.f32 %v1692_v7, %v675_v34 }
 0x107   : > { %939 = vst.msk [vmem:[%s1194_s26 + $0x158] sm:$0xff] %vm895_vm4, %v874_v17  ;;  %v878_v39 = vmax.f32 %v814_v37, 0.0  ;;  %v747_v47 = vmul.f32 %v1692_v7, %v676_v20  ;;  %940 = vst.msk [vmem:[%s1194_s26 + $0x160] sm:$0xff] %vm895_vm4, %v875_v29  ;;  %v815_v38 = vadd.f32 %v1694_v18, %v744_v40  ;;  %v748_v16 = vmul.f32 %v1692_v7, %v677_v26 }
 0x108   : > { %941 = vst.msk [vmem:[%s1194_s26 + $0x168] sm:$0xff] %vm895_vm4, %v876_v30  ;;  %942 = vst.msk [vmem:[%s1194_s26 + $0x170] sm:$0xff] %vm895_vm4, %v877_v32  ;;  %v749_v41 = vmul.f32 %v1692_v7, %v678_v24  ;;  %v750_v54 = vmul.f32 %v1692_v7, %v679_v27  ;;  %v816_v42 = vadd.f32 %v1694_v18, %v745_v35 }
 0x109   : > { %943 = vst.msk [vmem:[%s1194_s26 + $0x178] sm:$0xff] %vm895_vm4, %v878_v39  ;;  %v817_v44 = vadd.f32 %v1694_v18, %v746_v36  ;;  %v818_v60 = vadd.f32 %v1694_v18, %v747_v47  ;;  %v751_v45 = vmul.f32 %v1692_v7, %v680_v33  ;;  %v879_v5 = vmax.f32 %v815_v38, 0.0 }
 0x10a   : > { %v819_v46 = vadd.f32 %v1694_v18, %v748_v16  ;;  %v820_v50 = vadd.f32 %v1694_v18, %v749_v41  ;;  %v821_v9 = vadd.f32 %v1694_v18, %v750_v54  ;;  %v880_v22 = vmax.f32 %v816_v42, 0.0 }
 0x10b   : > { %v881_v55 = vmax.f32 %v817_v44, 0.0  ;;  %v882_v49 = vmax.f32 %v818_v60, 0.0  ;;  %v822_v13 = vadd.f32 %v1694_v18, %v751_v45  ;;  %944 = vst.msk [vmem:[%s1194_s26 + $0x180] sm:$0xff] %vm895_vm4, %v879_v5  ;;  %v752_v52 = vmul.f32 %v1692_v7, %v681_v19 }
 0x10c   : > { %v883_v25 = vmax.f32 %v819_v46, 0.0  ;;  %v884_v62 = vmax.f32 %v820_v50, 0.0  ;;  %v885_v43 = vmax.f32 %v821_v9, 0.0  ;;  %945 = vst.msk [vmem:[%s1194_s26 + $0x188] sm:$0xff] %vm895_vm4, %v880_v22  ;;  %v753_v4 = vmul.f32 %v1692_v7, %v682_v51 }
 0x10d   : > { %946 = vst.msk [vmem:[%s1194_s26 + $0x190] sm:$0xff] %vm895_vm4, %v881_v55  ;;  %947 = vst.msk [vmem:[%s1194_s26 + $0x198] sm:$0xff] %vm895_vm4, %v882_v49  ;;  %v886_v0 = vmax.f32 %v822_v13, 0.0  ;;  %v754_v48 = vmul.f32 %v1692_v7, %v683_v53  ;;  %v755_v28 = vmul.f32 %v1692_v7, %v684_v10  ;;  %v823_v6 = vadd.f32 %v1694_v18, %v752_v52 }
 0x10e   : > { %948 = vst.msk [vmem:[%s1194_s26 + $0x1a0] sm:$0xff] %vm895_vm4, %v883_v25  ;;  %949 = vst.msk [vmem:[%s1194_s26 + $0x1a8] sm:$0xff] %vm895_vm4, %v884_v62  ;;  %v756_v56 = vmul.f32 %v1692_v7, %v685_v57  ;;  %v757_v2 = vmul.f32 %v1692_v7, %v686_v58  ;;  %v758_v3 = vmul.f32 %v1692_v7, %v687_v59 }
 0x10f   : > { %950 = vst.msk [vmem:[%s1194_s26 + $0x1b0] sm:$0xff] %vm895_vm4, %v885_v43  ;;  %951 = vst.msk [vmem:[%s1194_s26 + $0x1b8] sm:$0xff] %vm895_vm4, %v886_v0  ;;  %v824_v8 = vadd.f32 %v1694_v18, %v753_v4  ;;  %v825_v61 = vadd.f32 %v1694_v18, %v754_v48  ;;  %v826_v31 = vadd.f32 %v1694_v18, %v755_v28  ;;  %v887_v12 = vmax.f32 %v823_v6, 0.0 }
 0x110   : > { %v759_v11 = vmul.f32 %v1692_v7, %v688_v63  ;;  %v827_v1 = vadd.f32 %v1694_v18, %v756_v56  ;;  %v828_v14 = vadd.f32 %v1694_v18, %v757_v2  ;;  %v829_v15 = vadd.f32 %v1694_v18, %v758_v3 }
 0x111   : > { %v888_v34 = vmax.f32 %v824_v8, 0.0  ;;  %v889_v20 = vmax.f32 %v825_v61, 0.0  ;;  %v890_v21 = vmax.f32 %v826_v31, 0.0  ;;  %952 = vst.msk [vmem:[%s1194_s26 + $0x1c0] sm:$0xff] %vm895_vm4, %v887_v12 }
 0x112   : > { %v830_v23 = vadd.f32 %v1694_v18, %v759_v11  ;;  %v891_v17 = vmax.f32 %v827_v1, 0.0  ;;  %v892_v7 = vmax.f32 %v828_v14, 0.0  ;;  %v893_v37 = vmax.f32 %v829_v15, 0.0 }
 0x113   : > { %953 = vst.msk [vmem:[%s1194_s26 + $0x1c8] sm:$0xff] %vm895_vm4, %v888_v34  ;;  %954 = vst.msk [vmem:[%s1194_s26 + $0x1d0] sm:$0xff] %vm895_vm4, %v889_v20 }
 0x114   : > { %955 = vst.msk [vmem:[%s1194_s26 + $0x1d8] sm:$0xff] %vm895_vm4, %v890_v21  ;;  %v894_v26 = vmax.f32 %v830_v23, 0.0  ;;  %956 = vst.msk [vmem:[%s1194_s26 + $0x1e0] sm:$0xff] %vm895_vm4, %v891_v17 }
 0x115   : > { %957 = vst.msk [vmem:[%s1194_s26 + $0x1e8] sm:$0xff] %vm895_vm4, %v892_v7  ;;  %958 = vst.msk [vmem:[%s1194_s26 + $0x1f0] sm:$0xff] %vm895_vm4, %v893_v37 }
 0x116   : > { %959 = vst.msk [vmem:[%s1194_s26 + $0x1f8] sm:$0xff] %vm895_vm4, %v894_v26 }
 0x117 PF: > { %s13_s16 = sadd.s32 1, %s1124_s16   ;;  %s2034_s12 = smov %s1116_s14 }
 0x118   : > { %p10_p13 = scmp.ge.s32.totalorder %s13_s16, 34   ;;  %s2035_s13 = smov %s1120_s15 }
 0x119   : > { %s2036_s14 = smov %s2039_s17  ;;  %s2037_s15 = smov %s2043_s18 }
 0x11a   :  { %12 = sbr.rel (!%p10_p13) target bundleno = 3 (0x3), region = 78 }

// kernel: net_forward.15
= control target key start
LH: loop header
LB: loop body
LE: loop exit
PB: predicated region body
PF: predicated region fallthrough
CT: control target
= control target key end

     0   :  { %s2209_s12 = smov 0   ;;  %s2759_s0 = inlined_call_operand.vmem [shape: bf16[2048,288], index: 0, kind: input, shape index: {}]   ;;  %s2760_s1 = inlined_call_operand.vmem [shape: bf16[288,32], index: 1, kind: input, shape index: {}]   ;;  %s2761_s2 = inlined_call_operand.vmem [shape: f32[1,32], index: 2, kind: input, shape index: {}]   ;;  %s2762_s3 = inlined_call_operand.vmem [shape: f32[2048,32], index: 3, kind: output, shape index: {}]  }
   0x1 LB: > { %s1732_s13 = sadd.s32 4294967295, %s2186_s12   ;;  %p1736_p0 = scmp.ge.s32.totalorder %s2186_s12, 1  ;;  %s2186_s12 = sphi %s2209_s12, %s13_s12  }
   0x2   : > { %p139_p1 = scmp.lt.s32.totalorder %s2186_s12, 5 }
   0x4   : > { %p140_p2 = pnand %p1736_p0, %p139_p1 }
   0x5   : > { %v2034_v0 = vld [vmem:[%s2760_s1] sm:$0xff] (!%p140_p2)   ;;  %v2188_v1 = vmov (!%p140_p2), 0   ;;  %s1737_s16 = sshll.u32 (!%p140_p2), %s1732_s13, 6  ;;  %v2035_v2 = vld [vmem:[%s2760_s1 + $0x8] sm:$0xff] (!%p140_p2)   ;;  %v2036_v3 = vld [vmem:[%s2760_s1 + $0x10] sm:$0xff] (!%p140_p2)   ;;  %vm937_vm0 = vcmask (!%p140_p2), 261120  }
   0x6   : > { %143 = sbr.rel (%p140_p2) target bundleno = 473 (0x1d9), region = 32  ;;  %1034 = vmatprep.subr.bf16.mxu0 (!%p140_p2), %v2188_v1  ;;  %1992 = vmatprep.subr.bf16.mxu1 (!%p140_p2), %v2188_v1  ;;  %p165_p3 = scmp.lt.s32.totalorder (!%p140_p2), %s1737_s16, 255  ;;  %v2037_v4 = vld [vmem:[%s2760_s1 + $0x18] sm:$0xff] (!%p140_p2)   ;;  %v2038_v5 = vld [vmem:[%s2760_s1 + $0x20] sm:$0xff] (!%p140_p2)   ;;  %v2039_v7 = vld [vmem:[%s2760_s1 + $0x28] sm:$0xff] (!%p140_p2)  }
   0x7   : > { %1035 = vmatpush1.bf16.msra.mxu0 (!%p140_p2), %v2034_v0  ;;  %2008 = vmatpush1.bf16.msra.mxu1 (!%p140_p2), %v2034_v0  ;;  %v2040_v9 = vld [vmem:[%s2760_s1 + $0x30] sm:$0xff] (!%p140_p2)   ;;  %v2041_v10 = vld [vmem:[%s2760_s1 + $0x38] sm:$0xff] (!%p140_p2)   ;;  %v2042_v11 = vld [vmem:[%s2760_s1 + $0x40] sm:$0xff] (!%p140_p2)  }
   0x8   : > { %1036 = vmatprep.subr.bf16.mxu0 (!%p140_p2), %v2188_v1  ;;  %1993 = vmatprep.subr.bf16.mxu1 (!%p140_p2), %v2188_v1  ;;  %v2043_v12 = vld [vmem:[%s2760_s1 + $0x48] sm:$0xff] (!%p140_p2)   ;;  %v2044_v13 = vld [vmem:[%s2760_s1 + $0x50] sm:$0xff] (!%p140_p2)   ;;  %v2045_v14 = vld [vmem:[%s2760_s1 + $0x58] sm:$0xff] (!%p140_p2)  }
   0x9   : > { %v2046_v15 = vld [vmem:[%s2760_s1 + $0x60] sm:$0xff] (!%p140_p2)   ;;  %v2047_v16 = vld [vmem:[%s2760_s1 + $0x68] sm:$0xff] (!%p140_p2)   ;;  %v2048_v17 = vld [vmem:[%s2760_s1 + $0x70] sm:$0xff] (!%p140_p2)  }
   0xa   : > { %v2049_v18 = vld [vmem:[%s2760_s1 + $0x78] sm:$0xff] (!%p140_p2)   ;;  %v2056_v19 = vld [vmem:[%s2760_s1 + $0x80] sm:$0xff] (!%p140_p2)   ;;  %v2081_v24 = vld [vmem:[%s2760_s1 + $0x88] sm:$0xff] (!%p140_p2)  }
   0xb   : > { %1037 = vmatpush1.bf16.msra.mxu0 (!%p140_p2), %v2035_v2  ;;  %2009 = vmatpush1.bf16.msra.mxu1 (!%p140_p2), %v2035_v2 }
   0xc   : > { %1038 = vmatprep.subr.bf16.mxu0 (!%p140_p2), %v2188_v1  ;;  %1994 = vmatprep.subr.bf16.mxu1 (!%p140_p2), %v2188_v1 }
   0xd   : > { %s2764_s16 = smov (!%p165_p3, %s1737_s16), 255 }
   0xe   : > { %s2024_s23 = smul.u32 12, %s2764_s16  ;;  %s1740_s5 = sshll.u32 %s2764_s16, 3 }
   0xf   : > { %1039 = vmatpush1.bf16.msra.mxu0 %v2036_v3  ;;  %2010 = vmatpush1.bf16.msra.mxu1 %v2036_v3  ;;  %s2513_s8 = scalar_lea.vmem %s2762_s3, %s1740_s5 }
  0x10   : > { %1040 = vmatprep.subr.bf16.mxu0 %v2188_v1  ;;  %1995 = vmatprep.subr.bf16.mxu1 %v2188_v1  ;;  %s2246_s28 = scalar_lea.vmem %s2759_s0, %s2024_s23 }
  0x11   : > { %v2052_v6 = vld [vmem:[%s2246_s28 + $0x4] ss:$12 sps:$4 sm:$0xff]   ;;  %v2050_v20 = vld [vmem:[%s2246_s28] ss:$12 sps:$4 sm:$0xff]   ;;  %v2057_v22 = vld [vmem:[%s2246_s28 + $0x1c] ss:$12 sps:$4 sm:$0xff]  }
  0x12   : > { %v2055_v8 = vld [vmem:[%s2246_s28 + $0x244] ss:$12 sps:$4 sm:$0xff]   ;;  %1066 = vmatprep.mubr.bf16.mxu0 %v2052_v6  ;;  %v2053_v21 = vld [vmem:[%s2246_s28 + $0x240] ss:$12 sps:$4 sm:$0xff]   ;;  %v2059_v23 = vld [vmem:[%s2246_s28 + $0x25c] ss:$12 sps:$4 sm:$0xff]  }
  0x13   : > { %1041 = vmatpush1.bf16.msra.mxu0 %v2037_v4  ;;  %2011 = vmatpush1.bf16.msra.mxu1 %v2037_v4  ;;  %v2061_v25 = vld [vmem:[%s2246_s28 + $0x18] ss:$12 sps:$4 sm:$0xff]   ;;  %v2063_v27 = vld [vmem:[%s2246_s28 + $0x34] ss:$12 sps:$4 sm:$0xff]   ;;  %v2067_v29 = vld [vmem:[%s2246_s28 + $0x30] ss:$12 sps:$4 sm:$0xff]  }
  0x14   : > { %1042 = vmatprep.subr.bf16.mxu0 %v2188_v1  ;;  %1996 = vmatprep.subr.bf16.mxu1 %v2188_v1  ;;  %v2062_v26 = vld [vmem:[%s2246_s28 + $0x258] ss:$12 sps:$4 sm:$0xff]   ;;  %v2065_v28 = vld [vmem:[%s2246_s28 + $0x274] ss:$12 sps:$4 sm:$0xff]   ;;  %v2068_v30 = vld [vmem:[%s2246_s28 + $0x270] ss:$12 sps:$4 sm:$0xff]  }
  0x15   : > { %1258 = vmatprep.mubr.bf16.mxu1 %v2055_v8  ;;  %v2069_v31 = vld [vmem:[%s2246_s28 + $0x4c] ss:$12 sps:$4 sm:$0xff]   ;;  %v2073_v33 = vld [vmem:[%s2246_s28 + $0x48] ss:$12 sps:$4 sm:$0xff]   ;;  %v2075_v35 = vld [vmem:[%s2246_s28 + $0x64] ss:$12 sps:$4 sm:$0xff]  }
  0x16   : > { %v2071_v32 = vld [vmem:[%s2246_s28 + $0x28c] ss:$12 sps:$4 sm:$0xff]   ;;  %v2074_v34 = vld [vmem:[%s2246_s28 + $0x288] ss:$12 sps:$4 sm:$0xff]   ;;  %v2077_v36 = vld [vmem:[%s2246_s28 + $0x2a4] ss:$12 sps:$4 sm:$0xff]  }
  0x17   : > { %1043 = vmatpush1.bf16.msra.mxu0 %v2038_v5  ;;  %2012 = vmatpush1.bf16.msra.mxu1 %v2038_v5  ;;  %v2079_v37 = vld [vmem:[%s2246_s28 + $0x60] ss:$12 sps:$4 sm:$0xff]   ;;  %v2082_v39 = vld [vmem:[%s2246_s28 + $0x7c] ss:$12 sps:$4 sm:$0xff]   ;;  %v2086_v41 = vld [vmem:[%s2246_s28 + $0x78] ss:$12 sps:$4 sm:$0xff]  }
  0x18   : > { %1044 = vmatprep.subr.bf16.mxu0 %v2188_v1  ;;  %1997 = vmatprep.subr.bf16.mxu1 %v2188_v1  ;;  %v2080_v38 = vld [vmem:[%s2246_s28 + $0x2a0] ss:$12 sps:$4 sm:$0xff]   ;;  %v2084_v40 = vld [vmem:[%s2246_s28 + $0x2bc] ss:$12 sps:$4 sm:$0xff]   ;;  %v2087_v42 = vld [vmem:[%s2246_s28 + $0x2b8] ss:$12 sps:$4 sm:$0xff]  }
  0x19   : > { %v2088_v43 = vld [vmem:[%s2246_s28 + $0x94] ss:$12 sps:$4 sm:$0xff]   ;;  %v2092_v45 = vld [vmem:[%s2246_s28 + $0x90] ss:$12 sps:$4 sm:$0xff]   ;;  %v2094_v47 = vld [vmem:[%s2246_s28 + $0xac] ss:$12 sps:$4 sm:$0xff]  }
  0x1a   : > { %v2090_v44 = vld [vmem:[%s2246_s28 + $0x2d4] ss:$12 sps:$4 sm:$0xff]   ;;  %v2093_v46 = vld [vmem:[%s2246_s28 + $0x2d0] ss:$12 sps:$4 sm:$0xff]   ;;  %v2096_v48 = vld [vmem:[%s2246_s28 + $0x2ec] ss:$12 sps:$4 sm:$0xff]  }
  0x1b   : > { %1045 = vmatpush1.bf16.msra.mxu0 %v2039_v7  ;;  %2013 = vmatpush1.bf16.msra.mxu1 %v2039_v7  ;;  %v2098_v49 = vld [vmem:[%s2246_s28 + $0xa8] ss:$12 sps:$4 sm:$0xff]   ;;  %v2100_v51 = vld [vmem:[%s2246_s28 + $0xc4] ss:$12 sps:$4 sm:$0xff]   ;;  %v2103_v53 = vld [vmem:[%s2246_s28 + $0xc0] ss:$12 sps:$4 sm:$0xff]  }
  0x1c   : > { %1046 = vmatprep.subr.bf16.mxu0 %v2188_v1  ;;  %1998 = vmatprep.subr.bf16.mxu1 %v2188_v1  ;;  %v2099_v50 = vld [vmem:[%s2246_s28 + $0x2e8] ss:$12 sps:$4 sm:$0xff]   ;;  %v2104_v54 = vld [vmem:[%s2246_s28 + $0x20] ss:$12 sps:$4 sm:$0xff]   ;;  %v2107_v56 = vld [vmem:[%s2246_s28 + $0x38] ss:$12 sps:$4 sm:$0xff]  }
  0x1d   : > { %v2102_v52 = vld [vmem:[%s2246_s28 + $0x8] ss:$12 sps:$4 sm:$0xff]   ;;  %v2108_v57 = vld [vmem:[%s2246_s28 + $0xd8] ss:$12 sps:$4 sm:$0xff]   ;;  %v2109_v58 = vld [vmem:[%s2246_s28 + $0x50] ss:$12 sps:$4 sm:$0xff]  }
  0x1e   : > { %v2105_v55 = vld [vmem:[%s2246_s28 + $0xdc] ss:$12 sps:$4 sm:$0xff]   ;;  %v2110_v59 = vld [vmem:[%s2246_s28 + $0xf4] ss:$12 sps:$4 sm:$0xff]   ;;  %v2115_v63 = vld [vmem:[%s2246_s28 + $0x10c] ss:$12 sps:$4 sm:$0xff]  }
  0x1f   : > { %1047 = vmatpush1.bf16.msra.mxu0 %v2040_v9  ;;  %2014 = vmatpush1.bf16.msra.mxu1 %v2040_v9  ;;  %v2112_v60 = vld [vmem:[%s2246_s28 + $0x68] ss:$12 sps:$4 sm:$0xff]   ;;  %v2113_v61 = vld [vmem:[%s2246_s28 + $0xf0] ss:$12 sps:$4 sm:$0xff]   ;;  %v2114_v62 = vld [vmem:[%s2246_s28 + $0x80] ss:$12 sps:$4 sm:$0xff]  }
  0x20   : > { %1048 = vmatprep.subr.bf16.mxu0 %v2188_v1  ;;  %1999 = vmatprep.subr.bf16.mxu1 %v2188_v1  ;;  %v2117_v0 = vld [vmem:[%s2246_s28 + $0x98] ss:$12 sps:$4 sm:$0xff]   ;;  %v2119_v2 = vld [vmem:[%s2246_s28 + $0xb0] ss:$12 sps:$4 sm:$0xff]   ;;  %v2122_v4 = vld [vmem:[%s2246_s28 + $0xc8] ss:$12 sps:$4 sm:$0xff]  }
  0x21   : > { %v2120_v3 = vld [vmem:[%s2246_s28 + $0x124] ss:$12 sps:$4 sm:$0xff]   ;;  %v2123_v5 = vld [vmem:[%s2246_s28 + $0x120] ss:$12 sps:$4 sm:$0xff]   ;;  %v2125_v7 = vld [vmem:[%s2246_s28 + $0x13c] ss:$12 sps:$4 sm:$0xff]  }
  0x22   : > { %v2124_v6 = vld [vmem:[%s2246_s28 + $0xe0] ss:$12 sps:$4 sm:$0xff]   ;;  %v2127_v8 = vld [vmem:[%s2246_s28 + $0xf8] ss:$12 sps:$4 sm:$0xff]  }
  0x23   : > { %1049 = vmatpush1.bf16.msra.mxu0 %v2041_v10  ;;  %2015 = vmatpush1.bf16.msra.mxu1 %v2041_v10  ;;  %v2128_v9 = vld [vmem:[%s2246_s28 + $0x138] ss:$12 sps:$4 sm:$0xff]   ;;  %v2129_v10 = vld [vmem:[%s2246_s28 + $0x110] ss:$12 sps:$4 sm:$0xff]  }
  0x24   : > { %1050 = vmatprep.subr.bf16.mxu0 %v2188_v1  ;;  %2000 = vmatprep.subr.bf16.mxu1 %v2188_v1 }
  0x27   : > { %1051 = vmatpush1.bf16.msra.mxu0 %v2042_v11  ;;  %2016 = vmatpush1.bf16.msra.mxu1 %v2042_v11  ;;  %v2130_v11 = vld [vmem:[%s2246_s28 + $0x154] ss:$12 sps:$4 sm:$0xff]  }
  0x28   : > { %1052 = vmatprep.subr.bf16.mxu0 %v2188_v1  ;;  %2001 = vmatprep.subr.bf16.mxu1 %v2188_v1 }
  0x2b   : > { %1053 = vmatpush1.bf16.msra.mxu0 %v2043_v12  ;;  %2017 = vmatpush1.bf16.msra.mxu1 %v2043_v12  ;;  %v2132_v12 = vld [vmem:[%s2246_s28 + $0x128] ss:$12 sps:$4 sm:$0xff]  }
  0x2c   : > { %1054 = vmatprep.subr.bf16.mxu0 %v2188_v1  ;;  %2002 = vmatprep.subr.bf16.mxu1 %v2188_v1 }
  0x2f   : > { %1055 = vmatpush1.bf16.msra.mxu0 %v2044_v13  ;;  %2018 = vmatpush1.bf16.msra.mxu1 %v2044_v13  ;;  %v2133_v13 = vld [vmem:[%s2246_s28 + $0x150] ss:$12 sps:$4 sm:$0xff]  }
  0x30   : > { %1056 = vmatprep.subr.bf16.mxu0 %v2188_v1  ;;  %2003 = vmatprep.subr.bf16.mxu1 %v2188_v1 }
  0x33   : > { %1057 = vmatpush1.bf16.msra.mxu0 %v2045_v14  ;;  %2019 = vmatpush1.bf16.msra.mxu1 %v2045_v14  ;;  %v2134_v14 = vld [vmem:[%s2246_s28 + $0x140] ss:$12 sps:$4 sm:$0xff]  }
  0x34   : > { %1058 = vmatprep.subr.bf16.mxu0 %v2188_v1  ;;  %2004 = vmatprep.subr.bf16.mxu1 %v2188_v1 }
  0x37   : > { %1059 = vmatpush1.bf16.msra.mxu0 %v2046_v15  ;;  %2020 = vmatpush1.bf16.msra.mxu1 %v2046_v15  ;;  %v2135_v15 = vld [vmem:[%s2246_s28 + $0x16c] ss:$12 sps:$4 sm:$0xff]  }
  0x38   : > { %1060 = vmatprep.subr.bf16.mxu0 %v2188_v1  ;;  %2005 = vmatprep.subr.bf16.mxu1 %v2188_v1 }
  0x3b   : > { %1061 = vmatpush1.bf16.msra.mxu0 %v2047_v16  ;;  %2021 = vmatpush1.bf16.msra.mxu1 %v2047_v16  ;;  %v2137_v16 = vld [vmem:[%s2246_s28 + $0x158] ss:$12 sps:$4 sm:$0xff]  }
  0x3c   : > { %1062 = vmatprep.subr.bf16.mxu0 %v2188_v1  ;;  %2006 = vmatprep.subr.bf16.mxu1 %v2188_v1 }
  0x3f   : > { %1063 = vmatpush1.bf16.msra.mxu0 %v2048_v17  ;;  %2022 = vmatpush1.bf16.msra.mxu1 %v2048_v17  ;;  %v2138_v17 = vld [vmem:[%s2246_s28 + $0x168] ss:$12 sps:$4 sm:$0xff]  }
  0x40   : > { %1064 = vmatprep.subr.bf16.mxu0 %v2188_v1  ;;  %2007 = vmatprep.subr.bf16.mxu1 %v2188_v1  ;;  %v2118_v1 = vld [vmem:[%s2246_s28 + $0x108] ss:$12 sps:$4 sm:$0xff]  }
  0x43   : > { %1065 = vmatpush1.bf16.msra.mxu0 %v2049_v18  ;;  %2023 = vmatpush1.bf16.msra.mxu1 %v2049_v18  ;;  %v2139_v18 = vld [vmem:[%s2246_s28 + $0x170] ss:$12 sps:$4 sm:$0xff]  }
  0x44   : > { %1924 = vmatprep.subr.bf16.mxu1 %v2056_v19 }
  0x46   : > { %1067 = vmatmul.mubr.bf16.vlgmr.msra.gmra.mrb[0].mxu0 %v2050_v20  ;;  %1259 = vmatmul.mubr.bf16.vlgmr.msra.gmra.mrb[0].mxu1 %v2053_v21  ;;  %v2142_v20 = vld [vmem:[%s2246_s28 + $0x188] ss:$12 sps:$4 sm:$0xff]   ;;  %v2143_v21 = vld [vmem:[%s2246_s28 + $0x180] ss:$12 sps:$4 sm:$0xff]  }
  0x47   : > { %1925 = vmatpush3.bf16.msra.mxu1 %v2056_v19  ;;  %1074 = vmatprep.mubr.bf16.mxu0 %v2057_v22  ;;  %v2140_v19 = vld [vmem:[%s2246_s28 + $0x184] ss:$12 sps:$4 sm:$0xff]   ;;  %v2144_v22 = vld [vmem:[%s2246_s28 + $0x1a0] ss:$12 sps:$4 sm:$0xff]  }
  0x48   : > { %1266 = vmatprep.mubr.bf16.mxu1 %v2059_v23  ;;  %1926 = vmatprep.subr.bf16.mxu1 %v2081_v24  ;;  %v2145_v23 = vld [vmem:[%s2246_s28 + $0x19c] ss:$12 sps:$4 sm:$0xff]  }
  0x4b   : > { %1927 = vmatpush3.bf16.msra.mxu1 %v2081_v24  ;;  %v2147_v24 = vld [vmem:[%s2246_s28 + $0x1b8] ss:$12 sps:$4 sm:$0xff]  }
  0x4e   : > { %1075 = vmatmul.mubr.bf16.gmra.mrb[4].mxu0 %v2061_v25  ;;  %1267 = vmatmul.mubr.bf16.gmra.mrb[4].mxu1 %v2062_v26  ;;  %v2148_v25 = vld [vmem:[%s2246_s28 + $0x198] ss:$12 sps:$4 sm:$0xff]   ;;  %v2149_v26 = vld [vmem:[%s2246_s28 + $0x1d0] ss:$12 sps:$4 sm:$0xff]  }
  0x4f   : > { %1082 = vmatprep.mubr.bf16.mxu0 %v2063_v27  ;;  %1274 = vmatprep.mubr.bf16.mxu1 %v2065_v28  ;;  %v2150_v27 = vld [vmem:[%s2246_s28 + $0x1b4] ss:$12 sps:$4 sm:$0xff]  }
  0x50   : > { %v2152_v28 = vld [vmem:[%s2246_s28 + $0x1e8] ss:$12 sps:$4 sm:$0xff]  }
  0x56   : > { %1083 = vmatmul.mubr.bf16.gmra.mrb[8].mxu0 %v2067_v29  ;;  %1275 = vmatmul.mubr.bf16.gmra.mrb[8].mxu1 %v2068_v30  ;;  %v2153_v29 = vld [vmem:[%s2246_s28 + $0x1b0] ss:$12 sps:$4 sm:$0xff]   ;;  %v2154_v30 = vld [vmem:[%s2246_s28 + $0x200] ss:$12 sps:$4 sm:$0xff]  }
  0x57   : > { %1090 = vmatprep.mubr.bf16.mxu0 %v2069_v31  ;;  %1282 = vmatprep.mubr.bf16.mxu1 %v2071_v32  ;;  %v2155_v31 = vld [vmem:[%s2246_s28 + $0x1cc] ss:$12 sps:$4 sm:$0xff]  }
  0x58   : > { %v2157_v32 = vld [vmem:[%s2246_s28 + $0x218] ss:$12 sps:$4 sm:$0xff]  }
  0x5e   : > { %1091 = vmatmul.mubr.bf16.gmra.mrb[12].mxu0 %v2073_v33  ;;  %1283 = vmatmul.mubr.bf16.gmra.mrb[12].mxu1 %v2074_v34  ;;  %v2158_v33 = vld [vmem:[%s2246_s28 + $0x1c8] ss:$12 sps:$4 sm:$0xff]   ;;  %v2159_v34 = vld [vmem:[%s2246_s28 + $0x230] ss:$12 sps:$4 sm:$0xff]  }
  0x5f   : > { %1098 = vmatprep.mubr.bf16.mxu0 %v2075_v35  ;;  %1290 = vmatprep.mubr.bf16.mxu1 %v2077_v36  ;;  %v2160_v35 = vld [vmem:[%s2246_s28 + $0x1e4] ss:$12 sps:$4 sm:$0xff]   ;;  %v2162_v36 = vld [vmem:[%s2246_s28 + $0x248] ss:$12 sps:$4 sm:$0xff]  }
  0x66   : > { %1099 = vmatmul.mubr.bf16.gmra.mrb[16].mxu0 %v2079_v37  ;;  %1291 = vmatmul.mubr.bf16.gmra.mrb[16].mxu1 %v2080_v38  ;;  %v2163_v37 = vld [vmem:[%s2246_s28 + $0x1e0] ss:$12 sps:$4 sm:$0xff]  }
  0x67   : > { %1106 = vmatprep.mubr.bf16.mxu0 %v2082_v39  ;;  %1298 = vmatprep.mubr.bf16.mxu1 %v2084_v40  ;;  %v2164_v38 = vld [vmem:[%s2246_s28 + $0x260] ss:$12 sps:$4 sm:$0xff]   ;;  %v2165_v39 = vld [vmem:[%s2246_s28 + $0x1fc] ss:$12 sps:$4 sm:$0xff]   ;;  %v2167_v40 = vld [vmem:[%s2246_s28 + $0x278] ss:$12 sps:$4 sm:$0xff]  }
  0x6e   : > { %1107 = vmatmul.mubr.bf16.gmra.mrb[20].mxu0 %v2086_v41  ;;  %1299 = vmatmul.mubr.bf16.gmra.mrb[20].mxu1 %v2087_v42  ;;  %v2168_v41 = vld [vmem:[%s2246_s28 + $0x1f8] ss:$12 sps:$4 sm:$0xff]   ;;  %v2169_v42 = vld [vmem:[%s2246_s28 + $0x290] ss:$12 sps:$4 sm:$0xff]  }
  0x6f   : > { %1114 = vmatprep.mubr.bf16.mxu0 %v2088_v43  ;;  %1306 = vmatprep.mubr.bf16.mxu1 %v2090_v44  ;;  %v2170_v43 = vld [vmem:[%s2246_s28 + $0x214] ss:$12 sps:$4 sm:$0xff]  }
  0x70   : > { %v2172_v44 = vld [vmem:[%s2246_s28 + $0x2a8] ss:$12 sps:$4 sm:$0xff]  }
  0x76   : > { %1115 = vmatmul.mubr.bf16.gmra.mrb[24].mxu0 %v2092_v45  ;;  %1307 = vmatmul.mubr.bf16.gmra.mrb[24].mxu1 %v2093_v46  ;;  %v2173_v45 = vld [vmem:[%s2246_s28 + $0x210] ss:$12 sps:$4 sm:$0xff]   ;;  %v2174_v46 = vld [vmem:[%s2246_s28 + $0x2c0] ss:$12 sps:$4 sm:$0xff]  }
  0x77   : > { %1122 = vmatprep.mubr.bf16.mxu0 %v2094_v47  ;;  %1314 = vmatprep.mubr.bf16.mxu1 %v2096_v48  ;;  %v2175_v47 = vld [vmem:[%s2246_s28 + $0x22c] ss:$12 sps:$4 sm:$0xff]  }
  0x78   : > { %v2177_v48 = vld [vmem:[%s2246_s28 + $0x2d8] ss:$12 sps:$4 sm:$0xff]  }
  0x7e   : > { %1123 = vmatmul.mubr.bf16.gmra.mrb[28].mxu0 %v2098_v49  ;;  %1315 = vmatmul.mubr.bf16.gmra.mrb[28].mxu1 %v2099_v50  ;;  %v2178_v49 = vld [vmem:[%s2246_s28 + $0x228] ss:$12 sps:$4 sm:$0xff]   ;;  %v2179_v50 = vld [vmem:[%s2246_s28 + $0x2f0] ss:$12 sps:$4 sm:$0xff]  }
  0x7f   : > { %1130 = vmatprep.mubr.bf16.mxu0 %v2100_v51  ;;  %1928 = vmatprep.mubr.msk.bf16.mxu1 %vm937_vm0, %v2102_v52 }
  0x86   : > { %1131 = vmatmul.mubr.bf16.gmra.mrb[32].mxu0 %v2103_v53  ;;  %1929 = vmatmul.mubr.msk.bf16.vlgmr.msra.gmra.mrb[32].mxu1 %vm937_vm0, %v2104_v54 }
  0x87   : > { %1138 = vmatprep.mubr.bf16.mxu0 %v2105_v55  ;;  %1932 = vmatprep.mubr.msk.bf16.mxu1 %vm937_vm0, %v2107_v56 }
  0x8e   : > { %1139 = vmatmul.mubr.bf16.gmra.mrb[36].mxu0 %v2108_v57  ;;  %1933 = vmatmul.mubr.msk.bf16.gmra.mrb[36].mxu1 %vm937_vm0, %v2109_v58 }
  0x8f   : > { %1146 = vmatprep.mubr.bf16.mxu0 %v2110_v59  ;;  %1936 = vmatprep.mubr.msk.bf16.mxu1 %vm937_vm0, %v2112_v60 }
  0x96   : > { %1147 = vmatmul.mubr.bf16.gmra.mrb[40].mxu0 %v2113_v61  ;;  %1937 = vmatmul.mubr.msk.bf16.gmra.mrb[40].mxu1 %vm937_vm0, %v2114_v62 }
  0x97   : > { %1154 = vmatprep.mubr.bf16.mxu0 %v2115_v63  ;;  %1940 = vmatprep.mubr.msk.bf16.mxu1 %vm937_vm0, %v2117_v0 }
  0x9e   : > { %1155 = vmatmul.mubr.bf16.gmra.mrb[44].mxu0 %v2118_v1  ;;  %1941 = vmatmul.mubr.msk.bf16.gmra.mrb[44].mxu1 %vm937_vm0, %v2119_v2 }
  0x9f   : > { %1162 = vmatprep.mubr.bf16.mxu0 %v2120_v3  ;;  %1944 = vmatprep.mubr.msk.bf16.mxu1 %vm937_vm0, %v2122_v4 }
  0xa6   : > { %1163 = vmatmul.mubr.bf16.gmra.mrb[48].mxu0 %v2123_v5  ;;  %1945 = vmatmul.mubr.msk.bf16.gmra.mrb[48].mxu1 %vm937_vm0, %v2124_v6 }
  0xa7   : > { %1170 = vmatprep.mubr.bf16.mxu0 %v2125_v7  ;;  %1948 = vmatprep.mubr.msk.bf16.mxu1 %vm937_vm0, %v2127_v8 }
  0xae   : > { %1171 = vmatmul.mubr.bf16.gmra.mrb[52].mxu0 %v2128_v9  ;;  %1949 = vmatmul.mubr.msk.bf16.gmra.mrb[52].mxu1 %vm937_vm0, %v2129_v10 }
  0xaf   : > { %1178 = vmatprep.mubr.bf16.mxu0 %v2130_v11  ;;  %1952 = vmatprep.mubr.msk.bf16.mxu1 %vm937_vm0, %v2132_v12 }
  0xb6   : > { %1179 = vmatmul.mubr.bf16.gmra.mrb[56].mxu0 %v2133_v13  ;;  %1953 = vmatmul.mubr.msk.bf16.gmra.mrb[56].mxu1 %vm937_vm0, %v2134_v14 }
  0xb7   : > { %1186 = vmatprep.mubr.bf16.mxu0 %v2135_v15  ;;  %1956 = vmatprep.mubr.msk.bf16.mxu1 %vm937_vm0, %v2137_v16 }
  0xbe   : > { %1187 = vmatmul.mubr.bf16.gmra.mrb[60].mxu0 %v2138_v17  ;;  %1957 = vmatmul.mubr.msk.bf16.gmra.mrb[60].mxu1 %vm937_vm0, %v2139_v18 }
  0xbf   : > { %1194 = vmatprep.mubr.bf16.mxu0 %v2140_v19  ;;  %1960 = vmatprep.mubr.msk.bf16.mxu1 %vm937_vm0, %v2142_v20 }
  0xc6   : > { %1195 = vmatmul.mubr.bf16.gmra.mrb[64].mxu0 %v2143_v21  ;;  %1961 = vmatmul.mubr.msk.bf16.gmra.mrb[64].mxu1 %vm937_vm0, %v2144_v22 }
  0xc7   : > { %1202 = vmatprep.mubr.bf16.mxu0 %v2145_v23  ;;  %1964 = vmatprep.mubr.msk.bf16.mxu1 %vm937_vm0, %v2147_v24 }
  0xce   : > { %1203 = vmatmul.mubr.bf16.gmra.mrb[68].mxu0 %v2148_v25  ;;  %1965 = vmatmul.mubr.msk.bf16.gmra.mrb[68].mxu1 %vm937_vm0, %v2149_v26 }
  0xcf   : > { %1210 = vmatprep.mubr.bf16.mxu0 %v2150_v27  ;;  %1968 = vmatprep.mubr.msk.bf16.mxu1 %vm937_vm0, %v2152_v28 }
  0xd6   : > { %1211 = vmatmul.mubr.bf16.gmra.mrb[72].mxu0 %v2153_v29  ;;  %1969 = vmatmul.mubr.msk.bf16.gmra.mrb[72].mxu1 %vm937_vm0, %v2154_v30 }
  0xd7   : > { %1218 = vmatprep.mubr.bf16.mxu0 %v2155_v31  ;;  %1972 = vmatprep.mubr.msk.bf16.mxu1 %vm937_vm0, %v2157_v32 }
  0xde   : > { %1219 = vmatmul.mubr.bf16.gmra.mrb[76].mxu0 %v2158_v33  ;;  %1973 = vmatmul.mubr.msk.bf16.gmra.mrb[76].mxu1 %vm937_vm0, %v2159_v34 }
  0xdf   : > { %1226 = vmatprep.mubr.bf16.mxu0 %v2160_v35  ;;  %1976 = vmatprep.mubr.msk.bf16.mxu1 %vm937_vm0, %v2162_v36 }
  0xe6   : > { %1227 = vmatmul.mubr.bf16.gmra.mrb[80].mxu0 %v2163_v37  ;;  %1977 = vmatmul.mubr.msk.bf16.gmra.mrb[80].mxu1 %vm937_vm0, %v2164_v38 }
  0xe7   : > { %1234 = vmatprep.mubr.bf16.mxu0 %v2165_v39  ;;  %1980 = vmatprep.mubr.msk.bf16.mxu1 %vm937_vm0, %v2167_v40 }
  0xee   : > { %1235 = vmatmul.mubr.bf16.gmra.mrb[84].mxu0 %v2168_v41  ;;  %1981 = vmatmul.mubr.msk.bf16.gmra.mrb[84].mxu1 %vm937_vm0, %v2169_v42 }
  0xef   : > { %1242 = vmatprep.mubr.bf16.mxu0 %v2170_v43  ;;  %1984 = vmatprep.mubr.msk.bf16.mxu1 %vm937_vm0, %v2172_v44 }
  0xf6   : > { %1243 = vmatmul.mubr.bf16.gmra.mrb[88].mxu0 %v2173_v45  ;;  %1985 = vmatmul.mubr.msk.bf16.gmra.mrb[88].mxu1 %vm937_vm0, %v2174_v46 }
  0xf7   : > { %1250 = vmatprep.mubr.bf16.mxu0 %v2175_v47  ;;  %1988 = vmatprep.mubr.msk.bf16.mxu1 %vm937_vm0, %v2177_v48 }
  0xfe   : > { %1251 = vmatmul.mubr.bf16.gmra.mrb[92].mxu0 %v2178_v49  ;;  %1989 = vmatmul.mubr.msk.bf16.gmra.mrb[92].mxu1 %vm937_vm0, %v2179_v50 }
 0x119   : > { %v2439_v51 = vpop.f32.mrb[0].mxu0  ;;  %v2441_v52 = vpop.f32.mrb[0].mxu1 }
 0x11a   : > { %v1070_v53 = vpop.f32.mrb[1].mxu0  ;;  %v1262_v54 = vpop.f32.mrb[1].mxu1 }
 0x11b   : > { %v2443_v55 = vpop.f32.mrb[2].mxu0  ;;  %v2445_v56 = vpop.f32.mrb[2].mxu1  ;;  %v2502_v53 = vld [vmem:[%s2761_s2] ss:$0 sm:$0xff] }
 0x11c   : > { %v1073_v57 = vpop.f32.mrb[3].mxu0  ;;  %v1265_v58 = vpop.f32.mrb[3].mxu1 }
 0x11d   : > { %v1069_v57 = vadd.f32 %v2502_v53, %v2439_v51  ;;  %v1072_v51 = vadd.f32 %v2502_v53, %v2443_v55 }
 0x121   : > { %v1076_v59 = vpop.f32.mrb[4].mxu0  ;;  %v2447_v60 = vpop.f32.mrb[4].mxu1 }
 0x122   : > { %v1078_v61 = vpop.f32.mrb[5].mxu0  ;;  %v1270_v62 = vpop.f32.mrb[5].mxu1  ;;  %v1077_v54 = vadd.f32 %v2502_v53, %v1076_v59 }
 0x123   : > { %v1079_v63 = vpop.f32.mrb[6].mxu0  ;;  %v2449_v0 = vpop.f32.mrb[6].mxu1 }
 0x124   : > { %v1081_v1 = vpop.f32.mrb[7].mxu0  ;;  %v1273_v2 = vpop.f32.mrb[7].mxu1  ;;  %v1080_v62 = vadd.f32 %v2502_v53, %v1079_v63 }
 0x129   : > { %v2451_v3 = vpop.f32.mrb[8].mxu0  ;;  %v2453_v4 = vpop.f32.mrb[8].mxu1 }
 0x12a   : > { %v1086_v5 = vpop.f32.mrb[9].mxu0  ;;  %v1278_v6 = vpop.f32.mrb[9].mxu1  ;;  %v1085_v63 = vadd.f32 %v2502_v53, %v2451_v3 }
 0x12b   : > { %v2455_v7 = vpop.f32.mrb[10].mxu0  ;;  %v2457_v8 = vpop.f32.mrb[10].mxu1 }
 0x12c   : > { %v1089_v9 = vpop.f32.mrb[11].mxu0  ;;  %v1281_v10 = vpop.f32.mrb[11].mxu1 }
 0x131   : > { %v2459_v11 = vpop.f32.mrb[12].mxu0  ;;  %v2461_v12 = vpop.f32.mrb[12].mxu1 }
 0x132   : > { %v1094_v13 = vpop.f32.mrb[13].mxu0  ;;  %v1286_v14 = vpop.f32.mrb[13].mxu1  ;;  %v1093_v55 = vadd.f32 %v2502_v53, %v2459_v11 }
 0x133   : > { %v2463_v15 = vpop.f32.mrb[14].mxu0  ;;  %v2465_v16 = vpop.f32.mrb[14].mxu1 }
 0x134   : > { %v1097_v17 = vpop.f32.mrb[15].mxu0  ;;  %v1289_v18 = vpop.f32.mrb[15].mxu1 }
 0x139   : > { %v2467_v19 = vpop.f32.mrb[16].mxu0  ;;  %v2469_v20 = vpop.f32.mrb[16].mxu1 }
 0x13a   : > { %v1102_v21 = vpop.f32.mrb[17].mxu0  ;;  %v1294_v22 = vpop.f32.mrb[17].mxu1 }
 0x13b   : > { %v2471_v23 = vpop.f32.mrb[18].mxu0  ;;  %v2473_v24 = vpop.f32.mrb[18].mxu1  ;;  %v1096_v22 = vadd.f32 %v2502_v53, %v2463_v15 }
 0x13c   : > { %v1105_v25 = vpop.f32.mrb[19].mxu0  ;;  %v1297_v26 = vpop.f32.mrb[19].mxu1 }
 0x141   : > { %v2475_v27 = vpop.f32.mrb[20].mxu0  ;;  %v2477_v28 = vpop.f32.mrb[20].mxu1 }
 0x142   : > { %v1110_v29 = vpop.f32.mrb[21].mxu0  ;;  %v1302_v30 = vpop.f32.mrb[21].mxu1  ;;  %v1109_v15 = vadd.f32 %v2502_v53, %v2475_v27 }
 0x143   : > { %v2479_v31 = vpop.f32.mrb[22].mxu0  ;;  %v2481_v32 = vpop.f32.mrb[22].mxu1  ;;  %v1088_v30 = vadd.f32 %v2502_v53, %v2455_v7  ;;  %v1101_v7 = vadd.f32 %v2502_v53, %v2467_v19 }
 0x144   : > { %v1113_v33 = vpop.f32.mrb[23].mxu0  ;;  %v1305_v34 = vpop.f32.mrb[23].mxu1 }
 0x149   : > { %v2483_v35 = vpop.f32.mrb[24].mxu0  ;;  %v2485_v36 = vpop.f32.mrb[24].mxu1 }
 0x14a   : > { %v1118_v37 = vpop.f32.mrb[25].mxu0  ;;  %v1310_v38 = vpop.f32.mrb[25].mxu1 }
 0x14b   : > { %v2487_v39 = vpop.f32.mrb[26].mxu0  ;;  %v2489_v40 = vpop.f32.mrb[26].mxu1 }
 0x14c   : > { %v1121_v41 = vpop.f32.mrb[27].mxu0  ;;  %v1313_v42 = vpop.f32.mrb[27].mxu1 }
 0x151   : > { %v2491_v43 = vpop.f32.mrb[28].mxu0  ;;  %v2493_v44 = vpop.f32.mrb[28].mxu1 }
 0x152   : > { %v1126_v45 = vpop.f32.mrb[29].mxu0  ;;  %v1318_v46 = vpop.f32.mrb[29].mxu1 }
 0x153   : > { %v2495_v47 = vpop.f32.mrb[30].mxu0  ;;  %v2497_v48 = vpop.f32.mrb[30].mxu1  ;;  %v1112_v46 = vadd.f32 %v2502_v53, %v2479_v31  ;;  %v1125_v31 = vadd.f32 %v2502_v53, %v2491_v43 }
 0x154   : > { %v1129_v49 = vpop.f32.mrb[31].mxu0  ;;  %v1321_v50 = vpop.f32.mrb[31].mxu1 }
 0x159   : > { %v2508_v58 = vpop.f32.mrb[32].mxu0  ;;  %v1930_v61 = vpop.f32.mrb[32].mxu1 }
 0x15a   : > { %v1366_v1 = vadd.f32 %v1930_v61, %v1077_v54  ;;  %v1134_v2 = vpop.f32.mrb[33].mxu0  ;;  %v1357_v59 = vpop.f32.mrb[33].mxu1 }
 0x15b   : > { %v1358_v5 = vadd.f32 %v1357_v59, %v1069_v57  ;;  %v2518_v6 = vpop.f32.mrb[34].mxu0  ;;  %v1931_v9 = vpop.f32.mrb[34].mxu1  ;;  %v1104_v57 = vadd.f32 %v2502_v53, %v2471_v23  ;;  %v1117_v23 = vadd.f32 %v2502_v53, %v2483_v35 }
 0x15c   : > { %1614 = vst.msk [vmem:[%s2513_s8 + $0x10] sm:$0xff] %vm937_vm0, %v1366_v1  ;;  %v1369_v10 = vadd.f32 %v1931_v9, %v1080_v62  ;;  %v1137_v13 = vpop.f32.mrb[35].mxu0  ;;  %v1360_v14 = vpop.f32.mrb[35].mxu1  ;;  %v1128_v9 = vadd.f32 %v2502_v53, %v2495_v47 }
 0x15d   : > { %1612 = vst.msk [vmem:[%s2513_s8] sm:$0xff] %vm937_vm0, %v1358_v5  ;;  %v1361_v17 = vadd.f32 %v1360_v14, %v1072_v51 }
 0x15e   : > { %1615 = vst.msk [vmem:[%s2513_s8 + $0x18] sm:$0xff] %vm937_vm0, %v1369_v10 }
 0x15f   : > { %1613 = vst.msk [vmem:[%s2513_s8 + $0x8] sm:$0xff] %vm937_vm0, %v1361_v17  ;;  %v1120_v17 = vadd.f32 %v2502_v53, %v2487_v39  ;;  %v1133_v39 = vadd.f32 %v2502_v53, %v2508_v58 }
 0x161   : > { %v1140_v18 = vpop.f32.mrb[36].mxu0  ;;  %v1934_v21 = vpop.f32.mrb[36].mxu1 }
 0x162   : > { %v1382_v25 = vadd.f32 %v1934_v21, %v1093_v55  ;;  %v1142_v26 = vpop.f32.mrb[37].mxu0  ;;  %v1373_v29 = vpop.f32.mrb[37].mxu1  ;;  %v1141_v47 = vadd.f32 %v2502_v53, %v1140_v18 }
 0x163   : > { %v1374_v33 = vadd.f32 %v1373_v29, %v1085_v63  ;;  %v1143_v34 = vpop.f32.mrb[38].mxu0  ;;  %v1935_v11 = vpop.f32.mrb[38].mxu1 }
 0x164   : > { %1618 = vst.msk [vmem:[%s2513_s8 + $0x30] sm:$0xff] %vm937_vm0, %v1382_v25  ;;  %v1385_v37 = vadd.f32 %v1935_v11, %v1096_v22  ;;  %v1145_v3 = vpop.f32.mrb[39].mxu0  ;;  %v1376_v38 = vpop.f32.mrb[39].mxu1 }
 0x165   : > { %1616 = vst.msk [vmem:[%s2513_s8 + $0x20] sm:$0xff] %vm937_vm0, %v1374_v33  ;;  %v1377_v41 = vadd.f32 %v1376_v38, %v1088_v30  ;;  %v1144_v30 = vadd.f32 %v2502_v53, %v1143_v34  ;;  %v1136_v3 = vadd.f32 %v2502_v53, %v2518_v6 }
 0x166   : > { %1619 = vst.msk [vmem:[%s2513_s8 + $0x38] sm:$0xff] %vm937_vm0, %v1385_v37 }
 0x167   : > { %1617 = vst.msk [vmem:[%s2513_s8 + $0x28] sm:$0xff] %vm937_vm0, %v1377_v41 }
 0x169   : > { %v1148_v42 = vpop.f32.mrb[40].mxu0  ;;  %v1938_v45 = vpop.f32.mrb[40].mxu1 }
 0x16a   : > { %v1398_v49 = vadd.f32 %v1938_v45, %v1109_v15  ;;  %v1150_v50 = vpop.f32.mrb[41].mxu0  ;;  %v1389_v54 = vpop.f32.mrb[41].mxu1  ;;  %v1149_v6 = vadd.f32 %v2502_v53, %v1148_v42 }
 0x16b   : > { %v1390_v61 = vadd.f32 %v1389_v54, %v1101_v7  ;;  %v1151_v62 = vpop.f32.mrb[42].mxu0  ;;  %v1939_v27 = vpop.f32.mrb[42].mxu1 }
 0x16c   : > { %1622 = vst.msk [vmem:[%s2513_s8 + $0x50] sm:$0xff] %vm937_vm0, %v1398_v49  ;;  %v1401_v1 = vadd.f32 %v1939_v27, %v1112_v46  ;;  %v1153_v19 = vpop.f32.mrb[43].mxu0  ;;  %v1392_v2 = vpop.f32.mrb[43].mxu1  ;;  %v1152_v27 = vadd.f32 %v2502_v53, %v1151_v62 }
 0x16d   : > { %1620 = vst.msk [vmem:[%s2513_s8 + $0x40] sm:$0xff] %vm937_vm0, %v1390_v61  ;;  %v1393_v59 = vadd.f32 %v1392_v2, %v1104_v57 }
 0x16e   : > { %1623 = vst.msk [vmem:[%s2513_s8 + $0x58] sm:$0xff] %vm937_vm0, %v1401_v1 }
 0x16f   : > { %1621 = vst.msk [vmem:[%s2513_s8 + $0x48] sm:$0xff] %vm937_vm0, %v1393_v59 }
 0x171   : > { %v1156_v51 = vpop.f32.mrb[44].mxu0  ;;  %v1942_v5 = vpop.f32.mrb[44].mxu1 }
 0x172   : > { %v1414_v10 = vadd.f32 %v1942_v5, %v1125_v31  ;;  %v1158_v13 = vpop.f32.mrb[45].mxu0  ;;  %v1405_v14 = vpop.f32.mrb[45].mxu1  ;;  %v1157_v34 = vadd.f32 %v2502_v53, %v1156_v51 }
 0x173   : > { %v1406_v55 = vadd.f32 %v1405_v14, %v1117_v23  ;;  %v1159_v63 = vpop.f32.mrb[46].mxu0  ;;  %v1943_v43 = vpop.f32.mrb[46].mxu1 }
 0x174   : > { %1626 = vst.msk [vmem:[%s2513_s8 + $0x70] sm:$0xff] %vm937_vm0, %v1414_v10  ;;  %v1417_v21 = vadd.f32 %v1943_v43, %v1128_v9  ;;  %v1161_v35 = vpop.f32.mrb[47].mxu0  ;;  %v1408_v22 = vpop.f32.mrb[47].mxu1  ;;  %v1160_v50 = vadd.f32 %v2502_v53, %v1159_v63 }
 0x175   : > { %1624 = vst.msk [vmem:[%s2513_s8 + $0x60] sm:$0xff] %vm937_vm0, %v1406_v55  ;;  %v1409_v25 = vadd.f32 %v1408_v22, %v1120_v17 }
 0x176   : > { %1627 = vst.msk [vmem:[%s2513_s8 + $0x78] sm:$0xff] %vm937_vm0, %v1417_v21 }
 0x177   : > { %1625 = vst.msk [vmem:[%s2513_s8 + $0x68] sm:$0xff] %vm937_vm0, %v1409_v25 }
 0x179   : > { %v1164_v26 = vpop.f32.mrb[48].mxu0  ;;  %v1946_v29 = vpop.f32.mrb[48].mxu1 }
 0x17a   : > { %v1430_v33 = vadd.f32 %v1946_v29, %v1141_v47  ;;  %v1166_v11 = vpop.f32.mrb[49].mxu0  ;;  %v1421_v37 = vpop.f32.mrb[49].mxu1  ;;  %v1165_v62 = vadd.f32 %v2502_v53, %v1164_v26 }
 0x17b   : > { %v1422_v38 = vadd.f32 %v1421_v37, %v1133_v39  ;;  %v1167_v41 = vpop.f32.mrb[50].mxu0  ;;  %v1947_v15 = vpop.f32.mrb[50].mxu1 }
 0x17c   : > { %1630 = vst.msk [vmem:[%s2513_s8 + $0x90] sm:$0xff] %vm937_vm0, %v1430_v33  ;;  %v1433_v18 = vadd.f32 %v1947_v15, %v1144_v30  ;;  %v1169_v7 = vpop.f32.mrb[51].mxu0  ;;  %v1424_v58 = vpop.f32.mrb[51].mxu1  ;;  %v1168_v55 = vadd.f32 %v2502_v53, %v1167_v41 }
 0x17d   : > { %1628 = vst.msk [vmem:[%s2513_s8 + $0x80] sm:$0xff] %vm937_vm0, %v1422_v38  ;;  %v1425_v45 = vadd.f32 %v1424_v58, %v1136_v3 }
 0x17e   : > { %1631 = vst.msk [vmem:[%s2513_s8 + $0x98] sm:$0xff] %vm937_vm0, %v1433_v18 }
 0x17f   : > { %1629 = vst.msk [vmem:[%s2513_s8 + $0x88] sm:$0xff] %vm937_vm0, %v1425_v45 }
 0x181   : > { %v1172_v46 = vpop.f32.mrb[52].mxu0  ;;  %v1950_v49 = vpop.f32.mrb[52].mxu1 }
 0x182   : > { %v1446_v54 = vadd.f32 %v1950_v49, %v1157_v34  ;;  %v1174_v57 = vpop.f32.mrb[53].mxu0  ;;  %v1437_v61 = vpop.f32.mrb[53].mxu1  ;;  %v1173_v51 = vadd.f32 %v2502_v53, %v1172_v46 }
 0x183   : > { %v1438_v1 = vadd.f32 %v1437_v61, %v1149_v6  ;;  %v1175_v19 = vpop.f32.mrb[54].mxu0  ;;  %v1951_v2 = vpop.f32.mrb[54].mxu1 }
 0x184   : > { %1634 = vst.msk [vmem:[%s2513_s8 + $0xb0] sm:$0xff] %vm937_vm0, %v1446_v54  ;;  %v1449_v59 = vadd.f32 %v1951_v2, %v1160_v50  ;;  %v1177_v31 = vpop.f32.mrb[55].mxu0  ;;  %v1440_v23 = vpop.f32.mrb[55].mxu1  ;;  %v1176_v10 = vadd.f32 %v2502_v53, %v1175_v19 }
 0x185   : > { %1632 = vst.msk [vmem:[%s2513_s8 + $0xa0] sm:$0xff] %vm937_vm0, %v1438_v1  ;;  %v1441_v42 = vadd.f32 %v1440_v23, %v1152_v27 }
 0x186   : > { %1635 = vst.msk [vmem:[%s2513_s8 + $0xb8] sm:$0xff] %vm937_vm0, %v1449_v59 }
 0x187   : > { %1633 = vst.msk [vmem:[%s2513_s8 + $0xa8] sm:$0xff] %vm937_vm0, %v1441_v42 }
 0x189   : > { %v1180_v5 = vpop.f32.mrb[56].mxu0  ;;  %v1954_v9 = vpop.f32.mrb[56].mxu1 }
 0x18a   : > { %v1462_v13 = vadd.f32 %v1954_v9, %v1173_v51  ;;  %v1182_v14 = vpop.f32.mrb[57].mxu0  ;;  %v1453_v17 = vpop.f32.mrb[57].mxu1  ;;  %v1181_v39 = vadd.f32 %v2502_v53, %v1180_v5 }
 0x18b   : > { %v1454_v63 = vadd.f32 %v1453_v17, %v1165_v62  ;;  %v1183_v43 = vpop.f32.mrb[58].mxu0  ;;  %v1955_v21 = vpop.f32.mrb[58].mxu1 }
 0x18c   : > { %1638 = vst.msk [vmem:[%s2513_s8 + $0xd0] sm:$0xff] %vm937_vm0, %v1462_v13  ;;  %v1465_v35 = vadd.f32 %v1955_v21, %v1176_v10  ;;  %v1185_v22 = vpop.f32.mrb[59].mxu0  ;;  %v1456_v25 = vpop.f32.mrb[59].mxu1  ;;  %v1184_v37 = vadd.f32 %v2502_v53, %v1183_v43 }
 0x18d   : > { %1636 = vst.msk [vmem:[%s2513_s8 + $0xc0] sm:$0xff] %vm937_vm0, %v1454_v63  ;;  %v1457_v47 = vadd.f32 %v1456_v25, %v1168_v55 }
 0x18e   : > { %1639 = vst.msk [vmem:[%s2513_s8 + $0xd8] sm:$0xff] %vm937_vm0, %v1465_v35 }
 0x18f   : > { %1637 = vst.msk [vmem:[%s2513_s8 + $0xc8] sm:$0xff] %vm937_vm0, %v1457_v47 }
 0x191   : > { %v1188_v26 = vpop.f32.mrb[60].mxu0  ;;  %v1958_v29 = vpop.f32.mrb[60].mxu1 }
 0x192   : > { %v1189_v30 = vadd.f32 %v2502_v53, %v1188_v26  ;;  %v1190_v33 = vpop.f32.mrb[61].mxu0  ;;  %v1469_v11 = vpop.f32.mrb[61].mxu1 }
 0x193   : > { %v1470_v3 = vadd.f32 %v1469_v11, %v1181_v39  ;;  %v1191_v38 = vpop.f32.mrb[62].mxu0  ;;  %v1959_v41 = vpop.f32.mrb[62].mxu1 }
 0x194   : > { %v1478_v15 = vadd.f32 %v1958_v29, %v1189_v30  ;;  %v1192_v18 = vadd.f32 %v2502_v53, %v1191_v38  ;;  %v1193_v7 = vpop.f32.mrb[63].mxu0  ;;  %v1472_v58 = vpop.f32.mrb[63].mxu1 }
 0x195   : > { %1640 = vst.msk [vmem:[%s2513_s8 + $0xe0] sm:$0xff] %vm937_vm0, %v1470_v3  ;;  %v1473_v45 = vadd.f32 %v1472_v58, %v1184_v37 }
 0x196   : > { %1642 = vst.msk [vmem:[%s2513_s8 + $0xf0] sm:$0xff] %vm937_vm0, %v1478_v15  ;;  %v1481_v34 = vadd.f32 %v1959_v41, %v1192_v18 }
 0x197   : > { %1641 = vst.msk [vmem:[%s2513_s8 + $0xe8] sm:$0xff] %vm937_vm0, %v1473_v45 }
 0x198   : > { %1643 = vst.msk [vmem:[%s2513_s8 + $0xf8] sm:$0xff] %vm937_vm0, %v1481_v34 }
 0x199   : > { %v1196_v6 = vpop.f32.mrb[64].mxu0  ;;  %v1962_v46 = vpop.f32.mrb[64].mxu1 }
 0x19a   : > { %v1197_v49 = vadd.f32 %v2502_v53, %v1196_v6  ;;  %v1198_v50 = vpop.f32.mrb[65].mxu0  ;;  %v1485_v54 = vpop.f32.mrb[65].mxu1 }
 0x19b   : > { %v1199_v57 = vpop.f32.mrb[66].mxu0  ;;  %v1963_v61 = vpop.f32.mrb[66].mxu1 }
 0x19c   : > { %v1486_v27 = vadd.f32 %v1485_v54, %v1197_v49  ;;  %v1200_v1 = vadd.f32 %v2502_v53, %v1199_v57  ;;  %v1201_v19 = vpop.f32.mrb[67].mxu0  ;;  %v1488_v2 = vpop.f32.mrb[67].mxu1  ;;  %v1261_v49 = vadd.f32 %v2502_v53, %v2441_v52  ;;  %v1272_v57 = vadd.f32 %v2502_v53, %v2449_v0 }
 0x19e   : > { %1644 = vst.msk [vmem:[%s2513_s8 + $0x100] sm:$0xff] %vm937_vm0, %v1486_v27  ;;  %v1489_v59 = vadd.f32 %v1488_v2, %v1200_v1 }
 0x1a0   : > { %1645 = vst.msk [vmem:[%s2513_s8 + $0x108] sm:$0xff] %vm937_vm0, %v1489_v59 }
 0x1a1   : > { %v1204_v31 = vpop.f32.mrb[68].mxu0  ;;  %v1966_v23 = vpop.f32.mrb[68].mxu1 }
 0x1a2   : > { %v1205_v42 = vadd.f32 %v2502_v53, %v1204_v31  ;;  %v1206_v51 = vpop.f32.mrb[69].mxu0  ;;  %v1501_v62 = vpop.f32.mrb[69].mxu1 }
 0x1a3   : > { %v1207_v5 = vpop.f32.mrb[70].mxu0  ;;  %v1967_v9 = vpop.f32.mrb[70].mxu1 }
 0x1a4   : > { %v1494_v10 = vadd.f32 %v1962_v46, %v1205_v42  ;;  %v1208_v13 = vadd.f32 %v2502_v53, %v1207_v5  ;;  %v1209_v14 = vpop.f32.mrb[71].mxu0  ;;  %v1504_v17 = vpop.f32.mrb[71].mxu1  ;;  %v1269_v46 = vadd.f32 %v2502_v53, %v2447_v60  ;;  %v1264_v60 = vadd.f32 %v2502_v53, %v2445_v56 }
 0x1a5   : > { %v1285_v56 = vadd.f32 %v2502_v53, %v2461_v12  ;;  %v1288_v14 = vadd.f32 %v2502_v53, %v2465_v16  ;;  %v1280_v12 = vadd.f32 %v2502_v53, %v2457_v8 }
 0x1a6   : > { %1646 = vst.msk [vmem:[%s2513_s8 + $0x110] sm:$0xff] %vm937_vm0, %v1494_v10  ;;  %v1497_v55 = vadd.f32 %v1963_v61, %v1208_v13 }
 0x1a8   : > { %1647 = vst.msk [vmem:[%s2513_s8 + $0x118] sm:$0xff] %vm937_vm0, %v1497_v55 }
 0x1a9   : > { %v1212_v63 = vpop.f32.mrb[72].mxu0  ;;  %v2638_v43 = vpop.f32.mrb[72].mxu1 }
 0x1aa   : > { %v1213_v21 = vadd.f32 %v2502_v53, %v1212_v63  ;;  %v1214_v35 = vpop.f32.mrb[73].mxu0  ;;  %v1517_v22 = vpop.f32.mrb[73].mxu1 }
 0x1ab   : > { %v1215_v25 = vpop.f32.mrb[74].mxu0  ;;  %v2641_v47 = vpop.f32.mrb[74].mxu1 }
 0x1ac   : > { %v1502_v39 = vadd.f32 %v1501_v62, %v1213_v21  ;;  %v1216_v26 = vadd.f32 %v2502_v53, %v1215_v25  ;;  %v1217_v29 = vpop.f32.mrb[75].mxu0  ;;  %v1520_v30 = vpop.f32.mrb[75].mxu1 }
 0x1ae   : > { %1648 = vst.msk [vmem:[%s2513_s8 + $0x120] sm:$0xff] %vm937_vm0, %v1502_v39  ;;  %v1505_v33 = vadd.f32 %v1504_v17, %v1216_v26 }
 0x1b0   : > { %1649 = vst.msk [vmem:[%s2513_s8 + $0x128] sm:$0xff] %vm937_vm0, %v1505_v33  ;;  %v1293_v33 = vadd.f32 %v2502_v53, %v2469_v20 }
 0x1b1   : > { %v1220_v11 = vpop.f32.mrb[76].mxu0  ;;  %v2648_v37 = vpop.f32.mrb[76].mxu1 }
 0x1b2   : > { %v1221_v3 = vadd.f32 %v2502_v53, %v1220_v11  ;;  %v1222_v38 = vpop.f32.mrb[77].mxu0  ;;  %v2651_v41 = vpop.f32.mrb[77].mxu1 }
 0x1b3   : > { %v1223_v15 = vpop.f32.mrb[78].mxu0  ;;  %v2653_v18 = vpop.f32.mrb[78].mxu1  ;;  %v1304_v38 = vadd.f32 %v2502_v53, %v2481_v32 }
 0x1b4   : > { %v1510_v7 = vadd.f32 %v1966_v23, %v1221_v3  ;;  %v1224_v58 = vadd.f32 %v2502_v53, %v1223_v15  ;;  %v1225_v45 = vpop.f32.mrb[79].mxu0  ;;  %v2656_v34 = vpop.f32.mrb[79].mxu1 }
 0x1b6   : > { %1650 = vst.msk [vmem:[%s2513_s8 + $0x130] sm:$0xff] %vm937_vm0, %v1510_v7  ;;  %v1513_v6 = vadd.f32 %v1967_v9, %v1224_v58  ;;  %v1277_v9 = vadd.f32 %v2502_v53, %v2453_v4 }
 0x1b8   : > { %1651 = vst.msk [vmem:[%s2513_s8 + $0x138] sm:$0xff] %vm937_vm0, %v1513_v6 }
 0x1b9   : > { %v1228_v50 = vpop.f32.mrb[80].mxu0  ;;  %v1978_v54 = vpop.f32.mrb[80].mxu1 }
 0x1ba   : > { %v1229_v61 = vadd.f32 %v2502_v53, %v1228_v50  ;;  %v1558_v27 = vadd.f32 %v1978_v54, %v1269_v46  ;;  %v1230_v1 = vpop.f32.mrb[81].mxu0  ;;  %v1549_v19 = vpop.f32.mrb[81].mxu1 }
 0x1bb   : > { %v1550_v2 = vadd.f32 %v1549_v19, %v1261_v49  ;;  %v1231_v52 = vpop.f32.mrb[82].mxu0  ;;  %v1979_v59 = vpop.f32.mrb[82].mxu1  ;;  %v1320_v19 = vadd.f32 %v2502_v53, %v2497_v48 }
 0x1bc   : > { %v1518_v31 = vadd.f32 %v1517_v22, %v1229_v61  ;;  %1662 = vst.msk [vmem:[%s2513_s8 + $0x190] sm:$0xff] %vm937_vm0, %v1558_v27  ;;  %v1232_v0 = vadd.f32 %v2502_v53, %v1231_v52  ;;  %v1561_v23 = vadd.f32 %v1979_v59, %v1272_v57  ;;  %v1233_v42 = vpop.f32.mrb[83].mxu0  ;;  %v1552_v51 = vpop.f32.mrb[83].mxu1  ;;  %v1309_v61 = vadd.f32 %v2502_v53, %v2485_v36 }
 0x1bd   : > { %1660 = vst.msk [vmem:[%s2513_s8 + $0x180] sm:$0xff] %vm937_vm0, %v1550_v2  ;;  %v1553_v62 = vadd.f32 %v1552_v51, %v1264_v60 }
 0x1be   : > { %1652 = vst.msk [vmem:[%s2513_s8 + $0x140] sm:$0xff] %vm937_vm0, %v1518_v31  ;;  %v1521_v5 = vadd.f32 %v1520_v30, %v1232_v0  ;;  %1663 = vst.msk [vmem:[%s2513_s8 + $0x198] sm:$0xff] %vm937_vm0, %v1561_v23 }
 0x1bf   : > { %1661 = vst.msk [vmem:[%s2513_s8 + $0x188] sm:$0xff] %vm937_vm0, %v1553_v62 }
 0x1c0   : > { %1653 = vst.msk [vmem:[%s2513_s8 + $0x148] sm:$0xff] %vm937_vm0, %v1521_v5 }
 0x1c1   : > { %v1236_v10 = vpop.f32.mrb[84].mxu0  ;;  %v1982_v13 = vpop.f32.mrb[84].mxu1 }
 0x1c2   : > { %v1237_v17 = vadd.f32 %v2502_v53, %v1236_v10  ;;  %v1574_v55 = vadd.f32 %v1982_v13, %v1285_v56  ;;  %v1238_v63 = vpop.f32.mrb[85].mxu0  ;;  %v1565_v21 = vpop.f32.mrb[85].mxu1 }
 0x1c3   : > { %v1566_v35 = vadd.f32 %v1565_v21, %v1277_v9  ;;  %v1239_v4 = vpop.f32.mrb[86].mxu0  ;;  %v1983_v22 = vpop.f32.mrb[86].mxu1 }
 0x1c4   : > { %v1526_v25 = vadd.f32 %v2638_v43, %v1237_v17  ;;  %1666 = vst.msk [vmem:[%s2513_s8 + $0x1b0] sm:$0xff] %vm937_vm0, %v1574_v55  ;;  %v1240_v16 = vadd.f32 %v2502_v53, %v1239_v4  ;;  %v1577_v39 = vadd.f32 %v1983_v22, %v1288_v14  ;;  %v1241_v26 = vpop.f32.mrb[87].mxu0  ;;  %v1568_v29 = vpop.f32.mrb[87].mxu1  ;;  %v1301_v43 = vadd.f32 %v2502_v53, %v2477_v28 }
 0x1c5   : > { %1664 = vst.msk [vmem:[%s2513_s8 + $0x1a0] sm:$0xff] %vm937_vm0, %v1566_v35  ;;  %v1569_v30 = vadd.f32 %v1568_v29, %v1280_v12  ;;  %v1296_v28 = vadd.f32 %v2502_v53, %v2473_v24 }
 0x1c6   : > { %1654 = vst.msk [vmem:[%s2513_s8 + $0x150] sm:$0xff] %vm937_vm0, %v1526_v25  ;;  %v1529_v8 = vadd.f32 %v2641_v47, %v1240_v16  ;;  %1667 = vst.msk [vmem:[%s2513_s8 + $0x1b8] sm:$0xff] %vm937_vm0, %v1577_v39 }
 0x1c7   : > { %1665 = vst.msk [vmem:[%s2513_s8 + $0x1a8] sm:$0xff] %vm937_vm0, %v1569_v30 }
 0x1c8   : > { %1655 = vst.msk [vmem:[%s2513_s8 + $0x158] sm:$0xff] %vm937_vm0, %v1529_v8 }
 0x1c9   : > { %v1244_v11 = vpop.f32.mrb[88].mxu0  ;;  %v1986_v3 = vpop.f32.mrb[88].mxu1 }
 0x1ca   : > { %v1245_v47 = vadd.f32 %v2502_v53, %v1244_v11  ;;  %v1590_v15 = vadd.f32 %v1986_v3, %v1301_v43  ;;  %v1246_v7 = vpop.f32.mrb[89].mxu0  ;;  %v1581_v58 = vpop.f32.mrb[89].mxu1 }
 0x1cb   : > { %v1582_v45 = vadd.f32 %v1581_v58, %v1293_v33  ;;  %v1247_v20 = vpop.f32.mrb[90].mxu0  ;;  %v1987_v6 = vpop.f32.mrb[90].mxu1 }
 0x1cc   : > { %v1534_v46 = vadd.f32 %v2651_v41, %v1245_v47  ;;  %1670 = vst.msk [vmem:[%s2513_s8 + $0x1d0] sm:$0xff] %vm937_vm0, %v1590_v15  ;;  %v1248_v32 = vadd.f32 %v2502_v53, %v1247_v20  ;;  %v1593_v49 = vadd.f32 %v1987_v6, %v1304_v38  ;;  %v1249_v50 = vpop.f32.mrb[91].mxu0  ;;  %v1584_v54 = vpop.f32.mrb[91].mxu1  ;;  %v1317_v41 = vadd.f32 %v2502_v53, %v2493_v44 }
 0x1cd   : > { %1668 = vst.msk [vmem:[%s2513_s8 + $0x1c0] sm:$0xff] %vm937_vm0, %v1582_v45  ;;  %v1585_v57 = vadd.f32 %v1584_v54, %v1296_v28  ;;  %v1312_v44 = vadd.f32 %v2502_v53, %v2489_v40 }
 0x1ce   : > { %1656 = vst.msk [vmem:[%s2513_s8 + $0x160] sm:$0xff] %vm937_vm0, %v1534_v46  ;;  %v1537_v24 = vadd.f32 %v2656_v34, %v1248_v32  ;;  %1671 = vst.msk [vmem:[%s2513_s8 + $0x1d8] sm:$0xff] %vm937_vm0, %v1593_v49 }
 0x1cf   : > { %1669 = vst.msk [vmem:[%s2513_s8 + $0x1c8] sm:$0xff] %vm937_vm0, %v1585_v57 }
 0x1d0   : > { %1657 = vst.msk [vmem:[%s2513_s8 + $0x168] sm:$0xff] %vm937_vm0, %v1537_v24 }
 0x1d1   : > { %v1252_v27 = vpop.f32.mrb[92].mxu0  ;;  %v1990_v1 = vpop.f32.mrb[92].mxu1 }
 0x1d2   : > { %v1253_v34 = vadd.f32 %v2502_v53, %v1252_v27  ;;  %v1606_v60 = vadd.f32 %v1990_v1, %v1317_v41  ;;  %v1254_v2 = vpop.f32.mrb[93].mxu0  ;;  %v1597_v52 = vpop.f32.mrb[93].mxu1 }
 0x1d3   : > { %v1598_v59 = vadd.f32 %v1597_v52, %v1309_v61  ;;  %v1255_v36 = vpop.f32.mrb[94].mxu0  ;;  %v1991_v31 = vpop.f32.mrb[94].mxu1 }
 0x1d4   : > { %v1542_v0 = vadd.f32 %v2648_v37, %v1253_v34  ;;  %1674 = vst.msk [vmem:[%s2513_s8 + $0x1f0] sm:$0xff] %vm937_vm0, %v1606_v60  ;;  %v1256_v48 = vadd.f32 %v2502_v53, %v1255_v36  ;;  %v1609_v23 = vadd.f32 %v1991_v31, %v1320_v19  ;;  %v1257_v42 = vpop.f32.mrb[95].mxu0  ;;  %v1600_v51 = vpop.f32.mrb[95].mxu1 }
 0x1d5   : > { %1672 = vst.msk [vmem:[%s2513_s8 + $0x1e0] sm:$0xff] %vm937_vm0, %v1598_v59  ;;  %v1601_v62 = vadd.f32 %v1600_v51, %v1312_v44 }
 0x1d6   : > { %1658 = vst.msk [vmem:[%s2513_s8 + $0x170] sm:$0xff] %vm937_vm0, %v1542_v0  ;;  %v1545_v40 = vadd.f32 %v2653_v18, %v1256_v48  ;;  %1675 = vst.msk [vmem:[%s2513_s8 + $0x1f8] sm:$0xff] %vm937_vm0, %v1609_v23 }
 0x1d7   : > { %1673 = vst.msk [vmem:[%s2513_s8 + $0x1e8] sm:$0xff] %vm937_vm0, %v1601_v62 }
 0x1d8   : > { %1659 = vst.msk [vmem:[%s2513_s8 + $0x178] sm:$0xff] %vm937_vm0, %v1545_v40 }
 0x1d9 PF: > { %s13_s12 = sadd.s32 1, %s2186_s12  }
 0x1da   : > { %p10_p4 = scmp.ge.s32.totalorder %s13_s12, 6  }
 0x1dc   :  { %12 = sbr.rel (!%p10_p4) target bundleno = 1 (0x1), region = 62 }

// kernel: net_forward.16
= control target key start
LH: loop header
LB: loop body
LE: loop exit
PB: predicated region body
PF: predicated region fallthrough
CT: control target
= control target key end

     0   :  { %s1147_s12 = smov 0   ;;  %s1149_s13 = smov 0   ;;  %s2030_s0 = inlined_call_operand.vmem [shape: f32[2048,32], index: 0, kind: input, shape index: {}]   ;;  %s2031_s1 = inlined_call_operand.vmem [shape: f32[1,32], index: 1, kind: input, shape index: {}]   ;;  %s2032_s2 = inlined_call_operand.vmem [shape: f32[1,32], index: 2, kind: input, shape index: {}]   ;;  %s2033_s3 = inlined_call_operand.vmem [shape: f32[2048,32], index: 3, kind: output, shape index: {}]  }
   0x1   :  { %s1151_s14 = smov 0   ;;  %s1153_s15 = smov 0  }
   0x2   :  { %s1155_s16 = smov 0  }
   0x3 LB: > { %s22_s17 = sadd.s32 1, %s1116_s14  ;;  %s25_s18 = sadd.s32 1, %s1120_s15  ;;  %s1124_s16 = sphi %s1155_s16, %s13_s16   ;;  %s1120_s15 = sphi %s1153_s15, %s2037_s15   ;;  %s1116_s14 = sphi %s1151_s14, %s2036_s14   ;;  %s1112_s13 = sphi %s1149_s13, %s2035_s13   ;;  %s1108_s12 = sphi %s1147_s12, %s2034_s12  }
   0x4   : > { %p23_p0 = scmp.ge.s32.totalorder %s22_s17, 4  ;;  %p1032_p1 = scmp.ge.s32.totalorder %s1124_s16, 1 }
   0x5   : > { %p150_p2 = scmp.lt.s32.totalorder %s1124_s16, 9 }
   0x6   : > { %s2039_s17 = smov (%p23_p0, %s22_s17), 0  ;;  %s2041_s18 = smov (!%p23_p0, %s25_s18), %s1120_s15 }
   0x7   : > { %p151_p3 = pnand %p1032_p1, %p150_p2  ;;  %p27_p4 = scmp.ge.s32.totalorder %s2041_s18, 2 }
   0x8   : > { %s1033_s19 = sshll.u32 (!%p151_p3), %s1108_s12, 6  ;;  %p186_p5 = scmp.eq.s32.totalorder (!%p151_p3), %s1112_s13, 0 }
   0x9   : > { %s2043_s18 = smov (%p27_p4, %s2041_s18), 0  ;;  %154 = sbr.rel (%p151_p3) target bundleno = 279 (0x117), region = 32 }
   0xa   : > { %p175_p6 = scmp.lt.s32.totalorder (!%p151_p3), %s1033_s19, 255  ;;  %p187_p7 = scmp.eq.s32.totalorder (!%p151_p3), %s1108_s12, 0 }
   0xc   : > { %p188_p8 = pnand (!%p151_p3), %p187_p7, %p186_p5 }
  0x10   : > { %s2045_s19 = smov (!%p175_p6, %s1033_s19), 255  ;;  %191 = sbr.rel (%p188_p8) target bundleno = 23 (0x17), region = 36 }
  0x11   : > { %s1034_s20 = sshll.u32 %s2045_s19, 3  ;;  %vm192_vm0 = vcmask (!%p188_p8), 253952   ;;  %v1126_v0 = vmov (!%p188_p8), 0.0  }
  0x12   : > { %s1189_s23 = scalar_lea.vmem %s2030_s0, %s1034_s20  ;;  %s1194_s26 = scalar_lea.vmem %s2033_s3, %s1034_s20  ;;  %193 = vst.msk [vmem:[#allocation2] sm:$0x1] (!%p188_p8), %vm192_vm0, %v1126_v0  ;;  %194 = vst.msk [vmem:[#allocation3] sm:$0x1] (!%p188_p8), %vm192_vm0, %v1126_v0 }
  0x17 PF: > { %p1037_p9 = scmp.ne.s32.totalorder %s1112_s13, 0 }
  0x18   : > { %v198_v1 = vld [vmem:[%s1189_s23] sm:$0xff] (!%p1037_p9)  ;;  %v199_v2 = vld [vmem:[%s1189_s23 + $0x8] sm:$0xff] (!%p1037_p9)  ;;  %v200_v3 = vld [vmem:[%s1189_s23 + $0x10] sm:$0xff] (!%p1037_p9)  ;;  %vm263_vm1 = vcmask (!%p1037_p9), 261120   ;;  %vm398_vm2 = vcmask (!%p1037_p9), 253952  }
  0x19   : > { %197 = sbr.rel (%p1037_p9) target bundleno = 188 (0xbc), region = 40  ;;  %v264_v4 = vsel (!%p1037_p9), %vm263_vm1, %v198_v1, 0.0  ;;  %v265_v5 = vsel (!%p1037_p9), %vm263_vm1, %v199_v2, 0.0  ;;  %v267_v6 = vsel (!%p1037_p9), %vm263_vm1, %v200_v3, 0.0  ;;  %v201_v7 = vld [vmem:[%s1189_s23 + $0x18] sm:$0xff] (!%p1037_p9)  ;;  %v202_v10 = vld [vmem:[%s1189_s23 + $0x20] sm:$0xff] (!%p1037_p9)  ;;  %v401_v55 = vmul.f32 (!%p1037_p9), %v198_v1, %v198_v1 }
  0x1a   : > { %v266_v8 = vadd.f32 (!%p1037_p9), %v265_v5, %v264_v4  ;;  %v269_v9 = vsel (!%p1037_p9), %vm263_vm1, %v201_v7, 0.0  ;;  %v271_v12 = vsel (!%p1037_p9), %vm263_vm1, %v202_v10, 0.0  ;;  %v203_v13 = vld [vmem:[%s1189_s23 + $0x28] sm:$0xff] (!%p1037_p9)  ;;  %v1210_v16 = vld [vmem:[%s1189_s23 + $0x30] sm:$0xff] (!%p1037_p9)  ;;  %v1215_v19 = vld [vmem:[%s1189_s23 + $0x38] sm:$0xff] (!%p1037_p9)  ;;  %v402_v58 = vmul.f32 (!%p1037_p9), %v199_v2, %v199_v2 }
  0x1b   : > { %v273_v15 = vsel (!%p1037_p9), %vm263_vm1, %v203_v13, 0.0  ;;  %v275_v18 = vsel (!%p1037_p9), %vm263_vm1, %v1210_v16, 0.0  ;;  %v277_v21 = vsel (!%p1037_p9), %vm263_vm1, %v1215_v19, 0.0  ;;  %v1220_v22 = vld [vmem:[%s1189_s23 + $0x40] sm:$0xff] (!%p1037_p9)  ;;  %v1225_v25 = vld [vmem:[%s1189_s23 + $0x48] sm:$0xff] (!%p1037_p9)  ;;  %v1230_v28 = vld [vmem:[%s1189_s23 + $0x50] sm:$0xff] (!%p1037_p9)  ;;  %v403_v59 = vmul.f32 (!%p1037_p9), %v200_v3, %v200_v3 }
  0x1c   : > { %v268_v11 = vadd.f32 (!%p1037_p9), %v267_v6, %v266_v8  ;;  %v279_v24 = vsel (!%p1037_p9), %vm263_vm1, %v1220_v22, 0.0  ;;  %v281_v27 = vsel (!%p1037_p9), %vm263_vm1, %v1225_v25, 0.0  ;;  %v283_v30 = vsel (!%p1037_p9), %vm263_vm1, %v1230_v28, 0.0  ;;  %v1235_v31 = vld [vmem:[%s1189_s23 + $0x58] sm:$0xff] (!%p1037_p9)  ;;  %v1240_v34 = vld [vmem:[%s1189_s23 + $0x60] sm:$0xff] (!%p1037_p9)  ;;  %v1245_v37 = vld [vmem:[%s1189_s23 + $0x68] sm:$0xff] (!%p1037_p9) }
  0x1d   : > { %v285_v33 = vsel (!%p1037_p9), %vm263_vm1, %v1235_v31, 0.0  ;;  %v287_v36 = vsel (!%p1037_p9), %vm263_vm1, %v1240_v34, 0.0  ;;  %v289_v39 = vsel (!%p1037_p9), %vm263_vm1, %v1245_v37, 0.0  ;;  %v1250_v40 = vld [vmem:[%s1189_s23 + $0x70] sm:$0xff] (!%p1037_p9)  ;;  %v1255_v43 = vld [vmem:[%s1189_s23 + $0x78] sm:$0xff] (!%p1037_p9)  ;;  %v1260_v46 = vld [vmem:[%s1189_s23 + $0x80] sm:$0xff] (!%p1037_p9)  ;;  %v404_v63 = vmul.f32 (!%p1037_p9), %v201_v7, %v201_v7 }
  0x1e   : > { %v270_v14 = vadd.f32 (!%p1037_p9), %v269_v9, %v268_v11  ;;  %v291_v42 = vsel (!%p1037_p9), %vm263_vm1, %v1250_v40, 0.0  ;;  %v293_v45 = vsel (!%p1037_p9), %vm263_vm1, %v1255_v43, 0.0  ;;  %v295_v48 = vsel (!%p1037_p9), %vm263_vm1, %v1260_v46, 0.0  ;;  %v1265_v49 = vld [vmem:[%s1189_s23 + $0x88] sm:$0xff] (!%p1037_p9)  ;;  %v1270_v52 = vld [vmem:[%s1189_s23 + $0x90] sm:$0xff] (!%p1037_p9)  ;;  %v1275_v56 = vld [vmem:[%s1189_s23 + $0x98] sm:$0xff] (!%p1037_p9) }
  0x1f   : > { %v297_v51 = vsel (!%p1037_p9), %vm263_vm1, %v1265_v49, 0.0  ;;  %v299_v54 = vsel (!%p1037_p9), %vm263_vm1, %v1270_v52, 0.0  ;;  %v301_v60 = vsel (!%p1037_p9), %vm263_vm1, %v1275_v56, 0.0  ;;  %v1280_v61 = vld [vmem:[%s1189_s23 + $0xa0] sm:$0xff] (!%p1037_p9)  ;;  %v465_v4 = vsel (!%p1037_p9), %vm263_vm1, %v401_v55, 0.0  ;;  %v1286_v1 = vld [vmem:[%s1189_s23 + $0xa8] sm:$0xff] (!%p1037_p9) }
  0x20   : > { %v272_v17 = vadd.f32 %v271_v12, %v270_v14  ;;  %v303_v0 = vsel %vm263_vm1, %v1280_v61, 0.0  ;;  %v405_v6 = vmul.f32 %v202_v10, %v202_v10  ;;  %v466_v2 = vsel %vm263_vm1, %v402_v58, 0.0  ;;  %v1293_v7 = vld [vmem:[%s1189_s23 + $0xb0] sm:$0xff] }
  0x21   : > { %v468_v3 = vsel %vm263_vm1, %v403_v59, 0.0  ;;  %v305_v8 = vsel %vm263_vm1, %v1286_v1, 0.0  ;;  %v467_v9 = vadd.f32 %v466_v2, %v465_v4  ;;  %v406_v12 = vmul.f32 %v203_v13, %v203_v13 }
  0x22   : > { %v274_v20 = vadd.f32 %v273_v15, %v272_v17  ;;  %v470_v14 = vsel %vm263_vm1, %v404_v63, 0.0  ;;  %v307_v15 = vsel %vm263_vm1, %v1293_v7, 0.0  ;;  %v1299_v17 = vld [vmem:[%s1189_s23 + $0xb8] sm:$0xff]  ;;  %v413_v63 = vmul.f32 %v1240_v34, %v1240_v34 }
  0x23   : > { %v469_v10 = vadd.f32 %v468_v3, %v467_v9  ;;  %v414_v2 = vmul.f32 %v1245_v37, %v1245_v37  ;;  %v1363_v9 = vld [vmem:[%s1189_s23 + $0xf8] sm:$0xff] }
  0x24   : > { %v276_v23 = vadd.f32 %v275_v18, %v274_v20  ;;  %v407_v20 = vmul.f32 %v1210_v16, %v1210_v16 }
  0x25   : > { %v471_v13 = vadd.f32 %v470_v14, %v469_v10  ;;  %v488_v14 = vsel %vm263_vm1, %v413_v63, 0.0  ;;  %v1371_v10 = vld [vmem:[%s1189_s23 + $0x100] sm:$0xff]  ;;  %v422_v63 = vmul.f32 %v1286_v1, %v1286_v1 }
  0x26   : > { %v278_v26 = vadd.f32 %v277_v21, %v276_v23  ;;  %v472_v21 = vsel %vm263_vm1, %v405_v6, 0.0  ;;  %v309_v23 = vsel %vm263_vm1, %v1299_v17, 0.0 }
  0x27   : > { %v473_v16 = vadd.f32 %v472_v21, %v471_v13  ;;  %v490_v21 = vsel %vm263_vm1, %v414_v2, 0.0  ;;  %v1379_v13 = vld [vmem:[%s1189_s23 + $0x108] sm:$0xff]  ;;  %v423_v2 = vmul.f32 %v1293_v7, %v1293_v7 }
  0x28   : > { %v280_v29 = vadd.f32 %v279_v24, %v278_v26  ;;  %v1307_v24 = vld [vmem:[%s1189_s23 + $0xc0] sm:$0xff] }
  0x2a   : > { %v282_v32 = vadd.f32 %v281_v27, %v280_v29  ;;  %v408_v27 = vmul.f32 %v1215_v19, %v1215_v19  ;;  %v474_v29 = vsel %vm263_vm1, %v406_v12, 0.0  ;;  %v415_v12 = vmul.f32 %v1250_v40, %v1250_v40 }
  0x2b   : > { %v475_v19 = vadd.f32 %v474_v29, %v473_v16  ;;  %v1387_v16 = vld [vmem:[%s1189_s23 + $0x110] sm:$0xff] }
  0x2c   : > { %v284_v35 = vadd.f32 %v283_v30, %v282_v32  ;;  %v311_v30 = vsel %vm263_vm1, %v1307_v24, 0.0  ;;  %v1315_v32 = vld [vmem:[%s1189_s23 + $0xc8] sm:$0xff]  ;;  %v492_v29 = vsel %vm263_vm1, %v415_v12, 0.0  ;;  %v424_v12 = vmul.f32 %v1299_v17, %v1299_v17 }
  0x2e   : > { %v286_v38 = vadd.f32 %v285_v33, %v284_v35  ;;  %v409_v35 = vmul.f32 %v1220_v22, %v1220_v22 }
  0x30   : > { %v288_v41 = vadd.f32 %v287_v36, %v286_v38  ;;  %v476_v36 = vsel %vm263_vm1, %v407_v20, 0.0  ;;  %v313_v38 = vsel %vm263_vm1, %v1315_v32, 0.0  ;;  %v416_v20 = vmul.f32 %v1255_v43, %v1255_v43 }
  0x31   : > { %v477_v22 = vadd.f32 %v476_v36, %v475_v19  ;;  %v1395_v19 = vld [vmem:[%s1189_s23 + $0x118] sm:$0xff] }
  0x32   : > { %v290_v44 = vadd.f32 %v289_v39, %v288_v41  ;;  %v1323_v39 = vld [vmem:[%s1189_s23 + $0xd0] sm:$0xff]  ;;  %v494_v36 = vsel %vm263_vm1, %v416_v20, 0.0  ;;  %v425_v20 = vmul.f32 %v1307_v24, %v1307_v24 }
  0x34   : > { %v292_v47 = vadd.f32 %v291_v42, %v290_v44  ;;  %v410_v42 = vmul.f32 %v1225_v25, %v1225_v25  ;;  %v478_v44 = vsel %vm263_vm1, %v408_v27, 0.0  ;;  %v417_v27 = vmul.f32 %v1260_v46, %v1260_v46 }
  0x35   : > { %v479_v25 = vadd.f32 %v478_v44, %v477_v22  ;;  %v1403_v22 = vld [vmem:[%s1189_s23 + $0x120] sm:$0xff] }
  0x36   : > { %v294_v50 = vadd.f32 %v293_v45, %v292_v47  ;;  %v315_v45 = vsel %vm263_vm1, %v1323_v39, 0.0  ;;  %v1331_v47 = vld [vmem:[%s1189_s23 + $0xd8] sm:$0xff]  ;;  %v482_v58 = vsel %vm263_vm1, %v410_v42, 0.0  ;;  %v419_v42 = vmul.f32 %v1270_v52, %v1270_v52 }
  0x37   : > { %v496_v44 = vsel %vm263_vm1, %v417_v27, 0.0  ;;  %v426_v27 = vmul.f32 %v1315_v32, %v1315_v32 }
  0x38   : > { %v296_v53 = vadd.f32 %v295_v48, %v294_v50  ;;  %v411_v50 = vmul.f32 %v1230_v28, %v1230_v28 }
  0x3a   : > { %v298_v57 = vadd.f32 %v297_v51, %v296_v53  ;;  %v480_v51 = vsel %vm263_vm1, %v409_v35, 0.0  ;;  %v317_v53 = vsel %vm263_vm1, %v1331_v47, 0.0  ;;  %v418_v35 = vmul.f32 %v1265_v49, %v1265_v49 }
  0x3b   : > { %v481_v28 = vadd.f32 %v480_v51, %v479_v25  ;;  %v1411_v25 = vld [vmem:[%s1189_s23 + $0x128] sm:$0xff] }
  0x3c   : > { %v300_v62 = vadd.f32 %v299_v54, %v298_v57  ;;  %v1339_v54 = vld [vmem:[%s1189_s23 + $0xe0] sm:$0xff]  ;;  %v412_v57 = vmul.f32 %v1235_v31, %v1235_v31  ;;  %v498_v51 = vsel %vm263_vm1, %v418_v35, 0.0  ;;  %v427_v35 = vmul.f32 %v1323_v39, %v1323_v39 }
  0x3d   : > { %v319_v59 = vsel %vm263_vm1, %v1339_v54, 0.0  ;;  %v483_v31 = vadd.f32 %v482_v58, %v481_v28  ;;  %v500_v58 = vsel %vm263_vm1, %v419_v42, 0.0  ;;  %v1419_v28 = vld [vmem:[%s1189_s23 + $0x130] sm:$0xff]  ;;  %v428_v42 = vmul.f32 %v1331_v47, %v1331_v47 }
  0x3e   : > { %v302_v5 = vadd.f32 %v301_v60, %v300_v62  ;;  %v1347_v60 = vld [vmem:[%s1189_s23 + $0xe8] sm:$0xff]  ;;  %v486_v3 = vsel %vm263_vm1, %v412_v57, 0.0  ;;  %v421_v57 = vmul.f32 %v1280_v61, %v1280_v61 }
  0x3f   : > { %v321_v4 = vsel %vm263_vm1, %v1347_v60, 0.0 }
  0x40   : > { %v304_v11 = vadd.f32 %v303_v0, %v302_v5  ;;  %v484_v0 = vsel %vm263_vm1, %v411_v50, 0.0  ;;  %v1355_v5 = vld [vmem:[%s1189_s23 + $0xf0] sm:$0xff]  ;;  %v420_v50 = vmul.f32 %v1275_v56, %v1275_v56 }
  0x41   : > { %v485_v34 = vadd.f32 %v484_v0, %v483_v31  ;;  %v1427_v31 = vld [vmem:[%s1189_s23 + $0x138] sm:$0xff] }
  0x42   : > { %v306_v18 = vadd.f32 %v305_v8, %v304_v11  ;;  %v323_v8 = vsel %vm263_vm1, %v1355_v5, 0.0  ;;  %v502_v0 = vsel %vm263_vm1, %v420_v50, 0.0  ;;  %v429_v50 = vmul.f32 %v1339_v54, %v1339_v54 }
  0x43   : > { %v487_v37 = vadd.f32 %v486_v3, %v485_v34  ;;  %v504_v3 = vsel %vm263_vm1, %v421_v57, 0.0  ;;  %v1435_v34 = vld [vmem:[%s1189_s23 + $0x140] sm:$0xff]  ;;  %v430_v57 = vmul.f32 %v1347_v60, %v1347_v60 }
  0x44   : > { %v308_v26 = vadd.f32 %v307_v15, %v306_v18  ;;  %v325_v15 = vsel %vm263_vm1, %v1363_v9, 0.0 }
  0x45   : > { %v489_v40 = vadd.f32 %v488_v14, %v487_v37  ;;  %v506_v14 = vsel %vm263_vm1, %v422_v63, 0.0  ;;  %v1443_v37 = vld [vmem:[%s1189_s23 + $0x148] sm:$0xff]  ;;  %v431_v63 = vmul.f32 %v1355_v5, %v1355_v5 }
  0x46   : > { %v310_v33 = vadd.f32 %v309_v23, %v308_v26  ;;  %v327_v23 = vsel %vm263_vm1, %v1371_v10, 0.0 }
  0x47   : > { %v491_v43 = vadd.f32 %v490_v21, %v489_v40  ;;  %v508_v21 = vsel %vm263_vm1, %v423_v2, 0.0  ;;  %v1451_v40 = vld [vmem:[%s1189_s23 + $0x150] sm:$0xff]  ;;  %v432_v2 = vmul.f32 %v1363_v9, %v1363_v9 }
  0x48   : > { %v312_v41 = vadd.f32 %v311_v30, %v310_v33  ;;  %v329_v30 = vsel %vm263_vm1, %v1379_v13, 0.0 }
  0x49   : > { %v493_v46 = vadd.f32 %v492_v29, %v491_v43  ;;  %v510_v29 = vsel %vm263_vm1, %v424_v12, 0.0  ;;  %v1459_v43 = vld [vmem:[%s1189_s23 + $0x158] sm:$0xff]  ;;  %v433_v12 = vmul.f32 %v1371_v10, %v1371_v10 }
  0x4a   : > { %v314_v48 = vadd.f32 %v313_v38, %v312_v41  ;;  %v331_v38 = vsel %vm263_vm1, %v1387_v16, 0.0 }
  0x4b   : > { %v495_v49 = vadd.f32 %v494_v36, %v493_v46  ;;  %v512_v36 = vsel %vm263_vm1, %v425_v20, 0.0  ;;  %v1467_v46 = vld [vmem:[%s1189_s23 + $0x160] sm:$0xff]  ;;  %v434_v20 = vmul.f32 %v1379_v13, %v1379_v13 }
  0x4c   : > { %v316_v55 = vadd.f32 %v315_v45, %v314_v48  ;;  %v333_v45 = vsel %vm263_vm1, %v1395_v19, 0.0 }
  0x4d   : > { %v497_v52 = vadd.f32 %v496_v44, %v495_v49  ;;  %v514_v44 = vsel %vm263_vm1, %v426_v27, 0.0  ;;  %v1475_v49 = vld [vmem:[%s1189_s23 + $0x168] sm:$0xff]  ;;  %v435_v27 = vmul.f32 %v1387_v16, %v1387_v16 }
  0x4e   : > { %v318_v62 = vadd.f32 %v317_v53, %v316_v55  ;;  %v335_v53 = vsel %vm263_vm1, %v1403_v22, 0.0 }
  0x4f   : > { %v499_v56 = vadd.f32 %v498_v51, %v497_v52  ;;  %v516_v51 = vsel %vm263_vm1, %v427_v35, 0.0  ;;  %v1483_v52 = vld [vmem:[%s1189_s23 + $0x170] sm:$0xff]  ;;  %v436_v35 = vmul.f32 %v1395_v19, %v1395_v19 }
  0x50   : > { %v320_v6 = vadd.f32 %v319_v59, %v318_v62  ;;  %v337_v59 = vsel %vm263_vm1, %v1411_v25, 0.0 }
  0x51   : > { %v501_v61 = vadd.f32 %v500_v58, %v499_v56  ;;  %v518_v58 = vsel %vm263_vm1, %v428_v42, 0.0  ;;  %v1491_v56 = vld [vmem:[%s1189_s23 + $0x178] sm:$0xff]  ;;  %v437_v42 = vmul.f32 %v1403_v22, %v1403_v22 }
  0x52   : > { %v322_v11 = vadd.f32 %v321_v4, %v320_v6  ;;  %v339_v4 = vsel %vm263_vm1, %v1419_v28, 0.0 }
  0x53   : > { %v503_v1 = vadd.f32 %v502_v0, %v501_v61  ;;  %v520_v0 = vsel %vm263_vm1, %v429_v50, 0.0  ;;  %v1499_v61 = vld [vmem:[%s1189_s23 + $0x180] sm:$0xff]  ;;  %v438_v50 = vmul.f32 %v1411_v25, %v1411_v25 }
  0x54   : > { %v324_v18 = vadd.f32 %v323_v8, %v322_v11  ;;  %v341_v8 = vsel %vm263_vm1, %v1427_v31, 0.0 }
  0x55   : > { %v505_v7 = vadd.f32 %v504_v3, %v503_v1  ;;  %v522_v3 = vsel %vm263_vm1, %v430_v57, 0.0  ;;  %v1507_v1 = vld [vmem:[%s1189_s23 + $0x188] sm:$0xff]  ;;  %v439_v57 = vmul.f32 %v1419_v28, %v1419_v28 }
  0x56   : > { %v326_v26 = vadd.f32 %v325_v15, %v324_v18  ;;  %v343_v15 = vsel %vm263_vm1, %v1435_v34, 0.0 }
  0x57   : > { %v507_v17 = vadd.f32 %v506_v14, %v505_v7  ;;  %v524_v14 = vsel %vm263_vm1, %v431_v63, 0.0  ;;  %v1515_v7 = vld [vmem:[%s1189_s23 + $0x190] sm:$0xff]  ;;  %v440_v63 = vmul.f32 %v1427_v31, %v1427_v31 }
  0x58   : > { %v328_v33 = vadd.f32 %v327_v23, %v326_v26  ;;  %v345_v23 = vsel %vm263_vm1, %v1443_v37, 0.0 }
  0x59   : > { %v509_v24 = vadd.f32 %v508_v21, %v507_v17  ;;  %v526_v21 = vsel %vm263_vm1, %v432_v2, 0.0  ;;  %v1523_v17 = vld [vmem:[%s1189_s23 + $0x198] sm:$0xff]  ;;  %v441_v2 = vmul.f32 %v1435_v34, %v1435_v34 }
  0x5a   : > { %v330_v41 = vadd.f32 %v329_v30, %v328_v33  ;;  %v347_v30 = vsel %vm263_vm1, %v1451_v40, 0.0 }
  0x5b   : > { %v511_v32 = vadd.f32 %v510_v29, %v509_v24  ;;  %v528_v29 = vsel %vm263_vm1, %v433_v12, 0.0  ;;  %v1531_v24 = vld [vmem:[%s1189_s23 + $0x1a0] sm:$0xff]  ;;  %v442_v12 = vmul.f32 %v1443_v37, %v1443_v37 }
  0x5c   : > { %v332_v48 = vadd.f32 %v331_v38, %v330_v41  ;;  %v349_v38 = vsel %vm263_vm1, %v1459_v43, 0.0 }
  0x5d   : > { %v513_v39 = vadd.f32 %v512_v36, %v511_v32  ;;  %v530_v36 = vsel %vm263_vm1, %v434_v20, 0.0  ;;  %v1539_v32 = vld [vmem:[%s1189_s23 + $0x1a8] sm:$0xff]  ;;  %v443_v20 = vmul.f32 %v1451_v40, %v1451_v40 }
  0x5e   : > { %v334_v55 = vadd.f32 %v333_v45, %v332_v48  ;;  %v351_v45 = vsel %vm263_vm1, %v1467_v46, 0.0 }
  0x5f   : > { %v515_v47 = vadd.f32 %v514_v44, %v513_v39  ;;  %v532_v44 = vsel %vm263_vm1, %v435_v27, 0.0  ;;  %v1547_v39 = vld [vmem:[%s1189_s23 + $0x1b0] sm:$0xff]  ;;  %v444_v27 = vmul.f32 %v1459_v43, %v1459_v43 }
  0x60   : > { %v336_v62 = vadd.f32 %v335_v53, %v334_v55  ;;  %v353_v53 = vsel %vm263_vm1, %v1475_v49, 0.0  ;;  %v1611_v43 = vld [vmem:[%s1189_s23 + $0x1f0] sm:$0xff] }
  0x61   : > { %v517_v54 = vadd.f32 %v516_v51, %v515_v47  ;;  %v534_v51 = vsel %vm263_vm1, %v436_v35, 0.0  ;;  %v1555_v47 = vld [vmem:[%s1189_s23 + $0x1b8] sm:$0xff]  ;;  %v445_v35 = vmul.f32 %v1467_v46, %v1467_v46 }
  0x62   : > { %v338_v6 = vadd.f32 %v337_v59, %v336_v62  ;;  %v355_v59 = vsel %vm263_vm1, %v1483_v52, 0.0 }
  0x63   : > { %v519_v60 = vadd.f32 %v518_v58, %v517_v54  ;;  %v536_v58 = vsel %vm263_vm1, %v437_v42, 0.0  ;;  %v1563_v54 = vld [vmem:[%s1189_s23 + $0x1c0] sm:$0xff]  ;;  %v446_v42 = vmul.f32 %v1475_v49, %v1475_v49  ;;  %v448_v49 = vmul.f32 %v1491_v56, %v1491_v56 }
  0x64   : > { %v340_v11 = vadd.f32 %v339_v4, %v338_v6  ;;  %v357_v4 = vsel %vm263_vm1, %v1491_v56, 0.0  ;;  %v451_v56 = vmul.f32 %v1515_v7, %v1515_v7 }
  0x65   : > { %v521_v5 = vadd.f32 %v520_v0, %v519_v60  ;;  %v538_v0 = vsel %vm263_vm1, %v438_v50, 0.0  ;;  %v1571_v60 = vld [vmem:[%s1189_s23 + $0x1c8] sm:$0xff]  ;;  %v447_v50 = vmul.f32 %v1483_v52, %v1483_v52 }
  0x66   : > { %v342_v18 = vadd.f32 %v341_v8, %v340_v11  ;;  %v359_v8 = vsel %vm263_vm1, %v1499_v61, 0.0 }
  0x67   : > { %v523_v9 = vadd.f32 %v522_v3, %v521_v5  ;;  %v540_v3 = vsel %vm263_vm1, %v439_v57, 0.0  ;;  %v1579_v5 = vld [vmem:[%s1189_s23 + $0x1d0] sm:$0xff]  ;;  %v554_v57 = vsel %vm263_vm1, %v446_v42, 0.0 }
  0x68   : > { %v344_v26 = vadd.f32 %v343_v15, %v342_v18  ;;  %v361_v15 = vsel %vm263_vm1, %v1507_v1, 0.0 }
  0x69   : > { %v525_v10 = vadd.f32 %v524_v14, %v523_v9  ;;  %v542_v14 = vsel %vm263_vm1, %v440_v63, 0.0  ;;  %v1587_v9 = vld [vmem:[%s1189_s23 + $0x1d8] sm:$0xff] }
  0x6a   : > { %v346_v33 = vadd.f32 %v345_v23, %v344_v26  ;;  %v363_v23 = vsel %vm263_vm1, %v1515_v7, 0.0  ;;  %v454_v7 = vmul.f32 %v1539_v32, %v1539_v32 }
  0x6b   : > { %v527_v13 = vadd.f32 %v526_v21, %v525_v10  ;;  %v544_v21 = vsel %vm263_vm1, %v441_v2, 0.0  ;;  %v1595_v10 = vld [vmem:[%s1189_s23 + $0x1e0] sm:$0xff] }
  0x6c   : > { %v348_v41 = vadd.f32 %v347_v30, %v346_v33  ;;  %v365_v30 = vsel %vm263_vm1, %v1523_v17, 0.0 }
  0x6d   : > { %v529_v16 = vadd.f32 %v528_v29, %v527_v13  ;;  %v546_v29 = vsel %vm263_vm1, %v442_v12, 0.0  ;;  %v1603_v13 = vld [vmem:[%s1189_s23 + $0x1e8] sm:$0xff] }
  0x6e   : > { %v350_v48 = vadd.f32 %v349_v38, %v348_v41  ;;  %v367_v38 = vsel %vm263_vm1, %v1531_v24, 0.0 }
  0x6f   : > { %v531_v19 = vadd.f32 %v530_v36, %v529_v16  ;;  %v548_v36 = vsel %vm263_vm1, %v443_v20, 0.0  ;;  %v262_v20 = vld [vmem:[#allocation2] sm:$0x1] }
  0x70   : > { %v352_v55 = vadd.f32 %v351_v45, %v350_v48  ;;  %v369_v45 = vsel %vm263_vm1, %v1539_v32, 0.0  ;;  %v457_v32 = vmul.f32 %v1563_v54, %v1563_v54 }
  0x71   : > { %v533_v22 = vadd.f32 %v532_v44, %v531_v19  ;;  %v550_v44 = vsel %vm263_vm1, %v444_v27, 0.0  ;;  %v456_v27 = vmul.f32 %v1555_v47, %v1555_v47 }
  0x72   : > { %v354_v62 = vadd.f32 %v353_v53, %v352_v55  ;;  %v371_v53 = vsel %vm263_vm1, %v1547_v39, 0.0 }
  0x73   : > { %v535_v25 = vadd.f32 %v534_v51, %v533_v22  ;;  %v552_v51 = vsel %vm263_vm1, %v445_v35, 0.0  ;;  %v574_v35 = vsel %vm263_vm1, %v456_v27, 0.0 }
  0x74   : > { %v356_v6 = vadd.f32 %v355_v59, %v354_v62  ;;  %v373_v59 = vsel %vm263_vm1, %v1555_v47, 0.0  ;;  %v459_v47 = vmul.f32 %v1579_v5, %v1579_v5 }
  0x75   : > { %v537_v28 = vadd.f32 %v536_v58, %v535_v25  ;;  %v449_v25 = vmul.f32 %v1499_v61, %v1499_v61  ;;  %v452_v61 = vmul.f32 %v1523_v17, %v1523_v17  ;;  %v455_v17 = vmul.f32 %v1547_v39, %v1547_v39 }
  0x76   : > { %v358_v11 = vadd.f32 %v357_v4, %v356_v6  ;;  %v375_v4 = vsel %vm263_vm1, %v1563_v54, 0.0  ;;  %v458_v39 = vmul.f32 %v1571_v60, %v1571_v60 }
  0x77   : > { %v539_v31 = vadd.f32 %v538_v0, %v537_v28  ;;  %v450_v0 = vmul.f32 %v1507_v1, %v1507_v1  ;;  %v560_v2 = vsel %vm263_vm1, %v449_v25, 0.0  ;;  %v453_v1 = vmul.f32 %v1531_v24, %v1531_v24 }
  0x78   : > { %v360_v18 = vadd.f32 %v359_v8, %v358_v11  ;;  %v377_v8 = vsel %vm263_vm1, %v1571_v60, 0.0  ;;  %v578_v54 = vsel %vm263_vm1, %v458_v39, 0.0  ;;  %v580_v60 = vsel %vm263_vm1, %v459_v47, 0.0 }
  0x79   : > { %v541_v34 = vadd.f32 %v540_v3, %v539_v31  ;;  %v562_v31 = vsel %vm263_vm1, %v450_v0, 0.0 }
  0x7a   : > { %v362_v26 = vadd.f32 %v361_v15, %v360_v18  ;;  %v379_v15 = vsel %vm263_vm1, %v1579_v5, 0.0 }
  0x7b   : > { %v543_v37 = vadd.f32 %v542_v14, %v541_v34  ;;  %v564_v14 = vsel %vm263_vm1, %v451_v56, 0.0 }
  0x7c   : > { %v364_v33 = vadd.f32 %v363_v23, %v362_v26  ;;  %v381_v23 = vsel %vm263_vm1, %v1587_v9, 0.0 }
  0x7d   : > { %v545_v40 = vadd.f32 %v544_v21, %v543_v37  ;;  %v568_v37 = vsel %vm263_vm1, %v453_v1, 0.0 }
  0x7e   : > { %v366_v41 = vadd.f32 %v365_v30, %v364_v33  ;;  %v383_v30 = vsel %vm263_vm1, %v1595_v10, 0.0 }
  0x7f   : > { %v547_v16 = vadd.f32 %v546_v29, %v545_v40  ;;  %v570_v29 = vsel %vm263_vm1, %v454_v7, 0.0  ;;  %v572_v40 = vsel %vm263_vm1, %v455_v17, 0.0 }
  0x80   : > { %v368_v48 = vadd.f32 %v367_v38, %v366_v41  ;;  %v385_v38 = vsel %vm263_vm1, %v1603_v13, 0.0 }
  0x81   : > { %v549_v19 = vadd.f32 %v548_v36, %v547_v16 }
  0x82   : > { %v370_v55 = vadd.f32 %v369_v45, %v368_v48  ;;  %v387_v45 = vsel %vm263_vm1, %v1611_v43, 0.0  ;;  %v1619_v48 = vld [vmem:[%s1189_s23 + $0x1f8] sm:$0xff] }
  0x83   : > { %v551_v22 = vadd.f32 %v550_v44, %v549_v19  ;;  %v461_v44 = vmul.f32 %v1595_v10, %v1595_v10  ;;  %v462_v19 = vmul.f32 %v1603_v13, %v1603_v13 }
  0x84   : > { %v372_v62 = vadd.f32 %v371_v53, %v370_v55  ;;  %v389_v53 = vsel %vm263_vm1, %v1619_v48, 0.0 }
  0x85   : > { %v553_v58 = vadd.f32 %v552_v51, %v551_v22  ;;  %v586_v10 = vsel %vm263_vm1, %v462_v19, 0.0 }
  0x86   : > { %v374_v6 = vadd.f32 %v373_v59, %v372_v62  ;;  %v556_v62 = vsel %vm263_vm1, %v447_v50, 0.0  ;;  %v463_v50 = vmul.f32 %v1611_v43, %v1611_v43 }
  0x87   : > { %v555_v52 = vadd.f32 %v554_v57, %v553_v58 }
  0x88   : > { %v376_v11 = vadd.f32 %v375_v4, %v374_v6  ;;  %v558_v4 = vsel %vm263_vm1, %v448_v49, 0.0 }
  0x89   : > { %v557_v28 = vadd.f32 %v556_v62, %v555_v52 }
  0x8a   : > { %v378_v18 = vadd.f32 %v377_v8, %v376_v11 }
  0x8b   : > { %v559_v3 = vadd.f32 %v558_v4, %v557_v28 }
  0x8c   : > { %v380_v26 = vadd.f32 %v379_v15, %v378_v18  ;;  %v566_v18 = vsel %vm263_vm1, %v452_v61, 0.0 }
  0x8d   : > { %v561_v11 = vadd.f32 %v560_v2, %v559_v3 }
  0x8e   : > { %v382_v33 = vadd.f32 %v381_v23, %v380_v26 }
  0x8f   : > { %v563_v15 = vadd.f32 %v562_v31, %v561_v11 }
  0x90   : > { %v384_v41 = vadd.f32 %v383_v30, %v382_v33 }
  0x91   : > { %v565_v21 = vadd.f32 %v564_v14, %v563_v15 }
  0x92   : > { %v386_v46 = vadd.f32 %v385_v38, %v384_v41  ;;  %v576_v38 = vsel %vm263_vm1, %v457_v32, 0.0  ;;  %v460_v41 = vmul.f32 %v1587_v9, %v1587_v9  ;;  %v584_v9 = vsel %vm263_vm1, %v461_v44, 0.0 }
  0x93   : > { %v567_v26 = vadd.f32 %v566_v18, %v565_v21 }
  0x94   : > { %v388_v55 = vadd.f32 %v387_v45, %v386_v46  ;;  %v582_v5 = vsel %vm263_vm1, %v460_v41, 0.0 }
  0x95   : > { %v569_v30 = vadd.f32 %v568_v37, %v567_v26 }
  0x96   : > { %v390_v59 = vadd.f32 %v389_v53, %v388_v55  ;;  %v464_v53 = vmul.f32 %v1619_v48, %v1619_v48  ;;  %v588_v55 = vsel %vm263_vm1, %v463_v50, 0.0 }
  0x97   : > { %v571_v33 = vadd.f32 %v570_v29, %v569_v30 }
  0x98   : > { %v391_v63 = vrot.slane %v390_v59, 4  ;;  %v590_v13 = vsel %vm263_vm1, %v464_v53, 0.0 }
  0x99   : > { %v573_v36 = vadd.f32 %v572_v40, %v571_v33 }
  0x9a   : > { %v392_v6 = vadd.f32 %v391_v63, %v390_v59  ;;  %v400_v63 = vld [vmem:[#allocation3] sm:$0x1] }
  0x9b   : > { %v575_v16 = vadd.f32 %v574_v35, %v573_v36 }
  0x9c   : > { %v393_v8 = vrot.slane %v392_v6, 2 }
  0x9d   : > { %v577_v42 = vadd.f32 %v576_v38, %v575_v16 }
  0x9e   : > { %v394_v12 = vadd.f32 %v393_v8, %v392_v6 }
  0x9f   : > { %v579_v45 = vadd.f32 %v578_v54, %v577_v42 }
  0xa0   : > { %v395_v34 = vrot.slane %v394_v12, 1 }
  0xa1   : > { %v581_v46 = vadd.f32 %v580_v60, %v579_v45 }
  0xa2   : > { %v396_v23 = vadd.f32 %v395_v34, %v394_v12 }
  0xa3   : > { %v583_v51 = vadd.f32 %v582_v5, %v581_v46 }
  0xa4   : > { %v397_v24 = vadd.f32 %v396_v23, %v262_v20 }
  0xa5   : > { %v585_v22 = vadd.f32 %v584_v9, %v583_v51 }
  0xa6   : > { %399 = vst.msk [vmem:[#allocation2] sm:$0x1] %vm398_vm2, %v397_v24 }
  0xa7   : > { %v587_v49 = vadd.f32 %v586_v10, %v585_v22 }
  0xa9   : > { %v589_v57 = vadd.f32 %v588_v55, %v587_v49 }
  0xab   : > { %v591_v58 = vadd.f32 %v590_v13, %v589_v57 }
  0xad   : > { %v592_v59 = vrot.slane %v591_v58, 4 }
  0xaf   : > { %v593_v25 = vadd.f32 %v592_v59, %v591_v58 }
  0xb1   : > { %v594_v62 = vrot.slane %v593_v25, 2 }
  0xb3   : > { %v595_v43 = vadd.f32 %v594_v62, %v593_v25 }
  0xb5   : > { %v596_v52 = vrot.slane %v595_v43, 1 }
  0xb7   : > { %v597_v0 = vadd.f32 %v596_v52, %v595_v43 }
  0xb9   : > { %v598_v4 = vadd.f32 %v597_v0, %v400_v63 }
  0xbb   : > { %599 = vst.msk [vmem:[#allocation3] sm:$0x1] %vm398_vm2, %v598_v4 }
  0xbc PF: > { %p600_p10 = scmp.eq.s32.totalorder %s1112_s13, 1 }
  0xbe   : > { %p601_p11 = pnand %p600_p10, %p187_p7 }
  0xbf   : > { %v605_v48 = vld [vmem:[#allocation2] sm:$0x1] (!%p601_p11)  ;;  %vm616_vm3 = vcmask (!%p601_p11), 253952  }
  0xc0   : > { %604 = sbr.rel (%p601_p11) target bundleno = 221 (0xdd), region = 44  ;;  %v606_v6 = vmul.f32 (!%p601_p11), 0.00048828125, %v605_v48  ;;  %v612_v31 = vld [vmem:[%s2031_s1] sm:$0x1] (!%p601_p11) }
  0xc1   : > { %v618_v1 = vld [vmem:[%s2032_s2] sm:$0x1] (!%p601_p11) }
  0xc2   : > { %v607_v28 = vld [vmem:[#allocation3] sm:$0x1] (!%p601_p11)  ;;  %v609_v2 = vmul.f32 (!%p601_p11), %v606_v6, %v606_v6 }
  0xc3   : > { %v608_v56 = vmul.f32 (!%p601_p11), 0.00048828125, %v607_v28 }
  0xc5   : > { %v610_v3 = vsub.f32 (!%p601_p11), %v608_v56, %v609_v2 }
  0xc7   : > { %v611_v8 = vmax.f32 %v610_v3, 0.0 }
  0xc9   : > { %v613_v61 = vadd.f32 1e-05, %v611_v8 }
  0xcb   : > { %1084 = vrsqrt.f32 %v613_v61 }
  0xd5   : > { %v1085_v11 = vpop.eup %1084 }
  0xd6   : > { %v615_v12 = vmul.f32 %v1085_v11, %v612_v31 }
  0xd8   : > { %617 = vst.msk [vmem:[#allocation4] sm:$0x1] %vm616_vm3, %v615_v12  ;;  %v619_v14 = vmul.f32 %v615_v12, %v606_v6 }
  0xda   : > { %v620_v15 = vsub.f32 %v618_v1, %v619_v14 }
  0xdc   : > { %621 = vst.msk [vmem:[#allocation5] sm:$0x1] %vm616_vm3, %v620_v15 }
  0xdd PF: > { %p1038_p12 = scmp.ne.s32.totalorder %s1112_s13, 1 }
  0xde   : > { %v625_v34 = vld [vmem:[%s1189_s23] sm:$0xff] (!%p1038_p12)  ;;  %v626_v21 = vld [vmem:[%s1189_s23 + $0x8] sm:$0xff] (!%p1038_p12)  ;;  %v627_v23 = vld [vmem:[%s1189_s23 + $0x10] sm:$0xff] (!%p1038_p12)  ;;  %vm895_vm4 = vcmask (!%p1038_p12), 261120  }
  0xdf   : > { %624 = sbr.rel (%p1038_p12) target bundleno = 279 (0x117), region = 48  ;;  %v1692_v7 = vld [vmem:[#allocation4] ss:$0 sm:$0xff] (!%p1038_p12)  ;;  %v628_v17 = vld [vmem:[%s1189_s23 + $0x18] sm:$0xff] (!%p1038_p12)  ;;  %v630_v29 = vld [vmem:[%s1189_s23 + $0x28] sm:$0xff] (!%p1038_p12) }
  0xe0   : > { %v696_v20 = vmul.f32 (!%p1038_p12), %v1692_v7, %v625_v34  ;;  %v697_v37 = vmul.f32 (!%p1038_p12), %v1692_v7, %v626_v21  ;;  %v698_v26 = vmul.f32 (!%p1038_p12), %v1692_v7, %v627_v23  ;;  %v699_v24 = vmul.f32 (!%p1038_p12), %v1692_v7, %v628_v17  ;;  %v629_v27 = vld [vmem:[%s1189_s23 + $0x20] sm:$0xff] (!%p1038_p12)  ;;  %v631_v30 = vld [vmem:[%s1189_s23 + $0x30] sm:$0xff] (!%p1038_p12)  ;;  %v632_v35 = vld [vmem:[%s1189_s23 + $0x38] sm:$0xff] (!%p1038_p12) }
  0xe1   : > { %v700_v40 = vmul.f32 (!%p1038_p12), %v1692_v7, %v629_v27  ;;  %v701_v33 = vmul.f32 (!%p1038_p12), %v1692_v7, %v630_v29  ;;  %v702_v39 = vmul.f32 (!%p1038_p12), %v1692_v7, %v631_v30  ;;  %v703_v16 = vmul.f32 (!%p1038_p12), %v1692_v7, %v632_v35  ;;  %v633_v41 = vld [vmem:[%s1189_s23 + $0x40] sm:$0xff] (!%p1038_p12)  ;;  %v634_v45 = vld [vmem:[%s1189_s23 + $0x48] sm:$0xff] (!%p1038_p12)  ;;  %v635_v19 = vld [vmem:[%s1189_s23 + $0x50] sm:$0xff] (!%p1038_p12) }
  0xe2   : > { %v636_v5 = vld [vmem:[%s1189_s23 + $0x58] sm:$0xff] (!%p1038_p12)  ;;  %v637_v53 = vld [vmem:[%s1189_s23 + $0x60] sm:$0xff] (!%p1038_p12)  ;;  %v638_v10 = vld [vmem:[%s1189_s23 + $0x68] sm:$0xff] (!%p1038_p12)  ;;  %v704_v57 = vmul.f32 (!%p1038_p12), %v1692_v7, %v633_v41  ;;  %v705_v25 = vmul.f32 (!%p1038_p12), %v1692_v7, %v634_v45  ;;  %v706_v62 = vmul.f32 (!%p1038_p12), %v1692_v7, %v635_v19 }
  0xe3   : > { %v1694_v18 = vld [vmem:[#allocation5] ss:$0 sm:$0xff] (!%p1038_p12)  ;;  %v639_v22 = vld [vmem:[%s1189_s23 + $0x70] sm:$0xff] (!%p1038_p12)  ;;  %v640_v58 = vld [vmem:[%s1189_s23 + $0x78] sm:$0xff] (!%p1038_p12)  ;;  %v707_v43 = vmul.f32 (!%p1038_p12), %v1692_v7, %v636_v5  ;;  %v708_v63 = vmul.f32 (!%p1038_p12), %v1692_v7, %v637_v53  ;;  %v709_v0 = vmul.f32 (!%p1038_p12), %v1692_v7, %v638_v10 }
  0xe4   : > { %v767_v32 = vadd.f32 (!%p1038_p12), %v1694_v18, %v696_v20  ;;  %v768_v36 = vadd.f32 (!%p1038_p12), %v1694_v18, %v697_v37  ;;  %v769_v47 = vadd.f32 (!%p1038_p12), %v1694_v18, %v698_v26  ;;  %v770_v38 = vadd.f32 (!%p1038_p12), %v1694_v18, %v699_v24  ;;  %v641_v2 = vld [vmem:[%s1189_s23 + $0x80] sm:$0xff] (!%p1038_p12)  ;;  %v642_v11 = vld [vmem:[%s1189_s23 + $0x88] sm:$0xff] (!%p1038_p12)  ;;  %v643_v12 = vld [vmem:[%s1189_s23 + $0x90] sm:$0xff] (!%p1038_p12) }
  0xe5   : > { %v771_v42 = vadd.f32 (!%p1038_p12), %v1694_v18, %v700_v40  ;;  %v772_v44 = vadd.f32 (!%p1038_p12), %v1694_v18, %v701_v33  ;;  %v773_v60 = vadd.f32 (!%p1038_p12), %v1694_v18, %v702_v39  ;;  %v774_v51 = vadd.f32 (!%p1038_p12), %v1694_v18, %v703_v16  ;;  %v644_v1 = vld [vmem:[%s1189_s23 + $0x98] sm:$0xff] (!%p1038_p12)  ;;  %v645_v21 = vld [vmem:[%s1189_s23 + $0xa0] sm:$0xff] (!%p1038_p12)  ;;  %v646_v23 = vld [vmem:[%s1189_s23 + $0xa8] sm:$0xff] (!%p1038_p12) }
  0xe6   : > { %v831_v54 = vmax.f32 %v767_v32, 0.0  ;;  %v832_v46 = vmax.f32 %v768_v36, 0.0  ;;  %v833_v50 = vmax.f32 %v769_v47, 0.0  ;;  %v834_v9 = vmax.f32 %v770_v38, 0.0  ;;  %v647_v17 = vld [vmem:[%s1189_s23 + $0xb0] sm:$0xff]  ;;  %v648_v29 = vld [vmem:[%s1189_s23 + $0xb8] sm:$0xff] }
  0xe7   : > { %v835_v55 = vmax.f32 %v771_v42, 0.0  ;;  %v836_v49 = vmax.f32 %v772_v44, 0.0  ;;  %v837_v13 = vmax.f32 %v773_v60, 0.0  ;;  %v838_v59 = vmax.f32 %v774_v51, 0.0  ;;  %v649_v42 = vld [vmem:[%s1189_s23 + $0xc0] sm:$0xff]  ;;  %v650_v5 = vld [vmem:[%s1189_s23 + $0xc8] sm:$0xff] }
  0xe8   : > { %896 = vst.msk [vmem:[%s1194_s26] sm:$0xff] %vm895_vm4, %v831_v54  ;;  %897 = vst.msk [vmem:[%s1194_s26 + $0x8] sm:$0xff] %vm895_vm4, %v832_v46  ;;  %v775_v52 = vadd.f32 %v1694_v18, %v704_v57  ;;  %v710_v4 = vmul.f32 %v1692_v7, %v639_v22  ;;  %v776_v48 = vadd.f32 %v1694_v18, %v705_v25  ;;  %v651_v46 = vld [vmem:[%s1189_s23 + $0xd0] sm:$0xff]  ;;  %v653_v22 = vld [vmem:[%s1189_s23 + $0xe0] sm:$0xff] }
  0xe9   : > { %898 = vst.msk [vmem:[%s1194_s26 + $0x10] sm:$0xff] %vm895_vm4, %v833_v50  ;;  %899 = vst.msk [vmem:[%s1194_s26 + $0x18] sm:$0xff] %vm895_vm4, %v834_v9  ;;  %v777_v28 = vadd.f32 %v1694_v18, %v706_v62  ;;  %v778_v6 = vadd.f32 %v1694_v18, %v707_v43  ;;  %v711_v56 = vmul.f32 %v1692_v7, %v640_v58  ;;  %v652_v50 = vld [vmem:[%s1189_s23 + $0xd8] sm:$0xff] }
  0xea   : > { %900 = vst.msk [vmem:[%s1194_s26 + $0x20] sm:$0xff] %vm895_vm4, %v835_v55  ;;  %901 = vst.msk [vmem:[%s1194_s26 + $0x28] sm:$0xff] %vm895_vm4, %v836_v49  ;;  %v839_v3 = vmax.f32 %v775_v52, 0.0  ;;  %v779_v8 = vadd.f32 %v1694_v18, %v708_v63  ;;  %v780_v61 = vadd.f32 %v1694_v18, %v709_v0  ;;  %v781_v31 = vadd.f32 %v1694_v18, %v710_v4  ;;  %v654_v55 = vld [vmem:[%s1189_s23 + $0xe8] sm:$0xff]  ;;  %v655_v49 = vld [vmem:[%s1189_s23 + $0xf0] sm:$0xff] }
  0xeb   : > { %902 = vst.msk [vmem:[%s1194_s26 + $0x30] sm:$0xff] %vm895_vm4, %v837_v13  ;;  %903 = vst.msk [vmem:[%s1194_s26 + $0x38] sm:$0xff] %vm895_vm4, %v838_v59  ;;  %v840_v14 = vmax.f32 %v776_v48, 0.0  ;;  %v841_v15 = vmax.f32 %v777_v28, 0.0  ;;  %v842_v34 = vmax.f32 %v778_v6, 0.0  ;;  %v782_v20 = vadd.f32 %v1694_v18, %v711_v56  ;;  %v656_v25 = vld [vmem:[%s1189_s23 + $0xf8] sm:$0xff] }
  0xec   : > { %904 = vst.msk [vmem:[%s1194_s26 + $0x40] sm:$0xff] %vm895_vm4, %v839_v3  ;;  %v843_v37 = vmax.f32 %v779_v8, 0.0  ;;  %v844_v26 = vmax.f32 %v780_v61, 0.0  ;;  %v845_v24 = vmax.f32 %v781_v31, 0.0  ;;  %v712_v27 = vmul.f32 %v1692_v7, %v641_v2  ;;  %v657_v8 = vld [vmem:[%s1189_s23 + $0x100] sm:$0xff] }
  0xed   : > { %905 = vst.msk [vmem:[%s1194_s26 + $0x48] sm:$0xff] %vm895_vm4, %v840_v14  ;;  %906 = vst.msk [vmem:[%s1194_s26 + $0x50] sm:$0xff] %vm895_vm4, %v841_v15  ;;  %v846_v30 = vmax.f32 %v782_v20, 0.0  ;;  %v713_v32 = vmul.f32 %v1692_v7, %v642_v11  ;;  %v714_v40 = vmul.f32 %v1692_v7, %v643_v12  ;;  %v715_v33 = vmul.f32 %v1692_v7, %v644_v1  ;;  %v658_v1 = vld [vmem:[%s1189_s23 + $0x108] sm:$0xff]  ;;  %v659_v14 = vld [vmem:[%s1189_s23 + $0x110] sm:$0xff] }
  0xee   : > { %907 = vst.msk [vmem:[%s1194_s26 + $0x58] sm:$0xff] %vm895_vm4, %v842_v34  ;;  %908 = vst.msk [vmem:[%s1194_s26 + $0x60] sm:$0xff] %vm895_vm4, %v843_v37  ;;  %v783_v39 = vadd.f32 %v1694_v18, %v712_v27  ;;  %v716_v35 = vmul.f32 %v1692_v7, %v645_v21  ;;  %v717_v36 = vmul.f32 %v1692_v7, %v646_v23  ;;  %v660_v15 = vld [vmem:[%s1189_s23 + $0x118] sm:$0xff]  ;;  %v662_v37 = vld [vmem:[%s1189_s23 + $0x128] sm:$0xff] }
  0xef   : > { %909 = vst.msk [vmem:[%s1194_s26 + $0x68] sm:$0xff] %vm895_vm4, %v844_v26  ;;  %910 = vst.msk [vmem:[%s1194_s26 + $0x70] sm:$0xff] %vm895_vm4, %v845_v24  ;;  %v718_v47 = vmul.f32 %v1692_v7, %v647_v17  ;;  %v784_v38 = vadd.f32 %v1694_v18, %v713_v32  ;;  %v785_v16 = vadd.f32 %v1694_v18, %v714_v40  ;;  %v661_v17 = vld [vmem:[%s1189_s23 + $0x120] sm:$0xff]  ;;  %v663_v26 = vld [vmem:[%s1189_s23 + $0x130] sm:$0xff] }
  0xf0   : > { %911 = vst.msk [vmem:[%s1194_s26 + $0x78] sm:$0xff] %vm895_vm4, %v846_v30  ;;  %v786_v41 = vadd.f32 %v1694_v18, %v715_v33  ;;  %v719_v54 = vmul.f32 %v1692_v7, %v648_v29  ;;  %v847_v44 = vmax.f32 %v783_v39, 0.0  ;;  %v787_v60 = vadd.f32 %v1694_v18, %v716_v35  ;;  %v664_v32 = vld [vmem:[%s1189_s23 + $0x138] sm:$0xff] }
  0xf1   : > { %v788_v45 = vadd.f32 %v1694_v18, %v717_v36  ;;  %v789_v19 = vadd.f32 %v1694_v18, %v718_v47  ;;  %v848_v9 = vmax.f32 %v784_v38, 0.0  ;;  %v849_v51 = vmax.f32 %v785_v16, 0.0 }
  0xf2   : > { %v850_v53 = vmax.f32 %v786_v41, 0.0  ;;  %v790_v10 = vadd.f32 %v1694_v18, %v719_v54  ;;  %912 = vst.msk [vmem:[%s1194_s26 + $0x80] sm:$0xff] %vm895_vm4, %v847_v44  ;;  %v851_v13 = vmax.f32 %v787_v60, 0.0  ;;  %v720_v59 = vmul.f32 %v1692_v7, %v649_v42  ;;  %v665_v60 = vld [vmem:[%s1189_s23 + $0x140] sm:$0xff] }
  0xf3   : > { %v852_v57 = vmax.f32 %v788_v45, 0.0  ;;  %v853_v58 = vmax.f32 %v789_v19, 0.0  ;;  %913 = vst.msk [vmem:[%s1194_s26 + $0x88] sm:$0xff] %vm895_vm4, %v848_v9  ;;  %914 = vst.msk [vmem:[%s1194_s26 + $0x90] sm:$0xff] %vm895_vm4, %v849_v51  ;;  %v721_v43 = vmul.f32 %v1692_v7, %v650_v5  ;;  %v722_v52 = vmul.f32 %v1692_v7, %v651_v46  ;;  %v667_v9 = vld [vmem:[%s1189_s23 + $0x150] sm:$0xff]  ;;  %v668_v51 = vld [vmem:[%s1189_s23 + $0x158] sm:$0xff] }
  0xf4   : > { %915 = vst.msk [vmem:[%s1194_s26 + $0x98] sm:$0xff] %vm895_vm4, %v850_v53  ;;  %v854_v62 = vmax.f32 %v790_v10, 0.0  ;;  %v723_v63 = vmul.f32 %v1692_v7, %v652_v50  ;;  %916 = vst.msk [vmem:[%s1194_s26 + $0xa0] sm:$0xff] %vm895_vm4, %v851_v13  ;;  %v791_v0 = vadd.f32 %v1694_v18, %v720_v59  ;;  %v724_v4 = vmul.f32 %v1692_v7, %v653_v22  ;;  %v666_v50 = vld [vmem:[%s1189_s23 + $0x148] sm:$0xff] }
  0xf5   : > { %917 = vst.msk [vmem:[%s1194_s26 + $0xa8] sm:$0xff] %vm895_vm4, %v852_v57  ;;  %918 = vst.msk [vmem:[%s1194_s26 + $0xb0] sm:$0xff] %vm895_vm4, %v853_v58  ;;  %v725_v48 = vmul.f32 %v1692_v7, %v654_v55  ;;  %v726_v28 = vmul.f32 %v1692_v7, %v655_v49  ;;  %v792_v6 = vadd.f32 %v1694_v18, %v721_v43  ;;  %v669_v49 = vld [vmem:[%s1189_s23 + $0x160] sm:$0xff]  ;;  %v670_v13 = vld [vmem:[%s1189_s23 + $0x168] sm:$0xff] }
  0xf6   : > { %919 = vst.msk [vmem:[%s1194_s26 + $0xb8] sm:$0xff] %vm895_vm4, %v854_v62  ;;  %v793_v56 = vadd.f32 %v1694_v18, %v722_v52  ;;  %v794_v2 = vadd.f32 %v1694_v18, %v723_v63  ;;  %v727_v3 = vmul.f32 %v1692_v7, %v656_v25  ;;  %v855_v61 = vmax.f32 %v791_v0, 0.0  ;;  %v671_v57 = vld [vmem:[%s1189_s23 + $0x170] sm:$0xff]  ;;  %v672_v43 = vld [vmem:[%s1189_s23 + $0x178] sm:$0xff] }
  0xf7   : > { %v795_v31 = vadd.f32 %v1694_v18, %v724_v4  ;;  %v796_v11 = vadd.f32 %v1694_v18, %v725_v48  ;;  %v797_v12 = vadd.f32 %v1694_v18, %v726_v28  ;;  %v856_v34 = vmax.f32 %v792_v6, 0.0 }
  0xf8   : > { %v857_v20 = vmax.f32 %v793_v56, 0.0  ;;  %v858_v21 = vmax.f32 %v794_v2, 0.0  ;;  %v798_v23 = vadd.f32 %v1694_v18, %v727_v3  ;;  %920 = vst.msk [vmem:[%s1194_s26 + $0xc0] sm:$0xff] %vm895_vm4, %v855_v61  ;;  %v728_v30 = vmul.f32 %v1692_v7, %v657_v8 }
  0xf9   : > { %v859_v24 = vmax.f32 %v795_v31, 0.0  ;;  %v860_v27 = vmax.f32 %v796_v11, 0.0  ;;  %v861_v29 = vmax.f32 %v797_v12, 0.0  ;;  %921 = vst.msk [vmem:[%s1194_s26 + $0xc8] sm:$0xff] %vm895_vm4, %v856_v34  ;;  %v729_v33 = vmul.f32 %v1692_v7, %v658_v1  ;;  %v673_v31 = vld [vmem:[%s1189_s23 + $0x180] sm:$0xff]  ;;  %v675_v34 = vld [vmem:[%s1189_s23 + $0x190] sm:$0xff] }
  0xfa   : > { %922 = vst.msk [vmem:[%s1194_s26 + $0xd0] sm:$0xff] %vm895_vm4, %v857_v20  ;;  %923 = vst.msk [vmem:[%s1194_s26 + $0xd8] sm:$0xff] %vm895_vm4, %v858_v21  ;;  %v862_v40 = vmax.f32 %v798_v23, 0.0  ;;  %v730_v39 = vmul.f32 %v1692_v7, %v659_v14  ;;  %v731_v35 = vmul.f32 %v1692_v7, %v660_v15  ;;  %v799_v36 = vadd.f32 %v1694_v18, %v728_v30  ;;  %v674_v15 = vld [vmem:[%s1189_s23 + $0x188] sm:$0xff]  ;;  %v676_v20 = vld [vmem:[%s1189_s23 + $0x198] sm:$0xff] }
  0xfb   : > { %924 = vst.msk [vmem:[%s1194_s26 + $0xe0] sm:$0xff] %vm895_vm4, %v859_v24  ;;  %925 = vst.msk [vmem:[%s1194_s26 + $0xe8] sm:$0xff] %vm895_vm4, %v860_v27  ;;  %v732_v47 = vmul.f32 %v1692_v7, %v661_v17  ;;  %v733_v38 = vmul.f32 %v1692_v7, %v662_v37  ;;  %v734_v16 = vmul.f32 %v1692_v7, %v663_v26  ;;  %v677_v26 = vld [vmem:[%s1189_s23 + $0x1a0] sm:$0xff]  ;;  %v678_v24 = vld [vmem:[%s1189_s23 + $0x1a8] sm:$0xff] }
  0xfc   : > { %926 = vst.msk [vmem:[%s1194_s26 + $0xf0] sm:$0xff] %vm895_vm4, %v861_v29  ;;  %927 = vst.msk [vmem:[%s1194_s26 + $0xf8] sm:$0xff] %vm895_vm4, %v862_v40  ;;  %v800_v41 = vadd.f32 %v1694_v18, %v729_v33  ;;  %v801_v54 = vadd.f32 %v1694_v18, %v730_v39  ;;  %v802_v42 = vadd.f32 %v1694_v18, %v731_v35  ;;  %v863_v45 = vmax.f32 %v799_v36, 0.0  ;;  %v679_v27 = vld [vmem:[%s1189_s23 + $0x1b0] sm:$0xff]  ;;  %v680_v33 = vld [vmem:[%s1189_s23 + $0x1b8] sm:$0xff] }
  0xfd   : > { %v735_v44 = vmul.f32 %v1692_v7, %v664_v32  ;;  %v803_v19 = vadd.f32 %v1694_v18, %v732_v47  ;;  %v804_v5 = vadd.f32 %v1694_v18, %v733_v38  ;;  %v805_v46 = vadd.f32 %v1694_v18, %v734_v16 }
  0xfe   : > { %v864_v53 = vmax.f32 %v800_v41, 0.0  ;;  %v865_v10 = vmax.f32 %v801_v54, 0.0  ;;  %v866_v22 = vmax.f32 %v802_v42, 0.0  ;;  %928 = vst.msk [vmem:[%s1194_s26 + $0x100] sm:$0xff] %vm895_vm4, %v863_v45  ;;  %v736_v62 = vmul.f32 %v1692_v7, %v665_v60 }
  0xff   : > { %v806_v55 = vadd.f32 %v1694_v18, %v735_v44  ;;  %v867_v58 = vmax.f32 %v803_v19, 0.0  ;;  %v868_v59 = vmax.f32 %v804_v5, 0.0  ;;  %v869_v25 = vmax.f32 %v805_v46, 0.0  ;;  %v681_v19 = vld [vmem:[%s1189_s23 + $0x1c0] sm:$0xff] }
 0x100   : > { %929 = vst.msk [vmem:[%s1194_s26 + $0x108] sm:$0xff] %vm895_vm4, %v864_v53  ;;  %930 = vst.msk [vmem:[%s1194_s26 + $0x110] sm:$0xff] %vm895_vm4, %v865_v10  ;;  %v737_v63 = vmul.f32 %v1692_v7, %v666_v50  ;;  %v738_v0 = vmul.f32 %v1692_v7, %v667_v9  ;;  %v739_v4 = vmul.f32 %v1692_v7, %v668_v51  ;;  %v682_v51 = vld [vmem:[%s1189_s23 + $0x1c8] sm:$0xff]  ;;  %v683_v53 = vld [vmem:[%s1189_s23 + $0x1d0] sm:$0xff] }
 0x101   : > { %931 = vst.msk [vmem:[%s1194_s26 + $0x118] sm:$0xff] %vm895_vm4, %v866_v22  ;;  %v870_v52 = vmax.f32 %v806_v55, 0.0  ;;  %932 = vst.msk [vmem:[%s1194_s26 + $0x120] sm:$0xff] %vm895_vm4, %v867_v58  ;;  %v807_v48 = vadd.f32 %v1694_v18, %v736_v62  ;;  %v740_v28 = vmul.f32 %v1692_v7, %v669_v49  ;;  %v741_v6 = vmul.f32 %v1692_v7, %v670_v13  ;;  %v684_v10 = vld [vmem:[%s1189_s23 + $0x1d8] sm:$0xff]  ;;  %v686_v58 = vld [vmem:[%s1189_s23 + $0x1e8] sm:$0xff] }
 0x102   : > { %933 = vst.msk [vmem:[%s1194_s26 + $0x128] sm:$0xff] %vm895_vm4, %v868_v59  ;;  %934 = vst.msk [vmem:[%s1194_s26 + $0x130] sm:$0xff] %vm895_vm4, %v869_v25  ;;  %v742_v56 = vmul.f32 %v1692_v7, %v671_v57  ;;  %v808_v2 = vadd.f32 %v1694_v18, %v737_v63  ;;  %v809_v3 = vadd.f32 %v1694_v18, %v738_v0  ;;  %v685_v57 = vld [vmem:[%s1189_s23 + $0x1e0] sm:$0xff]  ;;  %v687_v59 = vld [vmem:[%s1189_s23 + $0x1f0] sm:$0xff] }
 0x103   : > { %935 = vst.msk [vmem:[%s1194_s26 + $0x138] sm:$0xff] %vm895_vm4, %v870_v52  ;;  %v810_v8 = vadd.f32 %v1694_v18, %v739_v4  ;;  %v743_v61 = vmul.f32 %v1692_v7, %v672_v43  ;;  %v871_v11 = vmax.f32 %v807_v48, 0.0  ;;  %v811_v12 = vadd.f32 %v1694_v18, %v740_v28  ;;  %v688_v63 = vld [vmem:[%s1189_s23 + $0x1f8] sm:$0xff] }
 0x104   : > { %v812_v1 = vadd.f32 %v1694_v18, %v741_v6  ;;  %v813_v14 = vadd.f32 %v1694_v18, %v742_v56  ;;  %v872_v21 = vmax.f32 %v808_v2, 0.0  ;;  %v873_v23 = vmax.f32 %v809_v3, 0.0 }
 0x105   : > { %v874_v17 = vmax.f32 %v810_v8, 0.0  ;;  %v814_v37 = vadd.f32 %v1694_v18, %v743_v61  ;;  %936 = vst.msk [vmem:[%s1194_s26 + $0x140] sm:$0xff] %vm895_vm4, %v871_v11  ;;  %v875_v29 = vmax.f32 %v811_v12, 0.0  ;;  %v744_v40 = vmul.f32 %v1692_v7, %v673_v31 }
 0x106   : > { %v876_v30 = vmax.f32 %v812_v1, 0.0  ;;  %v877_v32 = vmax.f32 %v813_v14, 0.0  ;;  %937 = vst.msk [vmem:[%s1194_s26 + $0x148] sm:$0xff] %vm895_vm4, %v872_v21  ;;  %938 = vst.msk [vmem:[%s1194_s26 + $0x150] sm:$0xff] %vm895_vm4, %v873_v23  ;;  %v745_v35 = vmul.f32 %v1692_v7, %v674_v15  ;;  %v746_v36 = vmul.f32 %v1692_v7, %v675_v34 }
 0x107   : > { %939 = vst.msk [vmem:[%s1194_s26 + $0x158] sm:$0xff] %vm895_vm4, %v874_v17  ;;  %v878_v39 = vmax.f32 %v814_v37, 0.0  ;;  %v747_v47 = vmul.f32 %v1692_v7, %v676_v20  ;;  %940 = vst.msk [vmem:[%s1194_s26 + $0x160] sm:$0xff] %vm895_vm4, %v875_v29  ;;  %v815_v38 = vadd.f32 %v1694_v18, %v744_v40  ;;  %v748_v16 = vmul.f32 %v1692_v7, %v677_v26 }
 0x108   : > { %941 = vst.msk [vmem:[%s1194_s26 + $0x168] sm:$0xff] %vm895_vm4, %v876_v30  ;;  %942 = vst.msk [vmem:[%s1194_s26 + $0x170] sm:$0xff] %vm895_vm4, %v877_v32  ;;  %v749_v41 = vmul.f32 %v1692_v7, %v678_v24  ;;  %v750_v54 = vmul.f32 %v1692_v7, %v679_v27  ;;  %v816_v42 = vadd.f32 %v1694_v18, %v745_v35 }
 0x109   : > { %943 = vst.msk [vmem:[%s1194_s26 + $0x178] sm:$0xff] %vm895_vm4, %v878_v39  ;;  %v817_v44 = vadd.f32 %v1694_v18, %v746_v36  ;;  %v818_v60 = vadd.f32 %v1694_v18, %v747_v47  ;;  %v751_v45 = vmul.f32 %v1692_v7, %v680_v33  ;;  %v879_v5 = vmax.f32 %v815_v38, 0.0 }
 0x10a   : > { %v819_v46 = vadd.f32 %v1694_v18, %v748_v16  ;;  %v820_v50 = vadd.f32 %v1694_v18, %v749_v41  ;;  %v821_v9 = vadd.f32 %v1694_v18, %v750_v54  ;;  %v880_v22 = vmax.f32 %v816_v42, 0.0 }
 0x10b   : > { %v881_v55 = vmax.f32 %v817_v44, 0.0  ;;  %v882_v49 = vmax.f32 %v818_v60, 0.0  ;;  %v822_v13 = vadd.f32 %v1694_v18, %v751_v45  ;;  %944 = vst.msk [vmem:[%s1194_s26 + $0x180] sm:$0xff] %vm895_vm4, %v879_v5  ;;  %v752_v52 = vmul.f32 %v1692_v7, %v681_v19 }
 0x10c   : > { %v883_v25 = vmax.f32 %v819_v46, 0.0  ;;  %v884_v62 = vmax.f32 %v820_v50, 0.0  ;;  %v885_v43 = vmax.f32 %v821_v9, 0.0  ;;  %945 = vst.msk [vmem:[%s1194_s26 + $0x188] sm:$0xff] %vm895_vm4, %v880_v22  ;;  %v753_v4 = vmul.f32 %v1692_v7, %v682_v51 }
 0x10d   : > { %946 = vst.msk [vmem:[%s1194_s26 + $0x190] sm:$0xff] %vm895_vm4, %v881_v55  ;;  %947 = vst.msk [vmem:[%s1194_s26 + $0x198] sm:$0xff] %vm895_vm4, %v882_v49  ;;  %v886_v0 = vmax.f32 %v822_v13, 0.0  ;;  %v754_v48 = vmul.f32 %v1692_v7, %v683_v53  ;;  %v755_v28 = vmul.f32 %v1692_v7, %v684_v10  ;;  %v823_v6 = vadd.f32 %v1694_v18, %v752_v52 }
 0x10e   : > { %948 = vst.msk [vmem:[%s1194_s26 + $0x1a0] sm:$0xff] %vm895_vm4, %v883_v25  ;;  %949 = vst.msk [vmem:[%s1194_s26 + $0x1a8] sm:$0xff] %vm895_vm4, %v884_v62  ;;  %v756_v56 = vmul.f32 %v1692_v7, %v685_v57  ;;  %v757_v2 = vmul.f32 %v1692_v7, %v686_v58  ;;  %v758_v3 = vmul.f32 %v1692_v7, %v687_v59 }
 0x10f   : > { %950 = vst.msk [vmem:[%s1194_s26 + $0x1b0] sm:$0xff] %vm895_vm4, %v885_v43  ;;  %951 = vst.msk [vmem:[%s1194_s26 + $0x1b8] sm:$0xff] %vm895_vm4, %v886_v0  ;;  %v824_v8 = vadd.f32 %v1694_v18, %v753_v4  ;;  %v825_v61 = vadd.f32 %v1694_v18, %v754_v48  ;;  %v826_v31 = vadd.f32 %v1694_v18, %v755_v28  ;;  %v887_v12 = vmax.f32 %v823_v6, 0.0 }
 0x110   : > { %v759_v11 = vmul.f32 %v1692_v7, %v688_v63  ;;  %v827_v1 = vadd.f32 %v1694_v18, %v756_v56  ;;  %v828_v14 = vadd.f32 %v1694_v18, %v757_v2  ;;  %v829_v15 = vadd.f32 %v1694_v18, %v758_v3 }
 0x111   : > { %v888_v34 = vmax.f32 %v824_v8, 0.0  ;;  %v889_v20 = vmax.f32 %v825_v61, 0.0  ;;  %v890_v21 = vmax.f32 %v826_v31, 0.0  ;;  %952 = vst.msk [vmem:[%s1194_s26 + $0x1c0] sm:$0xff] %vm895_vm4, %v887_v12 }
 0x112   : > { %v830_v23 = vadd.f32 %v1694_v18, %v759_v11  ;;  %v891_v17 = vmax.f32 %v827_v1, 0.0  ;;  %v892_v7 = vmax.f32 %v828_v14, 0.0  ;;  %v893_v37 = vmax.f32 %v829_v15, 0.0 }
 0x113   : > { %953 = vst.msk [vmem:[%s1194_s26 + $0x1c8] sm:$0xff] %vm895_vm4, %v888_v34  ;;  %954 = vst.msk [vmem:[%s1194_s26 + $0x1d0] sm:$0xff] %vm895_vm4, %v889_v20 }
 0x114   : > { %955 = vst.msk [vmem:[%s1194_s26 + $0x1d8] sm:$0xff] %vm895_vm4, %v890_v21  ;;  %v894_v26 = vmax.f32 %v830_v23, 0.0  ;;  %956 = vst.msk [vmem:[%s1194_s26 + $0x1e0] sm:$0xff] %vm895_vm4, %v891_v17 }
 0x115   : > { %957 = vst.msk [vmem:[%s1194_s26 + $0x1e8] sm:$0xff] %vm895_vm4, %v892_v7  ;;  %958 = vst.msk [vmem:[%s1194_s26 + $0x1f0] sm:$0xff] %vm895_vm4, %v893_v37 }
 0x116   : > { %959 = vst.msk [vmem:[%s1194_s26 + $0x1f8] sm:$0xff] %vm895_vm4, %v894_v26 }
 0x117 PF: > { %s13_s16 = sadd.s32 1, %s1124_s16   ;;  %s2034_s12 = smov %s1116_s14 }
 0x118   : > { %p10_p13 = scmp.ge.s32.totalorder %s13_s16, 10   ;;  %s2035_s13 = smov %s1120_s15 }
 0x119   : > { %s2036_s14 = smov %s2039_s17  ;;  %s2037_s15 = smov %s2043_s18 }
 0x11a   :  { %12 = sbr.rel (!%p10_p13) target bundleno = 3 (0x3), region = 78 }

// kernel: net_forward.17
= control target key start
LH: loop header
LB: loop body
LE: loop exit
PB: predicated region body
PF: predicated region fallthrough
CT: control target
= control target key end

     0   :  { %s2279_s14 = smov 0   ;;  %s2838_s0 = inlined_call_operand.vmem [shape: bf16[2048,288], index: 0, kind: input, shape index: {}]   ;;  %s2839_s1 = inlined_call_operand.vmem [shape: bf16[288,1], index: 1, kind: input, shape index: {}]   ;;  %s2840_s2 = inlined_call_operand.<no memory space> [shape: f32[1,1], index: 2, kind: input, shape index: {}]   ;;  %s2841_s3 = inlined_call_operand.vmem [shape: f32[2048,1], index: 3, kind: output, shape index: {}]  }
   0x1   :  { %v8_v0 = vstv %s2840_s2 }
   0x2   :  { %9 = vst [vmem:[#allocation2] sm:$0x1] %v8_v0 }
   0x3 LB: > { %s1799_s15 = sadd.s32 4294967295, %s2253_s14   ;;  %p1803_p0 = scmp.ge.s32.totalorder %s2253_s14, 1  ;;  %s2253_s14 = sphi %s2279_s14, %s15_s14  }
   0x4   : > { %p141_p1 = scmp.lt.s32.totalorder %s2253_s14, 5 }
   0x6   : > { %p142_p2 = pnand %p1803_p0, %p141_p1 }
   0x7   : > { %v2101_v1 = vld [vmem:[%s2839_s1] sm:$0xff] (!%p142_p2)   ;;  %v2255_v2 = vmov (!%p142_p2), 0   ;;  %s1804_s2 = sshll.u32 (!%p142_p2), %s1799_s15, 6  ;;  %v2102_v3 = vld [vmem:[%s2839_s1 + $0x8] sm:$0xff] (!%p142_p2)   ;;  %v2103_v4 = vld [vmem:[%s2839_s1 + $0x10] sm:$0xff] (!%p142_p2)   ;;  %vm939_vm0 = vcmask (!%p142_p2), 261120  }
   0x8   : > { %145 = sbr.rel (%p142_p2) target bundleno = 477 (0x1dd), region = 32  ;;  %1036 = vmatprep.subr.bf16.mxu0 (!%p142_p2), %v2255_v2  ;;  %2059 = vmatprep.subr.bf16.mxu1 (!%p142_p2), %v2255_v2  ;;  %p167_p3 = scmp.lt.s32.totalorder (!%p142_p2), %s1804_s2, 255  ;;  %v2104_v5 = vld [vmem:[%s2839_s1 + $0x18] sm:$0xff] (!%p142_p2)   ;;  %v2105_v6 = vld [vmem:[%s2839_s1 + $0x20] sm:$0xff] (!%p142_p2)   ;;  %v2106_v8 = vld [vmem:[%s2839_s1 + $0x28] sm:$0xff] (!%p142_p2)   ;;  %vm1678_vm1 = vcmask (!%p142_p2), 7168  }
   0x9   : > { %1037 = vmatpush1.bf16.msra.mxu0 (!%p142_p2), %v2101_v1  ;;  %2075 = vmatpush1.bf16.msra.mxu1 (!%p142_p2), %v2101_v1  ;;  %v2107_v10 = vld [vmem:[%s2839_s1 + $0x30] sm:$0xff] (!%p142_p2)   ;;  %v2108_v11 = vld [vmem:[%s2839_s1 + $0x38] sm:$0xff] (!%p142_p2)   ;;  %v2109_v12 = vld [vmem:[%s2839_s1 + $0x40] sm:$0xff] (!%p142_p2)  }
   0xa   : > { %1038 = vmatprep.subr.bf16.mxu0 (!%p142_p2), %v2255_v2  ;;  %2060 = vmatprep.subr.bf16.mxu1 (!%p142_p2), %v2255_v2  ;;  %v2110_v13 = vld [vmem:[%s2839_s1 + $0x48] sm:$0xff] (!%p142_p2)   ;;  %v2111_v14 = vld [vmem:[%s2839_s1 + $0x50] sm:$0xff] (!%p142_p2)   ;;  %v2112_v15 = vld [vmem:[%s2839_s1 + $0x58] sm:$0xff] (!%p142_p2)  }
   0xb   : > { %v2113_v16 = vld [vmem:[%s2839_s1 + $0x60] sm:$0xff] (!%p142_p2)   ;;  %v2114_v17 = vld [vmem:[%s2839_s1 + $0x68] sm:$0xff] (!%p142_p2)   ;;  %v2115_v18 = vld [vmem:[%s2839_s1 + $0x70] sm:$0xff] (!%p142_p2)  }
   0xc   : > { %v2116_v19 = vld [vmem:[%s2839_s1 + $0x78] sm:$0xff] (!%p142_p2)   ;;  %v2123_v20 = vld [vmem:[%s2839_s1 + $0x80] sm:$0xff] (!%p142_p2)   ;;  %v2148_v25 = vld [vmem:[%s2839_s1 + $0x88] sm:$0xff] (!%p142_p2)  }
   0xd   : > { %1039 = vmatpush1.bf16.msra.mxu0 (!%p142_p2), %v2102_v3  ;;  %2076 = vmatpush1.bf16.msra.mxu1 (!%p142_p2), %v2102_v3 }
   0xe   : > { %1040 = vmatprep.subr.bf16.mxu0 (!%p142_p2), %v2255_v2  ;;  %2061 = vmatprep.subr.bf16.mxu1 (!%p142_p2), %v2255_v2 }
   0xf   : > { %s2843_s2 = smov (!%p167_p3, %s1804_s2), 255 }
  0x10   : > { %s2091_s24 = smul.u32 12, %s2843_s2 }
  0x11   : > { %1041 = vmatpush1.bf16.msra.mxu0 %v2103_v4  ;;  %2077 = vmatpush1.bf16.msra.mxu1 %v2103_v4 }
  0x12   : > { %1042 = vmatprep.subr.bf16.mxu0 %v2255_v2  ;;  %2062 = vmatprep.subr.bf16.mxu1 %v2255_v2  ;;  %s2316_s29 = scalar_lea.vmem %s2838_s0, %s2091_s24 }
  0x13   : > { %v2119_v7 = vld [vmem:[%s2316_s29 + $0x4] ss:$12 sps:$4 sm:$0xff]   ;;  %v2117_v21 = vld [vmem:[%s2316_s29] ss:$12 sps:$4 sm:$0xff]   ;;  %v2124_v23 = vld [vmem:[%s2316_s29 + $0x1c] ss:$12 sps:$4 sm:$0xff]  }
  0x14   : > { %v2122_v9 = vld [vmem:[%s2316_s29 + $0x244] ss:$12 sps:$4 sm:$0xff]   ;;  %1068 = vmatprep.mubr.bf16.mxu0 %v2119_v7  ;;  %v2120_v22 = vld [vmem:[%s2316_s29 + $0x240] ss:$12 sps:$4 sm:$0xff]   ;;  %v2126_v24 = vld [vmem:[%s2316_s29 + $0x25c] ss:$12 sps:$4 sm:$0xff]  }
  0x15   : > { %1043 = vmatpush1.bf16.msra.mxu0 %v2104_v5  ;;  %2078 = vmatpush1.bf16.msra.mxu1 %v2104_v5  ;;  %v2128_v26 = vld [vmem:[%s2316_s29 + $0x18] ss:$12 sps:$4 sm:$0xff]   ;;  %v2130_v28 = vld [vmem:[%s2316_s29 + $0x34] ss:$12 sps:$4 sm:$0xff]   ;;  %v2134_v30 = vld [vmem:[%s2316_s29 + $0x30] ss:$12 sps:$4 sm:$0xff]  }
  0x16   : > { %1044 = vmatprep.subr.bf16.mxu0 %v2255_v2  ;;  %2063 = vmatprep.subr.bf16.mxu1 %v2255_v2  ;;  %v2129_v27 = vld [vmem:[%s2316_s29 + $0x258] ss:$12 sps:$4 sm:$0xff]   ;;  %v2132_v29 = vld [vmem:[%s2316_s29 + $0x274] ss:$12 sps:$4 sm:$0xff]   ;;  %v2135_v31 = vld [vmem:[%s2316_s29 + $0x270] ss:$12 sps:$4 sm:$0xff]  }
  0x17   : > { %1260 = vmatprep.mubr.bf16.mxu1 %v2122_v9  ;;  %v2136_v32 = vld [vmem:[%s2316_s29 + $0x4c] ss:$12 sps:$4 sm:$0xff]   ;;  %v2140_v34 = vld [vmem:[%s2316_s29 + $0x48] ss:$12 sps:$4 sm:$0xff]   ;;  %v2142_v36 = vld [vmem:[%s2316_s29 + $0x64] ss:$12 sps:$4 sm:$0xff]  }
  0x18   : > { %v2138_v33 = vld [vmem:[%s2316_s29 + $0x28c] ss:$12 sps:$4 sm:$0xff]   ;;  %v2141_v35 = vld [vmem:[%s2316_s29 + $0x288] ss:$12 sps:$4 sm:$0xff]   ;;  %v2144_v37 = vld [vmem:[%s2316_s29 + $0x2a4] ss:$12 sps:$4 sm:$0xff]  }
  0x19   : > { %1045 = vmatpush1.bf16.msra.mxu0 %v2105_v6  ;;  %2079 = vmatpush1.bf16.msra.mxu1 %v2105_v6  ;;  %v2146_v38 = vld [vmem:[%s2316_s29 + $0x60] ss:$12 sps:$4 sm:$0xff]   ;;  %v2149_v40 = vld [vmem:[%s2316_s29 + $0x7c] ss:$12 sps:$4 sm:$0xff]   ;;  %v2153_v42 = vld [vmem:[%s2316_s29 + $0x78] ss:$12 sps:$4 sm:$0xff]  }
  0x1a   : > { %1046 = vmatprep.subr.bf16.mxu0 %v2255_v2  ;;  %2064 = vmatprep.subr.bf16.mxu1 %v2255_v2  ;;  %v2147_v39 = vld [vmem:[%s2316_s29 + $0x2a0] ss:$12 sps:$4 sm:$0xff]   ;;  %v2151_v41 = vld [vmem:[%s2316_s29 + $0x2bc] ss:$12 sps:$4 sm:$0xff]   ;;  %v2154_v43 = vld [vmem:[%s2316_s29 + $0x2b8] ss:$12 sps:$4 sm:$0xff]  }
  0x1b   : > { %v2155_v44 = vld [vmem:[%s2316_s29 + $0x94] ss:$12 sps:$4 sm:$0xff]   ;;  %v2159_v46 = vld [vmem:[%s2316_s29 + $0x90] ss:$12 sps:$4 sm:$0xff]   ;;  %v2161_v48 = vld [vmem:[%s2316_s29 + $0xac] ss:$12 sps:$4 sm:$0xff]  }
  0x1c   : > { %v2157_v45 = vld [vmem:[%s2316_s29 + $0x2d4] ss:$12 sps:$4 sm:$0xff]   ;;  %v2160_v47 = vld [vmem:[%s2316_s29 + $0x2d0] ss:$12 sps:$4 sm:$0xff]   ;;  %v2163_v49 = vld [vmem:[%s2316_s29 + $0x2ec] ss:$12 sps:$4 sm:$0xff]  }
  0x1d   : > { %1047 = vmatpush1.bf16.msra.mxu0 %v2106_v8  ;;  %2080 = vmatpush1.bf16.msra.mxu1 %v2106_v8  ;;  %v2165_v50 = vld [vmem:[%s2316_s29 + $0xa8] ss:$12 sps:$4 sm:$0xff]   ;;  %v2167_v52 = vld [vmem:[%s2316_s29 + $0xc4] ss:$12 sps:$4 sm:$0xff]   ;;  %v2170_v54 = vld [vmem:[%s2316_s29 + $0xc0] ss:$12 sps:$4 sm:$0xff]  }
  0x1e   : > { %1048 = vmatprep.subr.bf16.mxu0 %v2255_v2  ;;  %2065 = vmatprep.subr.bf16.mxu1 %v2255_v2  ;;  %v2166_v51 = vld [vmem:[%s2316_s29 + $0x2e8] ss:$12 sps:$4 sm:$0xff]   ;;  %v2171_v55 = vld [vmem:[%s2316_s29 + $0x20] ss:$12 sps:$4 sm:$0xff]   ;;  %v2174_v57 = vld [vmem:[%s2316_s29 + $0x38] ss:$12 sps:$4 sm:$0xff]  }
  0x1f   : > { %v2169_v53 = vld [vmem:[%s2316_s29 + $0x8] ss:$12 sps:$4 sm:$0xff]   ;;  %v2175_v58 = vld [vmem:[%s2316_s29 + $0xd8] ss:$12 sps:$4 sm:$0xff]   ;;  %v2176_v59 = vld [vmem:[%s2316_s29 + $0x50] ss:$12 sps:$4 sm:$0xff]  }
  0x20   : > { %v2172_v56 = vld [vmem:[%s2316_s29 + $0xdc] ss:$12 sps:$4 sm:$0xff]   ;;  %v2177_v60 = vld [vmem:[%s2316_s29 + $0xf4] ss:$12 sps:$4 sm:$0xff]   ;;  %v2182_v0 = vld [vmem:[%s2316_s29 + $0x10c] ss:$12 sps:$4 sm:$0xff]  }
  0x21   : > { %1049 = vmatpush1.bf16.msra.mxu0 %v2107_v10  ;;  %2081 = vmatpush1.bf16.msra.mxu1 %v2107_v10  ;;  %v2179_v61 = vld [vmem:[%s2316_s29 + $0x68] ss:$12 sps:$4 sm:$0xff]   ;;  %v2180_v62 = vld [vmem:[%s2316_s29 + $0xf0] ss:$12 sps:$4 sm:$0xff]   ;;  %v2181_v63 = vld [vmem:[%s2316_s29 + $0x80] ss:$12 sps:$4 sm:$0xff]  }
  0x22   : > { %1050 = vmatprep.subr.bf16.mxu0 %v2255_v2  ;;  %2066 = vmatprep.subr.bf16.mxu1 %v2255_v2  ;;  %v2184_v1 = vld [vmem:[%s2316_s29 + $0x98] ss:$12 sps:$4 sm:$0xff]   ;;  %v2186_v3 = vld [vmem:[%s2316_s29 + $0xb0] ss:$12 sps:$4 sm:$0xff]   ;;  %v2189_v5 = vld [vmem:[%s2316_s29 + $0xc8] ss:$12 sps:$4 sm:$0xff]  }
  0x23   : > { %v2187_v4 = vld [vmem:[%s2316_s29 + $0x124] ss:$12 sps:$4 sm:$0xff]   ;;  %v2190_v6 = vld [vmem:[%s2316_s29 + $0x120] ss:$12 sps:$4 sm:$0xff]   ;;  %v2192_v8 = vld [vmem:[%s2316_s29 + $0x13c] ss:$12 sps:$4 sm:$0xff]  }
  0x24   : > { %v2191_v7 = vld [vmem:[%s2316_s29 + $0xe0] ss:$12 sps:$4 sm:$0xff]   ;;  %v2194_v9 = vld [vmem:[%s2316_s29 + $0xf8] ss:$12 sps:$4 sm:$0xff]  }
  0x25   : > { %1051 = vmatpush1.bf16.msra.mxu0 %v2108_v11  ;;  %2082 = vmatpush1.bf16.msra.mxu1 %v2108_v11  ;;  %v2195_v10 = vld [vmem:[%s2316_s29 + $0x138] ss:$12 sps:$4 sm:$0xff]   ;;  %v2196_v11 = vld [vmem:[%s2316_s29 + $0x110] ss:$12 sps:$4 sm:$0xff]  }
  0x26   : > { %1052 = vmatprep.subr.bf16.mxu0 %v2255_v2  ;;  %2067 = vmatprep.subr.bf16.mxu1 %v2255_v2 }
  0x29   : > { %1053 = vmatpush1.bf16.msra.mxu0 %v2109_v12  ;;  %2083 = vmatpush1.bf16.msra.mxu1 %v2109_v12  ;;  %v2197_v12 = vld [vmem:[%s2316_s29 + $0x154] ss:$12 sps:$4 sm:$0xff]  }
  0x2a   : > { %1054 = vmatprep.subr.bf16.mxu0 %v2255_v2  ;;  %2068 = vmatprep.subr.bf16.mxu1 %v2255_v2 }
  0x2d   : > { %1055 = vmatpush1.bf16.msra.mxu0 %v2110_v13  ;;  %2084 = vmatpush1.bf16.msra.mxu1 %v2110_v13  ;;  %v2199_v13 = vld [vmem:[%s2316_s29 + $0x128] ss:$12 sps:$4 sm:$0xff]  }
  0x2e   : > { %1056 = vmatprep.subr.bf16.mxu0 %v2255_v2  ;;  %2069 = vmatprep.subr.bf16.mxu1 %v2255_v2 }
  0x31   : > { %1057 = vmatpush1.bf16.msra.mxu0 %v2111_v14  ;;  %2085 = vmatpush1.bf16.msra.mxu1 %v2111_v14  ;;  %v2200_v14 = vld [vmem:[%s2316_s29 + $0x150] ss:$12 sps:$4 sm:$0xff]  }
  0x32   : > { %1058 = vmatprep.subr.bf16.mxu0 %v2255_v2  ;;  %2070 = vmatprep.subr.bf16.mxu1 %v2255_v2 }
  0x35   : > { %1059 = vmatpush1.bf16.msra.mxu0 %v2112_v15  ;;  %2086 = vmatpush1.bf16.msra.mxu1 %v2112_v15  ;;  %v2201_v15 = vld [vmem:[%s2316_s29 + $0x140] ss:$12 sps:$4 sm:$0xff]  }
  0x36   : > { %1060 = vmatprep.subr.bf16.mxu0 %v2255_v2  ;;  %2071 = vmatprep.subr.bf16.mxu1 %v2255_v2 }
  0x39   : > { %1061 = vmatpush1.bf16.msra.mxu0 %v2113_v16  ;;  %2087 = vmatpush1.bf16.msra.mxu1 %v2113_v16  ;;  %v2202_v16 = vld [vmem:[%s2316_s29 + $0x16c] ss:$12 sps:$4 sm:$0xff]  }
  0x3a   : > { %1062 = vmatprep.subr.bf16.mxu0 %v2255_v2  ;;  %2072 = vmatprep.subr.bf16.mxu1 %v2255_v2 }
  0x3d   : > { %1063 = vmatpush1.bf16.msra.mxu0 %v2114_v17  ;;  %2088 = vmatpush1.bf16.msra.mxu1 %v2114_v17  ;;  %v2204_v17 = vld [vmem:[%s2316_s29 + $0x158] ss:$12 sps:$4 sm:$0xff]  }
  0x3e   : > { %1064 = vmatprep.subr.bf16.mxu0 %v2255_v2  ;;  %2073 = vmatprep.subr.bf16.mxu1 %v2255_v2 }
  0x41   : > { %1065 = vmatpush1.bf16.msra.mxu0 %v2115_v18  ;;  %2089 = vmatpush1.bf16.msra.mxu1 %v2115_v18  ;;  %v2205_v18 = vld [vmem:[%s2316_s29 + $0x168] ss:$12 sps:$4 sm:$0xff]  }
  0x42   : > { %1066 = vmatprep.subr.bf16.mxu0 %v2255_v2  ;;  %2074 = vmatprep.subr.bf16.mxu1 %v2255_v2  ;;  %v2185_v2 = vld [vmem:[%s2316_s29 + $0x108] ss:$12 sps:$4 sm:$0xff]  }
  0x45   : > { %1067 = vmatpush1.bf16.msra.mxu0 %v2116_v19  ;;  %2090 = vmatpush1.bf16.msra.mxu1 %v2116_v19  ;;  %v2206_v19 = vld [vmem:[%s2316_s29 + $0x170] ss:$12 sps:$4 sm:$0xff]  }
  0x46   : > { %1991 = vmatprep.subr.bf16.mxu1 %v2123_v20 }
  0x48   : > { %1069 = vmatmul.mubr.bf16.vlgmr.msra.gmra.mrb[0].mxu0 %v2117_v21  ;;  %1261 = vmatmul.mubr.bf16.vlgmr.msra.gmra.mrb[0].mxu1 %v2120_v22  ;;  %v2209_v21 = vld [vmem:[%s2316_s29 + $0x188] ss:$12 sps:$4 sm:$0xff]   ;;  %v2210_v22 = vld [vmem:[%s2316_s29 + $0x180] ss:$12 sps:$4 sm:$0xff]  }
  0x49   : > { %1992 = vmatpush3.bf16.msra.mxu1 %v2123_v20  ;;  %1076 = vmatprep.mubr.bf16.mxu0 %v2124_v23  ;;  %v2207_v20 = vld [vmem:[%s2316_s29 + $0x184] ss:$12 sps:$4 sm:$0xff]   ;;  %v2211_v23 = vld [vmem:[%s2316_s29 + $0x1a0] ss:$12 sps:$4 sm:$0xff]  }
  0x4a   : > { %1268 = vmatprep.mubr.bf16.mxu1 %v2126_v24  ;;  %1993 = vmatprep.subr.bf16.mxu1 %v2148_v25  ;;  %v2212_v24 = vld [vmem:[%s2316_s29 + $0x19c] ss:$12 sps:$4 sm:$0xff]  }
  0x4d   : > { %1994 = vmatpush3.bf16.msra.mxu1 %v2148_v25  ;;  %v2214_v25 = vld [vmem:[%s2316_s29 + $0x1b8] ss:$12 sps:$4 sm:$0xff]  }
  0x50   : > { %1077 = vmatmul.mubr.bf16.gmra.mrb[4].mxu0 %v2128_v26  ;;  %1269 = vmatmul.mubr.bf16.gmra.mrb[4].mxu1 %v2129_v27  ;;  %v2215_v26 = vld [vmem:[%s2316_s29 + $0x198] ss:$12 sps:$4 sm:$0xff]   ;;  %v2216_v27 = vld [vmem:[%s2316_s29 + $0x1d0] ss:$12 sps:$4 sm:$0xff]  }
  0x51   : > { %1084 = vmatprep.mubr.bf16.mxu0 %v2130_v28  ;;  %1276 = vmatprep.mubr.bf16.mxu1 %v2132_v29  ;;  %v2217_v28 = vld [vmem:[%s2316_s29 + $0x1b4] ss:$12 sps:$4 sm:$0xff]  }
  0x52   : > { %v2219_v29 = vld [vmem:[%s2316_s29 + $0x1e8] ss:$12 sps:$4 sm:$0xff]  }
  0x58   : > { %1085 = vmatmul.mubr.bf16.gmra.mrb[8].mxu0 %v2134_v30  ;;  %1277 = vmatmul.mubr.bf16.gmra.mrb[8].mxu1 %v2135_v31  ;;  %v2220_v30 = vld [vmem:[%s2316_s29 + $0x1b0] ss:$12 sps:$4 sm:$0xff]   ;;  %v2221_v31 = vld [vmem:[%s2316_s29 + $0x200] ss:$12 sps:$4 sm:$0xff]  }
  0x59   : > { %1092 = vmatprep.mubr.bf16.mxu0 %v2136_v32  ;;  %1284 = vmatprep.mubr.bf16.mxu1 %v2138_v33  ;;  %v2222_v32 = vld [vmem:[%s2316_s29 + $0x1cc] ss:$12 sps:$4 sm:$0xff]  }
  0x5a   : > { %v2224_v33 = vld [vmem:[%s2316_s29 + $0x218] ss:$12 sps:$4 sm:$0xff]  }
  0x60   : > { %1093 = vmatmul.mubr.bf16.gmra.mrb[12].mxu0 %v2140_v34  ;;  %1285 = vmatmul.mubr.bf16.gmra.mrb[12].mxu1 %v2141_v35  ;;  %v2225_v34 = vld [vmem:[%s2316_s29 + $0x1c8] ss:$12 sps:$4 sm:$0xff]   ;;  %v2226_v35 = vld [vmem:[%s2316_s29 + $0x230] ss:$12 sps:$4 sm:$0xff]  }
  0x61   : > { %1100 = vmatprep.mubr.bf16.mxu0 %v2142_v36  ;;  %1292 = vmatprep.mubr.bf16.mxu1 %v2144_v37  ;;  %v2227_v36 = vld [vmem:[%s2316_s29 + $0x1e4] ss:$12 sps:$4 sm:$0xff]   ;;  %v2229_v37 = vld [vmem:[%s2316_s29 + $0x248] ss:$12 sps:$4 sm:$0xff]  }
  0x68   : > { %1101 = vmatmul.mubr.bf16.gmra.mrb[16].mxu0 %v2146_v38  ;;  %1293 = vmatmul.mubr.bf16.gmra.mrb[16].mxu1 %v2147_v39  ;;  %v2230_v38 = vld [vmem:[%s2316_s29 + $0x1e0] ss:$12 sps:$4 sm:$0xff]  }
  0x69   : > { %1108 = vmatprep.mubr.bf16.mxu0 %v2149_v40  ;;  %1300 = vmatprep.mubr.bf16.mxu1 %v2151_v41  ;;  %v2231_v39 = vld [vmem:[%s2316_s29 + $0x260] ss:$12 sps:$4 sm:$0xff]   ;;  %v2232_v40 = vld [vmem:[%s2316_s29 + $0x1fc] ss:$12 sps:$4 sm:$0xff]   ;;  %v2234_v41 = vld [vmem:[%s2316_s29 + $0x278] ss:$12 sps:$4 sm:$0xff]  }
  0x70   : > { %1109 = vmatmul.mubr.bf16.gmra.mrb[20].mxu0 %v2153_v42  ;;  %1301 = vmatmul.mubr.bf16.gmra.mrb[20].mxu1 %v2154_v43  ;;  %v2235_v42 = vld [vmem:[%s2316_s29 + $0x1f8] ss:$12 sps:$4 sm:$0xff]   ;;  %v2236_v43 = vld [vmem:[%s2316_s29 + $0x290] ss:$12 sps:$4 sm:$0xff]  }
  0x71   : > { %1116 = vmatprep.mubr.bf16.mxu0 %v2155_v44  ;;  %1308 = vmatprep.mubr.bf16.mxu1 %v2157_v45  ;;  %v2237_v44 = vld [vmem:[%s2316_s29 + $0x214] ss:$12 sps:$4 sm:$0xff]  }
  0x72   : > { %v2239_v45 = vld [vmem:[%s2316_s29 + $0x2a8] ss:$12 sps:$4 sm:$0xff]  }
  0x78   : > { %1117 = vmatmul.mubr.bf16.gmra.mrb[24].mxu0 %v2159_v46  ;;  %1309 = vmatmul.mubr.bf16.gmra.mrb[24].mxu1 %v2160_v47  ;;  %v2240_v46 = vld [vmem:[%s2316_s29 + $0x210] ss:$12 sps:$4 sm:$0xff]   ;;  %v2241_v47 = vld [vmem:[%s2316_s29 + $0x2c0] ss:$12 sps:$4 sm:$0xff]  }
  0x79   : > { %1124 = vmatprep.mubr.bf16.mxu0 %v2161_v48  ;;  %1316 = vmatprep.mubr.bf16.mxu1 %v2163_v49  ;;  %v2242_v48 = vld [vmem:[%s2316_s29 + $0x22c] ss:$12 sps:$4 sm:$0xff]  }
  0x7a   : > { %v2244_v49 = vld [vmem:[%s2316_s29 + $0x2d8] ss:$12 sps:$4 sm:$0xff]  }
  0x80   : > { %1125 = vmatmul.mubr.bf16.gmra.mrb[28].mxu0 %v2165_v50  ;;  %1317 = vmatmul.mubr.bf16.gmra.mrb[28].mxu1 %v2166_v51  ;;  %v2245_v50 = vld [vmem:[%s2316_s29 + $0x228] ss:$12 sps:$4 sm:$0xff]   ;;  %v2246_v51 = vld [vmem:[%s2316_s29 + $0x2f0] ss:$12 sps:$4 sm:$0xff]   ;;  %s1807_s29 = sshll.u32 %s2843_s2, 3 }
  0x81   : > { %1132 = vmatprep.mubr.bf16.mxu0 %v2167_v52  ;;  %1995 = vmatprep.mubr.msk.bf16.mxu1 %vm939_vm0, %v2169_v53  ;;  %s2583_s6 = scalar_lea.vmem %s2841_s3, %s1807_s29 }
  0x88   : > { %1133 = vmatmul.mubr.bf16.gmra.mrb[32].mxu0 %v2170_v54  ;;  %1996 = vmatmul.mubr.msk.bf16.vlgmr.msra.gmra.mrb[32].mxu1 %vm939_vm0, %v2171_v55 }
  0x89   : > { %1140 = vmatprep.mubr.bf16.mxu0 %v2172_v56  ;;  %1999 = vmatprep.mubr.msk.bf16.mxu1 %vm939_vm0, %v2174_v57 }
  0x90   : > { %1141 = vmatmul.mubr.bf16.gmra.mrb[36].mxu0 %v2175_v58  ;;  %2000 = vmatmul.mubr.msk.bf16.gmra.mrb[36].mxu1 %vm939_vm0, %v2176_v59 }
  0x91   : > { %1148 = vmatprep.mubr.bf16.mxu0 %v2177_v60  ;;  %2003 = vmatprep.mubr.msk.bf16.mxu1 %vm939_vm0, %v2179_v61 }
  0x98   : > { %1149 = vmatmul.mubr.bf16.gmra.mrb[40].mxu0 %v2180_v62  ;;  %2004 = vmatmul.mubr.msk.bf16.gmra.mrb[40].mxu1 %vm939_vm0, %v2181_v63 }
  0x99   : > { %1156 = vmatprep.mubr.bf16.mxu0 %v2182_v0  ;;  %2007 = vmatprep.mubr.msk.bf16.mxu1 %vm939_vm0, %v2184_v1 }
  0xa0   : > { %1157 = vmatmul.mubr.bf16.gmra.mrb[44].mxu0 %v2185_v2  ;;  %2008 = vmatmul.mubr.msk.bf16.gmra.mrb[44].mxu1 %vm939_vm0, %v2186_v3 }
  0xa1   : > { %1164 = vmatprep.mubr.bf16.mxu0 %v2187_v4  ;;  %2011 = vmatprep.mubr.msk.bf16.mxu1 %vm939_vm0, %v2189_v5 }
  0xa8   : > { %1165 = vmatmul.mubr.bf16.gmra.mrb[48].mxu0 %v2190_v6  ;;  %2012 = vmatmul.mubr.msk.bf16.gmra.mrb[48].mxu1 %vm939_vm0, %v2191_v7 }
  0xa9   : > { %1172 = vmatprep.mubr.bf16.mxu0 %v2192_v8  ;;  %2015 = vmatprep.mubr.msk.bf16.mxu1 %vm939_vm0, %v2194_v9 }
  0xb0   : > { %1173 = vmatmul.mubr.bf16.gmra.mrb[52].mxu0 %v2195_v10  ;;  %2016 = vmatmul.mubr.msk.bf16.gmra.mrb[52].mxu1 %vm939_vm0, %v2196_v11 }
  0xb1   : > { %1180 = vmatprep.mubr.bf16.mxu0 %v2197_v12  ;;  %2019 = vmatprep.mubr.msk.bf16.mxu1 %vm939_vm0, %v2199_v13 }
  0xb8   : > { %1181 = vmatmul.mubr.bf16.gmra.mrb[56].mxu0 %v2200_v14  ;;  %2020 = vmatmul.mubr.msk.bf16.gmra.mrb[56].mxu1 %vm939_vm0, %v2201_v15 }
  0xb9   : > { %1188 = vmatprep.mubr.bf16.mxu0 %v2202_v16  ;;  %2023 = vmatprep.mubr.msk.bf16.mxu1 %vm939_vm0, %v2204_v17 }
  0xc0   : > { %1189 = vmatmul.mubr.bf16.gmra.mrb[60].mxu0 %v2205_v18  ;;  %2024 = vmatmul.mubr.msk.bf16.gmra.mrb[60].mxu1 %vm939_vm0, %v2206_v19 }
  0xc1   : > { %1196 = vmatprep.mubr.bf16.mxu0 %v2207_v20  ;;  %2027 = vmatprep.mubr.msk.bf16.mxu1 %vm939_vm0, %v2209_v21 }
  0xc8   : > { %1197 = vmatmul.mubr.bf16.gmra.mrb[64].mxu0 %v2210_v22  ;;  %2028 = vmatmul.mubr.msk.bf16.gmra.mrb[64].mxu1 %vm939_vm0, %v2211_v23 }
  0xc9   : > { %1204 = vmatprep.mubr.bf16.mxu0 %v2212_v24  ;;  %2031 = vmatprep.mubr.msk.bf16.mxu1 %vm939_vm0, %v2214_v25 }
  0xd0   : > { %1205 = vmatmul.mubr.bf16.gmra.mrb[68].mxu0 %v2215_v26  ;;  %2032 = vmatmul.mubr.msk.bf16.gmra.mrb[68].mxu1 %vm939_vm0, %v2216_v27 }
  0xd1   : > { %1212 = vmatprep.mubr.bf16.mxu0 %v2217_v28  ;;  %2035 = vmatprep.mubr.msk.bf16.mxu1 %vm939_vm0, %v2219_v29 }
  0xd8   : > { %1213 = vmatmul.mubr.bf16.gmra.mrb[72].mxu0 %v2220_v30  ;;  %2036 = vmatmul.mubr.msk.bf16.gmra.mrb[72].mxu1 %vm939_vm0, %v2221_v31 }
  0xd9   : > { %1220 = vmatprep.mubr.bf16.mxu0 %v2222_v32  ;;  %2039 = vmatprep.mubr.msk.bf16.mxu1 %vm939_vm0, %v2224_v33 }
  0xe0   : > { %1221 = vmatmul.mubr.bf16.gmra.mrb[76].mxu0 %v2225_v34  ;;  %2040 = vmatmul.mubr.msk.bf16.gmra.mrb[76].mxu1 %vm939_vm0, %v2226_v35 }
  0xe1   : > { %1228 = vmatprep.mubr.bf16.mxu0 %v2227_v36  ;;  %2043 = vmatprep.mubr.msk.bf16.mxu1 %vm939_vm0, %v2229_v37 }
  0xe8   : > { %1229 = vmatmul.mubr.bf16.gmra.mrb[80].mxu0 %v2230_v38  ;;  %2044 = vmatmul.mubr.msk.bf16.gmra.mrb[80].mxu1 %vm939_vm0, %v2231_v39 }
  0xe9   : > { %1236 = vmatprep.mubr.bf16.mxu0 %v2232_v40  ;;  %2047 = vmatprep.mubr.msk.bf16.mxu1 %vm939_vm0, %v2234_v41 }
  0xf0   : > { %1237 = vmatmul.mubr.bf16.gmra.mrb[84].mxu0 %v2235_v42  ;;  %2048 = vmatmul.mubr.msk.bf16.gmra.mrb[84].mxu1 %vm939_vm0, %v2236_v43 }
  0xf1   : > { %1244 = vmatprep.mubr.bf16.mxu0 %v2237_v44  ;;  %2051 = vmatprep.mubr.msk.bf16.mxu1 %vm939_vm0, %v2239_v45 }
  0xf8   : > { %1245 = vmatmul.mubr.bf16.gmra.mrb[88].mxu0 %v2240_v46  ;;  %2052 = vmatmul.mubr.msk.bf16.gmra.mrb[88].mxu1 %vm939_vm0, %v2241_v47 }
  0xf9   : > { %1252 = vmatprep.mubr.bf16.mxu0 %v2242_v48  ;;  %2055 = vmatprep.mubr.msk.bf16.mxu1 %vm939_vm0, %v2244_v49 }
 0x100   : > { %1253 = vmatmul.mubr.bf16.gmra.mrb[92].mxu0 %v2245_v50  ;;  %2056 = vmatmul.mubr.msk.bf16.gmra.mrb[92].mxu1 %vm939_vm0, %v2246_v51 }
 0x11b   : > { %v2509_v52 = vpop.f32.mrb[0].mxu0  ;;  %v2511_v53 = vpop.f32.mrb[0].mxu1 }
 0x11c   : > { %v1072_v54 = vpop.f32.mrb[1].mxu0  ;;  %v1264_v55 = vpop.f32.mrb[1].mxu1 }
 0x11d   : > { %v2513_v56 = vpop.f32.mrb[2].mxu0  ;;  %v2515_v57 = vpop.f32.mrb[2].mxu1  ;;  %v2569_v54 = vld [vmem:[#allocation2] ss:$0 sm:$0xff] }
 0x11e   : > { %v1075_v58 = vpop.f32.mrb[3].mxu0  ;;  %v1267_v59 = vpop.f32.mrb[3].mxu1 }
 0x11f   : > { %v1071_v58 = vadd.f32 %v2569_v54, %v2509_v52 }
 0x123   : > { %v1078_v60 = vpop.f32.mrb[4].mxu0  ;;  %v2517_v61 = vpop.f32.mrb[4].mxu1 }
 0x124   : > { %v1080_v62 = vpop.f32.mrb[5].mxu0  ;;  %v1272_v63 = vpop.f32.mrb[5].mxu1  ;;  %v1079_v55 = vadd.f32 %v2569_v54, %v1078_v60 }
 0x125   : > { %v1081_v0 = vpop.f32.mrb[6].mxu0  ;;  %v2519_v1 = vpop.f32.mrb[6].mxu1 }
 0x126   : > { %v1083_v2 = vpop.f32.mrb[7].mxu0  ;;  %v1275_v3 = vpop.f32.mrb[7].mxu1  ;;  %v1082_v63 = vadd.f32 %v2569_v54, %v1081_v0 }
 0x12b   : > { %v2521_v4 = vpop.f32.mrb[8].mxu0  ;;  %v2523_v5 = vpop.f32.mrb[8].mxu1 }
 0x12c   : > { %v1088_v6 = vpop.f32.mrb[9].mxu0  ;;  %v1280_v7 = vpop.f32.mrb[9].mxu1 }
 0x12d   : > { %v2525_v8 = vpop.f32.mrb[10].mxu0  ;;  %v2527_v9 = vpop.f32.mrb[10].mxu1  ;;  %v1074_v7 = vadd.f32 %v2569_v54, %v2513_v56 }
 0x12e   : > { %v1091_v10 = vpop.f32.mrb[11].mxu0  ;;  %v1283_v11 = vpop.f32.mrb[11].mxu1 }
 0x133   : > { %v2529_v12 = vpop.f32.mrb[12].mxu0  ;;  %v2531_v13 = vpop.f32.mrb[12].mxu1 }
 0x134   : > { %v1096_v14 = vpop.f32.mrb[13].mxu0  ;;  %v1288_v15 = vpop.f32.mrb[13].mxu1 }
 0x135   : > { %v2533_v16 = vpop.f32.mrb[14].mxu0  ;;  %v2535_v17 = vpop.f32.mrb[14].mxu1 }
 0x136   : > { %v1099_v18 = vpop.f32.mrb[15].mxu0  ;;  %v1291_v19 = vpop.f32.mrb[15].mxu1 }
 0x13b   : > { %v2537_v20 = vpop.f32.mrb[16].mxu0  ;;  %v2539_v21 = vpop.f32.mrb[16].mxu1 }
 0x13c   : > { %v1104_v22 = vpop.f32.mrb[17].mxu0  ;;  %v1296_v23 = vpop.f32.mrb[17].mxu1 }
 0x13d   : > { %v2541_v24 = vpop.f32.mrb[18].mxu0  ;;  %v2543_v25 = vpop.f32.mrb[18].mxu1  ;;  %v1095_v23 = vadd.f32 %v2569_v54, %v2529_v12  ;;  %v1090_v12 = vadd.f32 %v2569_v54, %v2525_v8 }
 0x13e   : > { %v1107_v26 = vpop.f32.mrb[19].mxu0  ;;  %v1299_v27 = vpop.f32.mrb[19].mxu1 }
 0x13f   : > { %v1087_v26 = vadd.f32 %v2569_v54, %v2521_v4 }
 0x143   : > { %v2545_v28 = vpop.f32.mrb[20].mxu0  ;;  %v2547_v29 = vpop.f32.mrb[20].mxu1 }
 0x144   : > { %v1112_v30 = vpop.f32.mrb[21].mxu0  ;;  %v1304_v31 = vpop.f32.mrb[21].mxu1  ;;  %v1111_v8 = vadd.f32 %v2569_v54, %v2545_v28  ;;  %v1106_v28 = vadd.f32 %v2569_v54, %v2541_v24 }
 0x145   : > { %v2549_v32 = vpop.f32.mrb[22].mxu0  ;;  %v2551_v33 = vpop.f32.mrb[22].mxu1  ;;  %v1098_v31 = vadd.f32 %v2569_v54, %v2533_v16 }
 0x146   : > { %v1115_v34 = vpop.f32.mrb[23].mxu0  ;;  %v1307_v35 = vpop.f32.mrb[23].mxu1 }
 0x14b   : > { %v2553_v36 = vpop.f32.mrb[24].mxu0  ;;  %v2555_v37 = vpop.f32.mrb[24].mxu1 }
 0x14c   : > { %v1120_v38 = vpop.f32.mrb[25].mxu0  ;;  %v1312_v39 = vpop.f32.mrb[25].mxu1 }
 0x14d   : > { %v2557_v40 = vpop.f32.mrb[26].mxu0  ;;  %v2559_v41 = vpop.f32.mrb[26].mxu1 }
 0x14e   : > { %v1123_v42 = vpop.f32.mrb[27].mxu0  ;;  %v1315_v43 = vpop.f32.mrb[27].mxu1 }
 0x153   : > { %v2561_v44 = vpop.f32.mrb[28].mxu0  ;;  %v2563_v45 = vpop.f32.mrb[28].mxu1 }
 0x154   : > { %v1128_v46 = vpop.f32.mrb[29].mxu0  ;;  %v1320_v47 = vpop.f32.mrb[29].mxu1  ;;  %v1127_v24 = vadd.f32 %v2569_v54, %v2561_v44  ;;  %v1122_v44 = vadd.f32 %v2569_v54, %v2557_v40 }
 0x155   : > { %v2565_v48 = vpop.f32.mrb[30].mxu0  ;;  %v2567_v49 = vpop.f32.mrb[30].mxu1 }
 0x156   : > { %v1131_v50 = vpop.f32.mrb[31].mxu0  ;;  %v1323_v51 = vpop.f32.mrb[31].mxu1 }
 0x15b   : > { %v2575_v59 = vpop.f32.mrb[32].mxu0  ;;  %v1997_v62 = vpop.f32.mrb[32].mxu1 }
 0x15c   : > { %v1368_v2 = vadd.f32 %v1997_v62, %v1079_v55  ;;  %v1136_v3 = vpop.f32.mrb[33].mxu0  ;;  %v1359_v6 = vpop.f32.mrb[33].mxu1  ;;  %v1103_v62 = vadd.f32 %v2569_v54, %v2537_v20  ;;  %v1135_v40 = vadd.f32 %v2569_v54, %v2575_v59 }
 0x15d   : > { %v1360_v52 = vadd.f32 %v1359_v6, %v1071_v58  ;;  %v2585_v60 = vpop.f32.mrb[34].mxu0  ;;  %v1998_v0 = vpop.f32.mrb[34].mxu1  ;;  %v1114_v3 = vadd.f32 %v2569_v54, %v2549_v32 }
 0x15e   : > { %v1616_v10 = vmax.f32 %v1368_v2, 0.0  ;;  %v1371_v11 = vadd.f32 %v1998_v0, %v1082_v63  ;;  %v1139_v14 = vpop.f32.mrb[35].mxu0  ;;  %v1362_v15 = vpop.f32.mrb[35].mxu1 }
 0x15f   : > { %v1614_v18 = vmax.f32 %v1360_v52, 0.0  ;;  %v1363_v56 = vadd.f32 %v1362_v15, %v1074_v7 }
 0x160   : > { %1681 = vst.msk [vmem:[%s2583_s6 + $0x10] sm:$0xff] %vm1678_vm1, %v1616_v10  ;;  %v1617_v19 = vmax.f32 %v1371_v11, 0.0 }
 0x161   : > { %1679 = vst.msk [vmem:[%s2583_s6] sm:$0xff] %vm1678_vm1, %v1614_v18  ;;  %v1615_v22 = vmax.f32 %v1363_v56, 0.0 }
 0x162   : > { %1682 = vst.msk [vmem:[%s2583_s6 + $0x18] sm:$0xff] %vm1678_vm1, %v1617_v19 }
 0x163   : > { %1680 = vst.msk [vmem:[%s2583_s6 + $0x8] sm:$0xff] %vm1678_vm1, %v1615_v22  ;;  %v2599_v27 = vpop.f32.mrb[36].mxu0  ;;  %v2001_v30 = vpop.f32.mrb[36].mxu1 }
 0x164   : > { %v1384_v34 = vadd.f32 %v2001_v30, %v1095_v23  ;;  %v1144_v35 = vpop.f32.mrb[37].mxu0  ;;  %v1375_v38 = vpop.f32.mrb[37].mxu1  ;;  %v1119_v23 = vadd.f32 %v2569_v54, %v2553_v36 }
 0x165   : > { %v1376_v39 = vadd.f32 %v1375_v38, %v1087_v26  ;;  %v2605_v4 = vpop.f32.mrb[38].mxu0  ;;  %v2002_v42 = vpop.f32.mrb[38].mxu1 }
 0x166   : > { %v1620_v43 = vmax.f32 %v1384_v34, 0.0  ;;  %v1387_v46 = vadd.f32 %v2002_v42, %v1098_v31  ;;  %v1147_v47 = vpop.f32.mrb[39].mxu0  ;;  %v1378_v50 = vpop.f32.mrb[39].mxu1  ;;  %v1130_v31 = vadd.f32 %v2569_v54, %v2565_v48 }
 0x167   : > { %v1618_v51 = vmax.f32 %v1376_v39, 0.0  ;;  %v1379_v55 = vadd.f32 %v1378_v50, %v1090_v12 }
 0x168   : > { %1685 = vst.msk [vmem:[%s2583_s6 + $0x30] sm:$0xff] %vm1678_vm1, %v1620_v43  ;;  %v1621_v16 = vmax.f32 %v1387_v46, 0.0 }
 0x169   : > { %1683 = vst.msk [vmem:[%s2583_s6 + $0x20] sm:$0xff] %vm1678_vm1, %v1618_v51  ;;  %v1619_v58 = vmax.f32 %v1379_v55, 0.0 }
 0x16a   : > { %1686 = vst.msk [vmem:[%s2583_s6 + $0x38] sm:$0xff] %vm1678_vm1, %v1621_v16  ;;  %v1143_v16 = vadd.f32 %v2569_v54, %v2599_v27  ;;  %v1138_v27 = vadd.f32 %v2569_v54, %v2585_v60 }
 0x16b   : > { %1684 = vst.msk [vmem:[%s2583_s6 + $0x28] sm:$0xff] %vm1678_vm1, %v1619_v58  ;;  %v2619_v63 = vpop.f32.mrb[40].mxu0  ;;  %v2005_v2 = vpop.f32.mrb[40].mxu1 }
 0x16c   : > { %v1400_v6 = vadd.f32 %v2005_v2, %v1111_v8  ;;  %v1152_v7 = vpop.f32.mrb[41].mxu0  ;;  %v1391_v52 = vpop.f32.mrb[41].mxu1  ;;  %v1151_v60 = vadd.f32 %v2569_v54, %v2619_v63 }
 0x16d   : > { %v1392_v0 = vadd.f32 %v1391_v52, %v1103_v62  ;;  %v2625_v20 = vpop.f32.mrb[42].mxu0  ;;  %v2006_v10 = vpop.f32.mrb[42].mxu1  ;;  %v1146_v62 = vadd.f32 %v2569_v54, %v2605_v4 }
 0x16e   : > { %v1624_v11 = vmax.f32 %v1400_v6, 0.0  ;;  %v1403_v14 = vadd.f32 %v2006_v10, %v1114_v3  ;;  %v1155_v15 = vpop.f32.mrb[43].mxu0  ;;  %v1394_v18 = vpop.f32.mrb[43].mxu1 }
 0x16f   : > { %v1622_v56 = vmax.f32 %v1392_v0, 0.0  ;;  %v1395_v19 = vadd.f32 %v1394_v18, %v1106_v28 }
 0x170   : > { %1689 = vst.msk [vmem:[%s2583_s6 + $0x50] sm:$0xff] %vm1678_vm1, %v1624_v11  ;;  %v1625_v32 = vmax.f32 %v1403_v14, 0.0 }
 0x171   : > { %1687 = vst.msk [vmem:[%s2583_s6 + $0x40] sm:$0xff] %vm1678_vm1, %v1622_v56  ;;  %v1623_v22 = vmax.f32 %v1395_v19, 0.0 }
 0x172   : > { %1690 = vst.msk [vmem:[%s2583_s6 + $0x58] sm:$0xff] %vm1678_vm1, %v1625_v32 }
 0x173   : > { %1688 = vst.msk [vmem:[%s2583_s6 + $0x48] sm:$0xff] %vm1678_vm1, %v1623_v22  ;;  %v1158_v26 = vpop.f32.mrb[44].mxu0  ;;  %v2009_v30 = vpop.f32.mrb[44].mxu1 }
 0x174   : > { %v1416_v34 = vadd.f32 %v2009_v30, %v1127_v24  ;;  %v1160_v35 = vpop.f32.mrb[45].mxu0  ;;  %v1407_v38 = vpop.f32.mrb[45].mxu1  ;;  %v1159_v56 = vadd.f32 %v2569_v54, %v1158_v26  ;;  %v1154_v26 = vadd.f32 %v2569_v54, %v2625_v20 }
 0x175   : > { %v1408_v12 = vadd.f32 %v1407_v38, %v1119_v23  ;;  %v1161_v39 = vpop.f32.mrb[46].mxu0  ;;  %v2010_v36 = vpop.f32.mrb[46].mxu1 }
 0x176   : > { %v1628_v42 = vmax.f32 %v1416_v34, 0.0  ;;  %v1419_v43 = vadd.f32 %v2010_v36, %v1130_v31  ;;  %v1163_v46 = vpop.f32.mrb[47].mxu0  ;;  %v1410_v47 = vpop.f32.mrb[47].mxu1  ;;  %v1162_v22 = vadd.f32 %v2569_v54, %v1161_v39 }
 0x177   : > { %v1626_v50 = vmax.f32 %v1408_v12, 0.0  ;;  %v1411_v51 = vadd.f32 %v1410_v47, %v1122_v44 }
 0x178   : > { %1693 = vst.msk [vmem:[%s2583_s6 + $0x70] sm:$0xff] %vm1678_vm1, %v1628_v42  ;;  %v1629_v48 = vmax.f32 %v1419_v43, 0.0 }
 0x179   : > { %1691 = vst.msk [vmem:[%s2583_s6 + $0x60] sm:$0xff] %vm1678_vm1, %v1626_v50  ;;  %v1627_v55 = vmax.f32 %v1411_v51, 0.0 }
 0x17a   : > { %1694 = vst.msk [vmem:[%s2583_s6 + $0x78] sm:$0xff] %vm1678_vm1, %v1629_v48 }
 0x17b   : > { %1692 = vst.msk [vmem:[%s2583_s6 + $0x68] sm:$0xff] %vm1678_vm1, %v1627_v55  ;;  %v1166_v58 = vpop.f32.mrb[48].mxu0  ;;  %v2013_v8 = vpop.f32.mrb[48].mxu1 }
 0x17c   : > { %v1432_v2 = vadd.f32 %v2013_v8, %v1143_v16  ;;  %v1168_v3 = vpop.f32.mrb[49].mxu0  ;;  %v1423_v6 = vpop.f32.mrb[49].mxu1  ;;  %v1167_v20 = vadd.f32 %v2569_v54, %v1166_v58 }
 0x17d   : > { %v1424_v7 = vadd.f32 %v1423_v6, %v1135_v40  ;;  %v1169_v52 = vpop.f32.mrb[50].mxu0  ;;  %v2014_v59 = vpop.f32.mrb[50].mxu1 }
 0x17e   : > { %v1632_v28 = vmax.f32 %v1432_v2, 0.0  ;;  %v1435_v0 = vadd.f32 %v2014_v59, %v1146_v62  ;;  %v1171_v10 = vpop.f32.mrb[51].mxu0  ;;  %v1426_v11 = vpop.f32.mrb[51].mxu1  ;;  %v1170_v40 = vadd.f32 %v2569_v54, %v1169_v52 }
 0x17f   : > { %v1630_v14 = vmax.f32 %v1424_v7, 0.0  ;;  %v1427_v15 = vadd.f32 %v1426_v11, %v1138_v27 }
 0x180   : > { %1697 = vst.msk [vmem:[%s2583_s6 + $0x90] sm:$0xff] %vm1678_vm1, %v1632_v28  ;;  %v1633_v4 = vmax.f32 %v1435_v0, 0.0 }
 0x181   : > { %1695 = vst.msk [vmem:[%s2583_s6 + $0x80] sm:$0xff] %vm1678_vm1, %v1630_v14  ;;  %v1631_v18 = vmax.f32 %v1427_v15, 0.0 }
 0x182   : > { %1698 = vst.msk [vmem:[%s2583_s6 + $0x98] sm:$0xff] %vm1678_vm1, %v1633_v4 }
 0x183   : > { %1696 = vst.msk [vmem:[%s2583_s6 + $0x88] sm:$0xff] %vm1678_vm1, %v1631_v18  ;;  %v1174_v19 = vpop.f32.mrb[52].mxu0  ;;  %v2017_v32 = vpop.f32.mrb[52].mxu1 }
 0x184   : > { %v1448_v24 = vadd.f32 %v2017_v32, %v1159_v56  ;;  %v1176_v23 = vpop.f32.mrb[53].mxu0  ;;  %v1439_v30 = vpop.f32.mrb[53].mxu1  ;;  %v1175_v46 = vadd.f32 %v2569_v54, %v1174_v19 }
 0x185   : > { %v1440_v31 = vadd.f32 %v1439_v30, %v1151_v60  ;;  %v1177_v34 = vpop.f32.mrb[54].mxu0  ;;  %v2018_v35 = vpop.f32.mrb[54].mxu1 }
 0x186   : > { %v1636_v63 = vmax.f32 %v1448_v24, 0.0  ;;  %v1451_v38 = vadd.f32 %v2018_v35, %v1162_v22  ;;  %v1179_v44 = vpop.f32.mrb[55].mxu0  ;;  %v1442_v12 = vpop.f32.mrb[55].mxu1  ;;  %v1178_v51 = vadd.f32 %v2569_v54, %v1177_v34 }
 0x187   : > { %v1634_v36 = vmax.f32 %v1440_v31, 0.0  ;;  %v1443_v42 = vadd.f32 %v1442_v12, %v1154_v26 }
 0x188   : > { %1701 = vst.msk [vmem:[%s2583_s6 + $0xb0] sm:$0xff] %vm1678_vm1, %v1636_v63  ;;  %v1637_v39 = vmax.f32 %v1451_v38, 0.0 }
 0x189   : > { %1699 = vst.msk [vmem:[%s2583_s6 + $0xa0] sm:$0xff] %vm1678_vm1, %v1634_v36  ;;  %v1635_v43 = vmax.f32 %v1443_v42, 0.0 }
 0x18a   : > { %1702 = vst.msk [vmem:[%s2583_s6 + $0xb8] sm:$0xff] %vm1678_vm1, %v1637_v39 }
 0x18b   : > { %1700 = vst.msk [vmem:[%s2583_s6 + $0xa8] sm:$0xff] %vm1678_vm1, %v1635_v43  ;;  %v1182_v47 = vpop.f32.mrb[56].mxu0  ;;  %v2021_v50 = vpop.f32.mrb[56].mxu1 }
 0x18c   : > { %v1464_v48 = vadd.f32 %v2021_v50, %v1175_v46  ;;  %v1184_v55 = vpop.f32.mrb[57].mxu0  ;;  %v1455_v16 = vpop.f32.mrb[57].mxu1  ;;  %v1183_v52 = vadd.f32 %v2569_v54, %v1182_v47 }
 0x18d   : > { %v1456_v8 = vadd.f32 %v1455_v16, %v1167_v20  ;;  %v1185_v62 = vpop.f32.mrb[58].mxu0  ;;  %v2022_v2 = vpop.f32.mrb[58].mxu1 }
 0x18e   : > { %v1640_v3 = vmax.f32 %v1464_v48, 0.0  ;;  %v1467_v58 = vadd.f32 %v2022_v2, %v1178_v51  ;;  %v1187_v6 = vpop.f32.mrb[59].mxu0  ;;  %v1458_v27 = vpop.f32.mrb[59].mxu1  ;;  %v1186_v18 = vadd.f32 %v2569_v54, %v1185_v62 }
 0x18f   : > { %v1638_v7 = vmax.f32 %v1456_v8, 0.0  ;;  %v1459_v59 = vadd.f32 %v1458_v27, %v1170_v40 }
 0x190   : > { %1705 = vst.msk [vmem:[%s2583_s6 + $0xd0] sm:$0xff] %vm1678_vm1, %v1640_v3  ;;  %v1641_v28 = vmax.f32 %v1467_v58, 0.0 }
 0x191   : > { %1703 = vst.msk [vmem:[%s2583_s6 + $0xc0] sm:$0xff] %vm1678_vm1, %v1638_v7  ;;  %v1639_v0 = vmax.f32 %v1459_v59, 0.0 }
 0x192   : > { %1706 = vst.msk [vmem:[%s2583_s6 + $0xd8] sm:$0xff] %vm1678_vm1, %v1641_v28 }
 0x193   : > { %1704 = vst.msk [vmem:[%s2583_s6 + $0xc8] sm:$0xff] %vm1678_vm1, %v1639_v0  ;;  %v1190_v10 = vpop.f32.mrb[60].mxu0  ;;  %v2025_v11 = vpop.f32.mrb[60].mxu1 }
 0x194   : > { %v1191_v14 = vadd.f32 %v2569_v54, %v1190_v10  ;;  %v1192_v15 = vpop.f32.mrb[61].mxu0  ;;  %v1471_v4 = vpop.f32.mrb[61].mxu1 }
 0x195   : > { %v1472_v56 = vadd.f32 %v1471_v4, %v1183_v52  ;;  %v1193_v60 = vpop.f32.mrb[62].mxu0  ;;  %v2026_v19 = vpop.f32.mrb[62].mxu1 }
 0x196   : > { %v1480_v32 = vadd.f32 %v2025_v11, %v1191_v14  ;;  %v1194_v22 = vadd.f32 %v2569_v54, %v1193_v60  ;;  %v1195_v24 = vpop.f32.mrb[63].mxu0  ;;  %v1474_v23 = vpop.f32.mrb[63].mxu1 }
 0x197   : > { %v1642_v30 = vmax.f32 %v1472_v56, 0.0  ;;  %v1475_v26 = vadd.f32 %v1474_v23, %v1186_v18 }
 0x198   : > { %v1644_v31 = vmax.f32 %v1480_v32, 0.0  ;;  %v1483_v34 = vadd.f32 %v2026_v19, %v1194_v22 }
 0x199   : > { %1707 = vst.msk [vmem:[%s2583_s6 + $0xe0] sm:$0xff] %vm1678_vm1, %v1642_v30  ;;  %v1643_v35 = vmax.f32 %v1475_v26, 0.0 }
 0x19a   : > { %1709 = vst.msk [vmem:[%s2583_s6 + $0xf0] sm:$0xff] %vm1678_vm1, %v1644_v31  ;;  %v1645_v63 = vmax.f32 %v1483_v34, 0.0 }
 0x19b   : > { %1708 = vst.msk [vmem:[%s2583_s6 + $0xe8] sm:$0xff] %vm1678_vm1, %v1643_v35  ;;  %v1198_v38 = vpop.f32.mrb[64].mxu0  ;;  %v2029_v44 = vpop.f32.mrb[64].mxu1 }
 0x19c   : > { %1710 = vst.msk [vmem:[%s2583_s6 + $0xf8] sm:$0xff] %vm1678_vm1, %v1645_v63  ;;  %v1199_v12 = vadd.f32 %v2569_v54, %v1198_v38  ;;  %v1200_v36 = vpop.f32.mrb[65].mxu0  ;;  %v1487_v42 = vpop.f32.mrb[65].mxu1 }
 0x19d   : > { %v1201_v39 = vpop.f32.mrb[66].mxu0  ;;  %v2030_v43 = vpop.f32.mrb[66].mxu1 }
 0x19e   : > { %v1488_v46 = vadd.f32 %v1487_v42, %v1199_v12  ;;  %v1202_v20 = vadd.f32 %v2569_v54, %v1201_v39  ;;  %v1203_v47 = vpop.f32.mrb[67].mxu0  ;;  %v1490_v50 = vpop.f32.mrb[67].mxu1 }
 0x1a0   : > { %v1646_v51 = vmax.f32 %v1488_v46, 0.0  ;;  %v1491_v48 = vadd.f32 %v1490_v50, %v1202_v20  ;;  %v1271_v20 = vadd.f32 %v2569_v54, %v2517_v61  ;;  %v1263_v50 = vadd.f32 %v2569_v54, %v2511_v53 }
 0x1a1   : > { %v1266_v61 = vadd.f32 %v2569_v54, %v2515_v57 }
 0x1a2   : > { %1711 = vst.msk [vmem:[%s2583_s6 + $0x100] sm:$0xff] %vm1678_vm1, %v1646_v51  ;;  %v1647_v55 = vmax.f32 %v1491_v48, 0.0 }
 0x1a3   : > { %v1206_v16 = vpop.f32.mrb[68].mxu0  ;;  %v2033_v40 = vpop.f32.mrb[68].mxu1 }
 0x1a4   : > { %1712 = vst.msk [vmem:[%s2583_s6 + $0x108] sm:$0xff] %vm1678_vm1, %v1647_v55  ;;  %v1207_v8 = vadd.f32 %v2569_v54, %v1206_v16  ;;  %v1208_v62 = vpop.f32.mrb[69].mxu0  ;;  %v1503_v2 = vpop.f32.mrb[69].mxu1  ;;  %v1274_v55 = vadd.f32 %v2569_v54, %v2519_v1 }
 0x1a5   : > { %v1209_v3 = vpop.f32.mrb[70].mxu0  ;;  %v2034_v58 = vpop.f32.mrb[70].mxu1 }
 0x1a6   : > { %v1496_v6 = vadd.f32 %v2029_v44, %v1207_v8  ;;  %v1210_v27 = vadd.f32 %v2569_v54, %v1209_v3  ;;  %v1211_v7 = vpop.f32.mrb[71].mxu0  ;;  %v1506_v59 = vpop.f32.mrb[71].mxu1 }
 0x1a8   : > { %v1648_v28 = vmax.f32 %v1496_v6, 0.0  ;;  %v1499_v0 = vadd.f32 %v2030_v43, %v1210_v27 }
 0x1aa   : > { %1713 = vst.msk [vmem:[%s2583_s6 + $0x110] sm:$0xff] %vm1678_vm1, %v1648_v28  ;;  %v1649_v52 = vmax.f32 %v1499_v0, 0.0 }
 0x1ab   : > { %v1214_v10 = vpop.f32.mrb[72].mxu0  ;;  %v2715_v11 = vpop.f32.mrb[72].mxu1 }
 0x1ac   : > { %1714 = vst.msk [vmem:[%s2583_s6 + $0x118] sm:$0xff] %vm1678_vm1, %v1649_v52  ;;  %v1215_v14 = vadd.f32 %v2569_v54, %v1214_v10  ;;  %v1216_v15 = vpop.f32.mrb[73].mxu0  ;;  %v1519_v4 = vpop.f32.mrb[73].mxu1 }
 0x1ad   : > { %v1217_v18 = vpop.f32.mrb[74].mxu0  ;;  %v2720_v56 = vpop.f32.mrb[74].mxu1  ;;  %v1287_v15 = vadd.f32 %v2569_v54, %v2531_v13 }
 0x1ae   : > { %v1504_v60 = vadd.f32 %v1503_v2, %v1215_v14  ;;  %v1218_v19 = vadd.f32 %v2569_v54, %v1217_v18  ;;  %v1219_v32 = vpop.f32.mrb[75].mxu0  ;;  %v1522_v22 = vpop.f32.mrb[75].mxu1  ;;  %v1279_v18 = vadd.f32 %v2569_v54, %v2523_v5 }
 0x1af   : > { %v1290_v32 = vadd.f32 %v2569_v54, %v2535_v17 }
 0x1b0   : > { %v1650_v24 = vmax.f32 %v1504_v60, 0.0  ;;  %v1507_v23 = vadd.f32 %v1506_v59, %v1218_v19 }
 0x1b2   : > { %1715 = vst.msk [vmem:[%s2583_s6 + $0x120] sm:$0xff] %vm1678_vm1, %v1650_v24  ;;  %v1651_v30 = vmax.f32 %v1507_v23, 0.0 }
 0x1b3   : > { %v1222_v26 = vpop.f32.mrb[76].mxu0  ;;  %v2725_v31 = vpop.f32.mrb[76].mxu1 }
 0x1b4   : > { %1716 = vst.msk [vmem:[%s2583_s6 + $0x128] sm:$0xff] %vm1678_vm1, %v1651_v30  ;;  %v1223_v34 = vadd.f32 %v2569_v54, %v1222_v26  ;;  %v1224_v35 = vpop.f32.mrb[77].mxu0  ;;  %v2730_v63 = vpop.f32.mrb[77].mxu1  ;;  %v1282_v30 = vadd.f32 %v2569_v54, %v2527_v9 }
 0x1b5   : > { %v1225_v38 = vpop.f32.mrb[78].mxu0  ;;  %v2732_v44 = vpop.f32.mrb[78].mxu1 }
 0x1b6   : > { %v1512_v12 = vadd.f32 %v2033_v40, %v1223_v34  ;;  %v1226_v36 = vadd.f32 %v2569_v54, %v1225_v38  ;;  %v1227_v42 = vpop.f32.mrb[79].mxu0  ;;  %v2735_v39 = vpop.f32.mrb[79].mxu1 }
 0x1b8   : > { %v1652_v43 = vmax.f32 %v1512_v12, 0.0  ;;  %v1515_v46 = vadd.f32 %v2034_v58, %v1226_v36 }
 0x1ba   : > { %1717 = vst.msk [vmem:[%s2583_s6 + $0x130] sm:$0xff] %vm1678_vm1, %v1652_v43  ;;  %v1653_v47 = vmax.f32 %v1515_v46, 0.0 }
 0x1bb   : > { %v1230_v51 = vpop.f32.mrb[80].mxu0  ;;  %v2045_v48 = vpop.f32.mrb[80].mxu1 }
 0x1bc   : > { %1718 = vst.msk [vmem:[%s2583_s6 + $0x138] sm:$0xff] %vm1678_vm1, %v1653_v47  ;;  %v1231_v16 = vadd.f32 %v2569_v54, %v1230_v51  ;;  %v1560_v40 = vadd.f32 %v2045_v48, %v1271_v20  ;;  %v1232_v8 = vpop.f32.mrb[81].mxu0  ;;  %v1551_v62 = vpop.f32.mrb[81].mxu1  ;;  %v1295_v48 = vadd.f32 %v2569_v54, %v2539_v21 }
 0x1bd   : > { %v1552_v2 = vadd.f32 %v1551_v62, %v1263_v50  ;;  %v1233_v3 = vpop.f32.mrb[82].mxu0  ;;  %v2046_v53 = vpop.f32.mrb[82].mxu1  ;;  %v1303_v50 = vadd.f32 %v2569_v54, %v2547_v29 }
 0x1be   : > { %v1520_v58 = vadd.f32 %v1519_v4, %v1231_v16  ;;  %v1664_v6 = vmax.f32 %v1560_v40, 0.0  ;;  %v1234_v1 = vadd.f32 %v2569_v54, %v1233_v3  ;;  %v1563_v27 = vadd.f32 %v2046_v53, %v1274_v55  ;;  %v1235_v7 = vpop.f32.mrb[83].mxu0  ;;  %v1554_v59 = vpop.f32.mrb[83].mxu1 }
 0x1bf   : > { %v1662_v28 = vmax.f32 %v1552_v2, 0.0  ;;  %v1555_v0 = vadd.f32 %v1554_v59, %v1266_v61  ;;  %v1298_v61 = vadd.f32 %v2569_v54, %v2543_v25 }
 0x1c0   : > { %v1654_v52 = vmax.f32 %v1520_v58, 0.0  ;;  %1729 = vst.msk [vmem:[%s2583_s6 + $0x190] sm:$0xff] %vm1678_vm1, %v1664_v6  ;;  %v1523_v57 = vadd.f32 %v1522_v22, %v1234_v1  ;;  %v1665_v10 = vmax.f32 %v1563_v27, 0.0 }
 0x1c1   : > { %1727 = vst.msk [vmem:[%s2583_s6 + $0x180] sm:$0xff] %vm1678_vm1, %v1662_v28  ;;  %v1663_v14 = vmax.f32 %v1555_v0, 0.0 }
 0x1c2   : > { %1719 = vst.msk [vmem:[%s2583_s6 + $0x140] sm:$0xff] %vm1678_vm1, %v1654_v52  ;;  %v1655_v4 = vmax.f32 %v1523_v57, 0.0  ;;  %1730 = vst.msk [vmem:[%s2583_s6 + $0x198] sm:$0xff] %vm1678_vm1, %v1665_v10  ;;  %v1319_v52 = vadd.f32 %v2569_v54, %v2563_v45  ;;  %v1311_v10 = vadd.f32 %v2569_v54, %v2555_v37 }
 0x1c3   : > { %1728 = vst.msk [vmem:[%s2583_s6 + $0x188] sm:$0xff] %vm1678_vm1, %v1663_v14  ;;  %v1238_v60 = vpop.f32.mrb[84].mxu0  ;;  %v2049_v19 = vpop.f32.mrb[84].mxu1 }
 0x1c4   : > { %1720 = vst.msk [vmem:[%s2583_s6 + $0x148] sm:$0xff] %vm1678_vm1, %v1655_v4  ;;  %v1239_v22 = vadd.f32 %v2569_v54, %v1238_v60  ;;  %v1576_v13 = vadd.f32 %v2049_v19, %v1287_v15  ;;  %v1240_v24 = vpop.f32.mrb[85].mxu0  ;;  %v1567_v23 = vpop.f32.mrb[85].mxu1  ;;  %v1314_v19 = vadd.f32 %v2569_v54, %v2559_v41 }
 0x1c5   : > { %v1568_v5 = vadd.f32 %v1567_v23, %v1279_v18  ;;  %v1241_v26 = vpop.f32.mrb[86].mxu0  ;;  %v2050_v34 = vpop.f32.mrb[86].mxu1 }
 0x1c6   : > { %v1528_v35 = vadd.f32 %v2715_v11, %v1239_v22  ;;  %v1668_v38 = vmax.f32 %v1576_v13, 0.0  ;;  %v1242_v17 = vadd.f32 %v2569_v54, %v1241_v26  ;;  %v1579_v12 = vadd.f32 %v2050_v34, %v1290_v32  ;;  %v1243_v36 = vpop.f32.mrb[87].mxu0  ;;  %v1570_v42 = vpop.f32.mrb[87].mxu1 }
 0x1c7   : > { %v1666_v43 = vmax.f32 %v1568_v5, 0.0  ;;  %v1571_v46 = vadd.f32 %v1570_v42, %v1282_v30 }
 0x1c8   : > { %v1656_v20 = vmax.f32 %v1528_v35, 0.0  ;;  %1733 = vst.msk [vmem:[%s2583_s6 + $0x1b0] sm:$0xff] %vm1678_vm1, %v1668_v38  ;;  %v1531_v9 = vadd.f32 %v2720_v56, %v1242_v17  ;;  %v1669_v47 = vmax.f32 %v1579_v12, 0.0  ;;  %v1306_v56 = vadd.f32 %v2569_v54, %v2551_v33 }
 0x1c9   : > { %1731 = vst.msk [vmem:[%s2583_s6 + $0x1a0] sm:$0xff] %vm1678_vm1, %v1666_v43  ;;  %v1667_v11 = vmax.f32 %v1571_v46, 0.0 }
 0x1ca   : > { %1721 = vst.msk [vmem:[%s2583_s6 + $0x150] sm:$0xff] %vm1678_vm1, %v1656_v20  ;;  %v1657_v51 = vmax.f32 %v1531_v9, 0.0  ;;  %1734 = vst.msk [vmem:[%s2583_s6 + $0x1b8] sm:$0xff] %vm1678_vm1, %v1669_v47 }
 0x1cb   : > { %1732 = vst.msk [vmem:[%s2583_s6 + $0x1a8] sm:$0xff] %vm1678_vm1, %v1667_v11  ;;  %v1246_v55 = vpop.f32.mrb[88].mxu0  ;;  %v2053_v16 = vpop.f32.mrb[88].mxu1 }
 0x1cc   : > { %1722 = vst.msk [vmem:[%s2583_s6 + $0x158] sm:$0xff] %vm1678_vm1, %v1657_v51  ;;  %v1247_v40 = vadd.f32 %v2569_v54, %v1246_v55  ;;  %v1592_v29 = vadd.f32 %v2053_v16, %v1303_v50  ;;  %v1248_v8 = vpop.f32.mrb[89].mxu0  ;;  %v1583_v62 = vpop.f32.mrb[89].mxu1 }
 0x1cd   : > { %v1584_v21 = vadd.f32 %v1583_v62, %v1295_v48  ;;  %v1249_v2 = vpop.f32.mrb[90].mxu0  ;;  %v2054_v3 = vpop.f32.mrb[90].mxu1 }
 0x1ce   : > { %v1536_v53 = vadd.f32 %v2730_v63, %v1247_v40  ;;  %v1672_v58 = vmax.f32 %v1592_v29, 0.0  ;;  %v1250_v33 = vadd.f32 %v2569_v54, %v1249_v2  ;;  %v1595_v6 = vadd.f32 %v2054_v3, %v1306_v56  ;;  %v1251_v1 = vpop.f32.mrb[91].mxu0  ;;  %v1586_v27 = vpop.f32.mrb[91].mxu1 }
 0x1cf   : > { %v1670_v7 = vmax.f32 %v1584_v21, 0.0  ;;  %v1587_v59 = vadd.f32 %v1586_v27, %v1298_v61 }
 0x1d0   : > { %v1658_v28 = vmax.f32 %v1536_v53, 0.0  ;;  %1737 = vst.msk [vmem:[%s2583_s6 + $0x1d0] sm:$0xff] %vm1678_vm1, %v1672_v58  ;;  %v1539_v25 = vadd.f32 %v2735_v39, %v1250_v33  ;;  %v1673_v0 = vmax.f32 %v1595_v6, 0.0  ;;  %v1322_v39 = vadd.f32 %v2569_v54, %v2567_v49 }
 0x1d1   : > { %1735 = vst.msk [vmem:[%s2583_s6 + $0x1c0] sm:$0xff] %vm1678_vm1, %v1670_v7  ;;  %v1671_v63 = vmax.f32 %v1587_v59, 0.0 }
 0x1d2   : > { %1723 = vst.msk [vmem:[%s2583_s6 + $0x160] sm:$0xff] %vm1678_vm1, %v1658_v28  ;;  %v1659_v57 = vmax.f32 %v1539_v25, 0.0  ;;  %1738 = vst.msk [vmem:[%s2583_s6 + $0x1d8] sm:$0xff] %vm1678_vm1, %v1673_v0 }
 0x1d3   : > { %1736 = vst.msk [vmem:[%s2583_s6 + $0x1c8] sm:$0xff] %vm1678_vm1, %v1671_v63  ;;  %v1254_v14 = vpop.f32.mrb[92].mxu0  ;;  %v2057_v15 = vpop.f32.mrb[92].mxu1 }
 0x1d4   : > { %1724 = vst.msk [vmem:[%s2583_s6 + $0x168] sm:$0xff] %vm1678_vm1, %v1659_v57  ;;  %v1255_v4 = vadd.f32 %v2569_v54, %v1254_v14  ;;  %v1608_v45 = vadd.f32 %v2057_v15, %v1319_v52  ;;  %v1256_v18 = vpop.f32.mrb[93].mxu0  ;;  %v1599_v60 = vpop.f32.mrb[93].mxu1 }
 0x1d5   : > { %v1600_v37 = vadd.f32 %v1599_v60, %v1311_v10  ;;  %v1257_v32 = vpop.f32.mrb[94].mxu0  ;;  %v2058_v22 = vpop.f32.mrb[94].mxu1 }
 0x1d6   : > { %v1544_v13 = vadd.f32 %v2725_v31, %v1255_v4  ;;  %v1676_v49 = vmax.f32 %v1608_v45, 0.0  ;;  %v1258_v24 = vadd.f32 %v2569_v54, %v1257_v32  ;;  %v1611_v23 = vadd.f32 %v2058_v22, %v1322_v39  ;;  %v1259_v30 = vpop.f32.mrb[95].mxu0  ;;  %v1602_v5 = vpop.f32.mrb[95].mxu1 }
 0x1d7   : > { %v1674_v26 = vmax.f32 %v1600_v37, 0.0  ;;  %v1603_v34 = vadd.f32 %v1602_v5, %v1314_v19 }
 0x1d8   : > { %v1660_v35 = vmax.f32 %v1544_v13, 0.0  ;;  %1741 = vst.msk [vmem:[%s2583_s6 + $0x1f0] sm:$0xff] %vm1678_vm1, %v1676_v49  ;;  %v1547_v41 = vadd.f32 %v2732_v44, %v1258_v24  ;;  %v1677_v38 = vmax.f32 %v1611_v23, 0.0 }
 0x1d9   : > { %1739 = vst.msk [vmem:[%s2583_s6 + $0x1e0] sm:$0xff] %vm1678_vm1, %v1674_v26  ;;  %v1675_v31 = vmax.f32 %v1603_v34, 0.0 }
 0x1da   : > { %1725 = vst.msk [vmem:[%s2583_s6 + $0x170] sm:$0xff] %vm1678_vm1, %v1660_v35  ;;  %v1661_v17 = vmax.f32 %v1547_v41, 0.0  ;;  %1742 = vst.msk [vmem:[%s2583_s6 + $0x1f8] sm:$0xff] %vm1678_vm1, %v1677_v38 }
 0x1db   : > { %1740 = vst.msk [vmem:[%s2583_s6 + $0x1e8] sm:$0xff] %vm1678_vm1, %v1675_v31 }
 0x1dc   : > { %1726 = vst.msk [vmem:[%s2583_s6 + $0x178] sm:$0xff] %vm1678_vm1, %v1661_v17 }
 0x1dd PF: > { %s15_s14 = sadd.s32 1, %s2253_s14  }
 0x1de   : > { %p12_p4 = scmp.ge.s32.totalorder %s15_s14, 6  }
 0x1e0   :  { %14 = sbr.rel (!%p12_p4) target bundleno = 3 (0x3), region = 62 }

</bundles_post_ra>
